<compile_context>
chip_gen: v5e
topology: v5e:2x2
jax: 0.10.0
libtpu: 0.0.40
codegen_flags: <defaults>
</compile_context>

<pallas_src>
import jax
import jax.numpy as jnp
from jax import lax
from jax.experimental import pallas as pl
from jax.experimental.pallas import tpu as pltpu

LANE = 128


def _round_up(x, m):
    return (x + m - 1) // m * m


def _basic_block_kernel(x_ref, w1_ref, s1_ref, b1_ref, w2_ref, s2_ref, b2_ref,
                        o_ref, xpad_scr, mid_scr):
    """One batch element per grid step.

    x_ref    : (1, H, W, Cp)   bf16 input (channels lane-padded to Cp)
    w1_ref   : (3, 3*Cp, Cp)   bf16 conv1 weights, row dy, cols (dx, cin)
    s1/b1    : (1, Cp)         f32 folded BN1 scale / bias
    w2_ref   : (3, 3*Cp, Cp)   bf16 conv2 weights
    s2/b2    : (1, Cp)         f32 folded BN2 scale / bias
    o_ref    : (1, H, W, Cp)   f32 output
    xpad_scr : (H+2, W+2, Cp)  bf16 scratch: spatially padded input
    mid_scr  : (H+2, W+2, Cp)  bf16 scratch: spatially padded conv1 activation
    """
    H, W, Cp = o_ref.shape[1], o_ref.shape[2], o_ref.shape[3]
    cdt = x_ref.dtype

    def zero_halo(scr):
        # Only the thin halo ring is written each step (scratch is per-core and
        # uninitialized, so this must not rely on program_id == 0 under
        # megacore "parallel" sharding).  The interior is overwritten below.
        scr[0:1, :, :] = jnp.zeros((1, W + 2, Cp), cdt)
        scr[H + 1:H + 2, :, :] = jnp.zeros((1, W + 2, Cp), cdt)
        scr[1:H + 1, 0:1, :] = jnp.zeros((H, 1, Cp), cdt)
        scr[1:H + 1, W + 1:W + 2, :] = jnp.zeros((H, 1, Cp), cdt)

    def conv3x3(scr, w_ref):
        # 3 MXU matmuls with K = 3*Cp (horizontal taps fused along K).
        acc = jnp.zeros((H * W, Cp), jnp.float32)
        for dy in range(3):
            patch = jnp.concatenate(
                [scr[dy:dy + H, dx:dx + W, :].reshape(H * W, Cp)
                 for dx in range(3)],
                axis=-1)                                       # (H*W, 3*Cp) bf16
            acc = acc + jnp.dot(patch, w_ref[dy],
                                preferred_element_type=jnp.float32)
        return acc

    # ---- build padded input in VMEM (halo ring = 0, interior = x) ----
    zero_halo(xpad_scr)
    xpad_scr[1:H + 1, 1:W + 1, :] = x_ref[0]

    # ---- conv1 + BN1 + ReLU ----
    h1 = jnp.maximum(conv3x3(xpad_scr, w1_ref) * s1_ref[...] + b1_ref[...], 0.0)

    # ---- stash conv1 activation (bf16) into padded scratch for conv2 ----
    zero_halo(mid_scr)
    mid_scr[1:H + 1, 1:W + 1, :] = h1.reshape(H, W, Cp).astype(cdt)

    # ---- conv2 + BN2 + residual add + ReLU ----
    h2 = conv3x3(mid_scr, w2_ref) * s2_ref[...] + b2_ref[...]
    residual = x_ref[0].reshape(H * W, Cp).astype(jnp.float32)
    out = jnp.maximum(h2 + residual, 0.0)
    o_ref[0] = out.reshape(H, W, Cp).astype(o_ref.dtype)


@jax.jit
def basic_block_forward(x_nhwc, w1_hwio, s1, b1, w2_hwio, s2, b2):
    """x_nhwc: (N,H,W,C) f32; w*_hwio: (3,3,C,C); s*/b*: (C,) folded BN."""
    N, H, W, C = x_nhwc.shape
    if w1_hwio.shape[-1] != C or w2_hwio.shape[-1] != C:
        raise ValueError("identity residual requires inplanes == planes "
                         "(stride=1, downsample=None)")
    Cp = _round_up(C, LANE)
    pc = Cp - C

    # Lane-dense channel padding + bf16 MXU operands.  In a real network the
    # padded bf16 NHWC layout would be carried between layers instead of being
    # re-created per call.
    xb = jnp.pad(x_nhwc.astype(jnp.bfloat16),
                 ((0, 0), (0, 0), (0, 0), (0, pc)))

    def prep_w(w):  # (3,3,C,C) HWIO -> (3, 3*Cp, Cp) bf16, cols ordered (dx,cin)
        w = jnp.pad(w, ((0, 0), (0, 0), (0, pc), (0, pc)))
        return w.reshape(3, 3 * Cp, Cp).astype(jnp.bfloat16)

    def prep_v(v):  # (C,) -> (1, Cp) f32
        return jnp.pad(v, (0, pc)).astype(jnp.float32)[None, :]

    w1p, w2p = prep_w(w1_hwio), prep_w(w2_hwio)
    s1p, b1p = prep_v(s1), prep_v(b1)
    s2p, b2p = prep_v(s2), prep_v(b2)

    grid_spec = pltpu.PrefetchScalarGridSpec(
        num_scalar_prefetch=0,
        grid=(N,),
        in_specs=[
            pl.BlockSpec((1, H, W, Cp), lambda n: (n, 0, 0, 0)),
            # Constant-index operands (weights / BN): at large C these should be
            # single-buffered (pipeline_mode=pl.Buffered(1)) for VMEM headroom.
            pl.BlockSpec((3, 3 * Cp, Cp), lambda n: (0, 0, 0)),
            pl.BlockSpec((1, Cp), lambda n: (0, 0)),
            pl.BlockSpec((1, Cp), lambda n: (0, 0)),
            pl.BlockSpec((3, 3 * Cp, Cp), lambda n: (0, 0, 0)),
            pl.BlockSpec((1, Cp), lambda n: (0, 0)),
            pl.BlockSpec((1, Cp), lambda n: (0, 0)),
        ],
        out_specs=pl.BlockSpec((1, H, W, Cp), lambda n: (n, 0, 0, 0)),
        scratch_shapes=[pltpu.VMEM((H + 2, W + 2, Cp), jnp.bfloat16),
                        pltpu.VMEM((H + 2, W + 2, Cp), jnp.bfloat16)],
    )

    # Explicit VMEM budget: double-buffered pipeline buffers + scratch, with
    # headroom, clamped to stay below v7x's 64 MiB physical VMEM.
    per_step = (2 * H * W * Cp * 2                # input block, bf16, x2 bufs
                + 2 * H * W * Cp * 4              # output block, f32, x2 bufs
                + 2 * 2 * 3 * 3 * Cp * Cp * 2     # two weight sets, bf16, x2 bufs
                + 4 * 2 * Cp * 4                  # scale/bias, f32, x2 bufs
                + 2 * (H + 2) * (W + 2) * Cp * 2)  # scratches
    vmem_limit = int(min(max(2 * per_step, 32 * 1024 * 1024), 64 * 1024 * 1024))

    flops = 2 * (2 * N * H * W * 9 * Cp * Cp)     # two 3x3 convs (MACs * 2)
    bytes_accessed = (xb.size * 2 + w1p.size * 2 + w2p.size * 2
                      + 4 * Cp * 4 + N * H * W * Cp * 4)

    out = pl.pallas_call(
        _basic_block_kernel,
        out_shape=jax.ShapeDtypeStruct((N, H, W, Cp), jnp.float32),
        grid_spec=grid_spec,
        compiler_params=pltpu.CompilerParams(
            dimension_semantics=("parallel",),
            vmem_limit_bytes=vmem_limit),
        cost_estimate=pl.CostEstimate(flops=int(flops), transcendentals=0,
                                      bytes_accessed=int(bytes_accessed)),
    )(xb, w1p, s1p, b1p, w2p, s2p, b2p)

    return out[..., :C]


def _fold_bn(gamma, beta, mean, var, eps=1e-5):
    scale = gamma / jnp.sqrt(var + eps)
    bias = beta - mean * scale
    return scale, bias


def _reference(x_nhwc, w1_hwio, s1, b1, w2_hwio, s2, b2):
    """Pure-JAX reference of the same math (bf16 conv operands, f32 accum)."""
    dn = ("NHWC", "HWIO", "NHWC")
    xb = x_nhwc.astype(jnp.bfloat16)
    y = lax.conv_general_dilated(xb, w1_hwio.astype(jnp.bfloat16), (1, 1),
                                 "SAME", dimension_numbers=dn,
                                 preferred_element_type=jnp.float32)
    y = jnp.maximum(y * s1 + b1, 0.0)
    y = lax.conv_general_dilated(y.astype(jnp.bfloat16),
                                 w2_hwio.astype(jnp.bfloat16), (1, 1), "SAME",
                                 dimension_numbers=dn,
                                 preferred_element_type=jnp.float32)
    y = y * s2 + b2
    return jnp.maximum(y + xb.astype(jnp.float32), 0.0)


if __name__ == "__main__":
    # Small shapes: N=2, inplanes=planes=4, spatial 16x16, stride=1, no downsample.
    N, C, H, W = 2, 4, 16, 16

    key = jax.random.PRNGKey(0)
    ks = jax.random.split(key, 11)

    # Conv weights in HWIO (torch (Cout,Cin,3,3) transposed to (3,3,Cin,Cout)).
    w1_hwio = 0.2 * jax.random.normal(ks[0], (3, 3, C, C), jnp.float32)
    w2_hwio = 0.2 * jax.random.normal(ks[1], (3, 3, C, C), jnp.float32)

    # BatchNorm params / running stats (eval-mode semantics).
    g1 = 1.0 + 0.1 * jax.random.normal(ks[2], (C,), jnp.float32)
    be1 = 0.1 * jax.random.normal(ks[3], (C,), jnp.float32)
    m1 = 0.1 * jax.random.normal(ks[4], (C,), jnp.float32)
    v1 = 1.0 + 0.1 * jax.random.uniform(ks[5], (C,), jnp.float32)
    g2 = 1.0 + 0.1 * jax.random.normal(ks[6], (C,), jnp.float32)
    be2 = 0.1 * jax.random.normal(ks[7], (C,), jnp.float32)
    m2 = 0.1 * jax.random.normal(ks[8], (C,), jnp.float32)
    v2 = 1.0 + 0.1 * jax.random.uniform(ks[9], (C,), jnp.float32)

    s1, b1 = _fold_bn(g1, be1, m1, v1)
    s2, b2 = _fold_bn(g2, be2, m2, v2)

    # Input (NHWC; NCHW users would transpose (0,2,3,1) before calling).
    x_nhwc = jax.random.normal(ks[10], (N, H, W, C), jnp.float32)

    out = basic_block_forward(x_nhwc, w1_hwio, s1, b1, w2_hwio, s2, b2)
    out = jax.block_until_ready(out)

    ref = _reference(x_nhwc, w1_hwio, s1, b1, w2_hwio, s2, b2)
    if not jnp.allclose(out, ref, atol=3e-2, rtol=3e-2):
        raise AssertionError("Pallas BasicBlock output mismatch vs reference")

    print("KERNEL_OK")
</pallas_src>

<mosaic_0001>
module attributes {stable_mosaic.version = 11 : i64} {
  func.func @_basic_block_kernel(%arg0: i32, %arg1: memref<1x16x16x128xbf16, #tpu.memory_space<vmem>>, %arg2: memref<3x384x128xbf16, #tpu.memory_space<vmem>>, %arg3: memref<1x128xf32, #tpu.memory_space<vmem>>, %arg4: memref<1x128xf32, #tpu.memory_space<vmem>>, %arg5: memref<3x384x128xbf16, #tpu.memory_space<vmem>>, %arg6: memref<1x128xf32, #tpu.memory_space<vmem>>, %arg7: memref<1x128xf32, #tpu.memory_space<vmem>>, %arg8: memref<1x16x16x128xf32, #tpu.memory_space<vmem>>, %arg9: memref<18x18x128xbf16, #tpu.memory_space<vmem>>, %arg10: memref<18x18x128xbf16, #tpu.memory_space<vmem>>) attributes {dimension_semantics = [#tpu.dimension_semantics<parallel>], iteration_bounds = array<i64: 2>, scalar_prefetch = 0 : i64, scratch_operands = 2 : i64, tpu.core_type = #tpu.core_type<tc>, window_params = [{transform_indices = @transform_0, window_bounds = array<i64: 1, 16, 16, 128>}, {pipeline_mode = #tpu.pipeline_mode<synchronous>, transform_indices = @transform_1, window_bounds = array<i64: 3, 384, 128>}, {pipeline_mode = #tpu.pipeline_mode<synchronous>, transform_indices = @transform_2, window_bounds = array<i64: 1, 128>}, {pipeline_mode = #tpu.pipeline_mode<synchronous>, transform_indices = @transform_3, window_bounds = array<i64: 1, 128>}, {pipeline_mode = #tpu.pipeline_mode<synchronous>, transform_indices = @transform_4, window_bounds = array<i64: 3, 384, 128>}, {pipeline_mode = #tpu.pipeline_mode<synchronous>, transform_indices = @transform_5, window_bounds = array<i64: 1, 128>}, {pipeline_mode = #tpu.pipeline_mode<synchronous>, transform_indices = @transform_6, window_bounds = array<i64: 1, 128>}, {transform_indices = @transform_7, window_bounds = array<i64: 1, 16, 16, 128>}]} {
    %cst = arith.constant 0.000000e+00 : bf16
    %0 = vector.broadcast %cst : bf16 to vector<1x18x128xbf16>
    %c0 = arith.constant 0 : index
    %c0_0 = arith.constant 0 : index
    %c0_1 = arith.constant 0 : index
    %1 = vector.load %arg9[%c0, %c0_0, %c0_1] : memref<18x18x128xbf16, #tpu.memory_space<vmem>>, vector<1x18x128xbf16>
    tpu.vector_store %arg9[%c0, %c0_0, %c0_1], %0 {strides = array<i32>} : memref<18x18x128xbf16, #tpu.memory_space<vmem>>, vector<1x18x128xbf16>,
    %cst_2 = arith.constant 0.000000e+00 : bf16
    %2 = vector.broadcast %cst_2 : bf16 to vector<1x18x128xbf16>
    %c17 = arith.constant 17 : index
    %c0_3 = arith.constant 0 : index
    %c0_4 = arith.constant 0 : index
    %3 = vector.load %arg9[%c17, %c0_3, %c0_4] : memref<18x18x128xbf16, #tpu.memory_space<vmem>>, vector<1x18x128xbf16>
    tpu.vector_store %arg9[%c17, %c0_3, %c0_4], %2 {strides = array<i32>} : memref<18x18x128xbf16, #tpu.memory_space<vmem>>, vector<1x18x128xbf16>,
    %cst_5 = arith.constant 0.000000e+00 : bf16
    %4 = vector.broadcast %cst_5 : bf16 to vector<16x1x128xbf16>
    %c1 = arith.constant 1 : index
    %c0_6 = arith.constant 0 : index
    %c0_7 = arith.constant 0 : index
    %5 = vector.load %arg9[%c1, %c0_6, %c0_7] : memref<18x18x128xbf16, #tpu.memory_space<vmem>>, vector<16x1x128xbf16>
    tpu.vector_store %arg9[%c1, %c0_6, %c0_7], %4 {strides = array<i32>} : memref<18x18x128xbf16, #tpu.memory_space<vmem>>, vector<16x1x128xbf16>,
    %cst_8 = arith.constant 0.000000e+00 : bf16
    %6 = vector.broadcast %cst_8 : bf16 to vector<16x1x128xbf16>
    %c1_9 = arith.constant 1 : index
    %c17_10 = arith.constant 17 : index
    %c0_11 = arith.constant 0 : index
    %7 = vector.load %arg9[%c1_9, %c17_10, %c0_11] : memref<18x18x128xbf16, #tpu.memory_space<vmem>>, vector<16x1x128xbf16>
    tpu.vector_store %arg9[%c1_9, %c17_10, %c0_11], %6 {strides = array<i32>} : memref<18x18x128xbf16, #tpu.memory_space<vmem>>, vector<16x1x128xbf16>,
    %c0_12 = arith.constant 0 : index
    %c0_13 = arith.constant 0 : index
    %c0_14 = arith.constant 0 : index
    %c0_15 = arith.constant 0 : index
    %8 = vector.load %arg1[%c0_12, %c0_13, %c0_14, %c0_15] : memref<1x16x16x128xbf16, #tpu.memory_space<vmem>>, vector<1x16x16x128xbf16>
    %9 = vector.shape_cast %8 : vector<1x16x16x128xbf16> to vector<16x16x128xbf16>
    %c1_16 = arith.constant 1 : index
    %c1_17 = arith.constant 1 : index
    %c0_18 = arith.constant 0 : index
    %10 = vector.load %arg9[%c1_16, %c1_17, %c0_18] : memref<18x18x128xbf16, #tpu.memory_space<vmem>>, vector<16x16x128xbf16>
    tpu.vector_store %arg9[%c1_16, %c1_17, %c0_18], %9 {strides = array<i32>} : memref<18x18x128xbf16, #tpu.memory_space<vmem>>, vector<16x16x128xbf16>,
    %cst_19 = arith.constant 0.000000e+00 : f32
    %11 = vector.broadcast %cst_19 : f32 to vector<256x128xf32>
    %c0_20 = arith.constant 0 : index
    %c0_21 = arith.constant 0 : index
    %c0_22 = arith.constant 0 : index
    %12 = vector.load %arg9[%c0_20, %c0_21, %c0_22] : memref<18x18x128xbf16, #tpu.memory_space<vmem>>, vector<16x16x128xbf16>
    %13 = vector.shape_cast %12 : vector<16x16x128xbf16> to vector<256x128xbf16>
    %c0_23 = arith.constant 0 : index
    %c1_24 = arith.constant 1 : index
    %c0_25 = arith.constant 0 : index
    %14 = vector.load %arg9[%c0_23, %c1_24, %c0_25] : memref<18x18x128xbf16, #tpu.memory_space<vmem>>, vector<16x16x128xbf16>
    %15 = vector.shape_cast %14 : vector<16x16x128xbf16> to vector<256x128xbf16>
    %c0_26 = arith.constant 0 : index
    %c2 = arith.constant 2 : index
    %c0_27 = arith.constant 0 : index
    %16 = vector.load %arg9[%c0_26, %c2, %c0_27] : memref<18x18x128xbf16, #tpu.memory_space<vmem>>, vector<16x16x128xbf16>
    %17 = vector.shape_cast %16 : vector<16x16x128xbf16> to vector<256x128xbf16>
    %18 = tpu.concatenate %13, %15, %17 in 1 : vector<256x128xbf16>, vector<256x128xbf16>, vector<256x128xbf16> -> vector<256x384xbf16>
    %c0_28 = arith.constant 0 : index
    %c0_29 = arith.constant 0 : index
    %c0_30 = arith.constant 0 : index
    %19 = vector.load %arg2[%c0_28, %c0_29, %c0_30] : memref<3x384x128xbf16, #tpu.memory_space<vmem>>, vector<1x384x128xbf16>
    %20 = vector.shape_cast %19 : vector<1x384x128xbf16> to vector<384x128xbf16>
    %cst_31 = arith.constant dense<0.000000e+00> : vector<256x128xf32>
    %21 = tpu.matmul %18, %20, %cst_31 {dimension_numbers = #tpu.dot_dimension_numbers<[1], [0], [0], [1], [0, 0, 1, 1], [], []>} : vector<256x384xbf16>, vector<384x128xbf16>, vector<256x128xf32> -> vector<256x128xf32>
    %22 = arith.addf %11, %21 : vector<256x128xf32>
    %c1_32 = arith.constant 1 : index
    %c0_33 = arith.constant 0 : index
    %c0_34 = arith.constant 0 : index
    %23 = vector.load %arg9[%c1_32, %c0_33, %c0_34] : memref<18x18x128xbf16, #tpu.memory_space<vmem>>, vector<16x16x128xbf16>
    %24 = vector.shape_cast %23 : vector<16x16x128xbf16> to vector<256x128xbf16>
    %c1_35 = arith.constant 1 : index
    %c1_36 = arith.constant 1 : index
    %c0_37 = arith.constant 0 : index
    %25 = vector.load %arg9[%c1_35, %c1_36, %c0_37] : memref<18x18x128xbf16, #tpu.memory_space<vmem>>, vector<16x16x128xbf16>
    %26 = vector.shape_cast %25 : vector<16x16x128xbf16> to vector<256x128xbf16>
    %c1_38 = arith.constant 1 : index
    %c2_39 = arith.constant 2 : index
    %c0_40 = arith.constant 0 : index
    %27 = vector.load %arg9[%c1_38, %c2_39, %c0_40] : memref<18x18x128xbf16, #tpu.memory_space<vmem>>, vector<16x16x128xbf16>
    %28 = vector.shape_cast %27 : vector<16x16x128xbf16> to vector<256x128xbf16>
    %29 = tpu.concatenate %24, %26, %28 in 1 : vector<256x128xbf16>, vector<256x128xbf16>, vector<256x128xbf16> -> vector<256x384xbf16>
    %c1_41 = arith.constant 1 : index
    %c0_42 = arith.constant 0 : index
    %c0_43 = arith.constant 0 : index
    %30 = vector.load %arg2[%c1_41, %c0_42, %c0_43] : memref<3x384x128xbf16, #tpu.memory_space<vmem>>, vector<1x384x128xbf16>
    %31 = vector.shape_cast %30 : vector<1x384x128xbf16> to vector<384x128xbf16>
    %cst_44 = arith.constant dense<0.000000e+00> : vector<256x128xf32>
    %32 = tpu.matmul %29, %31, %cst_44 {dimension_numbers = #tpu.dot_dimension_numbers<[1], [0], [0], [1], [0, 0, 1, 1], [], []>} : vector<256x384xbf16>, vector<384x128xbf16>, vector<256x128xf32> -> vector<256x128xf32>
    %33 = arith.addf %22, %32 : vector<256x128xf32>
    %c2_45 = arith.constant 2 : index
    %c0_46 = arith.constant 0 : index
    %c0_47 = arith.constant 0 : index
    %34 = vector.load %arg9[%c2_45, %c0_46, %c0_47] : memref<18x18x128xbf16, #tpu.memory_space<vmem>>, vector<16x16x128xbf16>
    %35 = vector.shape_cast %34 : vector<16x16x128xbf16> to vector<256x128xbf16>
    %c2_48 = arith.constant 2 : index
    %c1_49 = arith.constant 1 : index
    %c0_50 = arith.constant 0 : index
    %36 = vector.load %arg9[%c2_48, %c1_49, %c0_50] : memref<18x18x128xbf16, #tpu.memory_space<vmem>>, vector<16x16x128xbf16>
    %37 = vector.shape_cast %36 : vector<16x16x128xbf16> to vector<256x128xbf16>
    %c2_51 = arith.constant 2 : index
    %c2_52 = arith.constant 2 : index
    %c0_53 = arith.constant 0 : index
    %38 = vector.load %arg9[%c2_51, %c2_52, %c0_53] : memref<18x18x128xbf16, #tpu.memory_space<vmem>>, vector<16x16x128xbf16>
    %39 = vector.shape_cast %38 : vector<16x16x128xbf16> to vector<256x128xbf16>
    %40 = tpu.concatenate %35, %37, %39 in 1 : vector<256x128xbf16>, vector<256x128xbf16>, vector<256x128xbf16> -> vector<256x384xbf16>
    %c2_54 = arith.constant 2 : index
    %c0_55 = arith.constant 0 : index
    %c0_56 = arith.constant 0 : index
    %41 = vector.load %arg2[%c2_54, %c0_55, %c0_56] : memref<3x384x128xbf16, #tpu.memory_space<vmem>>, vector<1x384x128xbf16>
    %42 = vector.shape_cast %41 : vector<1x384x128xbf16> to vector<384x128xbf16>
    %cst_57 = arith.constant dense<0.000000e+00> : vector<256x128xf32>
    %43 = tpu.matmul %40, %42, %cst_57 {dimension_numbers = #tpu.dot_dimension_numbers<[1], [0], [0], [1], [0, 0, 1, 1], [], []>} : vector<256x384xbf16>, vector<384x128xbf16>, vector<256x128xf32> -> vector<256x128xf32>
    %44 = arith.addf %33, %43 : vector<256x128xf32>
    %c0_58 = arith.constant 0 : index
    %c0_59 = arith.constant 0 : index
    %45 = vector.load %arg3[%c0_58, %c0_59] : memref<1x128xf32, #tpu.memory_space<vmem>>, vector<1x128xf32>
    %46 = vector.broadcast %45 : vector<1x128xf32> to vector<256x128xf32>
    %47 = arith.mulf %44, %46 : vector<256x128xf32>
    %c0_60 = arith.constant 0 : index
    %c0_61 = arith.constant 0 : index
    %48 = vector.load %arg4[%c0_60, %c0_61] : memref<1x128xf32, #tpu.memory_space<vmem>>, vector<1x128xf32>
    %49 = vector.broadcast %48 : vector<1x128xf32> to vector<256x128xf32>
    %50 = arith.addf %47, %49 : vector<256x128xf32>
    %cst_62 = arith.constant 0.000000e+00 : f32
    %51 = vector.broadcast %cst_62 : f32 to vector<256x128xf32>
    %52 = arith.maximumf %50, %51 : vector<256x128xf32>
    %cst_63 = arith.constant 0.000000e+00 : bf16
    %53 = vector.broadcast %cst_63 : bf16 to vector<1x18x128xbf16>
    %c0_64 = arith.constant 0 : index
    %c0_65 = arith.constant 0 : index
    %c0_66 = arith.constant 0 : index
    %54 = vector.load %arg10[%c0_64, %c0_65, %c0_66] : memref<18x18x128xbf16, #tpu.memory_space<vmem>>, vector<1x18x128xbf16>
    tpu.vector_store %arg10[%c0_64, %c0_65, %c0_66], %53 {strides = array<i32>} : memref<18x18x128xbf16, #tpu.memory_space<vmem>>, vector<1x18x128xbf16>,
    %cst_67 = arith.constant 0.000000e+00 : bf16
    %55 = vector.broadcast %cst_67 : bf16 to vector<1x18x128xbf16>
    %c17_68 = arith.constant 17 : index
    %c0_69 = arith.constant 0 : index
    %c0_70 = arith.constant 0 : index
    %56 = vector.load %arg10[%c17_68, %c0_69, %c0_70] : memref<18x18x128xbf16, #tpu.memory_space<vmem>>, vector<1x18x128xbf16>
    tpu.vector_store %arg10[%c17_68, %c0_69, %c0_70], %55 {strides = array<i32>} : memref<18x18x128xbf16, #tpu.memory_space<vmem>>, vector<1x18x128xbf16>,
    %cst_71 = arith.constant 0.000000e+00 : bf16
    %57 = vector.broadcast %cst_71 : bf16 to vector<16x1x128xbf16>
    %c1_72 = arith.constant 1 : index
    %c0_73 = arith.constant 0 : index
    %c0_74 = arith.constant 0 : index
    %58 = vector.load %arg10[%c1_72, %c0_73, %c0_74] : memref<18x18x128xbf16, #tpu.memory_space<vmem>>, vector<16x1x128xbf16>
    tpu.vector_store %arg10[%c1_72, %c0_73, %c0_74], %57 {strides = array<i32>} : memref<18x18x128xbf16, #tpu.memory_space<vmem>>, vector<16x1x128xbf16>,
    %cst_75 = arith.constant 0.000000e+00 : bf16
    %59 = vector.broadcast %cst_75 : bf16 to vector<16x1x128xbf16>
    %c1_76 = arith.constant 1 : index
    %c17_77 = arith.constant 17 : index
    %c0_78 = arith.constant 0 : index
    %60 = vector.load %arg10[%c1_76, %c17_77, %c0_78] : memref<18x18x128xbf16, #tpu.memory_space<vmem>>, vector<16x1x128xbf16>
    tpu.vector_store %arg10[%c1_76, %c17_77, %c0_78], %59 {strides = array<i32>} : memref<18x18x128xbf16, #tpu.memory_space<vmem>>, vector<16x1x128xbf16>,
    %61 = vector.shape_cast %52 : vector<256x128xf32> to vector<16x16x128xf32>
    %62 = arith.truncf %61 : vector<16x16x128xf32> to vector<16x16x128xbf16>
    %c1_79 = arith.constant 1 : index
    %c1_80 = arith.constant 1 : index
    %c0_81 = arith.constant 0 : index
    %63 = vector.load %arg10[%c1_79, %c1_80, %c0_81] : memref<18x18x128xbf16, #tpu.memory_space<vmem>>, vector<16x16x128xbf16>
    tpu.vector_store %arg10[%c1_79, %c1_80, %c0_81], %62 {strides = array<i32>} : memref<18x18x128xbf16, #tpu.memory_space<vmem>>, vector<16x16x128xbf16>,
    %cst_82 = arith.constant 0.000000e+00 : f32
    %64 = vector.broadcast %cst_82 : f32 to vector<256x128xf32>
    %c0_83 = arith.constant 0 : index
    %c0_84 = arith.constant 0 : index
    %c0_85 = arith.constant 0 : index
    %65 = vector.load %arg10[%c0_83, %c0_84, %c0_85] : memref<18x18x128xbf16, #tpu.memory_space<vmem>>, vector<16x16x128xbf16>
    %66 = vector.shape_cast %65 : vector<16x16x128xbf16> to vector<256x128xbf16>
    %c0_86 = arith.constant 0 : index
    %c1_87 = arith.constant 1 : index
    %c0_88 = arith.constant 0 : index
    %67 = vector.load %arg10[%c0_86, %c1_87, %c0_88] : memref<18x18x128xbf16, #tpu.memory_space<vmem>>, vector<16x16x128xbf16>
    %68 = vector.shape_cast %67 : vector<16x16x128xbf16> to vector<256x128xbf16>
    %c0_89 = arith.constant 0 : index
    %c2_90 = arith.constant 2 : index
    %c0_91 = arith.constant 0 : index
    %69 = vector.load %arg10[%c0_89, %c2_90, %c0_91] : memref<18x18x128xbf16, #tpu.memory_space<vmem>>, vector<16x16x128xbf16>
    %70 = vector.shape_cast %69 : vector<16x16x128xbf16> to vector<256x128xbf16>
    %71 = tpu.concatenate %66, %68, %70 in 1 : vector<256x128xbf16>, vector<256x128xbf16>, vector<256x128xbf16> -> vector<256x384xbf16>
    %c0_92 = arith.constant 0 : index
    %c0_93 = arith.constant 0 : index
    %c0_94 = arith.constant 0 : index
    %72 = vector.load %arg5[%c0_92, %c0_93, %c0_94] : memref<3x384x128xbf16, #tpu.memory_space<vmem>>, vector<1x384x128xbf16>
    %73 = vector.shape_cast %72 : vector<1x384x128xbf16> to vector<384x128xbf16>
    %cst_95 = arith.constant dense<0.000000e+00> : vector<256x128xf32>
    %74 = tpu.matmul %71, %73, %cst_95 {dimension_numbers = #tpu.dot_dimension_numbers<[1], [0], [0], [1], [0, 0, 1, 1], [], []>} : vector<256x384xbf16>, vector<384x128xbf16>, vector<256x128xf32> -> vector<256x128xf32>
    %75 = arith.addf %64, %74 : vector<256x128xf32>
    %c1_96 = arith.constant 1 : index
    %c0_97 = arith.constant 0 : index
    %c0_98 = arith.constant 0 : index
    %76 = vector.load %arg10[%c1_96, %c0_97, %c0_98] : memref<18x18x128xbf16, #tpu.memory_space<vmem>>, vector<16x16x128xbf16>
    %77 = vector.shape_cast %76 : vector<16x16x128xbf16> to vector<256x128xbf16>
    %c1_99 = arith.constant 1 : index
    %c1_100 = arith.constant 1 : index
    %c0_101 = arith.constant 0 : index
    %78 = vector.load %arg10[%c1_99, %c1_100, %c0_101] : memref<18x18x128xbf16, #tpu.memory_space<vmem>>, vector<16x16x128xbf16>
    %79 = vector.shape_cast %78 : vector<16x16x128xbf16> to vector<256x128xbf16>
    %c1_102 = arith.constant 1 : index
    %c2_103 = arith.constant 2 : index
    %c0_104 = arith.constant 0 : index
    %80 = vector.load %arg10[%c1_102, %c2_103, %c0_104] : memref<18x18x128xbf16, #tpu.memory_space<vmem>>, vector<16x16x128xbf16>
    %81 = vector.shape_cast %80 : vector<16x16x128xbf16> to vector<256x128xbf16>
    %82 = tpu.concatenate %77, %79, %81 in 1 : vector<256x128xbf16>, vector<256x128xbf16>, vector<256x128xbf16> -> vector<256x384xbf16>
    %c1_105 = arith.constant 1 : index
    %c0_106 = arith.constant 0 : index
    %c0_107 = arith.constant 0 : index
    %83 = vector.load %arg5[%c1_105, %c0_106, %c0_107] : memref<3x384x128xbf16, #tpu.memory_space<vmem>>, vector<1x384x128xbf16>
    %84 = vector.shape_cast %83 : vector<1x384x128xbf16> to vector<384x128xbf16>
    %cst_108 = arith.constant dense<0.000000e+00> : vector<256x128xf32>
    %85 = tpu.matmul %82, %84, %cst_108 {dimension_numbers = #tpu.dot_dimension_numbers<[1], [0], [0], [1], [0, 0, 1, 1], [], []>} : vector<256x384xbf16>, vector<384x128xbf16>, vector<256x128xf32> -> vector<256x128xf32>
    %86 = arith.addf %75, %85 : vector<256x128xf32>
    %c2_109 = arith.constant 2 : index
    %c0_110 = arith.constant 0 : index
    %c0_111 = arith.constant 0 : index
    %87 = vector.load %arg10[%c2_109, %c0_110, %c0_111] : memref<18x18x128xbf16, #tpu.memory_space<vmem>>, vector<16x16x128xbf16>
    %88 = vector.shape_cast %87 : vector<16x16x128xbf16> to vector<256x128xbf16>
    %c2_112 = arith.constant 2 : index
    %c1_113 = arith.constant 1 : index
    %c0_114 = arith.constant 0 : index
    %89 = vector.load %arg10[%c2_112, %c1_113, %c0_114] : memref<18x18x128xbf16, #tpu.memory_space<vmem>>, vector<16x16x128xbf16>
    %90 = vector.shape_cast %89 : vector<16x16x128xbf16> to vector<256x128xbf16>
    %c2_115 = arith.constant 2 : index
    %c2_116 = arith.constant 2 : index
    %c0_117 = arith.constant 0 : index
    %91 = vector.load %arg10[%c2_115, %c2_116, %c0_117] : memref<18x18x128xbf16, #tpu.memory_space<vmem>>, vector<16x16x128xbf16>
    %92 = vector.shape_cast %91 : vector<16x16x128xbf16> to vector<256x128xbf16>
    %93 = tpu.concatenate %88, %90, %92 in 1 : vector<256x128xbf16>, vector<256x128xbf16>, vector<256x128xbf16> -> vector<256x384xbf16>
    %c2_118 = arith.constant 2 : index
    %c0_119 = arith.constant 0 : index
    %c0_120 = arith.constant 0 : index
    %94 = vector.load %arg5[%c2_118, %c0_119, %c0_120] : memref<3x384x128xbf16, #tpu.memory_space<vmem>>, vector<1x384x128xbf16>
    %95 = vector.shape_cast %94 : vector<1x384x128xbf16> to vector<384x128xbf16>
    %cst_121 = arith.constant dense<0.000000e+00> : vector<256x128xf32>
    %96 = tpu.matmul %93, %95, %cst_121 {dimension_numbers = #tpu.dot_dimension_numbers<[1], [0], [0], [1], [0, 0, 1, 1], [], []>} : vector<256x384xbf16>, vector<384x128xbf16>, vector<256x128xf32> -> vector<256x128xf32>
    %97 = arith.addf %86, %96 : vector<256x128xf32>
    %c0_122 = arith.constant 0 : index
    %c0_123 = arith.constant 0 : index
    %98 = vector.load %arg6[%c0_122, %c0_123] : memref<1x128xf32, #tpu.memory_space<vmem>>, vector<1x128xf32>
    %99 = vector.broadcast %98 : vector<1x128xf32> to vector<256x128xf32>
    %100 = arith.mulf %97, %99 : vector<256x128xf32>
    %c0_124 = arith.constant 0 : index
    %c0_125 = arith.constant 0 : index
    %101 = vector.load %arg7[%c0_124, %c0_125] : memref<1x128xf32, #tpu.memory_space<vmem>>, vector<1x128xf32>
    %102 = vector.broadcast %101 : vector<1x128xf32> to vector<256x128xf32>
    %103 = arith.addf %100, %102 : vector<256x128xf32>
    %c0_126 = arith.constant 0 : index
    %c0_127 = arith.constant 0 : index
    %c0_128 = arith.constant 0 : index
    %c0_129 = arith.constant 0 : index
    %104 = vector.load %arg1[%c0_126, %c0_127, %c0_128, %c0_129] : memref<1x16x16x128xbf16, #tpu.memory_space<vmem>>, vector<1x16x16x128xbf16>
    %105 = vector.shape_cast %104 : vector<1x16x16x128xbf16> to vector<16x16x128xbf16>
    %106 = vector.shape_cast %105 : vector<16x16x128xbf16> to vector<256x128xbf16>
    %107 = arith.extf %106 : vector<256x128xbf16> to vector<256x128xf32>
    %108 = arith.addf %103, %107 : vector<256x128xf32>
    %cst_130 = arith.constant 0.000000e+00 : f32
    %109 = vector.broadcast %cst_130 : f32 to vector<256x128xf32>
    %110 = arith.maximumf %108, %109 : vector<256x128xf32>
    %111 = vector.shape_cast %110 : vector<256x128xf32> to vector<16x16x128xf32>
    %c0_131 = arith.constant 0 : index
    %c0_132 = arith.constant 0 : index
    %c0_133 = arith.constant 0 : index
    %c0_134 = arith.constant 0 : index
    %112 = vector.load %arg8[%c0_131, %c0_132, %c0_133, %c0_134] : memref<1x16x16x128xf32, #tpu.memory_space<vmem>>, vector<1x16x16x128xf32>
    %113 = vector.shape_cast %112 : vector<1x16x16x128xf32> to vector<16x16x128xf32>
    %114 = vector.shape_cast %111 : vector<16x16x128xf32> to vector<1x16x16x128xf32>
    tpu.vector_store %arg8[%c0_131, %c0_132, %c0_133, %c0_134], %114 {strides = array<i32>} : memref<1x16x16x128xf32, #tpu.memory_space<vmem>>, vector<1x16x16x128xf32>,
    return
  }
  func.func @transform_0(%arg0: i32) -> (i32, i32, i32, i32) {
    %c0_i32 = arith.constant 0 : i32
    %c0_i32_0 = arith.constant 0 : i32
    %c0_i32_1 = arith.constant 0 : i32
    %c0_i32_2 = arith.constant 0 : i32
    return %arg0, %c0_i32, %c0_i32_0, %c0_i32_1 : i32, i32, i32, i32
  }
  func.func @transform_1(%arg0: i32) -> (i32, i32, i32) {
    %c0_i32 = arith.constant 0 : i32
    %c0_i32_0 = arith.constant 0 : i32
    %c0_i32_1 = arith.constant 0 : i32
    %c0_i32_2 = arith.constant 0 : i32
    return %c0_i32, %c0_i32_0, %c0_i32_1 : i32, i32, i32
  }
  func.func @transform_2(%arg0: i32) -> (i32, i32) {
    %c0_i32 = arith.constant 0 : i32
    %c0_i32_0 = arith.constant 0 : i32
    %c0_i32_1 = arith.constant 0 : i32
    return %c0_i32, %c0_i32_0 : i32, i32
  }
  func.func @transform_3(%arg0: i32) -> (i32, i32) {
    %c0_i32 = arith.constant 0 : i32
    %c0_i32_0 = arith.constant 0 : i32
    %c0_i32_1 = arith.constant 0 : i32
    return %c0_i32, %c0_i32_0 : i32, i32
  }
  func.func @transform_4(%arg0: i32) -> (i32, i32, i32) {
    %c0_i32 = arith.constant 0 : i32
    %c0_i32_0 = arith.constant 0 : i32
    %c0_i32_1 = arith.constant 0 : i32
    %c0_i32_2 = arith.constant 0 : i32
    return %c0_i32, %c0_i32_0, %c0_i32_1 : i32, i32, i32
  }
  func.func @transform_5(%arg0: i32) -> (i32, i32) {
    %c0_i32 = arith.constant 0 : i32
    %c0_i32_0 = arith.constant 0 : i32
    %c0_i32_1 = arith.constant 0 : i32
    return %c0_i32, %c0_i32_0 : i32, i32
  }
  func.func @transform_6(%arg0: i32) -> (i32, i32) {
    %c0_i32 = arith.constant 0 : i32
    %c0_i32_0 = arith.constant 0 : i32
    %c0_i32_1 = arith.constant 0 : i32
    return %c0_i32, %c0_i32_0 : i32, i32
  }
  func.func @transform_7(%arg0: i32) -> (i32, i32, i32, i32) {
    %c0_i32 = arith.constant 0 : i32
    %c0_i32_0 = arith.constant 0 : i32
    %c0_i32_1 = arith.constant 0 : i32
    %c0_i32_2 = arith.constant 0 : i32
    return %arg0, %c0_i32, %c0_i32_0, %c0_i32_1 : i32, i32, i32, i32
  }
}

</mosaic_0001>

<bundles_post_ra>
// kernel: basic_block_forward.1
= control target key start
LH: loop header
LB: loop body
LE: loop exit
PB: predicated region body
PF: predicated region fallthrough
CT: control target
= control target key end

     0   :  { %s11243_s24 = smov 0   ;;  %s15317_s0 = inlined_call_operand.vmem [shape: bf16[2,16,16,128], index: 0, kind: input, shape index: {}]   ;;  %s15318_s1 = inlined_call_operand.vmem [shape: bf16[3,384,128], index: 1, kind: input, shape index: {}]   ;;  %s15319_s2 = inlined_call_operand.vmem [shape: f32[1,128], index: 2, kind: input, shape index: {}]   ;;  %s15320_s3 = inlined_call_operand.vmem [shape: f32[1,128], index: 3, kind: input, shape index: {}]   ;;  %s15321_s4 = inlined_call_operand.vmem [shape: bf16[3,384,128], index: 4, kind: input, shape index: {}]   ;;  %s15322_s5 = inlined_call_operand.vmem [shape: f32[1,128], index: 5, kind: input, shape index: {}]   ;;  %s15323_s6 = inlined_call_operand.vmem [shape: f32[1,128], index: 6, kind: input, shape index: {}]   ;;  %s15324_s7 = inlined_call_operand.vmem [shape: f32[2,16,16,128], index: 7, kind: output, shape index: {}]  }
   0x1 LB: > { %s9542_s25 = sadd.s32 4294967295, %s11200_s24   ;;  %p9546_p0 = scmp.ge.s32.totalorder %s11200_s24, 1  ;;  %s11200_s24 = sphi %s11243_s24, %s17_s24  }
   0x2   : > { %p237_p1 = scmp.lt.s32.totalorder %s11200_s24, 3 }
   0x4   : > { %p238_p2 = pnand %p9546_p0, %p237_p1 }
   0x6   : > { %241 = sbr.rel (%p238_p2) target bundleno = 1522 (0x5f2), region = 48 }
   0xb   : > { %v10866_v0 = vld [vmem:[%s15318_s1 + $0xf8] sm:$0xff]  ;;  %p269_p3 = scmp.lt.s32.totalorder %s9542_s25, 1  ;;  %v10865_v2 = vld [vmem:[%s15318_s1 + $0xf0] sm:$0xff]  ;;  %vm288_vm0 = vcmask 1040384   ;;  %vm289_vm1 = vsmask.f32 256 }
   0xc   : > { %v10874_v1 = vld [vmem:[%s15318_s1 + $0x138] sm:$0xff]  ;;  %2736 = vmatpush.bf16.msra.mxu0 %v10866_v0  ;;  %11122 = vmatpush.bf16.msra.mxu2 %v10866_v0  ;;  %v10873_v3 = vld [vmem:[%s15318_s1 + $0x130] sm:$0xff]  ;;  %v10864_v4 = vld [vmem:[%s15318_s1 + $0xe8] sm:$0xff]  ;;  %v15335_v5 = vmov 0  ;;  %vm339_vm3 = vsmask.f32 7938 }
   0xd   : > { %s15552_s25 = smov (!%p269_p3, %s9542_s25), 1  ;;  %2825 = vmatpush.bf16.msra.mxu1 %v10874_v1  ;;  %11130 = vmatpush.bf16.msra.mxu3 %v10874_v1  ;;  %vm11276_vm2 = vmand %vm288_vm0, %vm289_vm1  ;;  %v291_v6 = vld [vmem:[#allocation2 + $0xc] sm:$0x1]  ;;  %vm421_vm4 = vsmask.f32 4368  ;;  %vm743_vm5 = vcmask 1043456  }
   0xe   : > { %s10801_s13 = sshll.u32 %s15552_s25, 7  ;;  %v15336_v5 = vsel %vm11276_vm2, 4294967295, %v15335_v5  ;;  %v10872_v7 = vld [vmem:[%s15318_s1 + $0x128] sm:$0xff]  ;;  %v292_v8 = vsel %vm11276_vm2, 0, %v291_v6  ;;  %vm11290_vm6 = vmand %vm288_vm0, %vm339_vm3  ;;  %v15338_v17 = vmov 0  ;;  %v10863_v23 = vld [vmem:[%s15318_s1 + $0xe0] sm:$0xff] }
   0xf   : > { %s11272_s16 = scalar_lea.vmem %s15317_s0, %s10801_s13  ;;  %15337 = vst [vmem:[#allocation4_spill] sm:$0xff] %v15336_v5  ;;  %v315_v15 = vld [vmem:[#allocation2 + $0x6c] sm:$0x1]  ;;  %v15339_v17 = vsel %vm11290_vm6, 4294967295, %v15338_v17  ;;  %vm11304_vm7 = vmor %vm289_vm1, %vm421_vm4  ;;  %v15341_v24 = vmov 0  ;;  %v10871_v28 = vld [vmem:[%s15318_s1 + $0x120] sm:$0xff] }
  0x10   : > { %2737 = vmatpush.bf16.msra.mxu0 %v10865_v2  ;;  %11123 = vmatpush.bf16.msra.mxu2 %v10865_v2  ;;  %v389_v9 = vld [vmem:[%s11272_s16] sm:$0xf]  ;;  %v390_v10 = vld [vmem:[%s11272_s16 + $0x4] sm:$0xf]  ;;  %293 = vst [vmem:[#allocation2 + $0xc] sm:$0x1] %v292_v8  ;;  %vm11317_vm8 = vmand %vm743_vm5, %vm339_vm3 }
  0x11   : > { %2826 = vmatpush.bf16.msra.mxu1 %v10873_v3  ;;  %11131 = vmatpush.bf16.msra.mxu3 %v10873_v3  ;;  %v424_v11 = vshrl.u32 %v389_v9, 16  ;;  %v427_v12 = vshll.u32 %v389_v9, 16  ;;  %v432_v13 = vshrl.u32 %v390_v10, 16  ;;  %v435_v14 = vshll.u32 %v390_v10, 16  ;;  %v405_v16 = vld [vmem:[%s11272_s16 + $0x40] sm:$0xf] }
  0x12   : > { %15340 = vst [vmem:[#allocation5_spill] sm:$0xff] %v15339_v17  ;;  %v316_v20 = vsel %vm11276_vm2, 0, %v315_v15  ;;  %v406_v21 = vld [vmem:[%s11272_s16 + $0x44] sm:$0xf]  ;;  %v560_v22 = vshrl.u32 %v405_v16, 16  ;;  %v15342_v24 = vsel %vm11304_vm7, 4294967295, %v15341_v24 }
  0x13   : > { %v426_v18 = vrot.slane %v424_v11, 7  ;;  %v11294_v19 = vrot.slane %v432_v13, 7  ;;  %15343 = vst [vmem:[#allocation6_spill] sm:$0xff] %v15342_v24  ;;  %v563_v25 = vshll.u32 %v405_v16, 16  ;;  %v568_v26 = vshrl.u32 %v406_v21, 16  ;;  %v10862_v34 = vld [vmem:[%s15318_s1 + $0xd8] sm:$0xff] }
  0x14   : > { %2738 = vmatpush.bf16.msra.mxu0 %v10864_v4  ;;  %11124 = vmatpush.bf16.msra.mxu2 %v10864_v4  ;;  %317 = vst [vmem:[#allocation2 + $0x6c] sm:$0x1] %v316_v20  ;;  %v571_v27 = vshll.u32 %v406_v21, 16  ;;  %v341_v32 = vld [vmem:[#allocation2 + $0x14] sm:$0x1]  ;;  %v15344_v35 = vmov 0 }
  0x15   : > { %2827 = vmatpush.bf16.msra.mxu1 %v10872_v7  ;;  %11132 = vmatpush.bf16.msra.mxu3 %v10872_v7  ;;  %v429_v29 = vor.u32 %v427_v12, %v426_v18  ;;  %v430_v30 = vrot.slane %v426_v18, 4  ;;  %v437_v31 = vor.u32 %v435_v14, %v11294_v19  ;;  %v365_v33 = vld [vmem:[#allocation2 + $0x74] sm:$0x1]  ;;  %v15345_v35 = vsel %vm11317_vm8, 4294967295, %v15344_v35  ;;  %v294_v41 = vld [vmem:[#allocation2 + $0x18] sm:$0x1] }
  0x16   : > { %15346 = vst [vmem:[#allocation7_spill] sm:$0xff] %v15345_v35  ;;  %v562_v36 = vrot.slane %v560_v22, 7  ;;  %v11321_v37 = vrot.slane %v568_v26, 7  ;;  %v342_v38 = vsel %vm11290_vm6, 0, %v341_v32  ;;  %v366_v39 = vsel %vm11290_vm6, 0, %v365_v33  ;;  %v10870_v43 = vld [vmem:[%s15318_s1 + $0x118] sm:$0xff] }
  0x17   : > { %v438_v40 = vsel %vm11304_vm7, %v430_v30, %v437_v31  ;;  %343 = vst [vmem:[#allocation2 + $0x14] sm:$0x1] %v342_v38  ;;  %v11330_v42 = vld [vmem:[%s11272_s16 + $0x8] sm:$0xf]  ;;  %v745_v44 = vld [vmem:[#allocation2 + $0xc] sm:$0xf] }
  0x18   : > { %2739 = vmatpush.bf16.msra.mxu0 %v10863_v23  ;;  %11125 = vmatpush.bf16.msra.mxu2 %v10863_v23  ;;  %748 = vst [vmem:[#allocation2 + $0x10] sm:$0xf] %v438_v40  ;;  %v565_v45 = vor.u32 %v563_v25, %v562_v36  ;;  %v566_v46 = vrot.slane %v562_v36, 4  ;;  %v573_v47 = vor.u32 %v571_v27, %v11321_v37  ;;  %v295_v49 = vsel %vm11276_vm2, 0, %v294_v41  ;;  %v392_v50 = vld [vmem:[%s11272_s16 + $0xc] sm:$0xf] }
  0x19   : > { %2828 = vmatpush.bf16.msra.mxu1 %v10871_v28  ;;  %11133 = vmatpush.bf16.msra.mxu3 %v10871_v28  ;;  %v746_v48 = vsel %vm11317_vm8, %v429_v29, %v745_v44  ;;  %367 = vst [vmem:[#allocation2 + $0x74] sm:$0x1] %v366_v39  ;;  %v441_v51 = vshrl.u32 %v11330_v42, 16  ;;  %v10861_v52 = vld [vmem:[%s15318_s1 + $0xd0] sm:$0xff]  ;;  %v439_v53 = vrot.slane %v11294_v19, 4  ;;  %v449_v55 = vshrl.u32 %v392_v50, 16 }
  0x1a   : > { %747 = vst [vmem:[#allocation2 + $0xc] sm:$0xf] %v746_v48  ;;  %v574_v54 = vsel %vm11304_vm7, %v566_v46, %v573_v47  ;;  %v452_v56 = vshll.u32 %v392_v50, 16  ;;  %v10869_v57 = vld [vmem:[%s15318_s1 + $0x110] sm:$0xff]  ;;  %v575_v58 = vrot.slane %v11321_v37, 4  ;;  %v444_v62 = vshll.u32 %v11330_v42, 16 }
  0x1b   : > { %v801_v59 = vld [vmem:[#allocation2 + $0x6c] sm:$0xf]  ;;  %804 = vst [vmem:[#allocation2 + $0x70] sm:$0xf] %v574_v54  ;;  %v443_v60 = vrot.slane %v441_v51, 7  ;;  %v11355_v63 = vrot.slane %v449_v55, 7 }
  0x1c   : > { %2740 = vmatpush.bf16.msra.mxu0 %v10862_v34  ;;  %11126 = vmatpush.bf16.msra.mxu2 %v10862_v34  ;;  %v802_v61 = vsel %vm11317_vm8, %v565_v45, %v801_v59  ;;  %vm905_vm9 = vsmask.f32 3328  ;;  %vm906_vm10 = vsmask.f32 7440  ;;  %296 = vst [vmem:[#allocation2 + $0x18] sm:$0x1] %v295_v49 }
  0x1d   : > { %v318_v0 = vld [vmem:[#allocation2 + $0x78] sm:$0x1]  ;;  %2829 = vmatpush.bf16.msra.mxu1 %v10870_v43  ;;  %11134 = vmatpush.bf16.msra.mxu3 %v10870_v43  ;;  %803 = vst [vmem:[#allocation2 + $0x6c] sm:$0xf] %v802_v61  ;;  %v447_v1 = vrot.slane %v443_v60, 4  ;;  %v454_v6 = vor.u32 %v452_v56, %v11355_v63  ;;  %v10860_v8 = vld [vmem:[%s15318_s1 + $0xc8] sm:$0xff]  ;;  %v446_v21 = vor.u32 %v444_v62, %v443_v60  ;;  %vm11405_vm11 = vmor %vm905_vm9, %vm906_vm10 }
  0x1e   : > { %v319_v2 = vsel %vm11276_vm2, 0, %v318_v0  ;;  %v407_v3 = vld [vmem:[%s11272_s16 + $0x48] sm:$0xf]  ;;  %v749_v4 = vld [vmem:[#allocation2 + $0x14] sm:$0x1]  ;;  %v10859_v23 = vld [vmem:[%s15318_s1 + $0xc0] sm:$0xff] }
  0x1f   : > { %320 = vst [vmem:[#allocation2 + $0x78] sm:$0x1] %v319_v2  ;;  %v577_v7 = vshrl.u32 %v407_v3, 16  ;;  %v750_v9 = vsel %vm11276_vm2, %v439_v53, %v749_v4  ;;  %v1728_v10 = vld [vmem:[#allocation2 + $0x10] sm:$0xf]  ;;  %v580_v12 = vshll.u32 %v407_v3, 16  ;;  %v455_v16 = vsel %vm11304_vm7, %v447_v1, %v454_v6 }
  0x20   : > { %v11367_v11 = vld [vmem:[%s11272_s16 + $0x4c] sm:$0xf]  ;;  %2741 = vmatpush.bf16.msra.mxu0 %v10861_v52  ;;  %11127 = vmatpush.bf16.msra.mxu2 %v10861_v52  ;;  %751 = vst [vmem:[#allocation2 + $0x14] sm:$0x1] %v750_v9  ;;  %v1785_v13 = vshll.u32 %v1728_v10, 16  ;;  %v1789_v14 = vshrl.u32 %v1728_v10, 16 }
  0x21   : > { %v805_v15 = vld [vmem:[#allocation2 + $0x74] sm:$0x1]  ;;  %2830 = vmatpush.bf16.msra.mxu1 %v10869_v57  ;;  %11135 = vmatpush.bf16.msra.mxu3 %v10869_v57  ;;  %v10868_v18 = vld [vmem:[%s15318_s1 + $0x108] sm:$0xff]  ;;  %755 = vst [vmem:[#allocation2 + $0x1c] sm:$0xf] %v455_v16  ;;  %v11376_v22 = vrot.slane %v577_v7, 7 }
  0x22   : > { %v1727_v19 = vld [vmem:[#allocation2 + $0xc] sm:$0xf]  ;;  %v806_v20 = vsel %vm11276_vm2, %v575_v58, %v805_v15  ;;  %v11381_v27 = vrot.slane %v1785_v13, 5  ;;  %v1791_v28 = vrot.slane %v1789_v14, 4  ;;  %v10867_v29 = vld [vmem:[%s15318_s1 + $0x100] sm:$0xff]  ;;  %v585_v33 = vshrl.u32 %v11367_v11, 16 }
  0x23   : > { %v1776_v25 = vshrl.u32 %v1727_v19, 16  ;;  %v1779_v26 = vshll.u32 %v1727_v19, 16  ;;  %807 = vst [vmem:[#allocation2 + $0x74] sm:$0x1] %v806_v20  ;;  %v1744_v30 = vld [vmem:[#allocation2 + $0x70] sm:$0xf]  ;;  %v582_v32 = vor.u32 %v580_v12, %v11376_v22 }
  0x24   : > { %v752_v31 = vld [vmem:[#allocation2 + $0x18] sm:$0xf]  ;;  %2742 = vmatpush.bf16.msra.mxu0 %v10860_v8  ;;  %11128 = vmatpush.bf16.msra.mxu2 %v10860_v8  ;;  %v1792_v37 = vor.u32 %v1791_v28, %v11381_v27  ;;  %v1743_v38 = vld [vmem:[#allocation2 + $0x6c] sm:$0xf]  ;;  %v1977_v39 = vshll.u32 %v1744_v30, 16  ;;  %v1981_v45 = vshrl.u32 %v1744_v30, 16 }
  0x25   : > { %v1778_v34 = vrot.slane %v1776_v25, 4  ;;  %v1781_v36 = vrot.slane %v1779_v26, 5  ;;  %v10882_v40 = vld [vmem:[%s15318_s1 + $0x178] sm:$0xff]  ;;  %2831 = vmatpush.bf16.msra.mxu1 %v10868_v18  ;;  %11136 = vmatpush.bf16.msra.mxu3 %v10868_v18  ;;  %v10843_v42 = vld [vmem:[#allocation2 + $0xc] sm:$0xff]  ;;  %v1968_v43 = vshrl.u32 %v1743_v38, 16  ;;  %v1971_v44 = vshll.u32 %v1743_v38, 16 }
  0x26   : > { %v10826_v41 = vld [vmem:[%s15318_s1 + $0x38] sm:$0xff]  ;;  %v753_v46 = vsel %vm11317_vm8, %v446_v21, %v752_v31  ;;  %v10851_v48 = vld [vmem:[#allocation2 + $0x6c] sm:$0xff]  ;;  %v1979_v50 = vrot.slane %v1977_v39, 5  ;;  %v583_v52 = vrot.slane %v11376_v22, 4  ;;  %v11401_v53 = vrot.slane %v585_v33, 7  ;;  %s10802_s10 = sshll.u32 %s15552_s25, 8 }
  0x27   : > { %v808_v47 = vld [vmem:[#allocation2 + $0x78] sm:$0xf]  ;;  %v1782_v49 = vor.u32 %v1781_v36, %v1778_v34  ;;  %754 = vst [vmem:[#allocation2 + $0x18] sm:$0xf] %v753_v46  ;;  %v1759_v55 = vld [vmem:[#allocation2 + $0x14] sm:$0x1]  ;;  %s15069_s13 = scalar_lea.vmem %s15324_s7, %s10802_s10 }
  0x28   : > { %v10834_v51 = vld [vmem:[%s15318_s1 + $0x78] sm:$0xff]  ;;  %v1970_v56 = vrot.slane %v1968_v43, 4  ;;  %v1973_v57 = vrot.slane %v1971_v44, 5  ;;  %v1983_v58 = vrot.slane %v1981_v45, 4  ;;  %v588_v59 = vshll.u32 %v11367_v11, 16  ;;  %2743 = vmatpush.bf16.msra.mxu0 %v10859_v23  ;;  %11129 = vmatpush.bf16.msra.mxu2 %v10859_v23  ;;  %v10881_v2 = vld [vmem:[%s15318_s1 + $0x170] sm:$0xff] }
  0x29   : > { %v1783_v60 = vrot.slane %v1782_v49, 4  ;;  %v1793_v61 = vrot.slane %v1792_v37, 4  ;;  %v1795_v62 = vshll.u32 %v1759_v55, 16  ;;  %v809_v0 = vsel %vm11317_vm8, %v582_v32, %v808_v47  ;;  %v344_v1 = vld [vmem:[#allocation2 + $0x20] sm:$0x1]  ;;  %2832 = vmatpush.bf16.msra.mxu1 %v10867_v29  ;;  %11137 = vmatpush.bf16.msra.mxu3 %v10867_v29  ;;  %v10825_v14 = vld [vmem:[%s15318_s1 + $0x30] sm:$0xff] }
  0x2a   : > { %v1767_v3 = vld [vmem:[#allocation2 + $0x74] sm:$0x1]  ;;  %v1974_v4 = vor.u32 %v1973_v57, %v1970_v56  ;;  %v1984_v6 = vor.u32 %v1983_v58, %v1979_v50  ;;  %v590_v7 = vor.u32 %v588_v59, %v11401_v53  ;;  %810 = vst [vmem:[#allocation2 + $0x78] sm:$0xf] %v809_v0  ;;  %v11416_v8 = vld [vmem:[#allocation2 + $0x1c] sm:$0xf] }
  0x2b   : > { %v1788_v9 = vsel %vm11405_vm11, %v1783_v60, %v11381_v27  ;;  %v1797_v10 = vrot.slane %v1795_v62, 5  ;;  %v1987_v11 = vshll.u32 %v1767_v3, 16  ;;  %v345_v12 = vsel %vm11290_vm6, 0, %v344_v1  ;;  %v368_v13 = vld [vmem:[#allocation2 + $0x80] sm:$0x1]  ;;  %2744 = vmatmul.bf16.vlgmr.msra.gmra.mxu0 %v10843_v42  ;;  %2784 = vmatmul.bf16.vlgmr.msra.gmra.mxu2 %v10851_v48  ;;  %v10833_v23 = vld [vmem:[%s15318_s1 + $0x70] sm:$0xff] }
  0x2c   : > { %2914 = vmatpush.bf16.msrb.mxu2 %v10882_v40  ;;  %v2415_v15 = vunpack.c.l.b16 %v1788_v9  ;;  %v1975_v16 = vrot.slane %v1974_v4, 4  ;;  %v1985_v18 = vrot.slane %v1984_v6, 4  ;;  %v591_v19 = vsel %vm11304_vm7, %v583_v52, %v590_v7  ;;  %346 = vst [vmem:[#allocation2 + $0x20] sm:$0x1] %v345_v12  ;;  %3236 = vmatpush.bf16.msrb.mxu0 %v10834_v51  ;;  %v297_v30 = vld [vmem:[#allocation2 + $0x24] sm:$0x1] }
  0x2d   : > { %3147 = vmatpush.bf16.msrb.mxu3 %v10826_v41  ;;  %v1798_v20 = vsel %vm11405_vm11, %v1793_v61, %v1797_v10  ;;  %v1989_v21 = vrot.slane %v1987_v11, 5  ;;  %v456_v22 = vrot.slane %v11355_v63, 4  ;;  %811 = vst [vmem:[#allocation2 + $0x7c] sm:$0xf] %v591_v19  ;;  %v1809_v28 = vshll.u32 %v11416_v8, 16 }
  0x2e   : > { %v2416_v25 = vunpack.c.l.b16 %v1798_v20  ;;  %v1980_v26 = vsel %vm11405_vm11, %v1975_v16, %v1979_v50  ;;  %v1729_v27 = vld [vmem:[#allocation2 + $0x18] sm:$0xf]  ;;  %v369_v29 = vsel %vm11290_vm6, 0, %v368_v13  ;;  %v393_v34 = vld [vmem:[%s11272_s16 + $0x10] sm:$0xf]  ;;  %v592_v38 = vrot.slane %v11401_v53, 4 }
  0x2f   : > { %v1990_v63 = vsel %vm11405_vm11, %v1985_v18, %v1989_v21  ;;  %v2431_v31 = vunpack.c.l.b16 %v1980_v26  ;;  %v1800_v32 = vshrl.u32 %v1729_v27, 16  ;;  %v1803_v33 = vshll.u32 %v1729_v27, 16  ;;  %370 = vst [vmem:[#allocation2 + $0x80] sm:$0x1] %v369_v29  ;;  %v394_v40 = vld [vmem:[%s11272_s16 + $0x14] sm:$0xf] }
  0x30   : > { %2915 = vmatpush.bf16.msrb.mxu2 %v10881_v2  ;;  %v2447_v36 = vpack.c.b16 %v2416_v25, %v2415_v15  ;;  %v2432_v37 = vunpack.c.l.b16 %v1990_v63  ;;  %v1813_v39 = vshrl.u32 %v11416_v8, 16  ;;  %3237 = vmatpush.bf16.msrb.mxu0 %v10833_v23  ;;  %v298_v44 = vsel %vm11276_vm2, 0, %v297_v30  ;;  %v321_v60 = vld [vmem:[#allocation2 + $0x84] sm:$0x1]  ;;  %v409_v61 = vld [vmem:[%s11272_s16 + $0x50] sm:$0xf] }
  0x31   : > { %3148 = vmatpush.bf16.msrb.mxu3 %v10825_v14  ;;  %v1802_v41 = vrot.slane %v1800_v32, 4  ;;  %v1805_v42 = vrot.slane %v1803_v33, 5  ;;  %v1745_v43 = vld [vmem:[#allocation2 + $0x78] sm:$0xf]  ;;  %v458_v45 = vshrl.u32 %v393_v34, 16  ;;  %v11447_v47 = vrot.slane %v1809_v28, 5 }
  0x32   : > { %2833 = vmatmul.bf16.vlgmr.msra.gmra.mxu1 %v2447_v36  ;;  %v2455_v46 = vpack.c.b16 %v2432_v37, %v2431_v31  ;;  %v1992_v48 = vshrl.u32 %v1745_v43, 16  ;;  %v1995_v49 = vshll.u32 %v1745_v43, 16  ;;  %299 = vst [vmem:[#allocation2 + $0x24] sm:$0x1] %v298_v44  ;;  %v461_v53 = vshll.u32 %v393_v34, 16  ;;  %v10844_v9 = vld [vmem:[#allocation2 + $0x18] sm:$0xff] }
  0x33   : > { %v756_v50 = vld [vmem:[#allocation2 + $0x20] sm:$0x1]  ;;  %v1806_v51 = vor.u32 %v1805_v42, %v1802_v41  ;;  %v460_v52 = vrot.slane %v458_v45, 7  ;;  %v466_v55 = vshrl.u32 %v394_v40, 16  ;;  %v1815_v0 = vrot.slane %v1813_v39, 4  ;;  %v10880_v26 = vld [vmem:[%s15318_s1 + $0x168] sm:$0xff] }
  0x34   : > { %2873 = vmatmul.bf16.vlgmr.msra.gmra.mxu3 %v2455_v46  ;;  %v757_v56 = vsel %vm11276_vm2, %v456_v22, %v756_v50  ;;  %v1746_v57 = vld [vmem:[#allocation2 + $0x7c] sm:$0xf]  ;;  %v1994_v58 = vrot.slane %v1992_v48, 4  ;;  %v1997_v59 = vrot.slane %v1995_v49, 5  ;;  %v469_v8 = vshll.u32 %v394_v40, 16  ;;  %v10824_v63 = vld [vmem:[%s15318_s1 + $0x28] sm:$0xff]  ;;  %2916 = vmatpush.bf16.msrb.mxu2 %v10880_v26 }
  0x35   : > { %758 = vst [vmem:[#allocation2 + $0x20] sm:$0x1] %v757_v56  ;;  %v1807_v62 = vrot.slane %v1806_v51, 4  ;;  %v2001_v1 = vshll.u32 %v1746_v57, 16  ;;  %v2005_v2 = vshrl.u32 %v1746_v57, 16  ;;  %v463_v4 = vor.u32 %v461_v53, %v460_v52  ;;  %v10852_v10 = vld [vmem:[#allocation2 + $0x78] sm:$0xff]  ;;  %3149 = vmatpush.bf16.msrb.mxu3 %v10824_v63 }
  0x36   : > { %v812_v3 = vld [vmem:[#allocation2 + $0x80] sm:$0x1]  ;;  %v464_v6 = vrot.slane %v460_v52, 4  ;;  %v11452_v7 = vrot.slane %v466_v55, 7  ;;  %v1998_v12 = vor.u32 %v1997_v59, %v1994_v58  ;;  %v410_v15 = vld [vmem:[%s11272_s16 + $0x54] sm:$0xf]  ;;  %v1816_v20 = vor.u32 %v1815_v0, %v11447_v47 }
  0x37   : > { %v813_v11 = vsel %vm11276_vm2, %v592_v38, %v812_v3  ;;  %v11456_v13 = vrot.slane %v2001_v1, 5  ;;  %v2007_v14 = vrot.slane %v2005_v2, 4  ;;  %v347_v18 = vld [vmem:[#allocation2 + $0x2c] sm:$0x1]  ;;  %v322_v23 = vsel %vm11276_vm2, 0, %v321_v60 }
  0x38   : > { %814 = vst [vmem:[#allocation2 + $0x80] sm:$0x1] %v813_v11  ;;  %v471_v16 = vor.u32 %v469_v8, %v11452_v7  ;;  %v371_v19 = vld [vmem:[#allocation2 + $0x8c] sm:$0x1]  ;;  %v594_v25 = vshrl.u32 %v409_v61, 16  ;;  %v597_v29 = vshll.u32 %v409_v61, 16  ;;  %v1812_v37 = vsel %vm11405_vm11, %v1807_v62, %v11447_v47 }
  0x39   : > { %v2008_v21 = vor.u32 %v2007_v14, %v11456_v13  ;;  %v759_v22 = vld [vmem:[#allocation2 + $0x24] sm:$0xf]  ;;  %323 = vst [vmem:[#allocation2 + $0x84] sm:$0x1] %v322_v23  ;;  %v602_v30 = vshrl.u32 %v410_v15, 16  ;;  %v10832_v31 = vld [vmem:[%s15318_s1 + $0x68] sm:$0xff]  ;;  %v2417_v50 = vunpack.c.l.b16 %v1812_v37 }
  0x3a   : > { %v472_v27 = vsel %vm11304_vm7, %v464_v6, %v471_v16  ;;  %v760_v28 = vsel %vm11317_vm8, %v463_v4, %v759_v22  ;;  %v1999_v32 = vrot.slane %v1998_v12, 4  ;;  %v596_v33 = vrot.slane %v594_v25, 7  ;;  %3238 = vmatpush.bf16.msrb.mxu0 %v10832_v31  ;;  %v300_v48 = vld [vmem:[#allocation2 + $0x30] sm:$0x1]  ;;  %v395_v53 = vld [vmem:[%s11272_s16 + $0x18] sm:$0xf] }
  0x3b   : > { %761 = vst [vmem:[#allocation2 + $0x24] sm:$0xf] %v760_v28  ;;  %v605_v34 = vshll.u32 %v410_v15, 16  ;;  %2749 = vmatmul.bf16.gmra.mxu0 %v10844_v9  ;;  %2789 = vmatmul.bf16.gmra.mxu2 %v10852_v10  ;;  %v604_v38 = vrot.slane %v602_v30, 7  ;;  %v348_v39 = vsel %vm11290_vm6, 0, %v347_v18  ;;  %v1817_v40 = vrot.slane %v1816_v20, 4 }
  0x3c   : > { %v1760_v36 = vld [vmem:[#allocation2 + $0x20] sm:$0x1]  ;;  %762 = vst [vmem:[#allocation2 + $0x28] sm:$0xf] %v472_v27  ;;  %v600_v42 = vrot.slane %v596_v33, 4  ;;  %v372_v43 = vsel %vm11290_vm6, 0, %v371_v19  ;;  %v599_v46 = vor.u32 %v597_v29, %v596_v33  ;;  %v2004_v55 = vsel %vm11405_vm11, %v1999_v32, %v11456_v13 }
  0x3d   : > { %v1819_v41 = vshll.u32 %v1760_v36, 16  ;;  %349 = vst [vmem:[#allocation2 + $0x2c] sm:$0x1] %v348_v39  ;;  %v2009_v44 = vrot.slane %v2008_v21, 4  ;;  %v473_v45 = vrot.slane %v11452_v7, 4  ;;  %v607_v47 = vor.u32 %v605_v34, %v604_v38 }
  0x3e   : > { %373 = vst [vmem:[#allocation2 + $0x8c] sm:$0x1] %v372_v43  ;;  %v301_v52 = vsel %vm11276_vm2, 0, %v300_v48  ;;  %v396_v58 = vld [vmem:[%s11272_s16 + $0x1c] sm:$0xf]  ;;  %v475_v59 = vshrl.u32 %v395_v53, 16  ;;  %v2433_v7 = vunpack.c.l.b16 %v2004_v55 }
  0x3f   : > { %v1821_v49 = vrot.slane %v1819_v41, 5  ;;  %v1768_v51 = vld [vmem:[#allocation2 + $0x80] sm:$0x1]  ;;  %v608_v57 = vsel %vm11304_vm7, %v600_v42, %v607_v47  ;;  %302 = vst [vmem:[#allocation2 + $0x30] sm:$0x1] %v301_v52  ;;  %v609_v61 = vrot.slane %v604_v38, 4 }
  0x40   : > { %v2011_v56 = vshll.u32 %v1768_v51, 16  ;;  %v815_v62 = vld [vmem:[#allocation2 + $0x84] sm:$0xf]  ;;  %818 = vst [vmem:[#allocation2 + $0x88] sm:$0xf] %v608_v57  ;;  %v478_v0 = vshll.u32 %v395_v53, 16 }
  0x41   : > { %v1822_v60 = vsel %vm11405_vm11, %v1817_v40, %v1821_v49  ;;  %v816_v3 = vsel %vm11317_vm8, %v599_v46, %v815_v62  ;;  %v477_v6 = vrot.slane %v475_v59, 7  ;;  %v483_v10 = vshrl.u32 %v396_v58, 16  ;;  %v324_v22 = vld [vmem:[#allocation2 + $0x90] sm:$0x1]  ;;  %v411_v28 = vld [vmem:[%s11272_s16 + $0x58] sm:$0xf] }
  0x42   : > { %v2418_v1 = vunpack.c.l.b16 %v1822_v60  ;;  %v2013_v2 = vrot.slane %v2011_v56, 5  ;;  %v1731_v4 = vld [vmem:[#allocation2 + $0x24] sm:$0xf]  ;;  %817 = vst [vmem:[#allocation2 + $0x84] sm:$0xf] %v816_v3  ;;  %v486_v36 = vshll.u32 %v396_v58, 16 }
  0x43   : > { %v1732_v8 = vld [vmem:[#allocation2 + $0x28] sm:$0xf]  ;;  %v1824_v9 = vshrl.u32 %v1731_v4, 16  ;;  %v1827_v14 = vshll.u32 %v1731_v4, 16  ;;  %v480_v27 = vor.u32 %v478_v0, %v477_v6  ;;  %v481_v31 = vrot.slane %v477_v6, 4  ;;  %v10879_v60 = vld [vmem:[%s15318_s1 + $0x160] sm:$0xff] }
  0x44   : > { %v2448_v11 = vpack.c.b16 %v2418_v1, %v2417_v50  ;;  %v2014_v12 = vsel %vm11405_vm11, %v2009_v44, %v2013_v2  ;;  %v763_v13 = vld [vmem:[#allocation2 + $0x2c] sm:$0x1]  ;;  %v1833_v15 = vshll.u32 %v1732_v8, 16  ;;  %v1837_v20 = vshrl.u32 %v1732_v8, 16  ;;  %v10845_v30 = vld [vmem:[#allocation2 + $0x24] sm:$0xff]  ;;  %2917 = vmatpush.bf16.msrb.mxu2 %v10879_v60 }
  0x45   : > { %v2434_v16 = vunpack.c.l.b16 %v2014_v12  ;;  %v764_v18 = vsel %vm11276_vm2, %v473_v45, %v763_v13  ;;  %v1826_v19 = vrot.slane %v1824_v9, 4  ;;  %v819_v21 = vld [vmem:[#allocation2 + $0x8c] sm:$0x1]  ;;  %v1829_v23 = vrot.slane %v1827_v14, 5  ;;  %v412_v47 = vld [vmem:[%s11272_s16 + $0x5c] sm:$0xf] }
  0x46   : > { %2838 = vmatmul.bf16.gmra.mxu1 %v2448_v11  ;;  %765 = vst [vmem:[#allocation2 + $0x2c] sm:$0x1] %v764_v18  ;;  %v1835_v25 = vrot.slane %v1833_v15, 5  ;;  %v820_v26 = vsel %vm11276_vm2, %v609_v61, %v819_v21  ;;  %v1839_v63 = vrot.slane %v1837_v20, 4  ;;  %v11505_v32 = vrot.slane %v483_v10, 7  ;;  %v10823_v61 = vld [vmem:[%s15318_s1 + $0x20] sm:$0xff] }
  0x47   : > { %v2456_v29 = vpack.c.b16 %v2434_v16, %v2433_v7  ;;  %821 = vst [vmem:[#allocation2 + $0x8c] sm:$0x1] %v820_v26  ;;  %v1830_v33 = vor.u32 %v1829_v23, %v1826_v19  ;;  %v1748_v34 = vld [vmem:[#allocation2 + $0x88] sm:$0xf]  ;;  %v766_v37 = vld [vmem:[#allocation2 + $0x30] sm:$0xf]  ;;  %3150 = vmatpush.bf16.msrb.mxu3 %v10823_v61 }
  0x48   : > { %v325_v38 = vsel %vm11276_vm2, 0, %v324_v22  ;;  %v1840_v39 = vor.u32 %v1839_v63, %v1835_v25  ;;  %v2025_v40 = vshll.u32 %v1748_v34, 16  ;;  %v2029_v41 = vshrl.u32 %v1748_v34, 16  ;;  %v350_v53 = vld [vmem:[#allocation2 + $0x38] sm:$0x1]  ;;  %v10831_v9 = vld [vmem:[%s15318_s1 + $0x60] sm:$0xff] }
  0x49   : > { %2878 = vmatmul.bf16.gmra.mxu3 %v2456_v29  ;;  %326 = vst [vmem:[#allocation2 + $0x90] sm:$0x1] %v325_v38  ;;  %v10853_v42 = vld [vmem:[#allocation2 + $0x84] sm:$0xff]  ;;  %v1831_v43 = vrot.slane %v1830_v33, 4  ;;  %v488_v45 = vor.u32 %v486_v36, %v11505_v32  ;;  %v767_v46 = vsel %vm11317_vm8, %v480_v27, %v766_v37  ;;  %v611_v48 = vshrl.u32 %v411_v28, 16  ;;  %3239 = vmatpush.bf16.msrb.mxu0 %v10831_v9 }
  0x4a   : > { %v1747_v44 = vld [vmem:[#allocation2 + $0x84] sm:$0xf]  ;;  %v1841_v49 = vrot.slane %v1840_v39, 4  ;;  %v2027_v52 = vrot.slane %v2025_v40, 5  ;;  %768 = vst [vmem:[#allocation2 + $0x30] sm:$0xf] %v767_v46 }
  0x4b   : > { %v2016_v50 = vshrl.u32 %v1747_v44, 16  ;;  %v2019_v51 = vshll.u32 %v1747_v44, 16  ;;  %2754 = vmatmul.bf16.gmra.mxu0 %v10845_v30  ;;  %2794 = vmatmul.bf16.gmra.mxu2 %v10853_v42  ;;  %v1836_v55 = vsel %vm11405_vm11, %v1831_v43, %v1835_v25  ;;  %v2031_v56 = vrot.slane %v2029_v41, 4  ;;  %v374_v59 = vld [vmem:[#allocation2 + $0x98] sm:$0x1] }
  0x4c   : > { %v489_v57 = vsel %vm11304_vm7, %v481_v31, %v488_v45  ;;  %v613_v58 = vrot.slane %v611_v48, 7  ;;  %v2419_v0 = vunpack.c.l.b16 %v1836_v55  ;;  %v614_v7 = vshll.u32 %v411_v28, 16  ;;  %v303_v14 = vld [vmem:[#allocation2 + $0x3c] sm:$0x1]  ;;  %v397_v36 = vld [vmem:[%s11272_s16 + $0x20] sm:$0xf] }
  0x4d   : > { %v1761_v62 = vld [vmem:[#allocation2 + $0x2c] sm:$0x1]  ;;  %v2018_v1 = vrot.slane %v2016_v50, 4  ;;  %v2021_v2 = vrot.slane %v2019_v51, 5  ;;  %769 = vst [vmem:[#allocation2 + $0x34] sm:$0xf] %v489_v57  ;;  %v2032_v6 = vor.u32 %v2031_v56, %v2027_v52 }
  0x4e   : > { %v1843_v3 = vshll.u32 %v1761_v62, 16  ;;  %v1769_v4 = vld [vmem:[#allocation2 + $0x8c] sm:$0x1]  ;;  %v617_v8 = vrot.slane %v613_v58, 4  ;;  %v619_v12 = vshrl.u32 %v412_v47, 16  ;;  %v622_v13 = vshll.u32 %v412_v47, 16 }
  0x4f   : > { %v2022_v10 = vor.u32 %v2021_v2, %v2018_v1  ;;  %v2035_v11 = vshll.u32 %v1769_v4, 16  ;;  %v2033_v16 = vrot.slane %v2032_v6, 4  ;;  %v616_v18 = vor.u32 %v614_v7, %v613_v58  ;;  %v398_v41 = vld [vmem:[%s11272_s16 + $0x24] sm:$0xf]  ;;  %v327_v46 = vld [vmem:[#allocation2 + $0x9c] sm:$0x1] }
  0x50   : > { %v1845_v15 = vrot.slane %v1843_v3, 5  ;;  %v822_v19 = vld [vmem:[#allocation2 + $0x90] sm:$0xf]  ;;  %v351_v20 = vsel %vm11290_vm6, 0, %v350_v53  ;;  %v621_v23 = vrot.slane %v619_v12, 7  ;;  %v375_v25 = vsel %vm11290_vm6, 0, %v374_v59 }
  0x51   : > { %v2023_v21 = vrot.slane %v2022_v10, 4  ;;  %v2037_v22 = vrot.slane %v2035_v11, 5  ;;  %352 = vst [vmem:[#allocation2 + $0x38] sm:$0x1] %v351_v20  ;;  %v490_v27 = vrot.slane %v11505_v32, 4  ;;  %v823_v28 = vsel %vm11317_vm8, %v616_v18, %v822_v19 }
  0x52   : > { %v1846_v26 = vsel %vm11405_vm11, %v1841_v49, %v1845_v15  ;;  %v1733_v29 = vld [vmem:[#allocation2 + $0x30] sm:$0xf]  ;;  %376 = vst [vmem:[#allocation2 + $0x98] sm:$0x1] %v375_v25  ;;  %v304_v30 = vsel %vm11276_vm2, 0, %v303_v14  ;;  %v624_v34 = vor.u32 %v622_v13, %v621_v23  ;;  %v626_v38 = vrot.slane %v621_v23, 4 }
  0x53   : > { %v2420_v63 = vunpack.c.l.b16 %v1846_v26  ;;  %v2028_v31 = vsel %vm11405_vm11, %v2023_v21, %v2027_v52  ;;  %v2038_v33 = vsel %vm11405_vm11, %v2033_v16, %v2037_v22  ;;  %824 = vst [vmem:[#allocation2 + $0x90] sm:$0xf] %v823_v28  ;;  %v1848_v40 = vshrl.u32 %v1733_v29, 16  ;;  %v413_v57 = vld [vmem:[%s11272_s16 + $0x60] sm:$0xf] }
  0x54   : > { %v2435_v32 = vunpack.c.l.b16 %v2028_v31  ;;  %v2436_v37 = vunpack.c.l.b16 %v2038_v33  ;;  %v1734_v39 = vld [vmem:[#allocation2 + $0x34] sm:$0xf]  ;;  %v625_v43 = vsel %vm11304_vm7, %v617_v8, %v624_v34  ;;  %v1851_v44 = vshll.u32 %v1733_v29, 16  ;;  %305 = vst [vmem:[#allocation2 + $0x3c] sm:$0x1] %v304_v30 }
  0x55   : > { %v2449_v42 = vpack.c.b16 %v2420_v63, %v2419_v0  ;;  %v1857_v45 = vshll.u32 %v1734_v39, 16  ;;  %v10846_v48 = vld [vmem:[#allocation2 + $0x30] sm:$0xff]  ;;  %825 = vst [vmem:[#allocation2 + $0x94] sm:$0xf] %v625_v43  ;;  %v1850_v49 = vrot.slane %v1848_v40, 4  ;;  %v1861_v50 = vshrl.u32 %v1734_v39, 16 }
  0x56   : > { %v2457_v47 = vpack.c.b16 %v2436_v37, %v2435_v32  ;;  %v492_v51 = vshrl.u32 %v397_v36, 16  ;;  %v1853_v52 = vrot.slane %v1851_v44, 5  ;;  %v495_v55 = vshll.u32 %v397_v36, 16  ;;  %v414_v16 = vld [vmem:[%s11272_s16 + $0x64] sm:$0xf]  ;;  %v10878_v43 = vld [vmem:[%s15318_s1 + $0x158] sm:$0xff] }
  0x57   : > { %2843 = vmatmul.bf16.gmra.mxu1 %v2449_v42  ;;  %v11545_v53 = vrot.slane %v1857_v45, 5  ;;  %v500_v56 = vshrl.u32 %v398_v41, 16  ;;  %v1863_v59 = vrot.slane %v1861_v50, 4  ;;  %v503_v61 = vshll.u32 %v398_v41, 16  ;;  %v353_v28 = vld [vmem:[#allocation2 + $0x44] sm:$0x1]  ;;  %2918 = vmatpush.bf16.msrb.mxu2 %v10878_v43 }
  0x58   : > { %v770_v58 = vld [vmem:[#allocation2 + $0x38] sm:$0x1]  ;;  %v494_v60 = vrot.slane %v492_v51, 7  ;;  %v328_v62 = vsel %vm11276_vm2, 0, %v327_v46  ;;  %v1854_v1 = vor.u32 %v1853_v52, %v1850_v49  ;;  %v628_v13 = vshrl.u32 %v413_v57, 16 }
  0x59   : > { %2883 = vmatmul.bf16.gmra.mxu3 %v2457_v47  ;;  %v771_v0 = vsel %vm11276_vm2, %v490_v27, %v770_v58  ;;  %v826_v2 = vld [vmem:[#allocation2 + $0x98] sm:$0x1]  ;;  %v11552_v3 = vrot.slane %v500_v56, 7  ;;  %329 = vst [vmem:[#allocation2 + $0x9c] sm:$0x1] %v328_v62  ;;  %v1864_v4 = vor.u32 %v1863_v59, %v11545_v53  ;;  %v631_v63 = vshll.u32 %v413_v57, 16 }
  0x5a   : > { %772 = vst [vmem:[#allocation2 + $0x38] sm:$0x1] %v771_v0  ;;  %v827_v6 = vsel %vm11276_vm2, %v626_v38, %v826_v2  ;;  %v1749_v7 = vld [vmem:[#allocation2 + $0x90] sm:$0xf]  ;;  %v497_v8 = vor.u32 %v495_v55, %v494_v60  ;;  %v498_v9 = vrot.slane %v494_v60, 4  ;;  %v1855_v14 = vrot.slane %v1854_v1, 4 }
  0x5b   : > { %828 = vst [vmem:[#allocation2 + $0x98] sm:$0x1] %v827_v6  ;;  %v2040_v10 = vshrl.u32 %v1749_v7, 16  ;;  %v2043_v11 = vshll.u32 %v1749_v7, 16  ;;  %v505_v12 = vor.u32 %v503_v61, %v11552_v3  ;;  %2759 = vmatmul.bf16.gmra.mxu0 %v10846_v48  ;;  %v773_v15 = vld [vmem:[#allocation2 + $0x3c] sm:$0xf] }
  0x5c   : > { %v10854_v18 = vld [vmem:[#allocation2 + $0x90] sm:$0xff]  ;;  %v1865_v19 = vrot.slane %v1864_v4, 4  ;;  %v774_v27 = vsel %vm11317_vm8, %v497_v8, %v773_v15  ;;  %v630_v30 = vrot.slane %v628_v13, 7  ;;  %v636_v31 = vshrl.u32 %v414_v16, 16  ;;  %v10822_v48 = vld [vmem:[%s15318_s1 + $0x18] sm:$0xff] }
  0x5d   : > { %v1750_v20 = vld [vmem:[#allocation2 + $0x94] sm:$0xf]  ;;  %v2042_v21 = vrot.slane %v2040_v10, 4  ;;  %v2045_v22 = vrot.slane %v2043_v11, 5  ;;  %v506_v23 = vsel %vm11304_vm7, %v498_v9, %v505_v12  ;;  %2799 = vmatmul.bf16.gmra.mxu2 %v10854_v18  ;;  %775 = vst [vmem:[#allocation2 + $0x3c] sm:$0xf] %v774_v27  ;;  %v1860_v44 = vsel %vm11405_vm11, %v1855_v14, %v11545_v53  ;;  %3151 = vmatpush.bf16.msrb.mxu3 %v10822_v48 }
  0x5e   : > { %v2049_v25 = vshll.u32 %v1750_v20, 16  ;;  %v2053_v26 = vshrl.u32 %v1750_v20, 16  ;;  %776 = vst [vmem:[#allocation2 + $0x40] sm:$0xf] %v506_v23  ;;  %v639_v36 = vshll.u32 %v414_v16, 16  ;;  %v354_v37 = vsel %vm11290_vm6, 0, %v353_v28 }
  0x5f   : > { %v2046_v29 = vor.u32 %v2045_v22, %v2042_v21  ;;  %v633_v40 = vor.u32 %v631_v63, %v630_v30  ;;  %v634_v41 = vrot.slane %v630_v30, 4  ;;  %v11565_v42 = vrot.slane %v636_v31, 7  ;;  %355 = vst [vmem:[#allocation2 + $0x44] sm:$0x1] %v354_v37  ;;  %v377_v52 = vld [vmem:[#allocation2 + $0xa4] sm:$0x1] }
  0x60   : > { %v2051_v33 = vrot.slane %v2049_v25, 5  ;;  %v2055_v34 = vrot.slane %v2053_v26, 4  ;;  %v829_v32 = vld [vmem:[#allocation2 + $0x9c] sm:$0xf]  ;;  %v306_v58 = vld [vmem:[#allocation2 + $0x48] sm:$0x1]  ;;  %v2421_v59 = vunpack.c.l.b16 %v1860_v44 }
  0x61   : > { %v1762_v38 = vld [vmem:[#allocation2 + $0x38] sm:$0x1]  ;;  %v2047_v39 = vrot.slane %v2046_v29, 4  ;;  %v641_v51 = vor.u32 %v639_v36, %v11565_v42  ;;  %v830_v57 = vsel %vm11317_vm8, %v633_v40, %v829_v32  ;;  %v378_v0 = vsel %vm11290_vm6, 0, %v377_v52  ;;  %v399_v1 = vld [vmem:[%s11272_s16 + $0x28] sm:$0xf] }
  0x62   : > { %v1867_v45 = vshll.u32 %v1762_v38, 16  ;;  %v1770_v46 = vld [vmem:[#allocation2 + $0x98] sm:$0x1]  ;;  %v2056_v47 = vor.u32 %v2055_v34, %v2051_v33  ;;  %831 = vst [vmem:[#allocation2 + $0x9c] sm:$0xf] %v830_v57  ;;  %v507_v6 = vrot.slane %v11552_v3, 4 }
  0x63   : > { %v2052_v49 = vsel %vm11405_vm11, %v2047_v39, %v2051_v33  ;;  %v2059_v50 = vshll.u32 %v1770_v46, 16  ;;  %v10830_v53 = vld [vmem:[%s15318_s1 + $0x58] sm:$0xff]  ;;  %v642_v61 = vsel %vm11304_vm7, %v634_v41, %v641_v51  ;;  %379 = vst [vmem:[#allocation2 + $0xa4] sm:$0x1] %v378_v0  ;;  %v11595_v13 = vld [vmem:[%s11272_s16 + $0x2c] sm:$0xf] }
  0x64   : > { %v1869_v55 = vrot.slane %v1867_v45, 5  ;;  %v2057_v56 = vrot.slane %v2056_v47, 4  ;;  %3240 = vmatpush.bf16.msrb.mxu0 %v10830_v53  ;;  %v2437_v4 = vunpack.c.l.b16 %v2052_v49  ;;  %832 = vst [vmem:[#allocation2 + $0xa0] sm:$0xf] %v642_v61  ;;  %v1735_v7 = vld [vmem:[#allocation2 + $0x3c] sm:$0xf] }
  0x65   : > { %v2061_v60 = vrot.slane %v2059_v50, 5  ;;  %v1736_v62 = vld [vmem:[#allocation2 + $0x40] sm:$0xf]  ;;  %v1872_v11 = vshrl.u32 %v1735_v7, 16  ;;  %v1875_v12 = vshll.u32 %v1735_v7, 16  ;;  %v307_v3 = vsel %vm11276_vm2, 0, %v306_v58 }
  0x66   : > { %v1870_v2 = vsel %vm11405_vm11, %v1865_v19, %v1869_v55  ;;  %v1881_v8 = vshll.u32 %v1736_v62, 16  ;;  %v10847_v15 = vld [vmem:[#allocation2 + $0x3c] sm:$0xff]  ;;  %v1885_v18 = vshrl.u32 %v1736_v62, 16  ;;  %v330_v19 = vld [vmem:[#allocation2 + $0xa8] sm:$0x1]  ;;  %v509_v28 = vshrl.u32 %v399_v1, 16 }
  0x67   : > { %v2422_v9 = vunpack.c.l.b16 %v1870_v2  ;;  %v2062_v10 = vsel %vm11405_vm11, %v2057_v56, %v2061_v60  ;;  %v777_v21 = vld [vmem:[#allocation2 + $0x44] sm:$0x1]  ;;  %v1874_v22 = vrot.slane %v1872_v11, 4  ;;  %v1877_v23 = vrot.slane %v1875_v12, 5  ;;  %308 = vst [vmem:[#allocation2 + $0x48] sm:$0x1] %v307_v3 }
  0x68   : > { %v2438_v14 = vunpack.c.l.b16 %v2062_v10  ;;  %v11597_v16 = vrot.slane %v1881_v8, 5  ;;  %v778_v26 = vsel %vm11276_vm2, %v507_v6, %v777_v21  ;;  %v1887_v27 = vrot.slane %v1885_v18, 4  ;;  %v415_v29 = vld [vmem:[%s11272_s16 + $0x68] sm:$0xf]  ;;  %v416_v43 = vld [vmem:[%s11272_s16 + $0x6c] sm:$0xf] }
  0x69   : > { %v2450_v20 = vpack.c.b16 %v2422_v9, %v2421_v59  ;;  %v643_v30 = vrot.slane %v11565_v42, 4  ;;  %779 = vst [vmem:[#allocation2 + $0x44] sm:$0x1] %v778_v26  ;;  %v1878_v63 = vor.u32 %v1877_v23, %v1874_v22  ;;  %v512_v31 = vshll.u32 %v399_v1, 16  ;;  %v1751_v34 = vld [vmem:[#allocation2 + $0x9c] sm:$0xf] }
  0x6a   : > { %v2458_v25 = vpack.c.b16 %v2438_v14, %v2437_v4  ;;  %v1888_v33 = vor.u32 %v1887_v27, %v11597_v16  ;;  %v511_v36 = vrot.slane %v509_v28, 7  ;;  %v517_v32 = vshrl.u32 %v11595_v13, 16  ;;  %v833_v44 = vld [vmem:[#allocation2 + $0xa4] sm:$0x1]  ;;  %v356_v7 = vld [vmem:[#allocation2 + $0x50] sm:$0x1] }
  0x6b   : > { %2848 = vmatmul.bf16.gmra.mxu1 %v2450_v20  ;;  %2764 = vmatmul.bf16.gmra.mxu0 %v10847_v15  ;;  %v331_v37 = vsel %vm11276_vm2, 0, %v330_v19  ;;  %v10855_v38 = vld [vmem:[#allocation2 + $0x9c] sm:$0xff]  ;;  %v2064_v40 = vshrl.u32 %v1751_v34, 16  ;;  %v2067_v41 = vshll.u32 %v1751_v34, 16  ;;  %v645_v42 = vshrl.u32 %v415_v29, 16  ;;  %v10877_v18 = vld [vmem:[%s15318_s1 + $0x150] sm:$0xff] }
  0x6c   : > { %2888 = vmatmul.bf16.gmra.mxu3 %v2458_v25  ;;  %v1752_v39 = vld [vmem:[#allocation2 + $0xa0] sm:$0xf]  ;;  %v514_v47 = vor.u32 %v512_v31, %v511_v36  ;;  %v520_v48 = vshll.u32 %v11595_v13, 16  ;;  %v1879_v49 = vrot.slane %v1878_v63, 4  ;;  %v834_v50 = vsel %vm11276_vm2, %v643_v30, %v833_v44  ;;  %332 = vst [vmem:[#allocation2 + $0xa8] sm:$0x1] %v331_v37  ;;  %2919 = vmatpush.bf16.msrb.mxu2 %v10877_v18 }
  0x6d   : > { %v2073_v45 = vshll.u32 %v1752_v39, 16  ;;  %v2077_v46 = vshrl.u32 %v1752_v39, 16  ;;  %2804 = vmatmul.bf16.gmra.mxu2 %v10855_v38  ;;  %v2066_v51 = vrot.slane %v2064_v40, 4  ;;  %v2069_v52 = vrot.slane %v2067_v41, 5  ;;  %835 = vst [vmem:[#allocation2 + $0xa4] sm:$0x1] %v834_v50 }
  0x6e   : > { %v1889_v53 = vrot.slane %v1888_v33, 4  ;;  %v515_v57 = vrot.slane %v511_v36, 4  ;;  %v11613_v59 = vrot.slane %v517_v32, 7  ;;  %v780_v60 = vld [vmem:[#allocation2 + $0x48] sm:$0xf]  ;;  %v647_v61 = vrot.slane %v645_v42, 7 }
  0x6f   : > { %v2075_v55 = vrot.slane %v2073_v45, 5  ;;  %v2079_v56 = vrot.slane %v2077_v46, 4  ;;  %v2070_v58 = vor.u32 %v2069_v52, %v2066_v51  ;;  %v648_v62 = vshll.u32 %v415_v29, 16  ;;  %v380_v12 = vld [vmem:[#allocation2 + $0xb0] sm:$0x1] }
  0x70   : > { %v1763_v0 = vld [vmem:[#allocation2 + $0x44] sm:$0x1]  ;;  %v781_v2 = vsel %vm11317_vm8, %v514_v47, %v780_v60  ;;  %v653_v4 = vshrl.u32 %v416_v43, 16  ;;  %v656_v6 = vshll.u32 %v416_v43, 16  ;;  %v1884_v8 = vsel %vm11405_vm11, %v1879_v49, %v11597_v16  ;;  %v10821_v3 = vld [vmem:[%s15318_s1 + $0x10] sm:$0xff] }
  0x71   : > { %v2080_v1 = vor.u32 %v2079_v56, %v2075_v55  ;;  %v1891_v9 = vshll.u32 %v1763_v0, 16  ;;  %v2071_v10 = vrot.slane %v2070_v58, 4  ;;  %v522_v11 = vor.u32 %v520_v48, %v11613_v59  ;;  %782 = vst [vmem:[#allocation2 + $0x48] sm:$0xf] %v781_v2  ;;  %v10829_v16 = vld [vmem:[%s15318_s1 + $0x50] sm:$0xff]  ;;  %3152 = vmatpush.bf16.msrb.mxu3 %v10821_v3 }
  0x72   : > { %v650_v13 = vor.u32 %v648_v62, %v647_v61  ;;  %v651_v14 = vrot.slane %v647_v61, 4  ;;  %v11621_v15 = vrot.slane %v653_v4, 7  ;;  %v357_v21 = vsel %vm11290_vm6, 0, %v356_v7  ;;  %v309_v22 = vld [vmem:[#allocation2 + $0x54] sm:$0x1]  ;;  %3241 = vmatpush.bf16.msrb.mxu0 %v10829_v16 }
  0x73   : > { %v1893_v19 = vrot.slane %v1891_v9, 5  ;;  %v523_v20 = vsel %vm11304_vm7, %v515_v57, %v522_v11  ;;  %v401_v23 = vld [vmem:[%s11272_s16 + $0x30] sm:$0xf]  ;;  %v2423_v25 = vunpack.c.l.b16 %v1884_v8  ;;  %v2076_v26 = vsel %vm11405_vm11, %v2071_v10, %v2075_v55  ;;  %v836_v29 = vld [vmem:[#allocation2 + $0xa8] sm:$0xf] }
  0x74   : > { %v2081_v27 = vrot.slane %v2080_v1, 4  ;;  %783 = vst [vmem:[#allocation2 + $0x4c] sm:$0xf] %v523_v20  ;;  %v658_v28 = vor.u32 %v656_v6, %v11621_v15  ;;  %v1771_v63 = vld [vmem:[#allocation2 + $0xa4] sm:$0x1]  ;;  %v837_v31 = vsel %vm11317_vm8, %v650_v13, %v836_v29  ;;  %v381_v33 = vsel %vm11290_vm6, 0, %v380_v12 }
  0x75   : > { %v1894_v30 = vsel %vm11405_vm11, %v1889_v53, %v1893_v19  ;;  %358 = vst [vmem:[#allocation2 + $0x50] sm:$0x1] %v357_v21  ;;  %v526_v34 = vshrl.u32 %v401_v23, 16  ;;  %v2083_v32 = vshll.u32 %v1771_v63, 16  ;;  %v310_v38 = vsel %vm11276_vm2, 0, %v309_v22 }
  0x76   : > { %v2424_v36 = vunpack.c.l.b16 %v1894_v30  ;;  %v659_v37 = vsel %vm11304_vm7, %v651_v14, %v658_v28  ;;  %838 = vst [vmem:[#allocation2 + $0xa8] sm:$0xf] %v837_v31  ;;  %v402_v39 = vld [vmem:[%s11272_s16 + $0x34] sm:$0xf]  ;;  %v529_v41 = vshll.u32 %v401_v23, 16  ;;  %v2439_v47 = vunpack.c.l.b16 %v2076_v26 }
  0x77   : > { %839 = vst [vmem:[#allocation2 + $0xac] sm:$0xf] %v659_v37  ;;  %v528_v40 = vrot.slane %v526_v34, 7  ;;  %v534_v43 = vshrl.u32 %v402_v39, 16  ;;  %v2085_v44 = vrot.slane %v2083_v32, 5  ;;  %v537_v46 = vshll.u32 %v402_v39, 16 }
  0x78   : > { %v2451_v42 = vpack.c.b16 %v2424_v36, %v2423_v25  ;;  %v1737_v45 = vld [vmem:[#allocation2 + $0x48] sm:$0xf]  ;;  %382 = vst [vmem:[#allocation2 + $0xb0] sm:$0x1] %v381_v33  ;;  %v524_v48 = vrot.slane %v11613_v59, 4  ;;  %v660_v52 = vrot.slane %v11621_v15, 4 }
  0x79   : > { %v1896_v49 = vshrl.u32 %v1737_v45, 16  ;;  %v1899_v50 = vshll.u32 %v1737_v45, 16  ;;  %311 = vst [vmem:[#allocation2 + $0x54] sm:$0x1] %v310_v38  ;;  %v2086_v51 = vsel %vm11405_vm11, %v2081_v27, %v2085_v44  ;;  %v532_v53 = vrot.slane %v528_v40, 4  ;;  %v10876_v36 = vld [vmem:[%s15318_s1 + $0x148] sm:$0xff] }
  0x7a   : > { %v11655_v55 = vrot.slane %v534_v43, 7  ;;  %v333_v56 = vld [vmem:[#allocation2 + $0xb4] sm:$0x1]  ;;  %v2440_v57 = vunpack.c.l.b16 %v2086_v51  ;;  %v531_v4 = vor.u32 %v529_v41, %v528_v40  ;;  %v417_v11 = vld [vmem:[%s11272_s16 + $0x70] sm:$0xf]  ;;  %v10820_v41 = vld [vmem:[%s15318_s1 + $0x8] sm:$0xff]  ;;  %2920 = vmatpush.bf16.msrb.mxu2 %v10876_v36 }
  0x7b   : > { %2853 = vmatmul.bf16.gmra.mxu1 %v2451_v42  ;;  %v10848_v58 = vld [vmem:[#allocation2 + $0x48] sm:$0xff]  ;;  %v1898_v61 = vrot.slane %v1896_v49, 4  ;;  %v1901_v62 = vrot.slane %v1899_v50, 5  ;;  %v334_v59 = vsel %vm11276_vm2, 0, %v333_v56  ;;  %v418_v3 = vld [vmem:[%s11272_s16 + $0x74] sm:$0xf]  ;;  %3153 = vmatpush.bf16.msrb.mxu3 %v10820_v41 }
  0x7c   : > { %v1738_v60 = vld [vmem:[#allocation2 + $0x4c] sm:$0xf]  ;;  %v784_v0 = vld [vmem:[#allocation2 + $0x50] sm:$0x1]  ;;  %v539_v6 = vor.u32 %v537_v46, %v11655_v55  ;;  %v2459_v7 = vpack.c.b16 %v2440_v57, %v2439_v47  ;;  %2769 = vmatmul.bf16.gmra.mxu0 %v10848_v58  ;;  %335 = vst [vmem:[#allocation2 + $0xb4] sm:$0x1] %v334_v59 }
  0x7d   : > { %v1905_v1 = vshll.u32 %v1738_v60, 16  ;;  %v1909_v2 = vshrl.u32 %v1738_v60, 16  ;;  %v785_v8 = vsel %vm11276_vm2, %v524_v48, %v784_v0  ;;  %v1902_v9 = vor.u32 %v1901_v62, %v1898_v61  ;;  %v1753_v10 = vld [vmem:[#allocation2 + $0xa8] sm:$0xf]  ;;  %v359_v63 = vld [vmem:[#allocation2 + $0x5c] sm:$0x1] }
  0x7e   : > { %v10856_v12 = vld [vmem:[#allocation2 + $0xa8] sm:$0xff]  ;;  %786 = vst [vmem:[#allocation2 + $0x50] sm:$0x1] %v785_v8  ;;  %v2088_v15 = vshrl.u32 %v1753_v10, 16  ;;  %v540_v18 = vsel %vm11304_vm7, %v532_v53, %v539_v6  ;;  %2893 = vmatmul.bf16.gmra.mxu3 %v2459_v7  ;;  %v2091_v21 = vshll.u32 %v1753_v10, 16  ;;  %v662_v34 = vshrl.u32 %v417_v11, 16 }
  0x7f   : > { %v11663_v13 = vrot.slane %v1905_v1, 5  ;;  %v1911_v14 = vrot.slane %v1909_v2, 4  ;;  %v1903_v16 = vrot.slane %v1902_v9, 4  ;;  %v840_v19 = vld [vmem:[#allocation2 + $0xb0] sm:$0x1]  ;;  %2809 = vmatmul.bf16.gmra.mxu2 %v10856_v12  ;;  %v665_v38 = vshll.u32 %v417_v11, 16 }
  0x80   : > { %v1754_v20 = vld [vmem:[#allocation2 + $0xac] sm:$0xf]  ;;  %v841_v23 = vsel %vm11276_vm2, %v660_v52, %v840_v19  ;;  %v2090_v25 = vrot.slane %v2088_v15, 4  ;;  %v787_v27 = vld [vmem:[#allocation2 + $0x54] sm:$0xf]  ;;  %v2093_v28 = vrot.slane %v2091_v21, 5 }
  0x81   : > { %v1912_v22 = vor.u32 %v1911_v14, %v11663_v13  ;;  %v2097_v26 = vshll.u32 %v1754_v20, 16  ;;  %790 = vst [vmem:[#allocation2 + $0x58] sm:$0xf] %v540_v18  ;;  %v2101_v29 = vshrl.u32 %v1754_v20, 16  ;;  %v788_v30 = vsel %vm11317_vm8, %v531_v4, %v787_v27  ;;  %v383_v40 = vld [vmem:[#allocation2 + $0xbc] sm:$0x1] }
  0x82   : > { %842 = vst [vmem:[#allocation2 + $0xb0] sm:$0x1] %v841_v23  ;;  %v2094_v32 = vor.u32 %v2093_v28, %v2090_v25  ;;  %v670_v39 = vshrl.u32 %v418_v3, 16  ;;  %v664_v43 = vrot.slane %v662_v34, 7  ;;  %v673_v42 = vshll.u32 %v418_v3, 16  ;;  %v10828_v57 = vld [vmem:[%s15318_s1 + $0x48] sm:$0xff] }
  0x83   : > { %v1913_v31 = vrot.slane %v1912_v22, 4  ;;  %v2099_v33 = vrot.slane %v2097_v26, 5  ;;  %789 = vst [vmem:[#allocation2 + $0x54] sm:$0xf] %v788_v30  ;;  %v2103_v37 = vrot.slane %v2101_v29, 4  ;;  %v360_v45 = vsel %vm11290_vm6, 0, %v359_v63  ;;  %3242 = vmatpush.bf16.msrb.mxu0 %v10828_v57 }
  0x84   : > { %v843_v44 = vld [vmem:[#allocation2 + $0xb4] sm:$0xf]  ;;  %v384_v46 = vsel %vm11290_vm6, 0, %v383_v40  ;;  %v2095_v48 = vrot.slane %v2094_v32, 4  ;;  %v672_v50 = vrot.slane %v670_v39, 7  ;;  %v1908_v51 = vsel %vm11405_vm11, %v1903_v16, %v11663_v13  ;;  %v10842_v58 = vld [vmem:[%s15318_s1 + $0xb8] sm:$0xff] }
  0x85   : > { %v1764_v47 = vld [vmem:[#allocation2 + $0x50] sm:$0x1]  ;;  %v2104_v49 = vor.u32 %v2103_v37, %v2099_v33  ;;  %361 = vst [vmem:[#allocation2 + $0x5c] sm:$0x1] %v360_v45  ;;  %v667_v53 = vor.u32 %v665_v38, %v664_v43  ;;  %v668_v56 = vrot.slane %v664_v43, 4  ;;  %v541_v61 = vrot.slane %v11655_v55, 4  ;;  %3325 = vmatpush.bf16.msrb.mxu1 %v10842_v58 }
  0x86   : > { %v1915_v52 = vshll.u32 %v1764_v47, 16  ;;  %385 = vst [vmem:[#allocation2 + $0xbc] sm:$0x1] %v384_v46  ;;  %v675_v62 = vor.u32 %v673_v42, %v672_v50  ;;  %v677_v59 = vrot.slane %v672_v50, 4  ;;  %v312_v7 = vld [vmem:[#allocation2 + $0x60] sm:$0x1]  ;;  %v2425_v8 = vunpack.c.l.b16 %v1908_v51 }
  0x87   : > { %v2105_v60 = vrot.slane %v2104_v49, 4  ;;  %v844_v4 = vsel %vm11317_vm8, %v667_v53, %v843_v44  ;;  %v2100_v9 = vsel %vm11405_vm11, %v2095_v48, %v2099_v33  ;;  %v403_v13 = vld [vmem:[%s11272_s16 + $0x38] sm:$0xf]  ;;  %v313_v21 = vsel %vm11276_vm2, 0, %v312_v7  ;;  %v11705_v22 = vld [vmem:[%s11272_s16 + $0x3c] sm:$0xf] }
  0x88   : > { %v1740_v0 = vld [vmem:[#allocation2 + $0x58] sm:$0xf]  ;;  %v1917_v1 = vrot.slane %v1915_v52, 5  ;;  %v676_v11 = vsel %vm11304_vm7, %v668_v56, %v675_v62  ;;  %845 = vst [vmem:[#allocation2 + $0xb4] sm:$0xf] %v844_v4  ;;  %v2441_v23 = vunpack.c.l.b16 %v2100_v9  ;;  %v543_v37 = vshrl.u32 %v403_v13, 16 }
  0x89   : > { %v1772_v2 = vld [vmem:[#allocation2 + $0xb0] sm:$0x1]  ;;  %v1929_v6 = vshll.u32 %v1740_v0, 16  ;;  %846 = vst [vmem:[#allocation2 + $0xb8] sm:$0xf] %v676_v11  ;;  %v1933_v20 = vshrl.u32 %v1740_v0, 16 }
  0x8a   : > { %v2107_v10 = vshll.u32 %v1772_v2, 16  ;;  %v10849_v55 = vld [vmem:[#allocation2 + $0x54] sm:$0xff]  ;;  %v1918_v14 = vsel %vm11405_vm11, %v1913_v31, %v1917_v1  ;;  %314 = vst [vmem:[#allocation2 + $0x60] sm:$0x1] %v313_v21  ;;  %v336_v33 = vld [vmem:[#allocation2 + $0xc0] sm:$0x1] }
  0x8b   : > { %v1739_v12 = vld [vmem:[#allocation2 + $0x54] sm:$0xf]  ;;  %v1931_v3 = vrot.slane %v1929_v6, 5  ;;  %v2426_v16 = vunpack.c.l.b16 %v1918_v14  ;;  %v1935_v63 = vrot.slane %v1933_v20, 4  ;;  %v546_v39 = vshll.u32 %v403_v13, 16 }
  0x8c   : > { %v1920_v15 = vshrl.u32 %v1739_v12, 16  ;;  %v1923_v18 = vshll.u32 %v1739_v12, 16  ;;  %v2109_v19 = vrot.slane %v2107_v10, 5  ;;  %v791_v25 = vld [vmem:[#allocation2 + $0x5c] sm:$0x1]  ;;  %2774 = vmatmul.bf16.gmra.mxu0 %v10849_v55  ;;  %v551_v40 = vshrl.u32 %v11705_v22, 16 }
  0x8d   : > { %v2452_v28 = vpack.c.b16 %v2426_v16, %v2425_v8  ;;  %v792_v30 = vsel %vm11276_vm2, %v541_v61, %v791_v25  ;;  %v847_v31 = vld [vmem:[#allocation2 + $0xbc] sm:$0x1]  ;;  %v1936_v38 = vor.u32 %v1935_v63, %v1931_v3  ;;  %v545_v44 = vrot.slane %v543_v37, 7  ;;  %v419_v57 = vld [vmem:[%s11272_s16 + $0x78] sm:$0xf]  ;;  %v10841_v7 = vld [vmem:[%s15318_s1 + $0xb0] sm:$0xff] }
  0x8e   : > { %v1922_v26 = vrot.slane %v1920_v15, 4  ;;  %v1925_v27 = vrot.slane %v1923_v18, 5  ;;  %v2110_v29 = vsel %vm11405_vm11, %v2105_v60, %v2109_v19  ;;  %793 = vst [vmem:[#allocation2 + $0x5c] sm:$0x1] %v792_v30  ;;  %v848_v32 = vsel %vm11276_vm2, %v677_v59, %v847_v31  ;;  %v420_v6 = vld [vmem:[%s11272_s16 + $0x7c] sm:$0xf]  ;;  %3326 = vmatpush.bf16.msrb.mxu1 %v10841_v7 }
  0x8f   : > { %v2442_v34 = vunpack.c.l.b16 %v2110_v29  ;;  %2858 = vmatmul.bf16.gmra.mxu1 %v2452_v28  ;;  %849 = vst [vmem:[#allocation2 + $0xbc] sm:$0x1] %v848_v32  ;;  %v1755_v42 = vld [vmem:[#allocation2 + $0xb4] sm:$0xf]  ;;  %v337_v45 = vsel %vm11276_vm2, 0, %v336_v33  ;;  %v554_v50 = vshll.u32 %v11705_v22, 16  ;;  %v548_v56 = vor.u32 %v546_v39, %v545_v44 }
  0x90   : > { %v1926_v36 = vor.u32 %v1925_v27, %v1922_v26  ;;  %v10857_v46 = vld [vmem:[#allocation2 + $0xb4] sm:$0xff]  ;;  %v2112_v48 = vshrl.u32 %v1755_v42, 16  ;;  %v2115_v49 = vshll.u32 %v1755_v42, 16  ;;  %338 = vst [vmem:[#allocation2 + $0xc0] sm:$0x1] %v337_v45  ;;  %v1937_v58 = vrot.slane %v1936_v38, 4 }
  0x91   : > { %v2460_v41 = vpack.c.b16 %v2442_v34, %v2441_v23  ;;  %v1756_v47 = vld [vmem:[#allocation2 + $0xb8] sm:$0xf]  ;;  %2814 = vmatmul.bf16.gmra.mxu2 %v10857_v46  ;;  %v549_v62 = vrot.slane %v545_v44, 4  ;;  %v794_v59 = vld [vmem:[#allocation2 + $0x60] sm:$0xf]  ;;  %v11720_v2 = vrot.slane %v551_v40, 7 }
  0x92   : > { %v1927_v43 = vrot.slane %v1926_v36, 4  ;;  %v2121_v52 = vshll.u32 %v1756_v47, 16  ;;  %v2125_v53 = vshrl.u32 %v1756_v47, 16  ;;  %v2114_v60 = vrot.slane %v2112_v48, 4  ;;  %v362_v12 = vld [vmem:[#allocation2 + $0x68] sm:$0x1] }
  0x93   : > { %2898 = vmatmul.bf16.gmra.mxu3 %v2460_v41  ;;  %v2117_v61 = vrot.slane %v2115_v49, 5  ;;  %v795_v4 = vsel %vm11317_vm8, %v548_v56, %v794_v59  ;;  %v679_v55 = vshrl.u32 %v419_v57, 16  ;;  %v682_v11 = vshll.u32 %v419_v57, 16  ;;  %v386_v16 = vld [vmem:[#allocation2 + $0xc8] sm:$0x1]  ;;  %v10875_v23 = vld [vmem:[%s15318_s1 + $0x140] sm:$0xff] }
  0x94   : > { %v1932_v51 = vsel %vm11405_vm11, %v1927_v43, %v1931_v3  ;;  %v2123_v0 = vrot.slane %v2121_v52, 5  ;;  %v2127_v1 = vrot.slane %v2125_v53, 4  ;;  %796 = vst [vmem:[#allocation2 + $0x60] sm:$0xf] %v795_v4  ;;  %v556_v18 = vor.u32 %v554_v50, %v11720_v2  ;;  %v10819_v25 = vld [vmem:[%s15318_s1] sm:$0xff]  ;;  %v10840_v30 = vld [vmem:[%s15318_s1 + $0xa8] sm:$0xff]  ;;  %2921 = vmatpush.bf16.msrb.mxu2 %v10875_v23 }
  0x95   : > { %v11728_v8 = vld [vmem:[#allocation2 + $0x5c] sm:$0x1]  ;;  %v2427_v9 = vunpack.c.l.b16 %v1932_v51  ;;  %v2118_v10 = vor.u32 %v2117_v61, %v2114_v60  ;;  %v558_v3 = vrot.slane %v11720_v2, 4  ;;  %v681_v21 = vrot.slane %v679_v55, 7  ;;  %v10827_v63 = vld [vmem:[%s15318_s1 + $0x40] sm:$0xff]  ;;  %3154 = vmatpush.bf16.msrb.mxu3 %v10819_v25  ;;  %3327 = vmatpush.bf16.msrb.mxu1 %v10840_v30 }
  0x96   : > { %v1939_v13 = vshll.u32 %v11728_v8, 16  ;;  %v1773_v14 = vld [vmem:[#allocation2 + $0xbc] sm:$0x1]  ;;  %v2128_v15 = vor.u32 %v2127_v1, %v2123_v0  ;;  %v687_v22 = vshrl.u32 %v420_v6, 16  ;;  %v557_v28 = vsel %vm11304_vm7, %v549_v62, %v556_v18  ;;  %3243 = vmatpush.bf16.msrb.mxu0 %v10827_v63  ;;  %v10839_v41 = vld [vmem:[%s15318_s1 + $0xa0] sm:$0xff] }
  0x97   : > { %v2119_v19 = vrot.slane %v2118_v10, 4  ;;  %v2131_v20 = vshll.u32 %v1773_v14, 16  ;;  %v690_v29 = vshll.u32 %v420_v6, 16  ;;  %797 = vst [vmem:[#allocation2 + $0x64] sm:$0xf] %v557_v28  ;;  %v684_v34 = vor.u32 %v682_v11, %v681_v21  ;;  %v10838_v56 = vld [vmem:[%s15318_s1 + $0x98] sm:$0xff] }
  0x98   : > { %v1941_v26 = vrot.slane %v1939_v13, 5  ;;  %v2129_v27 = vrot.slane %v2128_v15, 4  ;;  %v685_v36 = vrot.slane %v681_v21, 4  ;;  %v850_v32 = vld [vmem:[#allocation2 + $0xc0] sm:$0xf]  ;;  %v689_v39 = vrot.slane %v687_v22, 7 }
  0x99   : > { %v2124_v31 = vsel %vm11405_vm11, %v2119_v19, %v2123_v0  ;;  %v2133_v33 = vrot.slane %v2131_v20, 5  ;;  %v363_v40 = vsel %vm11290_vm6, 0, %v362_v12  ;;  %v851_v44 = vsel %vm11317_vm8, %v684_v34, %v850_v32  ;;  %v2159_v49 = vld [vmem:[#allocation2 + $0xc] sm:$0xe]  ;;  %3328 = vmatpush.bf16.msrb.mxu1 %v10839_v41  ;;  %v11151_v60 = vld [vmem:[#allocation2 + $0x10] sm:$0xf] }
  0x9a   : > { %v1942_v37 = vsel %vm11405_vm11, %v1937_v58, %v1941_v26  ;;  %v2443_v38 = vunpack.c.l.b16 %v2124_v31  ;;  %364 = vst [vmem:[#allocation2 + $0x68] sm:$0x1] %v363_v40  ;;  %v387_v45 = vsel %vm11290_vm6, 0, %v386_v16  ;;  %v692_v47 = vor.u32 %v690_v29, %v689_v39  ;;  %v11152_v11 = vld [vmem:[#allocation2 + $0x14] sm:$0x1] }
  0x9b   : > { %v2428_v43 = vunpack.c.l.b16 %v1942_v37  ;;  %v2134_v42 = vsel %vm11405_vm11, %v2129_v27, %v2133_v33  ;;  %852 = vst [vmem:[#allocation2 + $0xc0] sm:$0xf] %v851_v44  ;;  %v1741_v48 = vld [vmem:[#allocation2 + $0x60] sm:$0xf]  ;;  %v694_v51 = vrot.slane %v689_v39, 4  ;;  %vm1356_vm12 = vcmask 1042432  }
  0x9c   : > { %v2444_v46 = vunpack.c.l.b16 %v2134_v42  ;;  %v1944_v52 = vshrl.u32 %v1741_v48, 16  ;;  %v1947_v53 = vshll.u32 %v1741_v48, 16  ;;  %388 = vst [vmem:[#allocation2 + $0xc8] sm:$0x1] %v387_v45  ;;  %v693_v58 = vsel %vm11304_vm7, %v685_v36, %v692_v47 }
  0x9d   : > { %v2453_v50 = vpack.c.b16 %v2428_v43, %v2427_v9  ;;  %v2225_v61 = vrot.slane %v11151_v60, 5  ;;  %853 = vst [vmem:[#allocation2 + $0xc4] sm:$0xf] %v693_v58  ;;  %vm1357_vm13 = vcmask 1046532   ;;  %v9631_v4 = vrot.slane %v2159_v49, 9  ;;  %3329 = vmatpush.bf16.msrb.mxu1 %v10838_v56  ;;  %v10906_v60 = vld [vmem:[%s15318_s1 + $0x1b8] sm:$0xff] }
  0x9e   : > { %v2461_v57 = vpack.c.b16 %v2444_v46, %v2443_v38  ;;  %v1946_v62 = vrot.slane %v1944_v52, 4  ;;  %v1949_v59 = vrot.slane %v1947_v53, 5  ;;  %v10850_v0 = vld [vmem:[#allocation2 + $0x60] sm:$0xff]  ;;  %v11202_v6 = vmov 0   ;;  %vm11782_vm14 = vmor %vm1356_vm12, %vm1357_vm13  ;;  %4424 = vmatpush.bf16.msra.mxu2 %v10906_v60 }
  0x9f   : > { %2863 = vmatmul.bf16.gmra.mxu1 %v2453_v50  ;;  %v11767_v1 = vld [vmem:[#allocation2 + $0x64] sm:$0xf]  ;;  %280 = vst [vmem:[#allocation2] sm:$0xf] %v11202_v6  ;;  %2779 = vmatmul.bf16.gmra.mxu0 %v10850_v0  ;;  %v2227_v55 = vrot.slane %v2225_v61, 4  ;;  %v2228_v12 = vrot.slane %v11152_v11, 5  ;;  %v11794_v27 = vsel %vm11782_vm14, %v9631_v4, %v2225_v61 }
  0xa0   : > { %v1953_v7 = vshll.u32 %v11767_v1, 16  ;;  %v1957_v9 = vshrl.u32 %v11767_v1, 16  ;;  %281 = vst [vmem:[#allocation2 + $0x4] sm:$0xf] %v11202_v6  ;;  %v1950_v14 = vor.u32 %v1949_v59, %v1946_v62  ;;  %v2479_v0 = vunpack.c.l.b16 %v11794_v27 }
  0xa1   : > { %v798_v10 = vld [vmem:[#allocation2 + $0x68] sm:$0x1]  ;;  %282 = vst [vmem:[#allocation2 + $0x8] sm:$0x1] %v11202_v6  ;;  %v11799_v36 = vsel %vm11782_vm14, %v2227_v55, %v2228_v12 }
  0xa2   : > { %v799_v13 = vsel %vm11276_vm2, %v558_v3, %v798_v10  ;;  %v11778_v15 = vrot.slane %v1953_v7, 5  ;;  %v1959_v18 = vrot.slane %v1957_v9, 4  ;;  %v1757_v16 = vld [vmem:[#allocation2 + $0xc0] sm:$0xf]  ;;  %284 = vst [vmem:[#allocation2 + $0xcc] sm:$0xf] %v11202_v6 }
  0xa3   : > { %2903 = vmatmul.bf16.gmra.mxu3 %v2461_v57  ;;  %800 = vst [vmem:[#allocation2 + $0x68] sm:$0x1] %v799_v13  ;;  %v854_v20 = vld [vmem:[#allocation2 + $0xc8] sm:$0x1]  ;;  %v2136_v21 = vshrl.u32 %v1757_v16, 16  ;;  %v2139_v22 = vshll.u32 %v1757_v16, 16 }
  0xa4   : > { %v855_v2 = vsel %vm11276_vm2, %v694_v51, %v854_v20  ;;  %v10837_v3 = vld [vmem:[%s15318_s1 + $0x90] sm:$0xff]  ;;  %v10858_v23 = vld [vmem:[#allocation2 + $0xc0] sm:$0xff]  ;;  %v1951_v28 = vrot.slane %v1950_v14, 4  ;;  %v1960_v34 = vor.u32 %v1959_v18, %v11778_v15  ;;  %285 = vst [vmem:[#allocation2 + $0xd0] sm:$0xf] %v11202_v6  ;;  %v10914_v7 = vld [vmem:[%s15318_s1 + $0x1f8] sm:$0xff] }
  0xa5   : > { %856 = vst [vmem:[#allocation2 + $0xc8] sm:$0x1] %v855_v2  ;;  %v1758_v25 = vld [vmem:[#allocation2 + $0xc4] sm:$0xf]  ;;  %v2138_v26 = vrot.slane %v2136_v21, 4  ;;  %v2141_v29 = vrot.slane %v2139_v22, 5  ;;  %3330 = vmatpush.bf16.msrb.mxu1 %v10837_v3  ;;  %2819 = vmatmul.bf16.gmra.mxu2 %v10858_v23 }
  0xa6   : > { %v2145_v30 = vshll.u32 %v1758_v25, 16  ;;  %v2149_v63 = vshrl.u32 %v1758_v25, 16  ;;  %v857_v33 = vld [vmem:[#allocation2] sm:$0xf]  ;;  %286 = vst [vmem:[#allocation2 + $0xd4] sm:$0x1] %v11202_v6  ;;  %v1956_v49 = vsel %vm11405_vm11, %v1951_v28, %v11778_v15  ;;  %v2480_v15 = vunpack.c.l.b16 %v11799_v36  ;;  %4513 = vmatpush.bf16.msra.mxu3 %v10914_v7 }
  0xa7   : > { %v11801_v32 = vld [vmem:[#allocation2 + $0x4] sm:$0xf]  ;;  %v909_v37 = vshrl.u32 %v857_v33, 16  ;;  %v912_v38 = vshll.u32 %v857_v33, 16  ;;  %v2142_v39 = vor.u32 %v2141_v29, %v2138_v26  ;;  %4827 = vst [vmem:[#allocation3] sm:$0xf] %v11202_v6  ;;  %v2429_v14 = vunpack.c.l.b16 %v1956_v49 }
  0xa8   : > { %v2745_v31 = vpop.f32.mrf.mxu0  ;;  %v2147_v40 = vrot.slane %v2145_v30, 5  ;;  %v2151_v41 = vrot.slane %v2149_v63, 4  ;;  %v11804_v43 = vld [vmem:[#allocation2 + $0x8] sm:$0x1]  ;;  %v918_v42 = vshll.u32 %v11801_v32, 16  ;;  %v922_v46 = vshrl.u32 %v11801_v32, 16 }
  0xa9   : > { %v911_v44 = vrot.slane %v909_v37, 4  ;;  %v914_v45 = vrot.slane %v912_v38, 5  ;;  %v928_v47 = vshll.u32 %v11804_v43, 16  ;;  %v2143_v50 = vrot.slane %v2142_v39, 4  ;;  %4828 = vst [vmem:[#allocation3 + $0x4] sm:$0xf] %v11202_v6 }
  0xaa   : > { %v11810_v48 = vld [vmem:[#allocation2 + $0x68] sm:$0x1]  ;;  %v2152_v51 = vor.u32 %v2151_v41, %v2147_v40  ;;  %v920_v52 = vrot.slane %v918_v42, 5  ;;  %v1961_v53 = vrot.slane %v1960_v34, 4  ;;  %v924_v58 = vrot.slane %v922_v46, 4  ;;  %v10922_v21 = vld [vmem:[%s15318_s1 + $0x238] sm:$0xff] }
  0xab   : > { %v1963_v56 = vshll.u32 %v11810_v48, 16  ;;  %v915_v57 = vor.u32 %v914_v45, %v911_v44  ;;  %v2148_v62 = vsel %vm11405_vm11, %v2143_v50, %v2147_v40  ;;  %v930_v4 = vrot.slane %v928_v47, 5  ;;  %4829 = vst [vmem:[#allocation3 + $0x8] sm:$0x1] %v11202_v6  ;;  %v10836_v13 = vld [vmem:[%s15318_s1 + $0x88] sm:$0xff]  ;;  %v10835_v25 = vld [vmem:[%s15318_s1 + $0x80] sm:$0xff]  ;;  %4602 = vmatpush.bf16.msra.mxu0 %v10922_v21 }
  0xac   : > { %v1774_v61 = vld [vmem:[#allocation2 + $0xc8] sm:$0x1]  ;;  %v2153_v55 = vrot.slane %v2152_v51, 4  ;;  %4831 = vst [vmem:[#allocation3 + $0xcc] sm:$0xf] %v11202_v6  ;;  %v925_v16 = vor.u32 %v924_v58, %v920_v52  ;;  %v2445_v23 = vunpack.c.l.b16 %v2148_v62  ;;  %3331 = vmatpush.bf16.msrb.mxu1 %v10836_v13  ;;  %v1361_v26 = vrot.slane %v11801_v32, 5 }
  0xad   : > { %v1965_v10 = vrot.slane %v1963_v56, 5  ;;  %v2155_v11 = vshll.u32 %v1774_v61, 16  ;;  %v916_v18 = vrot.slane %v915_v57, 4  ;;  %4832 = vst [vmem:[#allocation3 + $0xd0] sm:$0xf] %v11202_v6  ;;  %v2511_v38 = vpack.c.b16 %v2480_v15, %v2479_v0 }
  0xae   : > { %v2785_v9 = vpop.f32.mrf.mxu2  ;;  %v1292_v22 = vld [vmem:[#allocation2] sm:$0xe]  ;;  %4833 = vst [vmem:[#allocation3 + $0xd4] sm:$0x1] %v11202_v6  ;;  %v926_v29 = vrot.slane %v925_v16, 4  ;;  %v1363_v33 = vrot.slane %v1361_v26, 4 }
  0xaf   : > { %v2834_v59 = vpop.f32.mrf.mxu1  ;;  %v1966_v2 = vsel %vm11405_vm11, %v1961_v53, %v1965_v10  ;;  %v2157_v3 = vrot.slane %v2155_v11, 5  ;;  %v921_v28 = vsel %vm11405_vm11, %v916_v18, %v920_v52  ;;  %v9551_v30 = vrot.slane %v1292_v22, 9  ;;  %v859_v34 = vld [vmem:[#allocation2 + $0xc] sm:$0xf]  ;;  %v2160_v40 = vld [vmem:[#allocation2 + $0x18] sm:$0xe] }
  0xb0   : > { %v11828_v12 = vadd.f32 %v2834_v59, %v2745_v31  ;;  %v11836_v20 = vpop.f32.mrf.mxu0  ;;  %v2430_v27 = vunpack.c.l.b16 %v1966_v2  ;;  %v1551_v31 = vunpack.c.l.b16 %v921_v28  ;;  %v1364_v6 = vrot.slane %v11804_v43, 5  ;;  %3332 = vmatpush.bf16.msrb.mxu1 %v10835_v25  ;;  %v11153_v41 = vld [vmem:[#allocation2 + $0x1c] sm:$0xf]  ;;  %v11855_v46 = vld [vmem:[#allocation2 + $0x10] sm:$0xf] }
  0xb1   : > { %v2158_v63 = vsel %vm11405_vm11, %v2153_v55, %v2157_v3  ;;  %v931_v32 = vsel %vm11405_vm11, %v926_v29, %v930_v4  ;;  %v2232_v42 = vrot.slane %v11153_v41, 5  ;;  %v11857_v47 = vld [vmem:[#allocation2 + $0x14] sm:$0x1]  ;;  %v933_v43 = vshrl.u32 %v859_v34, 16  ;;  %v11154_v61 = vld [vmem:[#allocation2 + $0x20] sm:$0x1] }
  0xb2   : > { %v2454_v36 = vpack.c.b16 %v2430_v27, %v2429_v14  ;;  %v2446_v37 = vunpack.c.l.b16 %v2158_v63  ;;  %v1552_v39 = vunpack.c.l.b16 %v931_v32  ;;  %v1362_v52 = vsel %vm11782_vm14, %v9551_v30, %v1361_v26  ;;  %v861_v13 = vld [vmem:[#allocation2 + $0x18] sm:$0xf]  ;;  %v11878_v30 = vld [vmem:[#allocation2 + $0x1c] sm:$0xf] }
  0xb3   : > { %v1365_v53 = vsel %vm11782_vm14, %v1363_v33, %v1364_v6  ;;  %v9632_v58 = vrot.slane %v2160_v40, 9  ;;  %v2234_v60 = vrot.slane %v2232_v42, 4  ;;  %v2235_v62 = vrot.slane %v11154_v61, 5 }
  0xb4   : > { %2868 = vmatmul.bf16.gmra.mxu1 %v2454_v36  ;;  %v2462_v44 = vpack.c.b16 %v2446_v37, %v2445_v23  ;;  %v1583_v49 = vpack.c.b16 %v1552_v39, %v1551_v31  ;;  %v935_v59 = vrot.slane %v933_v43, 4  ;;  %v936_v0 = vshll.u32 %v859_v34, 16  ;;  %v1293_v36 = vld [vmem:[#allocation2 + $0xc] sm:$0xe] }
  0xb5   : > { %2922 = vmatmul.bf16.vlgmr.msrb.gmra.mxu2 %v2511_v38  ;;  %v942_v4 = vshll.u32 %v11855_v46, 16  ;;  %v946_v7 = vshrl.u32 %v11855_v46, 16  ;;  %v1615_v14 = vunpack.c.l.b16 %v1362_v52  ;;  %v1616_v15 = vunpack.c.l.b16 %v1365_v53 }
  0xb6   : > { %v11861_v51 = vpop.f32.mrf.mxu2  ;;  %2908 = vmatmul.bf16.gmra.mxu3 %v2462_v44  ;;  %3244 = vmatmul.bf16.vlgmr.msrb.gmra.mxu0 %v1583_v49  ;;  %v938_v10 = vrot.slane %v936_v0, 5  ;;  %v2233_v18 = vsel %vm11782_vm14, %v9632_v58, %v2232_v42  ;;  %v2236_v16 = vsel %vm11782_vm14, %v2234_v60, %v2235_v62  ;;  %v957_v3 = vshrl.u32 %v861_v13, 16  ;;  %v11889_v44 = vld [vmem:[#allocation2 + $0x20] sm:$0x1]  ;;  %v11155_v60 = vld [vmem:[#allocation2 + $0x28] sm:$0xf] }
  0xb7   : > { %v2874_v45 = vpop.f32.mrf.mxu3  ;;  %v11867_v56 = vpop.f32.mrf.mxu1  ;;  %v944_v55 = vrot.slane %v942_v4, 5  ;;  %v948_v11 = vrot.slane %v946_v7, 4  ;;  %v2481_v27 = vunpack.c.l.b16 %v2233_v18  ;;  %v2482_v28 = vunpack.c.l.b16 %v2236_v16  ;;  %v10803_v49 = vld [vmem:[#allocation2] sm:$0xff]  ;;  %v11156_v16 = vld [vmem:[#allocation2 + $0x2c] sm:$0x1] }
  0xb8   : > { %v11859_v50 = vadd.f32 %v2874_v45, %v2785_v9  ;;  %v2750_v57 = vpop.f32.mrf.mxu0  ;;  %v952_v9 = vshll.u32 %v11857_v47, 16  ;;  %v939_v21 = vor.u32 %v938_v10, %v935_v59  ;;  %v960_v63 = vshll.u32 %v861_v13, 16  ;;  %v10913_v13 = vld [vmem:[%s15318_s1 + $0x1f0] sm:$0xff] }
  0xb9   : > { %v949_v22 = vor.u32 %v948_v11, %v944_v55  ;;  %v1647_v33 = vpack.c.b16 %v1616_v15, %v1615_v14  ;;  %v1368_v37 = vrot.slane %v11855_v46, 5  ;;  %v959_v40 = vrot.slane %v957_v3, 4  ;;  %v10905_v11 = vld [vmem:[%s15318_s1 + $0x1b0] sm:$0xff]  ;;  %4514 = vmatpush.bf16.msra.mxu3 %v10913_v13 }
  0xba   : > { %v954_v2 = vrot.slane %v952_v9, 5  ;;  %v940_v23 = vrot.slane %v939_v21, 4  ;;  %v962_v41 = vrot.slane %v960_v63, 5  ;;  %v966_v45 = vshll.u32 %v11878_v30, 16  ;;  %4425 = vmatpush.bf16.msra.mxu2 %v10905_v11  ;;  %v10804_v11 = vld [vmem:[#allocation2 + $0xc] sm:$0xff] }
  0xbb   : > { %v950_v25 = vrot.slane %v949_v22, 4  ;;  %v970_v43 = vshrl.u32 %v11878_v30, 16  ;;  %v2512_v52 = vpack.c.b16 %v2482_v28, %v2481_v27  ;;  %v9552_v53 = vrot.slane %v1293_v36, 9  ;;  %v863_v28 = vld [vmem:[#allocation2 + $0x24] sm:$0xf] }
  0xbc   : > { %v945_v6 = vsel %vm11405_vm11, %v940_v23, %v944_v55  ;;  %v2239_v61 = vrot.slane %v11155_v60, 5  ;;  %v968_v46 = vrot.slane %v966_v45, 5  ;;  %v1370_v59 = vrot.slane %v1368_v37, 4 }
  0xbd   : > { %v955_v34 = vsel %vm11405_vm11, %v950_v25, %v954_v2  ;;  %v1553_v38 = vunpack.c.l.b16 %v945_v6  ;;  %v972_v62 = vrot.slane %v970_v43, 4  ;;  %v1371_v0 = vrot.slane %v11857_v47, 5  ;;  %v10921_v47 = vld [vmem:[%s15318_s1 + $0x230] sm:$0xff] }
  0xbe   : > { %v2790_v26 = vpop.f32.mrf.mxu2  ;;  %v1554_v39 = vunpack.c.l.b16 %v955_v34  ;;  %v963_v4 = vor.u32 %v962_v41, %v959_v40  ;;  %v976_v7 = vshll.u32 %v11889_v44, 16  ;;  %v1369_v14 = vsel %vm11782_vm14, %v9552_v53, %v1368_v37  ;;  %4603 = vmatpush.bf16.msra.mxu0 %v10921_v47 }
  0xbf   : > { %v11880_v31 = vpop.f32.mrf.mxu3  ;;  %v973_v10 = vor.u32 %v972_v62, %v968_v46  ;;  %v2241_v18 = vrot.slane %v2239_v61, 4  ;;  %v2242_v21 = vrot.slane %v11156_v16, 5  ;;  %v1372_v2 = vsel %vm11782_vm14, %v1370_v59, %v1371_v0  ;;  %v11157_v16 = vld [vmem:[#allocation2 + $0x34] sm:$0xf] }
  0xc0   : > { %v11876_v29 = vpop.f32.mrf.mxu0  ;;  %v1584_v58 = vpack.c.b16 %v1554_v39, %v1553_v38  ;;  %v964_v3 = vrot.slane %v963_v4, 4  ;;  %v978_v25 = vrot.slane %v976_v7, 5  ;;  %v1617_v6 = vunpack.c.l.b16 %v1369_v14 }
  0xc1   : > { %v974_v23 = vrot.slane %v973_v10, 4  ;;  %v1618_v34 = vunpack.c.l.b16 %v1372_v2  ;;  %v2243_v37 = vsel %vm11782_vm14, %v2241_v18, %v2242_v21  ;;  %v981_v39 = vshrl.u32 %v863_v28, 16  ;;  %v11931_v10 = vld [vmem:[#allocation2 + $0x2c] sm:$0x1]  ;;  %v2162_v2 = vld [vmem:[#allocation2 + $0x30] sm:$0xe] }
  0xc2   : > { %v984_v40 = vshll.u32 %v863_v28, 16  ;;  %v1378_v18 = vrot.slane %v11889_v44, 5 }
  0xc3   : > { %v2839_v32 = vpop.f32.mrf.mxu1  ;;  %v979_v38 = vsel %vm11405_vm11, %v974_v23, %v978_v25  ;;  %v1648_v53 = vpack.c.b16 %v1618_v34, %v1617_v6  ;;  %v983_v62 = vrot.slane %v981_v39, 4  ;;  %v1000_v25 = vshll.u32 %v11931_v10, 16  ;;  %v11158_v34 = vld [vmem:[#allocation2 + $0x38] sm:$0x1] }
  0xc4   : > { %v11887_v42 = vadd.f32 %v2839_v32, %v2750_v57  ;;  %3333 = vmatmul.bf16.vlgmr.msrb.gmra.mxu1 %v1647_v33  ;;  %v2161_v57 = vld [vmem:[#allocation2 + $0x24] sm:$0xe]  ;;  %v11914_v33 = vld [vmem:[#allocation2 + $0x28] sm:$0xf]  ;;  %v969_v32 = vsel %vm11405_vm11, %v964_v3, %v968_v46  ;;  %v1556_v60 = vunpack.c.l.b16 %v979_v38  ;;  %v1294_v46 = vld [vmem:[#allocation2 + $0x18] sm:$0xe] }
  0xc5   : > { %2927 = vmatmul.bf16.gmra.mxu2 %v2512_v52  ;;  %v9633_v15 = vrot.slane %v2161_v57, 9  ;;  %v990_v41 = vshll.u32 %v11914_v33, 16  ;;  %v994_v45 = vshrl.u32 %v11914_v33, 16  ;;  %v986_v59 = vrot.slane %v984_v40, 5 }
  0xc6   : > { %v11895_v9 = vpop.f32.mrf.mxu2  ;;  %3155 = vmatmul.bf16.vlgmr.msrb.gmra.mxu3 %v10803_v49  ;;  %3249 = vmatmul.bf16.gmra.mxu0 %v1584_v58  ;;  %v2484_v49 = vunpack.c.l.b16 %v2243_v37  ;;  %v1555_v58 = vunpack.c.l.b16 %v969_v32  ;;  %v9634_v6 = vrot.slane %v2162_v2, 9  ;;  %v865_v37 = vld [vmem:[#allocation2 + $0x30] sm:$0xf]  ;;  %v1002_v40 = vrot.slane %v1000_v25, 5  ;;  %v1295_v25 = vld [vmem:[#allocation2 + $0x24] sm:$0xe] }
  0xc7   : > { %v2240_v36 = vsel %vm11782_vm14, %v9633_v15, %v2239_v61  ;;  %v1375_v61 = vrot.slane %v11878_v30, 5  ;;  %v992_v0 = vrot.slane %v990_v41, 5  ;;  %v996_v57 = vrot.slane %v994_v45, 4  ;;  %v11943_v45 = vld [vmem:[#allocation2 + $0x34] sm:$0xf] }
  0xc8   : > { %v2755_v55 = vpop.f32.mrf.mxu0  ;;  %v2483_v43 = vunpack.c.l.b16 %v2240_v36  ;;  %v1585_v14 = vpack.c.b16 %v1556_v60, %v1555_v58  ;;  %v9553_v15 = vrot.slane %v1294_v46, 9  ;;  %v2246_v30 = vrot.slane %v11157_v16, 5 }
  0xc9   : > { %v1377_v21 = vrot.slane %v1375_v61, 4  ;;  %v987_v3 = vor.u32 %v986_v59, %v983_v62  ;;  %v997_v23 = vor.u32 %v996_v57, %v992_v0  ;;  %v2249_v36 = vrot.slane %v11158_v34, 5  ;;  %v10805_v34 = vld [vmem:[#allocation2 + $0x18] sm:$0xff] }
  0xca   : > { %v2513_v47 = vpack.c.b16 %v2484_v49, %v2483_v43  ;;  %v2248_v44 = vrot.slane %v2246_v30, 4  ;;  %v1005_v49 = vshrl.u32 %v865_v37, 16  ;;  %v2247_v46 = vsel %vm11782_vm14, %v9634_v6, %v2246_v30  ;;  %v11159_v6 = vld [vmem:[#allocation2 + $0x40] sm:$0xf] }
  0xcb   : > { %v11908_v22 = vpop.f32.mrf.mxu1  ;;  %v1379_v32 = vsel %vm11782_vm14, %v1377_v21, %v1378_v18  ;;  %v988_v38 = vrot.slane %v987_v3, 4  ;;  %v998_v39 = vrot.slane %v997_v23, 4  ;;  %v2485_v16 = vunpack.c.l.b16 %v2247_v46 }
  0xcc   : > { %v2879_v27 = vpop.f32.mrf.mxu3  ;;  %v2250_v62 = vsel %vm11782_vm14, %v2248_v44, %v2249_v36  ;;  %v2253_v44 = vrot.slane %v11159_v6, 5 }
  0xcd   : > { %v11912_v63 = vadd.f32 %v2879_v27, %v2790_v26  ;;  %v993_v59 = vsel %vm11405_vm11, %v988_v38, %v992_v0  ;;  %v1003_v57 = vsel %vm11405_vm11, %v998_v39, %v1002_v40  ;;  %v2486_v30 = vunpack.c.l.b16 %v2250_v62  ;;  %v11963_v0 = vld [vmem:[#allocation2 + $0x38] sm:$0x1]  ;;  %v11160_v62 = vld [vmem:[#allocation2 + $0x44] sm:$0x1] }
  0xce   : > { %v2795_v26 = vpop.f32.mrf.mxu2  ;;  %v1557_v21 = vunpack.c.l.b16 %v993_v59  ;;  %v1558_v2 = vunpack.c.l.b16 %v1003_v57  ;;  %v1024_v39 = vshll.u32 %v11963_v0, 16  ;;  %v2255_v46 = vrot.slane %v2253_v44, 4 }
  0xcf   : > { %v2514_v40 = vpack.c.b16 %v2486_v30, %v2485_v16  ;;  %v2256_v59 = vrot.slane %v11160_v62, 5  ;;  %v10920_v16 = vld [vmem:[%s15318_s1 + $0x228] sm:$0xff]  ;;  %v867_v30 = vld [vmem:[#allocation2 + $0x3c] sm:$0xf]  ;;  %v1389_v62 = vrot.slane %v11943_v45, 5 }
  0xd0   : > { %v11926_v52 = vpop.f32.mrf.mxu0  ;;  %4604 = vmatpush.bf16.msra.mxu0 %v10920_v16 }
  0xd1   : > { %v2257_v6 = vsel %vm11782_vm14, %v2255_v46, %v2256_v59  ;;  %v1296_v46 = vld [vmem:[#allocation2 + $0x30] sm:$0xe] }
  0xd4   : > { %v11929_v4 = vpop.f32.mrf.mxu3  ;;  %v2844_v7 = vpop.f32.mrf.mxu1  ;;  %3338 = vmatmul.bf16.gmra.mxu1 %v1648_v53  ;;  %v1008_v53 = vshll.u32 %v865_v37, 16  ;;  %v2163_v37 = vld [vmem:[#allocation2 + $0x3c] sm:$0xe] }
  0xd5   : > { %v11933_v13 = vadd.f32 %v2844_v7, %v2755_v55  ;;  %2932 = vmatmul.bf16.gmra.mxu2 %v2513_v47  ;;  %v1376_v55 = vsel %vm11782_vm14, %v9553_v15, %v1375_v61  ;;  %v1620_v61 = vunpack.c.l.b16 %v1379_v32  ;;  %v1018_v7 = vshrl.u32 %v11943_v45, 16 }
  0xd6   : > { %v11937_v27 = vpop.f32.mrf.mxu2  ;;  %3160 = vmatmul.bf16.gmra.mxu3 %v10804_v11  ;;  %3254 = vmatmul.bf16.gmra.mxu0 %v1585_v14  ;;  %v1619_v60 = vunpack.c.l.b16 %v1376_v55  ;;  %v1007_v47 = vrot.slane %v1005_v49, 4  ;;  %v1010_v14 = vrot.slane %v1008_v53, 5  ;;  %v1382_v55 = vrot.slane %v11914_v33, 5 }
  0xd7   : > { %15351 = vst [vmem:[#allocation8_spill] sm:$0xff] %v11937_v27  ;;  %v1020_v18 = vrot.slane %v1018_v7, 4  ;;  %v9554_v49 = vrot.slane %v1295_v25, 9  ;;  %v1385_v53 = vrot.slane %v11931_v10, 5  ;;  %v9635_v33 = vrot.slane %v2163_v37, 9  ;;  %v10912_v10 = vld [vmem:[%s15318_s1 + $0x1e8] sm:$0xff] }
  0xd8   : > { %v2760_v28 = vpop.f32.mrf.mxu0  ;;  %v1649_v23 = vpack.c.b16 %v1620_v61, %v1619_v60  ;;  %v1011_v32 = vor.u32 %v1010_v14, %v1007_v47  ;;  %v1384_v61 = vrot.slane %v1382_v55, 4  ;;  %v1026_v14 = vrot.slane %v1024_v39, 5  ;;  %4515 = vmatpush.bf16.msra.mxu3 %v10912_v10 }
  0xd9   : > { %v2254_v25 = vsel %vm11782_vm14, %v9635_v33, %v2253_v44 }
  0xda   : > { %v1012_v7 = vrot.slane %v1011_v32, 4  ;;  %v1029_v32 = vshrl.u32 %v867_v30, 16 }
  0xdc   : > { %v2884_v41 = vpop.f32.mrf.mxu3  ;;  %v11947_v58 = vpop.f32.mrf.mxu1 }
  0xdd   : > { %v11945_v43 = vadd.f32 %v2884_v41, %v2795_v26  ;;  %v1014_v26 = vshll.u32 %v11943_v45, 16  ;;  %v1586_v41 = vpack.c.b16 %v1558_v2, %v1557_v21  ;;  %v11986_v21 = vld [vmem:[#allocation2 + $0x40] sm:$0xf]  ;;  %v1383_v2 = vsel %vm11782_vm14, %v9554_v49, %v1382_v55 }
  0xde   : > { %v1038_v55 = vshll.u32 %v11986_v21, 16  ;;  %v1042_v39 = vshrl.u32 %v11986_v21, 16 }
  0xdf   : > { %15352 = vst [vmem:[#allocation9_spill] sm:$0xff] %v11945_v43  ;;  %v11961_v15 = vrot.slane %v1014_v26, 5 }
  0xe0   : > { %v11959_v11 = vpop.f32.mrf.mxu0  ;;  %v2800_v3 = vpop.f32.mrf.mxu2  ;;  %v1044_v10 = vrot.slane %v1042_v39, 4 }
  0xe1   : > { %v1021_v38 = vor.u32 %v1020_v18, %v11961_v15  ;;  %v10904_v18 = vld [vmem:[%s15318_s1 + $0x1a8] sm:$0xff] }
  0xe2   : > { %4426 = vmatpush.bf16.msra.mxu2 %v10904_v18  ;;  %v1040_v18 = vrot.slane %v1038_v55, 5 }
  0xe3   : > { %v1022_v47 = vrot.slane %v1021_v38, 4  ;;  %v1032_v38 = vshll.u32 %v867_v30, 16  ;;  %v9555_v30 = vrot.slane %v1296_v46, 9 }
  0xe4   : > { %v11966_v36 = vpop.f32.mrf.mxu3  ;;  %3343 = vmatmul.bf16.gmra.mxu1 %v1649_v23  ;;  %v1386_v23 = vsel %vm11782_vm14, %v1384_v61, %v1385_v53  ;;  %v2488_v61 = vunpack.c.l.b16 %v2257_v6  ;;  %v1392_v6 = vrot.slane %v11963_v0, 5  ;;  %v1045_v35 = vor.u32 %v1044_v10, %v1040_v18  ;;  %v11162_v0 = vld [vmem:[#allocation2 + $0x50] sm:$0x1]  ;;  %v869_v10 = vld [vmem:[#allocation2 + $0x48] sm:$0xf] }
  0xe5   : > { %15353 = vst [vmem:[#allocation10_spill] sm:$0xff] %v11966_v36  ;;  %2937 = vmatmul.bf16.gmra.mxu2 %v2514_v40  ;;  %v1027_v37 = vsel %vm11405_vm11, %v1022_v47, %v1026_v14  ;;  %v1622_v49 = vunpack.c.l.b16 %v1386_v23  ;;  %v1031_v47 = vrot.slane %v1029_v32, 4  ;;  %v1034_v14 = vrot.slane %v1032_v38, 5  ;;  %v12199_v36 = vld [vmem:[#allocation2 + $0x80] sm:$0x1] }
  0xe6   : > { %3165 = vmatmul.bf16.gmra.mxu3 %v10805_v34  ;;  %3259 = vmatmul.bf16.gmra.mxu0 %v1586_v41  ;;  %v1017_v34 = vsel %vm11405_vm11, %v1012_v7, %v11961_v15  ;;  %v1621_v41 = vunpack.c.l.b16 %v1383_v2  ;;  %v1560_v15 = vunpack.c.l.b16 %v1027_v37  ;;  %v10806_v2 = vld [vmem:[#allocation2 + $0x24] sm:$0xff]  ;;  %v1390_v38 = vsel %vm11782_vm14, %v9555_v30, %v1389_v62 }
  0xe7   : > { %v1559_v33 = vunpack.c.l.b16 %v1017_v34  ;;  %v11161_v34 = vld [vmem:[#allocation2 + $0x4c] sm:$0xf]  ;;  %v1035_v24 = vor.u32 %v1034_v14, %v1031_v47  ;;  %v1046_v46 = vrot.slane %v1045_v35, 4  ;;  %v1623_v30 = vunpack.c.l.b16 %v1390_v38 }
  0xe8   : > { %v2849_v60 = vpop.f32.mrf.mxu1  ;;  %v11973_v26 = vpop.f32.mrf.mxu0  ;;  %v1650_v16 = vpack.c.b16 %v1622_v49, %v1621_v41  ;;  %v2260_v37 = vrot.slane %v11161_v34, 5 }
  0xe9   : > { %v11971_v57 = vadd.f32 %v2849_v60, %v2760_v28  ;;  %v11984_v28 = vpop.f32.mrf.mxu2  ;;  %v2487_v60 = vunpack.c.l.b16 %v2254_v25  ;;  %v1391_v25 = vrot.slane %v1389_v62, 4  ;;  %v1587_v45 = vpack.c.b16 %v1560_v15, %v1559_v33 }
  0xea   : > { %15354 = vst [vmem:[#allocation11_spill] sm:$0xff] %v11984_v28  ;;  %v2262_v49 = vrot.slane %v2260_v37, 4  ;;  %v1036_v15 = vrot.slane %v1035_v24, 4 }
  0xeb   : > { %v2515_v23 = vpack.c.b16 %v2488_v61, %v2487_v60  ;;  %v1393_v39 = vsel %vm11782_vm14, %v1391_v25, %v1392_v6  ;;  %v2263_v60 = vrot.slane %v11162_v0, 5  ;;  %v1056_v6 = vshll.u32 %v869_v10, 16 }
  0xec   : > { %v1041_v24 = vsel %vm11405_vm11, %v1036_v15, %v1040_v18 }
  0xed   : > { %v1561_v38 = vunpack.c.l.b16 %v1041_v24  ;;  %v1058_v0 = vrot.slane %v1056_v6, 5 }
  0xef   : > { %v2889_v40 = vpop.f32.mrf.mxu3 }
  0xf0   : > { %v12003_v44 = vadd.f32 %v2889_v40, %v2800_v3  ;;  %v12005_v53 = vpop.f32.mrf.mxu1  ;;  %v12010_v7 = vpop.f32.mrf.mxu0  ;;  %v12012_v3 = vld [vmem:[#allocation2 + $0x44] sm:$0x1]  ;;  %v2164_v40 = vld [vmem:[#allocation2 + $0x48] sm:$0xe] }
  0xf1   : > { %v12008_v59 = vpop.f32.mrf.mxu2  ;;  %v1048_v32 = vshll.u32 %v12012_v3, 16  ;;  %v9636_v41 = vrot.slane %v2164_v40, 9 }
  0xf2   : > { %15355 = vst [vmem:[#allocation12_spill] sm:$0xff] %v12003_v44 }
  0xf3   : > { %v1050_v47 = vrot.slane %v1048_v32, 5  ;;  %v2261_v25 = vsel %vm11782_vm14, %v9636_v41, %v2260_v37  ;;  %v1297_v41 = vld [vmem:[#allocation2 + $0x3c] sm:$0xe] }
  0xf4   : > { %3348 = vmatmul.bf16.gmra.mxu1 %v1650_v16  ;;  %v12029_v16 = vld [vmem:[#allocation2 + $0x4c] sm:$0xf]  ;;  %v2489_v40 = vunpack.c.l.b16 %v2261_v25 }
  0xf5   : > { %2942 = vmatmul.bf16.gmra.mxu2 %v2515_v23  ;;  %v1051_v35 = vsel %vm11405_vm11, %v1046_v46, %v1050_v47  ;;  %v1053_v23 = vshrl.u32 %v869_v10, 16  ;;  %v1062_v34 = vshll.u32 %v12029_v16, 16  ;;  %v12044_v47 = vld [vmem:[#allocation2 + $0x50] sm:$0x1]  ;;  %v1403_v28 = vrot.slane %v12029_v16, 5 }
  0xf6   : > { %3170 = vmatmul.bf16.gmra.mxu3 %v10806_v2  ;;  %3264 = vmatmul.bf16.gmra.mxu0 %v1587_v45  ;;  %v1624_v2 = vunpack.c.l.b16 %v1393_v39  ;;  %v1066_v45 = vshrl.u32 %v12029_v16, 16  ;;  %v1396_v39 = vrot.slane %v11986_v21, 5  ;;  %v10807_v10 = vld [vmem:[#allocation2 + $0x30] sm:$0xff]  ;;  %v9556_v21 = vrot.slane %v1297_v41, 9 }
  0xf7   : > { %v12020_v61 = vpop.f32.mrf.mxu3  ;;  %v1064_v18 = vrot.slane %v1062_v34, 5  ;;  %v2165_v34 = vld [vmem:[#allocation2 + $0x54] sm:$0xe] }
  0xf8   : > { %v2854_v55 = vpop.f32.mrf.mxu1  ;;  %15356 = vst [vmem:[#allocation13_spill] sm:$0xff] %v12020_v61  ;;  %v1651_v37 = vpack.c.b16 %v1624_v2, %v1623_v30  ;;  %v1398_v2 = vrot.slane %v1396_v39, 4  ;;  %v1072_v61 = vshll.u32 %v12044_v47, 16  ;;  %v871_v41 = vld [vmem:[#allocation2 + $0x54] sm:$0xf] }
  0xf9   : > { %v12023_v33 = vadd.f32 %v2854_v55, %v11973_v26  ;;  %v12025_v62 = vpop.f32.mrf.mxu2  ;;  %v12027_v14 = vpop.f32.mrf.mxu0  ;;  %v2264_v26 = vsel %vm11782_vm14, %v2262_v49, %v2263_v60  ;;  %v1562_v55 = vunpack.c.l.b16 %v1051_v35  ;;  %v1055_v49 = vrot.slane %v1053_v23, 4  ;;  %v11163_v23 = vld [vmem:[#allocation2 + $0x58] sm:$0xf] }
  0xfa   : > { %v2490_v32 = vunpack.c.l.b16 %v2264_v26  ;;  %v1068_v60 = vrot.slane %v1066_v45, 4  ;;  %v1399_v35 = vrot.slane %v12012_v3, 5  ;;  %v2267_v6 = vrot.slane %v11163_v23, 5  ;;  %v10919_v3 = vld [vmem:[%s15318_s1 + $0x220] sm:$0xff] }
  0xfb   : > { %v1588_v26 = vpack.c.b16 %v1562_v55, %v1561_v38  ;;  %v1059_v45 = vor.u32 %v1058_v0, %v1055_v49  ;;  %v9637_v55 = vrot.slane %v2165_v34, 9  ;;  %v12068_v49 = vld [vmem:[#allocation2 + $0x58] sm:$0xf]  ;;  %v2270_v0 = vrot.slane %v11728_v8, 5  ;;  %4605 = vmatpush.bf16.msra.mxu0 %v10919_v3 }
  0xfc   : > { %v2516_v25 = vpack.c.b16 %v2490_v32, %v2489_v40  ;;  %v1069_v5 = vor.u32 %v1068_v60, %v1064_v18  ;;  %v10911_v40 = vld [vmem:[%s15318_s1 + $0x1e0] sm:$0xff]  ;;  %v1397_v32 = vsel %vm11782_vm14, %v9556_v21, %v1396_v39  ;;  %v1400_v38 = vsel %vm11782_vm14, %v1398_v2, %v1399_v35 }
  0xfd   : > { %v1060_v60 = vrot.slane %v1059_v45, 4  ;;  %4516 = vmatpush.bf16.msra.mxu3 %v10911_v40  ;;  %v1080_v21 = vshll.u32 %v871_v41, 16  ;;  %v1086_v2 = vshll.u32 %v12068_v49, 16  ;;  %v1090_v35 = vshrl.u32 %v12068_v49, 16 }
  0xfe   : > { %v1625_v34 = vunpack.c.l.b16 %v1397_v32 }
  0xff   : > { %v1082_v32 = vrot.slane %v1080_v21, 5 }
 0x100   : > { %v12042_v46 = vpop.f32.mrf.mxu1 }
 0x101   : > { %v2894_v15 = vpop.f32.mrf.mxu3  ;;  %v12051_v30 = vpop.f32.mrf.mxu0 }
 0x102   : > { %v12047_v17 = vadd.f32 %v2894_v15, %v12008_v59  ;;  %v12049_v24 = vpop.f32.mrf.mxu2  ;;  %v10903_v59 = vld [vmem:[%s15318_s1 + $0x1a0] sm:$0xff]  ;;  %v1070_v15 = vrot.slane %v1069_v5, 4  ;;  %v2268_v5 = vsel %vm11782_vm14, %v9637_v55, %v2267_v6 }
 0x103   : > { %4427 = vmatpush.bf16.msra.mxu2 %v10903_v59  ;;  %v1065_v59 = vsel %vm11405_vm11, %v1060_v60, %v1064_v18  ;;  %v10808_v18 = vld [vmem:[#allocation2 + $0x3c] sm:$0xff] }
 0x104   : > { %15357 = vst [vmem:[#allocation14_spill] sm:$0xff] %v12047_v17  ;;  %3353 = vmatmul.bf16.gmra.mxu1 %v1651_v37  ;;  %v2269_v37 = vrot.slane %v2267_v6, 4  ;;  %v1626_v17 = vunpack.c.l.b16 %v1400_v38  ;;  %v1088_v38 = vrot.slane %v1086_v2, 5  ;;  %v1563_v55 = vunpack.c.l.b16 %v1065_v59  ;;  %v2166_v60 = vld [vmem:[#allocation2 + $0x60] sm:$0xe] }
 0x105   : > { %2947 = vmatmul.bf16.gmra.mxu2 %v2516_v25 }
 0x106   : > { %3175 = vmatmul.bf16.gmra.mxu3 %v10807_v10  ;;  %3269 = vmatmul.bf16.gmra.mxu0 %v1588_v26  ;;  %v1074_v10 = vrot.slane %v1072_v61, 5  ;;  %v1077_v26 = vshrl.u32 %v871_v41, 16  ;;  %v1092_v41 = vrot.slane %v1090_v35, 4 }
 0x108   : > { %v1075_v40 = vsel %vm11405_vm11, %v1070_v15, %v1074_v10  ;;  %v1079_v3 = vrot.slane %v1077_v26, 4  ;;  %v1093_v15 = vor.u32 %v1092_v41, %v1088_v38 }
 0x109   : > { %v2896_v25 = vpop.f32.mrf.mxu3  ;;  %v2775_v45 = vpop.f32.mrf.mxu0 }
 0x10a   : > { %v12072_v39 = vadd.f32 %v2896_v25, %v12025_v62  ;;  %v2812_v61 = vpop.f32.mrf.mxu2  ;;  %v2271_v62 = vsel %vm11782_vm14, %v2269_v37, %v2270_v0  ;;  %v2491_v25 = vunpack.c.l.b16 %v2268_v5  ;;  %v1298_v37 = vld [vmem:[#allocation2 + $0x48] sm:$0xe]  ;;  %v2274_v0 = vrot.slane %v11767_v1, 5 }
 0x10b   : > { %v2492_v6 = vunpack.c.l.b16 %v2271_v62  ;;  %v1083_v44 = vor.u32 %v1082_v32, %v1079_v3  ;;  %v1406_v1 = vrot.slane %v12044_v47, 5  ;;  %v9638_v62 = vrot.slane %v2166_v60, 9 }
 0x10c   : > { %15358 = vst [vmem:[#allocation15_spill] sm:$0xff] %v12072_v39  ;;  %v2859_v23 = vpop.f32.mrf.mxu1  ;;  %v1652_v39 = vpack.c.b16 %v1626_v17, %v1625_v34  ;;  %v9557_v17 = vrot.slane %v1298_v37, 9  ;;  %v1405_v34 = vrot.slane %v1403_v28, 4  ;;  %v2276_v59 = vrot.slane %v2274_v0, 4 }
 0x10d   : > { %v12079_v8 = vadd.f32 %v2859_v23, %v12027_v14  ;;  %v1564_v14 = vunpack.c.l.b16 %v1075_v40  ;;  %v12087_v23 = vld [vmem:[#allocation2 + $0x5c] sm:$0x1]  ;;  %v2517_v21 = vpack.c.b16 %v2492_v6, %v2491_v25  ;;  %v2277_v32 = vrot.slane %v11810_v48, 5 }
 0x10e   : > { %v1096_v10 = vshll.u32 %v12087_v23, 16  ;;  %v1084_v41 = vrot.slane %v1083_v44, 4  ;;  %v1094_v25 = vrot.slane %v1093_v15, 4  ;;  %v1407_v47 = vsel %vm11782_vm14, %v1405_v34, %v1406_v1 }
 0x10f   : > { %v1589_v2 = vpack.c.b16 %v1564_v14, %v1563_v55  ;;  %v2275_v55 = vsel %vm11782_vm14, %v9638_v62, %v2274_v0  ;;  %v2278_v48 = vsel %vm11782_vm14, %v2276_v59, %v2277_v32  ;;  %v1410_v1 = vrot.slane %v12068_v49, 5  ;;  %v1299_v62 = vld [vmem:[#allocation2 + $0x54] sm:$0xe] }
 0x110   : > { %v1098_v6 = vrot.slane %v1096_v10, 5  ;;  %v1089_v44 = vsel %vm11405_vm11, %v1084_v41, %v1088_v38 }
 0x111   : > { %v2777_v3 = vpop.f32.mrf.mxu0  ;;  %v1565_v38 = vunpack.c.l.b16 %v1089_v44  ;;  %v11164_v44 = vld [vmem:[#allocation2 + $0x70] sm:$0xf] }
 0x112   : > { %v1099_v14 = vsel %vm11405_vm11, %v1094_v25, %v1098_v6 }
 0x113   : > { %v1566_v34 = vunpack.c.l.b16 %v1099_v14  ;;  %v2281_v14 = vrot.slane %v11164_v44, 5 }
 0x114   : > { %v2861_v26 = vpop.f32.mrf.mxu1  ;;  %3358 = vmatmul.bf16.gmra.mxu1 %v1652_v39  ;;  %v2815_v40 = vpop.f32.mrf.mxu2  ;;  %v12100_v39 = vld [vmem:[#allocation2 + $0x64] sm:$0xf] }
 0x115   : > { %v12093_v5 = vadd.f32 %v2861_v26, %v12051_v30  ;;  %2952 = vmatmul.bf16.gmra.mxu2 %v2517_v21  ;;  %v873_v30 = vld [vmem:[#allocation2 + $0x60] sm:$0xf]  ;;  %v1114_v15 = vshrl.u32 %v12100_v39, 16  ;;  %v1628_v21 = vunpack.c.l.b16 %v1407_v47  ;;  %v9558_v47 = vrot.slane %v1299_v62, 9 }
 0x116   : > { %v2899_v35 = vpop.f32.mrf.mxu3  ;;  %3180 = vmatmul.bf16.gmra.mxu3 %v10808_v18  ;;  %3274 = vmatmul.bf16.gmra.mxu0 %v1589_v2  ;;  %v1101_v18 = vshrl.u32 %v873_v30, 16  ;;  %v1104_v60 = vshll.u32 %v873_v30, 16 }
 0x117   : > { %v12096_v16 = vadd.f32 %v2899_v35, %v12049_v24  ;;  %v1404_v24 = vsel %vm11782_vm14, %v9557_v17, %v1403_v28  ;;  %v1110_v28 = vshll.u32 %v12100_v39, 16  ;;  %v2493_v35 = vunpack.c.l.b16 %v2275_v55 }
 0x118   : > { %v1627_v0 = vunpack.c.l.b16 %v1404_v24  ;;  %v2494_v17 = vunpack.c.l.b16 %v2278_v48  ;;  %v1103_v59 = vrot.slane %v1101_v18, 4  ;;  %v1106_v32 = vrot.slane %v1104_v60, 5  ;;  %v2167_v18 = vld [vmem:[#allocation2 + $0x6c] sm:$0xe] }
 0x119   : > { %15359 = vst [vmem:[#allocation16_spill] sm:$0xff] %v12096_v16  ;;  %v1112_v41 = vrot.slane %v1110_v28, 5  ;;  %v1116_v25 = vrot.slane %v1114_v15, 4  ;;  %v1412_v55 = vrot.slane %v1410_v1, 4  ;;  %v1413_v48 = vrot.slane %v12087_v23, 5 }
 0x11a   : > { %v1653_v30 = vpack.c.b16 %v1628_v21, %v1627_v0  ;;  %v2518_v24 = vpack.c.b16 %v2494_v17, %v2493_v35  ;;  %v1107_v60 = vor.u32 %v1106_v32, %v1103_v59  ;;  %v1411_v35 = vsel %vm11782_vm14, %v9558_v47, %v1410_v1 }
 0x11b   : > { %v1117_v28 = vor.u32 %v1116_v25, %v1112_v41  ;;  %v1414_v23 = vsel %vm11782_vm14, %v1412_v55, %v1413_v48  ;;  %v9639_v17 = vrot.slane %v2167_v18, 9  ;;  %v875_v25 = vld [vmem:[#allocation2 + $0x6c] sm:$0xf]  ;;  %v1629_v55 = vunpack.c.l.b16 %v1411_v35 }
 0x11c   : > { %v2864_v37 = vpop.f32.mrf.mxu1  ;;  %v2817_v6 = vpop.f32.mrf.mxu2  ;;  %v1108_v59 = vrot.slane %v1107_v60, 4  ;;  %v1630_v48 = vunpack.c.l.b16 %v1414_v23  ;;  %v1125_v60 = vshrl.u32 %v875_v25, 16 }
 0x11d   : > { %v12116_v26 = vadd.f32 %v2864_v37, %v2775_v45  ;;  %v12121_v16 = vpop.f32.mrf.mxu0  ;;  %v12123_v45 = vld [vmem:[#allocation2 + $0x68] sm:$0x1]  ;;  %v1590_v37 = vpack.c.b16 %v1566_v34, %v1565_v38  ;;  %v2283_v38 = vrot.slane %v2281_v14, 4  ;;  %v10902_v34 = vld [vmem:[%s15318_s1 + $0x198] sm:$0xff]  ;;  %v1118_v32 = vrot.slane %v1117_v28, 4 }
 0x11e   : > { %v2901_v10 = vpop.f32.mrf.mxu3  ;;  %v1120_v15 = vshll.u32 %v12123_v45, 16  ;;  %4428 = vmatpush.bf16.msra.mxu2 %v10902_v34  ;;  %v1128_v28 = vshll.u32 %v875_v25, 16 }
 0x11f   : > { %v12118_v2 = vadd.f32 %v2901_v10, %v2812_v61  ;;  %v10809_v61 = vld [vmem:[#allocation2 + $0x48] sm:$0xff] }
 0x120   : > { %v1122_v1 = vrot.slane %v1120_v15, 5 }
 0x121   : > { %15360 = vst [vmem:[#allocation17_spill] sm:$0xff] %v12118_v2 }
 0x124   : > { %v2866_v49 = vpop.f32.mrf.mxu1  ;;  %3363 = vmatmul.bf16.gmra.mxu1 %v1653_v30  ;;  %v12141_v30 = vld [vmem:[#allocation2 + $0x70] sm:$0xf] }
 0x125   : > { %v12127_v0 = vadd.f32 %v2866_v49, %v2777_v3  ;;  %v10910_v3 = vld [vmem:[%s15318_s1 + $0x1d8] sm:$0xff]  ;;  %2957 = vmatmul.bf16.gmra.mxu2 %v2518_v24  ;;  %v12145_v47 = vpop.f32.mrf.mxu0  ;;  %v2282_v24 = vsel %vm11782_vm14, %v9639_v17, %v2281_v14  ;;  %v1113_v49 = vsel %vm11405_vm11, %v1108_v59, %v1112_v41  ;;  %v1134_v15 = vshll.u32 %v12141_v30, 16 }
 0x126   : > { %v2904_v10 = vpop.f32.mrf.mxu3  ;;  %3185 = vmatmul.bf16.gmra.mxu3 %v10809_v61  ;;  %3279 = vmatmul.bf16.gmra.mxu0 %v1590_v37  ;;  %v1123_v37 = vsel %vm11405_vm11, %v1118_v32, %v1122_v1  ;;  %v2495_v23 = vunpack.c.l.b16 %v2282_v24  ;;  %v1567_v17 = vunpack.c.l.b16 %v1113_v49  ;;  %v10918_v41 = vld [vmem:[%s15318_s1 + $0x218] sm:$0xff]  ;;  %v1130_v59 = vrot.slane %v1128_v28, 5 }
 0x127   : > { %v12129_v21 = vadd.f32 %v2904_v10, %v2815_v40  ;;  %v11165_v40 = vld [vmem:[#allocation2 + $0x74] sm:$0x1]  ;;  %4517 = vmatpush.bf16.msra.mxu3 %v10910_v3  ;;  %v1138_v10 = vshrl.u32 %v12141_v30, 16  ;;  %v1568_v34 = vunpack.c.l.b16 %v1123_v37  ;;  %v1417_v3 = vrot.slane %v12100_v39, 5  ;;  %4606 = vmatpush.bf16.msra.mxu0 %v10918_v41  ;;  %v2168_v28 = vld [vmem:[#allocation2 + $0x78] sm:$0xe] }
 0x128   : > { %v2284_v62 = vrot.slane %v11165_v40, 5  ;;  %v12143_v61 = vpop.f32.mrf.mxu2  ;;  %v1300_v40 = vld [vmem:[#allocation2 + $0x60] sm:$0xe]  ;;  %v1136_v32 = vrot.slane %v1134_v15, 5  ;;  %v1420_v39 = vrot.slane %v12123_v45, 5 }
 0x129   : > { %15361 = vst [vmem:[#allocation18_spill] sm:$0xff] %v12129_v21  ;;  %v1140_v1 = vrot.slane %v1138_v10, 4 }
 0x12a   : > { %v2285_v44 = vsel %vm11782_vm14, %v2283_v38, %v2284_v62  ;;  %v1654_v38 = vpack.c.b16 %v1630_v48, %v1629_v55  ;;  %v1127_v62 = vrot.slane %v1125_v60, 4  ;;  %v1419_v55 = vrot.slane %v1417_v3, 4  ;;  %v11166_v48 = vld [vmem:[#allocation2 + $0x7c] sm:$0xf] }
 0x12b   : > { %v2496_v14 = vunpack.c.l.b16 %v2285_v44  ;;  %v10810_v44 = vld [vmem:[#allocation2 + $0x54] sm:$0xff]  ;;  %v2288_v41 = vrot.slane %v11166_v48, 5  ;;  %v1141_v10 = vor.u32 %v1140_v1, %v1136_v32 }
 0x12c   : > { %v1131_v15 = vor.u32 %v1130_v59, %v1127_v62  ;;  %v1421_v45 = vsel %vm11782_vm14, %v1419_v55, %v1420_v39 }
 0x12d   : > { %v2519_v37 = vpack.c.b16 %v2496_v14, %v2495_v23  ;;  %v9640_v14 = vrot.slane %v2168_v28, 9  ;;  %v1142_v59 = vrot.slane %v1141_v10, 4  ;;  %v1632_v10 = vunpack.c.l.b16 %v1421_v45 }
 0x12e   : > { %v2906_v18 = vpop.f32.mrf.mxu3  ;;  %v1132_v62 = vrot.slane %v1131_v15, 4 }
 0x12f   : > { %v12157_v35 = vadd.f32 %v2906_v18, %v2817_v6  ;;  %v12163_v6 = vld [vmem:[#allocation2 + $0x74] sm:$0x1]  ;;  %v1591_v18 = vpack.c.b16 %v1568_v34, %v1567_v17  ;;  %v2290_v17 = vrot.slane %v2288_v41, 4  ;;  %v12176_v34 = vld [vmem:[#allocation2 + $0x7c] sm:$0xf] }
 0x130   : > { %v2822_v49 = vpop.f32.mrf.mxu2  ;;  %v1144_v21 = vshll.u32 %v12163_v6, 16  ;;  %v1158_v55 = vshll.u32 %v12176_v34, 16  ;;  %v1162_v39 = vshrl.u32 %v12176_v34, 16 }
 0x131   : > { %15362 = vst [vmem:[#allocation19_spill] sm:$0xff] %v12157_v35  ;;  %v2869_v25 = vpop.f32.mrf.mxu1  ;;  %v9559_v35 = vrot.slane %v1300_v40, 9 }
 0x132   : > { %v12166_v24 = vadd.f32 %v2869_v25, %v12121_v16  ;;  %v877_v16 = vld [vmem:[#allocation2 + $0x78] sm:$0xf]  ;;  %v1146_v1 = vrot.slane %v1144_v21, 5 }
 0x133   : > { %v12169_v60 = vpop.f32.mrf.mxu0  ;;  %v1418_v23 = vsel %vm11782_vm14, %v9559_v35, %v1417_v3  ;;  %v1149_v48 = vshrl.u32 %v877_v16, 16 }
 0x134   : > { %3368 = vmatmul.bf16.gmra.mxu1 %v1654_v38  ;;  %v11167_v38 = vld [vmem:[#allocation2 + $0x80] sm:$0x1]  ;;  %v1631_v15 = vunpack.c.l.b16 %v1418_v23 }
 0x135   : > { %2962 = vmatmul.bf16.gmra.mxu2 %v2519_v37  ;;  %v2291_v40 = vrot.slane %v11167_v38, 5  ;;  %v1152_v37 = vshll.u32 %v877_v16, 16  ;;  %v2289_v16 = vsel %vm11782_vm14, %v9640_v14, %v2288_v41  ;;  %v1147_v38 = vsel %vm11405_vm11, %v1142_v59, %v1146_v1  ;;  %v10811_v1 = vld [vmem:[#allocation2 + $0x60] sm:$0xff] }
 0x136   : > { %3190 = vmatmul.bf16.gmra.mxu3 %v10810_v44  ;;  %3284 = vmatmul.bf16.gmra.mxu0 %v1591_v18  ;;  %v2497_v23 = vunpack.c.l.b16 %v2289_v16  ;;  %v1570_v2 = vunpack.c.l.b16 %v1147_v38  ;;  %v1655_v41 = vpack.c.b16 %v1632_v10, %v1631_v15  ;;  %v1424_v14 = vrot.slane %v12141_v30, 5 }
 0x137   : > { %v1168_v16 = vshll.u32 %v12199_v36, 16  ;;  %v1427_v38 = vrot.slane %v12163_v6, 5  ;;  %v12215_v6 = vld [vmem:[#allocation2 + $0x88] sm:$0xf] }
 0x138   : > { %v2923_v3 = vpop.f32.mrf.mxu2  ;;  %v1426_v10 = vrot.slane %v1424_v14, 4 }
 0x139   : > { %v2909_v25 = vpop.f32.mrf.mxu3  ;;  %v2871_v44 = vpop.f32.mrf.mxu1  ;;  %v2924_v28 = vadd.f32 %v2923_v3, %v11828_v12  ;;  %v1164_v12 = vrot.slane %v1162_v39, 4 }
 0x13a   : > { %v12179_v18 = vadd.f32 %v2909_v25, %v12143_v61  ;;  %v12182_v35 = vadd.f32 %v2871_v44, %v12145_v47  ;;  %v2292_v61 = vsel %vm11782_vm14, %v2290_v17, %v2291_v40  ;;  %v1137_v47 = vsel %vm11405_vm11, %v1132_v62, %v1136_v32  ;;  %v1301_v32 = vld [vmem:[#allocation2 + $0x6c] sm:$0xe]  ;;  %v11168_v62 = vld [vmem:[#allocation2 + $0x88] sm:$0xf] }
 0x13b   : > { %v12187_v21 = vpop.f32.mrf.mxu0  ;;  %v1151_v25 = vrot.slane %v1149_v48, 4  ;;  %v1154_v44 = vrot.slane %v1152_v37, 5  ;;  %v2498_v45 = vunpack.c.l.b16 %v2292_v61  ;;  %v1569_v3 = vunpack.c.l.b16 %v1137_v47  ;;  %v2169_v37 = vld [vmem:[#allocation2 + $0x84] sm:$0xe] }
 0x13c   : > { %15363 = vst [vmem:[#allocation20_spill] sm:$0xff] %v12179_v18  ;;  %v12197_v18 = vrot.slane %v1158_v55, 5  ;;  %v2295_v27 = vrot.slane %v11168_v62, 5  ;;  %v9560_v30 = vrot.slane %v1301_v32, 9  ;;  %v9641_v62 = vrot.slane %v2169_v37, 9 }
 0x13d   : > { %v1155_v55 = vor.u32 %v1154_v44, %v1151_v25  ;;  %v2520_v61 = vpack.c.b16 %v2498_v45, %v2497_v23  ;;  %v1592_v47 = vpack.c.b16 %v1570_v2, %v1569_v3  ;;  %v1170_v44 = vrot.slane %v1168_v16, 5  ;;  %v10909_v2 = vld [vmem:[%s15318_s1 + $0x1d0] sm:$0xff]  ;;  %v879_v23 = vld [vmem:[#allocation2 + $0x84] sm:$0xf] }
 0x13e   : > { %v1165_v39 = vor.u32 %v1164_v12, %v12197_v18  ;;  %v10901_v12 = vld [vmem:[%s15318_s1 + $0x190] sm:$0xff]  ;;  %4518 = vmatpush.bf16.msra.mxu3 %v10909_v2  ;;  %v1428_v32 = vsel %vm11782_vm14, %v1426_v10, %v1427_v38  ;;  %v1182_v10 = vshll.u32 %v12215_v6, 16  ;;  %v1302_v2 = vld [vmem:[#allocation2 + $0x78] sm:$0xe] }
 0x13f   : > { %v1156_v43 = vrot.slane %v1155_v55, 4  ;;  %4429 = vmatpush.bf16.msra.mxu2 %v10901_v12  ;;  %v10917_v12 = vld [vmem:[%s15318_s1 + $0x210] sm:$0xff] }
 0x140   : > { %v2925_v48 = vpop.f32.mrf.mxu2  ;;  %v1166_v25 = vrot.slane %v1165_v39, 4  ;;  %4607 = vmatpush.bf16.msra.mxu0 %v10917_v12  ;;  %v11171_v12 = vld [vmem:[#allocation2 + $0x98] sm:$0x1] }
 0x141   : > { %v2911_v17 = vpop.f32.mrf.mxu3  ;;  %v3334_v40 = vpop.f32.mrf.mxu1  ;;  %v1161_v16 = vsel %vm11405_vm11, %v1156_v43, %v12197_v18  ;;  %v1634_v18 = vunpack.c.l.b16 %v1428_v32  ;;  %v12248_v32 = vld [vmem:[#allocation2 + $0x8c] sm:$0x1] }
 0x142   : > { %v12202_v59 = vadd.f32 %v2911_v17, %v2822_v49  ;;  %v2297_v49 = vrot.slane %v2295_v27, 4  ;;  %v11169_v17 = vld [vmem:[#allocation2 + $0x8c] sm:$0x1] }
 0x143   : > { %v12206_v15 = vpop.f32.mrf.mxu0 }
 0x144   : > { %15364 = vst [vmem:[#allocation21_spill] sm:$0xff] %v12202_v59  ;;  %3373 = vmatmul.bf16.gmra.mxu1 %v1655_v41  ;;  %v2298_v59 = vrot.slane %v11169_v17, 5  ;;  %v1425_v41 = vsel %vm11782_vm14, %v9560_v30, %v1424_v14  ;;  %v1176_v30 = vshll.u32 %v879_v23, 16  ;;  %v1571_v17 = vunpack.c.l.b16 %v1161_v16 }
 0x145   : > { %2967 = vmatmul.bf16.gmra.mxu2 %v2520_v61  ;;  %v1171_v61 = vsel %vm11405_vm11, %v1166_v25, %v1170_v44  ;;  %v1633_v43 = vunpack.c.l.b16 %v1425_v41 }
 0x146   : > { %3195 = vmatmul.bf16.gmra.mxu3 %v10811_v1  ;;  %3289 = vmatmul.bf16.gmra.mxu0 %v1592_v47  ;;  %v2296_v1 = vsel %vm11782_vm14, %v9641_v62, %v2295_v27  ;;  %v2299_v37 = vsel %vm11782_vm14, %v2297_v49, %v2298_v59  ;;  %v1173_v47 = vshrl.u32 %v879_v23, 16  ;;  %v1186_v27 = vshrl.u32 %v12215_v6, 16 }
 0x147   : > { %v2499_v62 = vunpack.c.l.b16 %v2296_v1  ;;  %v2500_v49 = vunpack.c.l.b16 %v2299_v37  ;;  %v1572_v44 = vunpack.c.l.b16 %v1171_v61  ;;  %v12246_v23 = vrot.slane %v1182_v10, 5 }
 0x148   : > { %v2928_v39 = vpop.f32.mrf.mxu2  ;;  %v1656_v41 = vpack.c.b16 %v1634_v18, %v1633_v43  ;;  %v9561_v37 = vrot.slane %v1302_v2, 9  ;;  %v1434_v10 = vrot.slane %v12199_v36, 5  ;;  %v1192_v18 = vshll.u32 %v12248_v32, 16 }
 0x149   : > { %v3156_v45 = vpop.f32.mrf.mxu3  ;;  %v3336_v3 = vpop.f32.mrf.mxu1  ;;  %v12231_v14 = vadd.f32 %v2928_v39, %v11887_v42  ;;  %v10812_v39 = vld [vmem:[#allocation2 + $0x6c] sm:$0xff]  ;;  %v1593_v61 = vpack.c.b16 %v1572_v44, %v1571_v17  ;;  %v2305_v2 = vrot.slane %v11171_v12, 5  ;;  %v1438_v12 = vrot.slane %v12215_v6, 5  ;;  %v11172_v6 = vld [vmem:[#allocation2 + $0xa0] sm:$0xf] }
 0x14a   : > { %v3157_v55 = vadd.f32 %v3156_v45, %v2924_v28  ;;  %v2837_v28 = vadd.f32 %v11867_v56, %v11836_v20  ;;  %v1431_v20 = vrot.slane %v12176_v34, 5  ;;  %v1175_v56 = vrot.slane %v1173_v47, 4  ;;  %v10986_v34 = vld [vmem:[%s15321_s4 + $0xf8] sm:$0xff]  ;;  %v11170_v47 = vld [vmem:[#allocation2 + $0x94] sm:$0xf] }
 0x14b   : > { %v12238_v38 = vpop.f32.mrf.mxu0  ;;  %v1188_v45 = vrot.slane %v1186_v27, 4  ;;  %v2170_v27 = vld [vmem:[#allocation2 + $0x90] sm:$0xe]  ;;  %7268 = vmatpush.bf16.msra.mxu1 %v10986_v34 }
 0x14c   : > { %v3246_v59 = vadd.f32 %v12169_v60, %v3157_v55  ;;  %v2926_v42 = vadd.f32 %v2925_v48, %v2837_v28  ;;  %v1178_v60 = vrot.slane %v1176_v30, 5  ;;  %v2521_v48 = vpack.c.b16 %v2500_v49, %v2499_v62 }
 0x14d   : > { %v1433_v28 = vrot.slane %v1431_v20, 4  ;;  %v2302_v30 = vrot.slane %v11170_v47, 5  ;;  %v1189_v43 = vor.u32 %v1188_v45, %v12246_v23  ;;  %v1432_v17 = vsel %vm11782_vm14, %v9561_v37, %v1431_v20 }
 0x14e   : > { %v12240_v25 = vadd.f32 %v3334_v40, %v3246_v59  ;;  %v1179_v59 = vor.u32 %v1178_v60, %v1175_v56  ;;  %v9642_v44 = vrot.slane %v2170_v27, 9  ;;  %v1194_v45 = vrot.slane %v1192_v18, 5 }
 0x14f   : > { %v2304_v36 = vrot.slane %v2302_v30, 4  ;;  %v1435_v56 = vsel %vm11782_vm14, %v1433_v28, %v1434_v10  ;;  %v1190_v60 = vrot.slane %v1189_v43, 4  ;;  %v2842_v20 = vadd.f32 %v11908_v22, %v11876_v29 }
 0x150   : > { %v2930_v16 = vpop.f32.mrf.mxu2 }
 0x151   : > { %v3158_v40 = vpop.f32.mrf.mxu3  ;;  %v3339_v1 = vpop.f32.mrf.mxu1  ;;  %v2306_v28 = vsel %vm11782_vm14, %v2304_v36, %v2305_v2  ;;  %v1195_v22 = vsel %vm11405_vm11, %v1190_v60, %v1194_v45  ;;  %v1303_v2 = vld [vmem:[#allocation2 + $0x84] sm:$0xe] }
 0x152   : > { %v3159_v55 = vadd.f32 %v3158_v40, %v2926_v42 }
 0x153   : > { %v12257_v49 = vpop.f32.mrf.mxu0 }
 0x154   : > { %v3248_v62 = vadd.f32 %v12187_v21, %v3159_v55  ;;  %3378 = vmatmul.bf16.gmra.mxu1 %v1656_v41  ;;  %v1180_v21 = vrot.slane %v1179_v59, 4  ;;  %v881_v41 = vld [vmem:[#allocation2 + $0x90] sm:$0xf]  ;;  %v12267_v55 = vld [vmem:[#allocation2 + $0x94] sm:$0xf] }
 0x155   : > { %2972 = vmatmul.bf16.gmra.mxu2 %v2521_v48  ;;  %v1636_v48 = vunpack.c.l.b16 %v1435_v56  ;;  %v1197_v10 = vshrl.u32 %v881_v41, 16  ;;  %v1200_v59 = vshll.u32 %v881_v41, 16  ;;  %v1210_v43 = vshrl.u32 %v12267_v55, 16 }
 0x156   : > { %3200 = vmatmul.bf16.gmra.mxu3 %v10812_v39  ;;  %v12261_v42 = vadd.f32 %v3336_v3, %v3248_v62  ;;  %3294 = vmatmul.bf16.gmra.mxu0 %v1593_v61  ;;  %v1635_v3 = vunpack.c.l.b16 %v1432_v17  ;;  %v2303_v61 = vsel %vm11782_vm14, %v9642_v44, %v2302_v30  ;;  %v1185_v29 = vsel %vm11405_vm11, %v1180_v21, %v12246_v23 }
 0x157   : > { %v1206_v30 = vshll.u32 %v12267_v55, 16  ;;  %v2501_v18 = vunpack.c.l.b16 %v2303_v61  ;;  %v2931_v17 = vadd.f32 %v2930_v16, %v2842_v20  ;;  %v1573_v44 = vunpack.c.l.b16 %v1185_v29 }
 0x158   : > { %v2933_v34 = vpop.f32.mrf.mxu2  ;;  %v1574_v23 = vunpack.c.l.b16 %v1195_v22  ;;  %v1657_v36 = vpack.c.b16 %v1636_v48, %v1635_v3  ;;  %v1199_v56 = vrot.slane %v1197_v10, 4  ;;  %v1212_v60 = vrot.slane %v1210_v43, 4  ;;  %v2171_v10 = vld [vmem:[#allocation2 + $0x9c] sm:$0xe] }
 0x159   : > { %v3161_v40 = vpop.f32.mrf.mxu3  ;;  %v3341_v37 = vpop.f32.mrf.mxu1  ;;  %v12275_v47 = vadd.f32 %v2933_v34, %v11933_v13  ;;  %v2502_v13 = vunpack.c.l.b16 %v2306_v28  ;;  %v12290_v21 = vrot.slane %v1206_v30, 5  ;;  %v10813_v34 = vld [vmem:[#allocation2 + $0x78] sm:$0xff]  ;;  %v9562_v20 = vrot.slane %v1303_v2, 9 }
 0x15a   : > { %v3162_v39 = vadd.f32 %v3161_v40, %v12231_v14  ;;  %v12292_v40 = vld [vmem:[#allocation2 + $0x98] sm:$0x1]  ;;  %v1594_v16 = vpack.c.b16 %v1574_v23, %v1573_v44  ;;  %v1440_v28 = vrot.slane %v1438_v12, 4  ;;  %v1441_v3 = vrot.slane %v12248_v32, 5  ;;  %v10900_v32 = vld [vmem:[%s15318_s1 + $0x188] sm:$0xff] }
 0x15b   : > { %v12283_v27 = vpop.f32.mrf.mxu0  ;;  %v2522_v61 = vpack.c.b16 %v2502_v13, %v2501_v18  ;;  %v2309_v48 = vrot.slane %v11172_v6, 5  ;;  %v1216_v30 = vshll.u32 %v12292_v40, 16  ;;  %v883_v18 = vld [vmem:[#allocation2 + $0x9c] sm:$0xf]  ;;  %v1439_v13 = vsel %vm11782_vm14, %v9562_v20, %v1438_v12  ;;  %v12312_v23 = vld [vmem:[#allocation2 + $0xa0] sm:$0xf]  ;;  %4430 = vmatpush.bf16.msra.mxu2 %v10900_v32 }
 0x15c   : > { %v3251_v14 = vadd.f32 %v12206_v15, %v3162_v39  ;;  %v1202_v15 = vrot.slane %v1200_v59, 5  ;;  %v1213_v59 = vor.u32 %v1212_v60, %v12290_v21  ;;  %v9643_v44 = vrot.slane %v2171_v10, 9 }
 0x15d   : > { %v1218_v60 = vrot.slane %v1216_v30, 5  ;;  %v1221_v12 = vshrl.u32 %v883_v18, 16  ;;  %v1224_v20 = vshll.u32 %v883_v18, 16 }
 0x15e   : > { %v12287_v62 = vadd.f32 %v3339_v1, %v3251_v14  ;;  %v1203_v14 = vor.u32 %v1202_v15, %v1199_v56  ;;  %v1214_v15 = vrot.slane %v1213_v59, 4 }
 0x15f   : > { %v1223_v32 = vrot.slane %v1221_v12, 4  ;;  %v10814_v12 = vld [vmem:[#allocation2 + $0x84] sm:$0xff] }
 0x160   : > { %v2935_v1 = vpop.f32.mrf.mxu2  ;;  %v1204_v56 = vrot.slane %v1203_v14, 4  ;;  %v2310_v14 = vsel %vm11782_vm14, %v9643_v44, %v2309_v48 }
 0x161   : > { %v3163_v45 = vpop.f32.mrf.mxu3  ;;  %v3344_v41 = vpop.f32.mrf.mxu1 }
 0x162   : > { %v3164_v39 = vadd.f32 %v3163_v45, %v2931_v17  ;;  %v1442_v17 = vsel %vm11782_vm14, %v1440_v28, %v1441_v3  ;;  %v2847_v45 = vadd.f32 %v11947_v58, %v11926_v52  ;;  %v1230_v28 = vshll.u32 %v12312_v23, 16 }
 0x163   : > { %v12296_v22 = vpop.f32.mrf.mxu0  ;;  %v1234_v3 = vshrl.u32 %v12312_v23, 16  ;;  %v1638_v10 = vunpack.c.l.b16 %v1442_v17  ;;  %v1209_v59 = vsel %vm11405_vm11, %v1204_v56, %v12290_v21  ;;  %v2503_v17 = vunpack.c.l.b16 %v2310_v14  ;;  %v12341_v21 = vld [vmem:[#allocation2 + $0xa4] sm:$0x1] }
 0x164   : > { %v3253_v29 = vadd.f32 %v12238_v38, %v3164_v39  ;;  %3383 = vmatmul.bf16.gmra.mxu1 %v1657_v36  ;;  %v10908_v38 = vld [vmem:[%s15318_s1 + $0x1c8] sm:$0xff]  ;;  %v11173_v36 = vld [vmem:[#allocation2 + $0xa4] sm:$0x1]  ;;  %v2936_v30 = vadd.f32 %v2935_v1, %v2847_v45  ;;  %v12339_v18 = vrot.slane %v1230_v28, 5  ;;  %v1445_v1 = vrot.slane %v12267_v55, 5 }
 0x165   : > { %2977 = vmatmul.bf16.gmra.mxu2 %v2522_v61  ;;  %v2312_v2 = vrot.slane %v11173_v36, 5  ;;  %4519 = vmatpush.bf16.msra.mxu3 %v10908_v38 }
 0x166   : > { %3205 = vmatmul.bf16.gmra.mxu3 %v10813_v34  ;;  %v12300_v43 = vadd.f32 %v3341_v37, %v3253_v29  ;;  %3299 = vmatmul.bf16.gmra.mxu0 %v1594_v16  ;;  %v2311_v37 = vrot.slane %v2309_v48, 4  ;;  %v1637_v29 = vunpack.c.l.b16 %v1439_v13  ;;  %v1226_v48 = vrot.slane %v1224_v20, 5  ;;  %v2172_v20 = vld [vmem:[#allocation2 + $0xa8] sm:$0xe] }
 0x167   : > { %v1236_v13 = vrot.slane %v1234_v3, 4 }
 0x168   : > { %v2938_v16 = vpop.f32.mrf.mxu2  ;;  %v1227_v28 = vor.u32 %v1226_v48, %v1223_v32 }
 0x169   : > { %v3166_v39 = vpop.f32.mrf.mxu3  ;;  %v3346_v34 = vpop.f32.mrf.mxu1  ;;  %v12320_v6 = vadd.f32 %v2938_v16, %v11971_v57  ;;  %v1219_v57 = vsel %vm11405_vm11, %v1214_v15, %v1218_v60  ;;  %v1304_v15 = vld [vmem:[#allocation2 + $0x90] sm:$0xe]  ;;  %v11174_v60 = vld [vmem:[#allocation2 + $0xac] sm:$0xf]  ;;  %v1237_v3 = vor.u32 %v1236_v13, %v12339_v18 }
 0x16a   : > { %v3167_v61 = vadd.f32 %v3166_v39, %v12275_v47  ;;  %v2313_v47 = vsel %vm11782_vm14, %v2311_v37, %v2312_v2  ;;  %v1575_v37 = vunpack.c.l.b16 %v1209_v59  ;;  %v1576_v36 = vunpack.c.l.b16 %v1219_v57  ;;  %v10985_v16 = vld [vmem:[%s15321_s4 + $0xf0] sm:$0xff] }
 0x16b   : > { %v12325_v58 = vpop.f32.mrf.mxu0  ;;  %v2504_v44 = vunpack.c.l.b16 %v2313_v47  ;;  %v1658_v2 = vpack.c.b16 %v1638_v10, %v1637_v29  ;;  %v2316_v45 = vrot.slane %v11174_v60, 5  ;;  %v1240_v29 = vshll.u32 %v12341_v21, 16  ;;  %7269 = vmatpush.bf16.msra.mxu1 %v10985_v16 }
 0x16c   : > { %v3256_v52 = vadd.f32 %v12257_v49, %v3167_v61  ;;  %v10916_v49 = vld [vmem:[%s15318_s1 + $0x208] sm:$0xff]  ;;  %v1595_v55 = vpack.c.b16 %v1576_v36, %v1575_v37  ;;  %v9563_v47 = vrot.slane %v1304_v15, 9  ;;  %v1447_v59 = vrot.slane %v1445_v1, 4 }
 0x16d   : > { %4608 = vmatpush.bf16.msra.mxu0 %v10916_v49  ;;  %v2523_v10 = vpack.c.b16 %v2504_v44, %v2503_v17  ;;  %v1448_v57 = vrot.slane %v12292_v40, 5  ;;  %v2318_v49 = vrot.slane %v2316_v45, 4  ;;  %v1228_v13 = vrot.slane %v1227_v28, 4  ;;  %v12355_v37 = vld [vmem:[#allocation2 + $0xac] sm:$0xf] }
 0x16e   : > { %v12334_v38 = vadd.f32 %v3344_v41, %v3256_v52  ;;  %v1238_v17 = vrot.slane %v1237_v3, 4  ;;  %v1242_v44 = vrot.slane %v1240_v29, 5  ;;  %v1446_v40 = vsel %vm11782_vm14, %v9563_v47, %v1445_v1 }
 0x16f   : > { %v1449_v15 = vsel %vm11782_vm14, %v1447_v59, %v1448_v57  ;;  %v1233_v16 = vsel %vm11405_vm11, %v1228_v13, %v12339_v18  ;;  %v1258_v29 = vshrl.u32 %v12355_v37, 16  ;;  %v1639_v18 = vunpack.c.l.b16 %v1446_v40 }
 0x170   : > { %v2940_v61 = vpop.f32.mrf.mxu2  ;;  %v1577_v57 = vunpack.c.l.b16 %v1233_v16  ;;  %v11176_v16 = vld [vmem:[#allocation2 + $0xb8] sm:$0xf] }
 0x171   : > { %v3168_v41 = vpop.f32.mrf.mxu3  ;;  %v3349_v56 = vpop.f32.mrf.mxu1 }
 0x172   : > { %v3169_v39 = vadd.f32 %v3168_v41, %v2936_v30  ;;  %v9644_v30 = vrot.slane %v2172_v20, 9  ;;  %v11175_v41 = vld [vmem:[#allocation2 + $0xb0] sm:$0x1]  ;;  %v1243_v20 = vsel %vm11405_vm11, %v1238_v17, %v1242_v44 }
 0x173   : > { %v12350_v52 = vpop.f32.mrf.mxu0  ;;  %v2319_v32 = vrot.slane %v11175_v41, 5  ;;  %v1305_v41 = vld [vmem:[#allocation2 + $0x9c] sm:$0xe] }
 0x174   : > { %v3258_v14 = vadd.f32 %v12283_v27, %v3169_v39  ;;  %3388 = vmatmul.bf16.gmra.mxu1 %v1658_v2  ;;  %v885_v27 = vld [vmem:[#allocation2 + $0xa8] sm:$0xf] }
 0x175   : > { %2982 = vmatmul.bf16.gmra.mxu2 %v2523_v10  ;;  %v2320_v60 = vsel %vm11782_vm14, %v2318_v49, %v2319_v32  ;;  %v1245_v1 = vshrl.u32 %v885_v27, 16  ;;  %v1248_v3 = vshll.u32 %v885_v27, 16  ;;  %v1452_v32 = vrot.slane %v12312_v23, 5 }
 0x176   : > { %3210 = vmatmul.bf16.gmra.mxu3 %v10814_v12  ;;  %v12353_v48 = vadd.f32 %v3346_v34, %v3258_v14  ;;  %3304 = vmatmul.bf16.gmra.mxu0 %v1595_v55  ;;  %v2317_v34 = vsel %vm11782_vm14, %v9644_v30, %v2316_v45  ;;  %v1254_v45 = vshll.u32 %v12355_v37, 16  ;;  %v1640_v14 = vunpack.c.l.b16 %v1449_v15 }
 0x177   : > { %v2505_v47 = vunpack.c.l.b16 %v2317_v34  ;;  %v2506_v59 = vunpack.c.l.b16 %v2320_v60  ;;  %v1578_v30 = vunpack.c.l.b16 %v1243_v20  ;;  %v1247_v13 = vrot.slane %v1245_v1, 4  ;;  %v10815_v60 = vld [vmem:[#allocation2 + $0x90] sm:$0xff] }
 0x178   : > { %v2943_v12 = vpop.f32.mrf.mxu2  ;;  %v1250_v17 = vrot.slane %v1248_v3, 5  ;;  %v12384_v44 = vrot.slane %v1254_v45, 5  ;;  %v2857_v27 = vadd.f32 %v12042_v46, %v12010_v7  ;;  %v9564_v34 = vrot.slane %v1305_v41, 9  ;;  %v2173_v3 = vld [vmem:[#allocation2 + $0xb4] sm:$0xe] }
 0x179   : > { %v3171_v36 = vpop.f32.mrf.mxu3  ;;  %v3351_v2 = vpop.f32.mrf.mxu1  ;;  %v12372_v28 = vadd.f32 %v2943_v12, %v12023_v33  ;;  %v2524_v15 = vpack.c.b16 %v2506_v59, %v2505_v47  ;;  %v1454_v23 = vrot.slane %v1452_v32, 4  ;;  %v1455_v12 = vrot.slane %v12341_v21, 5  ;;  %v11177_v47 = vld [vmem:[#allocation2 + $0xbc] sm:$0x1] }
 0x17a   : > { %v3172_v39 = vadd.f32 %v3171_v36, %v12320_v6  ;;  %v2852_v6 = vadd.f32 %v12005_v53, %v11959_v11  ;;  %v1260_v11 = vrot.slane %v1258_v29, 4  ;;  %v1659_v53 = vpack.c.b16 %v1640_v14, %v1639_v18 }
 0x17b   : > { %v12379_v55 = vpop.f32.mrf.mxu0  ;;  %v2323_v20 = vrot.slane %v11176_v16, 5  ;;  %v1251_v45 = vor.u32 %v1250_v17, %v1247_v13  ;;  %v9645_v21 = vrot.slane %v2173_v3, 9  ;;  %v2326_v59 = vrot.slane %v11177_v47, 5 }
 0x17c   : > { %v3261_v10 = vadd.f32 %v12296_v22, %v3172_v39  ;;  %v2941_v49 = vadd.f32 %v2940_v61, %v2852_v6  ;;  %v12386_v22 = vld [vmem:[#allocation2 + $0xb0] sm:$0x1]  ;;  %v1261_v29 = vor.u32 %v1260_v11, %v12384_v44 }
 0x17d   : > { %v1264_v7 = vshll.u32 %v12386_v22, 16  ;;  %v2325_v14 = vrot.slane %v2323_v20, 4 }
 0x17e   : > { %v12381_v33 = vadd.f32 %v3349_v56, %v3261_v10  ;;  %v1596_v56 = vpack.c.b16 %v1578_v30, %v1577_v57  ;;  %v1453_v10 = vsel %vm11782_vm14, %v9564_v34, %v1452_v32  ;;  %v10899_v57 = vld [vmem:[%s15318_s1 + $0x180] sm:$0xff]  ;;  %v1456_v30 = vsel %vm11782_vm14, %v1454_v23, %v1455_v12  ;;  %v887_v32 = vld [vmem:[#allocation2 + $0xb4] sm:$0xf] }
 0x17f   : > { %v1266_v41 = vrot.slane %v1264_v7, 5  ;;  %4431 = vmatpush.bf16.msra.mxu2 %v10899_v57  ;;  %v1641_v11 = vunpack.c.l.b16 %v1453_v10  ;;  %v2327_v34 = vsel %vm11782_vm14, %v2325_v14, %v2326_v59  ;;  %v1269_v23 = vshrl.u32 %v887_v32, 16 }
 0x180   : > { %v2945_v39 = vpop.f32.mrf.mxu2  ;;  %v1272_v16 = vshll.u32 %v887_v32, 16 }
 0x181   : > { %v3173_v36 = vpop.f32.mrf.mxu3  ;;  %v3354_v40 = vpop.f32.mrf.mxu1  ;;  %v2946_v1 = vadd.f32 %v2945_v39, %v2857_v27  ;;  %v1271_v14 = vrot.slane %v1269_v23, 4 }
 0x182   : > { %v3174_v61 = vadd.f32 %v3173_v36, %v2941_v49  ;;  %v1252_v49 = vrot.slane %v1251_v45, 4  ;;  %v1274_v47 = vrot.slane %v1272_v16, 5 }
 0x183   : > { %v12394_v6 = vpop.f32.mrf.mxu0 }
 0x184   : > { %v3263_v46 = vadd.f32 %v12325_v58, %v3174_v61  ;;  %3393 = vmatmul.bf16.gmra.mxu1 %v1659_v53  ;;  %v10907_v58 = vld [vmem:[%s15318_s1 + $0x1c0] sm:$0xff]  ;;  %v12410_v53 = vld [vmem:[#allocation2 + $0xb8] sm:$0xf]  ;;  %v1275_v23 = vor.u32 %v1274_v47, %v1271_v14 }
 0x185   : > { %2987 = vmatmul.bf16.gmra.mxu2 %v2524_v15  ;;  %4520 = vmatpush.bf16.msra.mxu3 %v10907_v58  ;;  %v1642_v15 = vunpack.c.l.b16 %v1456_v30  ;;  %v1282_v3 = vshrl.u32 %v12410_v53, 16 }
 0x186   : > { %3215 = vmatmul.bf16.gmra.mxu3 %v10815_v60  ;;  %v12398_v18 = vadd.f32 %v3351_v2, %v3263_v46  ;;  %3309 = vmatmul.bf16.gmra.mxu0 %v1596_v56  ;;  %v1262_v2 = vrot.slane %v1261_v29, 4  ;;  %v2324_v56 = vsel %vm11782_vm14, %v9645_v21, %v2323_v20  ;;  %v1257_v60 = vsel %vm11405_vm11, %v1252_v49, %v12384_v44  ;;  %v10915_v44 = vld [vmem:[%s15318_s1 + $0x200] sm:$0xff]  ;;  %v1306_v21 = vld [vmem:[#allocation2 + $0xa8] sm:$0xe] }
 0x187   : > { %v1278_v20 = vshll.u32 %v12410_v53, 16  ;;  %v2507_v45 = vunpack.c.l.b16 %v2324_v56  ;;  %v1579_v7 = vunpack.c.l.b16 %v1257_v60  ;;  %v1660_v10 = vpack.c.b16 %v1642_v15, %v1641_v11  ;;  %4609 = vmatpush.bf16.msra.mxu0 %v10915_v44  ;;  %v10984_v11 = vld [vmem:[%s15321_s4 + $0xe8] sm:$0xff]  ;;  %v11178_v56 = vld [vmem:[#allocation2 + $0xc4] sm:$0xf] }
 0x188   : > { %v2948_v36 = vpop.f32.mrf.mxu2  ;;  %v1267_v39 = vsel %vm11405_vm11, %v1262_v2, %v1266_v41  ;;  %v1284_v57 = vrot.slane %v1282_v3, 4  ;;  %v10816_v2 = vld [vmem:[#allocation2 + $0x9c] sm:$0xff]  ;;  %v1462_v15 = vrot.slane %v12386_v22, 5  ;;  %7270 = vmatpush.bf16.msra.mxu1 %v10984_v11  ;;  %v11179_v3 = vld [vmem:[#allocation2 + $0xc8] sm:$0x1] }
 0x189   : > { %v3176_v13 = vpop.f32.mrf.mxu3  ;;  %v12408_v17 = vpop.f32.mrf.mxu1  ;;  %v2949_v61 = vadd.f32 %v2948_v36, %v12079_v8  ;;  %v2508_v8 = vunpack.c.l.b16 %v2327_v34  ;;  %v1580_v46 = vunpack.c.l.b16 %v1267_v39  ;;  %v1280_v59 = vrot.slane %v1278_v20, 5  ;;  %v2174_v39 = vld [vmem:[#allocation2 + $0xc0] sm:$0xe] }
 0x18a   : > { %v3177_v27 = vadd.f32 %v3176_v13, %v12372_v28  ;;  %v2330_v34 = vrot.slane %v11178_v56, 5 }
 0x18b   : > { %v12424_v12 = vpop.f32.mrf.mxu0  ;;  %v2525_v32 = vpack.c.b16 %v2508_v8, %v2507_v45  ;;  %v1597_v13 = vpack.c.b16 %v1580_v46, %v1579_v7  ;;  %v2333_v45 = vrot.slane %v11179_v3, 5  ;;  %v1276_v8 = vrot.slane %v1275_v23, 4 }
 0x18c   : > { %v3266_v28 = vadd.f32 %v12350_v52, %v3177_v27  ;;  %v1459_v52 = vrot.slane %v12355_v37, 5  ;;  %v9565_v27 = vrot.slane %v1306_v21, 9  ;;  %v2332_v20 = vrot.slane %v2330_v34, 4 }
 0x18e   : > { %v12428_v29 = vadd.f32 %v3354_v40, %v3266_v28  ;;  %v12434_v40 = vld [vmem:[#allocation2 + $0xbc] sm:$0x1]  ;;  %v1461_v36 = vrot.slane %v1459_v52, 4  ;;  %v1285_v28 = vor.u32 %v1284_v57, %v1280_v59 }
 0x18f   : > { %v1288_v16 = vshll.u32 %v12434_v40, 16 }
 0x190   : > { %v2950_v41 = vpop.f32.mrf.mxu2  ;;  %v1463_v22 = vsel %vm11782_vm14, %v1461_v36, %v1462_v15  ;;  %v1286_v7 = vrot.slane %v1285_v28, 4  ;;  %v10817_v28 = vld [vmem:[#allocation2 + $0xa8] sm:$0xff] }
 0x191   : > { %v3178_v58 = vpop.f32.mrf.mxu3  ;;  %v3359_v30 = vpop.f32.mrf.mxu1  ;;  %v2951_v37 = vadd.f32 %v2950_v41, %v12093_v5  ;;  %v1460_v5 = vsel %vm11782_vm14, %v9565_v27, %v1459_v52  ;;  %v1290_v46 = vrot.slane %v1288_v16, 5  ;;  %v2334_v41 = vsel %vm11782_vm14, %v2332_v20, %v2333_v45 }
 0x192   : > { %v3179_v49 = vadd.f32 %v3178_v58, %v2946_v1  ;;  %v1643_v57 = vunpack.c.l.b16 %v1460_v5  ;;  %v1644_v58 = vunpack.c.l.b16 %v1463_v22  ;;  %v2510_v27 = vunpack.c.l.b16 %v2334_v41 }
 0x193   : > { %v12444_v1 = vpop.f32.mrf.mxu0 }
 0x194   : > { %v12442_v60 = vadd.f32 %v12379_v55, %v3179_v49  ;;  %3398 = vmatmul.bf16.gmra.mxu1 %v1660_v10  ;;  %v9646_v55 = vrot.slane %v2174_v39, 9  ;;  %v1661_v15 = vpack.c.b16 %v1644_v58, %v1643_v57  ;;  %v1466_v39 = vrot.slane %v12410_v53, 5  ;;  %v3447_v53 = vld [vmem:[#allocation2 + $0x20] sm:$0x1] }
 0x195   : > { %2992 = vmatmul.bf16.gmra.mxu2 %v2525_v32  ;;  %v1281_v32 = vsel %vm11405_vm11, %v1276_v8, %v1280_v59 }
 0x196   : > { %3220 = vmatmul.bf16.gmra.mxu3 %v10816_v2  ;;  %3314 = vmatmul.bf16.gmra.mxu0 %v1597_v13  ;;  %v2331_v52 = vsel %vm11782_vm14, %v9646_v55, %v2330_v34  ;;  %v1581_v11 = vunpack.c.l.b16 %v1281_v32  ;;  %v1307_v34 = vld [vmem:[#allocation2 + $0xb4] sm:$0xe]  ;;  %v3416_v55 = vld [vmem:[#allocation2 + $0x1c] sm:$0xf]  ;;  %v1468_v8 = vrot.slane %v1466_v39, 4 }
 0x197   : > { %v9566_v3 = vrot.slane %v1307_v34, 9  ;;  %v3913_v45 = vrot.slane %v3416_v55, 5 }
 0x198   : > { %v2953_v14 = vpop.f32.mrf.mxu2 }
 0x199   : > { %v3181_v44 = vpop.f32.mrf.mxu3  ;;  %v12451_v10 = vpop.f32.mrf.mxu1  ;;  %v2954_v47 = vadd.f32 %v2953_v14, %v12116_v26  ;;  %v2509_v26 = vunpack.c.l.b16 %v2331_v52 }
 0x19a   : > { %v3182_v21 = vadd.f32 %v3181_v44, %v2949_v61  ;;  %v1291_v61 = vsel %vm11405_vm11, %v1286_v7, %v1290_v46  ;;  %v1469_v7 = vrot.slane %v12434_v40, 5  ;;  %v1467_v46 = vsel %vm11782_vm14, %v9566_v3, %v1466_v39 }
 0x19b   : > { %v12457_v2 = vpop.f32.mrf.mxu0  ;;  %v1582_v36 = vunpack.c.l.b16 %v1291_v61  ;;  %v2526_v5 = vpack.c.b16 %v2510_v27, %v2509_v26  ;;  %v1645_v61 = vunpack.c.l.b16 %v1467_v46  ;;  %v3473_v26 = vshll.u32 %v3416_v55, 16 }
 0x19c   : > { %v3271_v49 = vadd.f32 %v12394_v6, %v3182_v21  ;;  %v3916_v21 = vrot.slane %v3447_v53, 5  ;;  %v1470_v58 = vsel %vm11782_vm14, %v1468_v8, %v1469_v7  ;;  %v3477_v27 = vshrl.u32 %v3416_v55, 16  ;;  %v10818_v8 = vld [vmem:[#allocation2 + $0xb4] sm:$0xff] }
 0x19d   : > { %v1598_v22 = vpack.c.b16 %v1582_v36, %v1581_v11 }
 0x19e   : > { %v12465_v13 = vadd.f32 %v3359_v30, %v3271_v49 }
 0x1a0   : > { %v2955_v16 = vpop.f32.mrf.mxu2 }
 0x1a1   : > { %v3183_v56 = vpop.f32.mrf.mxu3  ;;  %v3364_v6 = vpop.f32.mrf.mxu1  ;;  %v2956_v59 = vadd.f32 %v2955_v16, %v12127_v0  ;;  %v3415_v0 = vld [vmem:[#allocation2 + $0x18] sm:$0xf]  ;;  %v3475_v16 = vrot.slane %v3473_v26, 5 }
 0x1a2   : > { %v3184_v23 = vadd.f32 %v3183_v56, %v2951_v37  ;;  %v3847_v37 = vld [vmem:[#allocation2 + $0x18] sm:$0xe]  ;;  %v3464_v49 = vshrl.u32 %v3415_v0, 16  ;;  %v3467_v41 = vshll.u32 %v3415_v0, 16 }
 0x1a3   : > { %v12472_v20 = vpop.f32.mrf.mxu0  ;;  %v9951_v44 = vrot.slane %v3847_v37, 9  ;;  %v10883_v0 = vld [vmem:[#allocation2 + $0x18] sm:$0xff] }
 0x1a4   : > { %v12470_v30 = vadd.f32 %v12424_v12, %v3184_v23  ;;  %3403 = vmatmul.bf16.gmra.mxu1 %v1661_v15  ;;  %v3915_v12 = vrot.slane %v3913_v45, 4  ;;  %v1646_v15 = vunpack.c.l.b16 %v1470_v58  ;;  %v3466_v39 = vrot.slane %v3464_v49, 4 }
 0x1a5   : > { %2997 = vmatmul.bf16.gmra.mxu2 %v2526_v5  ;;  %v3914_v56 = vsel %vm11782_vm14, %v9951_v44, %v3913_v45  ;;  %v3469_v23 = vrot.slane %v3467_v41, 5  ;;  %v3479_v5 = vrot.slane %v3477_v27, 4  ;;  %v10983_v45 = vld [vmem:[%s15321_s4 + $0xe0] sm:$0xff] }
 0x1a6   : > { %3225 = vmatmul.bf16.gmra.mxu3 %v10817_v28  ;;  %3319 = vmatmul.bf16.gmra.mxu0 %v1598_v22  ;;  %v3917_v34 = vsel %vm11782_vm14, %v3915_v12, %v3916_v21  ;;  %v4167_v28 = vunpack.c.l.b16 %v3914_v56  ;;  %v1662_v22 = vpack.c.b16 %v1646_v15, %v1645_v61  ;;  %v3483_v12 = vshll.u32 %v3447_v53, 16  ;;  %v3418_v21 = vld [vmem:[#allocation2 + $0x28] sm:$0xf]  ;;  %v3417_v61 = vld [vmem:[#allocation2 + $0x24] sm:$0xf] }
 0x1a7   : > { %v3470_v37 = vor.u32 %v3469_v23, %v3466_v39  ;;  %v3480_v44 = vor.u32 %v3479_v5, %v3475_v16  ;;  %7271 = vmatpush.bf16.msra.mxu1 %v10983_v45  ;;  %v3488_v39 = vshrl.u32 %v3417_v61, 16  ;;  %v3491_v23 = vshll.u32 %v3417_v61, 16 }
 0x1a8   : > { %v2958_v40 = vpop.f32.mrf.mxu2  ;;  %v3485_v41 = vrot.slane %v3483_v12, 5  ;;  %v3497_v5 = vshll.u32 %v3418_v21, 16 }
 0x1a9   : > { %v3186_v14 = vpop.f32.mrf.mxu3  ;;  %v12477_v57 = vpop.f32.mrf.mxu1  ;;  %v2959_v32 = vadd.f32 %v2958_v40, %v12166_v24  ;;  %v4168_v24 = vunpack.c.l.b16 %v3917_v34  ;;  %v3848_v40 = vld [vmem:[#allocation2 + $0x24] sm:$0xe]  ;;  %v3471_v49 = vrot.slane %v3470_v37, 4  ;;  %v3490_v45 = vrot.slane %v3488_v39, 4  ;;  %v3449_v39 = vld [vmem:[#allocation2 + $0x38] sm:$0x1] }
 0x1aa   : > { %v3187_v52 = vadd.f32 %v3186_v14, %v2954_v47  ;;  %v9952_v26 = vrot.slane %v3848_v40, 9 }
 0x1ab   : > { %v12483_v36 = vpop.f32.mrf.mxu0  ;;  %v4199_v46 = vpack.c.b16 %v4168_v24, %v4167_v28  ;;  %v3476_v56 = vsel %vm11405_vm11, %v3471_v49, %v3475_v16 }
 0x1ac   : > { %v3276_v11 = vadd.f32 %v12444_v1, %v3187_v52  ;;  %v3448_v52 = vld [vmem:[#allocation2 + $0x2c] sm:$0x1] }
 0x1ad   : > { %v3923_v27 = vrot.slane %v3448_v52, 5 }
 0x1ae   : > { %v12489_v47 = vadd.f32 %v3364_v6, %v3276_v11 }
 0x1b0   : > { %v2960_v7 = vpop.f32.mrf.mxu2 }
 0x1b1   : > { %v3188_v55 = vpop.f32.mrf.mxu3  ;;  %v3369_v1 = vpop.f32.mrf.mxu1  ;;  %v2961_v6 = vadd.f32 %v2960_v7, %v12182_v35  ;;  %v3481_v35 = vrot.slane %v3480_v44, 4  ;;  %v3499_v44 = vrot.slane %v3497_v5, 5 }
 0x1b2   : > { %v3189_v3 = vadd.f32 %v3188_v55, %v2956_v59  ;;  %v3920_v59 = vrot.slane %v3418_v21, 5 }
 0x1b3   : > { %v12498_v58 = vpop.f32.mrf.mxu0  ;;  %v3486_v28 = vsel %vm11405_vm11, %v3481_v35, %v3485_v41 }
 0x1b4   : > { %v12496_v14 = vadd.f32 %v12457_v2, %v3189_v3  ;;  %3408 = vmatmul.bf16.gmra.mxu1 %v1662_v22  ;;  %v3922_v53 = vrot.slane %v3920_v59, 4  ;;  %v3501_v22 = vshrl.u32 %v3418_v21, 16  ;;  %v4104_v37 = vunpack.c.l.b16 %v3486_v28  ;;  %v3419_v28 = vld [vmem:[#allocation2 + $0x30] sm:$0xf] }
 0x1b5   : > { %4432 = vmatmul.bf16.vlgmr.msra.gmra.mxu2 %v10883_v0  ;;  %v3493_v0 = vrot.slane %v3491_v23, 5 }
 0x1b6   : > { %3230 = vmatmul.bf16.gmra.mxu3 %v10818_v8  ;;  %4610 = vmatmul.bf16.vlgmr.msra.gmra.mxu0 %v4199_v46  ;;  %v3924_v16 = vsel %vm11782_vm14, %v3922_v53, %v3923_v27  ;;  %v4103_v8 = vunpack.c.l.b16 %v3476_v56  ;;  %v3503_v12 = vrot.slane %v3501_v22, 4  ;;  %v3507_v27 = vshll.u32 %v3448_v52, 16 }
 0x1b7   : > { %v3494_v41 = vor.u32 %v3493_v0, %v3490_v45  ;;  %v3515_v45 = vshll.u32 %v3419_v28, 16 }
 0x1b8   : > { %v2963_v34 = vpop.f32.mrf.mxu2  ;;  %v3504_v53 = vor.u32 %v3503_v12, %v3499_v44  ;;  %v3509_v23 = vrot.slane %v3507_v27, 5 }
 0x1b9   : > { %v3191_v11 = vpop.f32.mrf.mxu3  ;;  %v12500_v2 = vpop.f32.mrf.mxu1  ;;  %v2964_v24 = vadd.f32 %v2963_v34, %v11859_v50  ;;  %v4170_v50 = vunpack.c.l.b16 %v3924_v16 }
 0x1ba   : > { %v3192_v15 = vadd.f32 %v3191_v11, %v2959_v32  ;;  %v3921_v32 = vsel %vm11782_vm14, %v9952_v26, %v3920_v59  ;;  %v4135_v59 = vpack.c.b16 %v4104_v37, %v4103_v8  ;;  %v10884_v26 = vld [vmem:[#allocation2 + $0x24] sm:$0xff]  ;;  %v3420_v11 = vld [vmem:[#allocation2 + $0x34] sm:$0xf]  ;;  %v3512_v37 = vshrl.u32 %v3419_v28, 16 }
 0x1bb   : > { %v12508_v3 = vpop.f32.mrf.mxu0  ;;  %v4169_v46 = vunpack.c.l.b16 %v3921_v32  ;;  %v3927_v34 = vrot.slane %v3420_v11, 5  ;;  %v3525_v12 = vshrl.u32 %v3420_v11, 16 }
 0x1bc   : > { %v3281_v55 = vadd.f32 %v12472_v20, %v3192_v15  ;;  %v2877_v20 = vadd.f32 %v11880_v31, %v11861_v51  ;;  %v3849_v51 = vld [vmem:[#allocation2 + $0x30] sm:$0xe]  ;;  %v3495_v31 = vrot.slane %v3494_v41, 4  ;;  %v3514_v41 = vrot.slane %v3512_v37, 4 }
 0x1bd   : > { %v9953_v5 = vrot.slane %v3849_v51, 9  ;;  %v3929_v22 = vrot.slane %v3927_v34, 4  ;;  %v3527_v27 = vrot.slane %v3525_v12, 4 }
 0x1be   : > { %v12514_v7 = vadd.f32 %v3369_v1, %v3281_v55  ;;  %v4200_v1 = vpack.c.b16 %v4170_v50, %v4169_v46  ;;  %v3930_v55 = vrot.slane %v3449_v39, 5  ;;  %v3500_v16 = vsel %vm11405_vm11, %v3495_v31, %v3499_v44 }
 0x1bf   : > { %v3521_v50 = vshll.u32 %v3420_v11, 16 }
 0x1c0   : > { %v2965_v35 = vpop.f32.mrf.mxu2  ;;  %v3931_v44 = vsel %vm11782_vm14, %v3929_v22, %v3930_v55 }
 0x1c1   : > { %v3193_v21 = vpop.f32.mrf.mxu3  ;;  %v3374_v40 = vpop.f32.mrf.mxu1  ;;  %v2966_v61 = vadd.f32 %v2965_v35, %v2877_v20 }
 0x1c2   : > { %v3194_v49 = vadd.f32 %v3193_v21, %v2961_v6  ;;  %v3505_v6 = vrot.slane %v3504_v53, 4  ;;  %v3523_v53 = vrot.slane %v3521_v50, 5  ;;  %v3421_v50 = vld [vmem:[#allocation2 + $0x3c] sm:$0xf] }
 0x1c3   : > { %v12521_v56 = vpop.f32.mrf.mxu0 }
 0x1c4   : > { %v12519_v15 = vadd.f32 %v12483_v36, %v3194_v49  ;;  %v3510_v0 = vsel %vm11405_vm11, %v3505_v6, %v3509_v23  ;;  %v4105_v49 = vunpack.c.l.b16 %v3500_v16  ;;  %v3528_v55 = vor.u32 %v3527_v27, %v3523_v53 }
 0x1c5   : > { %4437 = vmatmul.bf16.gmra.mxu2 %v10884_v26  ;;  %v4106_v35 = vunpack.c.l.b16 %v3510_v0  ;;  %v3517_v26 = vrot.slane %v3515_v45, 5 }
 0x1c6   : > { %4521 = vmatmul.bf16.vlgmr.msra.gmra.mxu3 %v4135_v59  ;;  %4615 = vmatmul.bf16.gmra.mxu0 %v4200_v1  ;;  %v3529_v45 = vrot.slane %v3528_v55, 4 }
 0x1c7   : > { %v3518_v23 = vor.u32 %v3517_v26, %v3514_v41  ;;  %v3536_v41 = vshrl.u32 %v3421_v50, 16  ;;  %v3539_v26 = vshll.u32 %v3421_v50, 16 }
 0x1c8   : > { %v2968_v8 = vpop.f32.mrf.mxu2 }
 0x1c9   : > { %v3196_v52 = vpop.f32.mrf.mxu3  ;;  %v12523_v32 = vpop.f32.mrf.mxu1  ;;  %v2969_v46 = vadd.f32 %v2968_v8, %v11912_v63  ;;  %v4172_v63 = vunpack.c.l.b16 %v3931_v44  ;;  %v3850_v8 = vld [vmem:[#allocation2 + $0x3c] sm:$0xe]  ;;  %v3519_v37 = vrot.slane %v3518_v23, 4 }
 0x1ca   : > { %15365 = vst [vmem:[#allocation22_spill] sm:$0xff] %v12523_v32  ;;  %v3197_v36 = vadd.f32 %v3196_v52, %v2964_v24  ;;  %v3928_v24 = vsel %vm11782_vm14, %v9953_v5, %v3927_v34  ;;  %v4136_v34 = vpack.c.b16 %v4106_v35, %v4105_v49  ;;  %v10885_v5 = vld [vmem:[#allocation2 + $0x30] sm:$0xff]  ;;  %v3531_v52 = vshll.u32 %v3449_v39, 16 }
 0x1cb   : > { %v12531_v21 = vpop.f32.mrf.mxu0  ;;  %v4171_v1 = vunpack.c.l.b16 %v3928_v24  ;;  %v9954_v12 = vrot.slane %v3850_v8, 9  ;;  %v3524_v49 = vsel %vm11405_vm11, %v3519_v37, %v3523_v53  ;;  %v15369_v37 = vld [vmem:[#allocation8_spill] sm:$0xff] }
 0x1cc   : > { %v3286_v20 = vadd.f32 %v12498_v58, %v3197_v36  ;;  %v2882_v58 = vadd.f32 %v11929_v4, %v11895_v9  ;;  %v3422_v36 = vld [vmem:[#allocation2 + $0x40] sm:$0xf]  ;;  %v3533_v0 = vrot.slane %v3531_v52, 5 }
 0x1cd   : > { %v4201_v22 = vpack.c.b16 %v4172_v63, %v4171_v1  ;;  %v3934_v4 = vrot.slane %v3422_v36, 5  ;;  %v15367_v63 = vld [vmem:[#allocation9_spill] sm:$0xff] }
 0x1ce   : > { %v12537_v59 = vadd.f32 %v3374_v40, %v3286_v20  ;;  %v10982_v40 = vld [vmem:[%s15321_s4 + $0xd8] sm:$0xff]  ;;  %v3534_v1 = vsel %vm11405_vm11, %v3529_v45, %v3533_v0 }
 0x1cf   : > { %7272 = vmatpush.bf16.msra.mxu1 %v10982_v40  ;;  %v3936_v20 = vrot.slane %v3934_v4, 4  ;;  %v4108_v40 = vunpack.c.l.b16 %v3534_v1 }
 0x1d0   : > { %v2970_v6 = vpop.f32.mrf.mxu2 }
 0x1d1   : > { %v3198_v11 = vpop.f32.mrf.mxu3  ;;  %v3379_v51 = vpop.f32.mrf.mxu1  ;;  %v2971_v28 = vadd.f32 %v2970_v6, %v2882_v58  ;;  %v3545_v58 = vshll.u32 %v3422_v36, 16  ;;  %v4107_v6 = vunpack.c.l.b16 %v3524_v49 }
 0x1d2   : > { %v3199_v31 = vadd.f32 %v3198_v11, %v2966_v61  ;;  %v3450_v61 = vld [vmem:[#allocation2 + $0x44] sm:$0x1]  ;;  %v3549_v11 = vshrl.u32 %v3422_v36, 16 }
 0x1d3   : > { %v12547_v9 = vpop.f32.mrf.mxu0  ;;  %v3937_v39 = vrot.slane %v3450_v61, 5  ;;  %v3547_v8 = vrot.slane %v3545_v58, 5  ;;  %v3451_v58 = vld [vmem:[#allocation2 + $0x50] sm:$0x1] }
 0x1d4   : > { %v12545_v16 = vadd.f32 %v12508_v3, %v3199_v31  ;;  %v3551_v36 = vrot.slane %v3549_v11, 4  ;;  %v3851_v11 = vld [vmem:[#allocation2 + $0x48] sm:$0xe] }
 0x1d5   : > { %4442 = vmatmul.bf16.gmra.mxu2 %v10885_v5  ;;  %v3938_v53 = vsel %vm11782_vm14, %v3936_v20, %v3937_v39  ;;  %v3538_v5 = vrot.slane %v3536_v41, 4  ;;  %v10886_v39 = vld [vmem:[#allocation2 + $0x3c] sm:$0xff]  ;;  %v3424_v41 = vld [vmem:[#allocation2 + $0x4c] sm:$0xf] }
 0x1d6   : > { %4526 = vmatmul.bf16.gmra.mxu3 %v4136_v34  ;;  %4620 = vmatmul.bf16.gmra.mxu0 %v4201_v22  ;;  %v3541_v22 = vrot.slane %v3539_v26, 5  ;;  %v4174_v52 = vunpack.c.l.b16 %v3938_v53  ;;  %v3552_v49 = vor.u32 %v3551_v36, %v3547_v8  ;;  %v3423_v53 = vld [vmem:[#allocation2 + $0x48] sm:$0xf] }
 0x1d7   : > { %v3560_v36 = vshrl.u32 %v3423_v53, 16 }
 0x1d8   : > { %v2973_v35 = vpop.f32.mrf.mxu2 }
 0x1d9   : > { %v3201_v24 = vpop.f32.mrf.mxu3  ;;  %v12549_v44 = vpop.f32.mrf.mxu1  ;;  %v2974_v27 = vadd.f32 %v2973_v35, %v15367_v63  ;;  %v3555_v35 = vshll.u32 %v3450_v61, 16  ;;  %v3941_v63 = vrot.slane %v3424_v41, 5 }
 0x1da   : > { %15366 = vst [vmem:[#allocation23_spill] sm:$0xff] %v12549_v44  ;;  %v3202_v3 = vadd.f32 %v3201_v24, %v2969_v46  ;;  %v3935_v46 = vsel %vm11782_vm14, %v9954_v12, %v3934_v4  ;;  %v4137_v4 = vpack.c.b16 %v4108_v40, %v4107_v6  ;;  %v9955_v6 = vrot.slane %v3851_v11, 9 }
 0x1db   : > { %v12557_v34 = vpop.f32.mrf.mxu0  ;;  %v4173_v55 = vunpack.c.l.b16 %v3935_v46  ;;  %v3557_v46 = vrot.slane %v3555_v35, 5  ;;  %v3943_v40 = vrot.slane %v3941_v63, 4  ;;  %v3562_v35 = vrot.slane %v3560_v36, 4 }
 0x1dc   : > { %v3291_v31 = vadd.f32 %v12521_v56, %v3202_v3  ;;  %v15370_v56 = vld [vmem:[#allocation10_spill] sm:$0xff]  ;;  %v3542_v3 = vor.u32 %v3541_v22, %v3538_v5  ;;  %v3944_v5 = vrot.slane %v3451_v58, 5 }
 0x1dd   : > { %v2887_v45 = vadd.f32 %v15370_v56, %v15369_v37  ;;  %v3563_v37 = vshll.u32 %v3423_v53, 16  ;;  %v15375_v53 = vld [vmem:[#allocation11_spill] sm:$0xff] }
 0x1de   : > { %v12563_v23 = vadd.f32 %v3379_v51, %v3291_v31  ;;  %v4202_v51 = vpack.c.b16 %v4174_v52, %v4173_v55  ;;  %v3543_v31 = vrot.slane %v3542_v3, 4 }
 0x1df   : > { %v3565_v11 = vrot.slane %v3563_v37, 5  ;;  %v3579_v37 = vshll.u32 %v3451_v58, 16 }
 0x1e0   : > { %15368 = vst [vmem:[#allocation9_spill] sm:$0xff] %v12563_v23  ;;  %v2975_v12 = vpop.f32.mrf.mxu2  ;;  %v3548_v55 = vsel %vm11405_vm11, %v3543_v31, %v3547_v8  ;;  %v3945_v8 = vsel %vm11782_vm14, %v3943_v40, %v3944_v5  ;;  %v10887_v5 = vld [vmem:[#allocation2 + $0x48] sm:$0xff] }
 0x1e1   : > { %v3203_v0 = vpop.f32.mrf.mxu3  ;;  %v3384_v50 = vpop.f32.mrf.mxu1  ;;  %v2976_v20 = vadd.f32 %v2975_v12, %v2887_v45  ;;  %v15373_v45 = vld [vmem:[#allocation12_spill] sm:$0xff] }
 0x1e2   : > { %v3204_v24 = vadd.f32 %v3203_v0, %v2971_v28  ;;  %v3553_v28 = vrot.slane %v3552_v49, 4 }
 0x1e3   : > { %v12570_v1 = vpop.f32.mrf.mxu0 }
 0x1e4   : > { %v12568_v26 = vadd.f32 %v12531_v21, %v3204_v24  ;;  %v3558_v56 = vsel %vm11405_vm11, %v3553_v28, %v3557_v46  ;;  %v3569_v24 = vshll.u32 %v3424_v41, 16  ;;  %v4176_v28 = vunpack.c.l.b16 %v3945_v8 }
 0x1e5   : > { %4447 = vmatmul.bf16.gmra.mxu2 %v10886_v39  ;;  %v4109_v39 = vunpack.c.l.b16 %v3548_v55  ;;  %v4110_v49 = vunpack.c.l.b16 %v3558_v56  ;;  %v3426_v56 = vld [vmem:[#allocation2 + $0x58] sm:$0xf] }
 0x1e6   : > { %15371 = vst [vmem:[#allocation8_spill] sm:$0xff] %v12568_v26  ;;  %4531 = vmatmul.bf16.gmra.mxu3 %v4137_v4  ;;  %4625 = vmatmul.bf16.gmra.mxu0 %v4202_v51  ;;  %v3573_v4 = vshrl.u32 %v3424_v41, 16  ;;  %v3571_v46 = vrot.slane %v3569_v24, 5 }
 0x1e8   : > { %v2978_v52 = vpop.f32.mrf.mxu2  ;;  %v3575_v41 = vrot.slane %v3573_v4, 4 }
 0x1e9   : > { %v3206_v61 = vpop.f32.mrf.mxu3  ;;  %v12572_v22 = vpop.f32.mrf.mxu1  ;;  %v2979_v0 = vadd.f32 %v2978_v52, %v15373_v45 }
 0x1ea   : > { %15372 = vst [vmem:[#allocation10_spill] sm:$0xff] %v12572_v22  ;;  %v3207_v21 = vadd.f32 %v3206_v61, %v2974_v27  ;;  %v3942_v27 = vsel %vm11782_vm14, %v9955_v6, %v3941_v63  ;;  %v4138_v63 = vpack.c.b16 %v4110_v49, %v4109_v39  ;;  %v3566_v22 = vor.u32 %v3565_v11, %v3562_v35  ;;  %v3425_v35 = vld [vmem:[#allocation2 + $0x54] sm:$0xf] }
 0x1eb   : > { %v12580_v3 = vpop.f32.mrf.mxu0  ;;  %v4175_v31 = vunpack.c.l.b16 %v3942_v27  ;;  %v3576_v36 = vor.u32 %v3575_v41, %v3571_v46  ;;  %v3852_v27 = vld [vmem:[#allocation2 + $0x54] sm:$0xe]  ;;  %v3581_v49 = vrot.slane %v3579_v37, 5 }
 0x1ec   : > { %v3296_v12 = vadd.f32 %v12547_v9, %v3207_v21  ;;  %v15376_v9 = vld [vmem:[#allocation13_spill] sm:$0xff]  ;;  %v3567_v8 = vrot.slane %v3566_v22, 4  ;;  %v9956_v11 = vrot.slane %v3852_v27, 9 }
 0x1ed   : > { %v2892_v61 = vadd.f32 %v15376_v9, %v15375_v53  ;;  %v4203_v55 = vpack.c.b16 %v4176_v28, %v4175_v31  ;;  %v3577_v39 = vrot.slane %v3576_v36, 4 }
 0x1ee   : > { %v12586_v51 = vadd.f32 %v3384_v50, %v3296_v12  ;;  %v10981_v50 = vld [vmem:[%s15321_s4 + $0xd0] sm:$0xff]  ;;  %v3452_v12 = vld [vmem:[#allocation2 + $0x5c] sm:$0x1]  ;;  %v3572_v53 = vsel %vm11405_vm11, %v3567_v8, %v3571_v46 }
 0x1ef   : > { %7273 = vmatpush.bf16.msra.mxu1 %v10981_v50  ;;  %v3951_v58 = vrot.slane %v3452_v12, 5  ;;  %v3582_v22 = vsel %vm11405_vm11, %v3577_v39, %v3581_v49  ;;  %v3597_v50 = vshrl.u32 %v3426_v56, 16  ;;  %v4111_v36 = vunpack.c.l.b16 %v3572_v53  ;;  %v3428_v53 = vld [vmem:[#allocation2 + $0x64] sm:$0xf] }
 0x1f0   : > { %15374 = vst [vmem:[#allocation12_spill] sm:$0xff] %v12586_v51  ;;  %v2980_v6 = vpop.f32.mrf.mxu2  ;;  %v4112_v27 = vunpack.c.l.b16 %v3582_v22  ;;  %v10888_v51 = vld [vmem:[#allocation2 + $0x54] sm:$0xff]  ;;  %v3955_v22 = vrot.slane %v3428_v53, 5 }
 0x1f1   : > { %v3208_v21 = vpop.f32.mrf.mxu3  ;;  %v3389_v52 = vpop.f32.mrf.mxu1  ;;  %v2981_v40 = vadd.f32 %v2980_v6, %v2892_v61  ;;  %v3584_v61 = vshrl.u32 %v3425_v35, 16  ;;  %v3593_v6 = vshll.u32 %v3426_v56, 16 }
 0x1f2   : > { %v3209_v45 = vadd.f32 %v3208_v21, %v2976_v20  ;;  %v3948_v20 = vrot.slane %v3426_v56, 5  ;;  %v3587_v21 = vshll.u32 %v3425_v35, 16  ;;  %v3599_v56 = vrot.slane %v3597_v50, 4  ;;  %v3853_v50 = vld [vmem:[#allocation2 + $0x60] sm:$0xe] }
 0x1f3   : > { %v12596_v4 = vpop.f32.mrf.mxu0  ;;  %v3586_v8 = vrot.slane %v3584_v61, 4 }
 0x1f4   : > { %v12594_v24 = vadd.f32 %v12557_v34, %v3209_v45  ;;  %v3950_v31 = vrot.slane %v3948_v20, 4  ;;  %v15379_v45 = vld [vmem:[#allocation14_spill] sm:$0xff]  ;;  %v3589_v39 = vrot.slane %v3587_v21, 5 }
 0x1f5   : > { %4452 = vmatmul.bf16.gmra.mxu2 %v10887_v5 }
 0x1f6   : > { %15377 = vst [vmem:[#allocation11_spill] sm:$0xff] %v12594_v24  ;;  %4536 = vmatmul.bf16.gmra.mxu3 %v4138_v63  ;;  %4630 = vmatmul.bf16.gmra.mxu0 %v4203_v55  ;;  %v3952_v46 = vsel %vm11782_vm14, %v3950_v31, %v3951_v58  ;;  %v3590_v24 = vor.u32 %v3589_v39, %v3586_v8 }
 0x1f7   : > { %v4178_v35 = vunpack.c.l.b16 %v3952_v46  ;;  %v9957_v46 = vrot.slane %v3853_v50, 9 }
 0x1f8   : > { %v2983_v9 = vpop.f32.mrf.mxu2 }
 0x1f9   : > { %v3211_v28 = vpop.f32.mrf.mxu3  ;;  %v12598_v41 = vpop.f32.mrf.mxu1  ;;  %v2984_v63 = vadd.f32 %v2983_v9, %v15379_v45  ;;  %v4139_v45 = vpack.c.b16 %v4112_v27, %v4111_v36  ;;  %v3957_v36 = vrot.slane %v3955_v22, 4 }
 0x1fa   : > { %15378 = vst [vmem:[#allocation13_spill] sm:$0xff] %v12598_v41  ;;  %v3212_v34 = vadd.f32 %v3211_v28, %v2979_v0  ;;  %v3949_v0 = vsel %vm11782_vm14, %v9956_v11, %v3948_v20  ;;  %v3595_v28 = vrot.slane %v3593_v6, 5  ;;  %v15381_v20 = vld [vmem:[#allocation15_spill] sm:$0xff] }
 0x1fb   : > { %v12606_v55 = vpop.f32.mrf.mxu0  ;;  %v4177_v49 = vunpack.c.l.b16 %v3949_v0  ;;  %v3453_v6 = vld [vmem:[#allocation2 + $0x68] sm:$0x1] }
 0x1fc   : > { %v3301_v5 = vadd.f32 %v12570_v1, %v3212_v34  ;;  %v3600_v58 = vor.u32 %v3599_v56, %v3595_v28  ;;  %v3958_v27 = vrot.slane %v3453_v6, 5 }
 0x1fd   : > { %v4204_v31 = vpack.c.b16 %v4178_v35, %v4177_v49 }
 0x1fe   : > { %v12612_v37 = vadd.f32 %v3389_v52, %v3301_v5  ;;  %v3603_v52 = vshll.u32 %v3452_v12, 16  ;;  %v3601_v5 = vrot.slane %v3600_v58, 4 }
 0x200   : > { %15380 = vst [vmem:[#allocation14_spill] sm:$0xff] %v12612_v37  ;;  %v2985_v41 = vpop.f32.mrf.mxu2  ;;  %v3605_v0 = vrot.slane %v3603_v52, 5 }
 0x201   : > { %v3213_v9 = vpop.f32.mrf.mxu3  ;;  %v3394_v1 = vpop.f32.mrf.mxu1  ;;  %v2986_v11 = vadd.f32 %v2985_v41, %v15381_v20  ;;  %v3427_v41 = vld [vmem:[#allocation2 + $0x60] sm:$0xf] }
 0x202   : > { %v3214_v34 = vadd.f32 %v3213_v9, %v2981_v40  ;;  %v3591_v40 = vrot.slane %v3590_v24, 4  ;;  %v3608_v35 = vshrl.u32 %v3427_v41, 16  ;;  %v3611_v56 = vshll.u32 %v3427_v41, 16  ;;  %v15384_v24 = vld [vmem:[#allocation16_spill] sm:$0xff] }
 0x203   : > { %v12618_v21 = vpop.f32.mrf.mxu0 }
 0x204   : > { %v12616_v61 = vadd.f32 %v12580_v3, %v3214_v34  ;;  %v3596_v39 = vsel %vm11405_vm11, %v3591_v40, %v3595_v28  ;;  %v3617_v34 = vshll.u32 %v3428_v53, 16  ;;  %v3959_v28 = vsel %vm11782_vm14, %v3957_v36, %v3958_v27  ;;  %v15386_v36 = vld [vmem:[#allocation17_spill] sm:$0xff]  ;;  %v10889_v27 = vld [vmem:[#allocation2 + $0x60] sm:$0xff] }
 0x205   : > { %4457 = vmatmul.bf16.gmra.mxu2 %v10888_v51  ;;  %v3606_v51 = vsel %vm11405_vm11, %v3601_v5, %v3605_v0  ;;  %v4113_v58 = vunpack.c.l.b16 %v3596_v39  ;;  %v3610_v40 = vrot.slane %v3608_v35, 4  ;;  %v3613_v5 = vrot.slane %v3611_v56, 5 }
 0x206   : > { %15382 = vst [vmem:[#allocation15_spill] sm:$0xff] %v12616_v61  ;;  %4541 = vmatmul.bf16.gmra.mxu3 %v4139_v45  ;;  %4635 = vmatmul.bf16.gmra.mxu0 %v4204_v31  ;;  %v3621_v45 = vshrl.u32 %v3428_v53, 16  ;;  %v4114_v50 = vunpack.c.l.b16 %v3606_v51  ;;  %v4180_v41 = vunpack.c.l.b16 %v3959_v28  ;;  %v3627_v56 = vshll.u32 %v3453_v6, 16  ;;  %v3430_v51 = vld [vmem:[#allocation2 + $0x70] sm:$0xf] }
 0x208   : > { %v2988_v49 = vpop.f32.mrf.mxu2  ;;  %v3623_v53 = vrot.slane %v3621_v45, 4 }
 0x209   : > { %v3216_v12 = vpop.f32.mrf.mxu3  ;;  %v12620_v8 = vpop.f32.mrf.mxu1  ;;  %v2989_v9 = vadd.f32 %v2988_v49, %v15384_v24 }
 0x20a   : > { %15383 = vst [vmem:[#allocation24_spill] sm:$0xff] %v12620_v8  ;;  %v3217_v3 = vadd.f32 %v3216_v12, %v2984_v63  ;;  %v3956_v63 = vsel %vm11782_vm14, %v9957_v46, %v3955_v22  ;;  %v3619_v12 = vrot.slane %v3617_v34, 5  ;;  %v3614_v8 = vor.u32 %v3613_v5, %v3610_v40  ;;  %v10980_v22 = vld [vmem:[%s15321_s4 + $0xc8] sm:$0xff] }
 0x20b   : > { %v12628_v31 = vpop.f32.mrf.mxu0  ;;  %v4179_v0 = vunpack.c.l.b16 %v3956_v63  ;;  %7274 = vmatpush.bf16.msra.mxu1 %v10980_v22  ;;  %v3854_v63 = vld [vmem:[#allocation2 + $0x6c] sm:$0xe] }
 0x20c   : > { %v3306_v20 = vadd.f32 %v12596_v4, %v3217_v3  ;;  %v4140_v3 = vpack.c.b16 %v4114_v50, %v4113_v58  ;;  %v3624_v35 = vor.u32 %v3623_v53, %v3619_v12  ;;  %v3615_v28 = vrot.slane %v3614_v8, 4  ;;  %v3429_v40 = vld [vmem:[#allocation2 + $0x6c] sm:$0xf]  ;;  %v15388_v8 = vld [vmem:[#allocation18_spill] sm:$0xff] }
 0x20d   : > { %v4205_v39 = vpack.c.b16 %v4180_v41, %v4179_v0  ;;  %v3629_v50 = vrot.slane %v3627_v56, 5  ;;  %v9958_v5 = vrot.slane %v3854_v63, 9 }
 0x20e   : > { %v12634_v52 = vadd.f32 %v3394_v1, %v3306_v20  ;;  %v3454_v20 = vld [vmem:[#allocation2 + $0x74] sm:$0x1]  ;;  %v3625_v58 = vrot.slane %v3624_v35, 4 }
 0x20f   : > { %v3965_v6 = vrot.slane %v3454_v20, 5 }
 0x210   : > { %15385 = vst [vmem:[#allocation16_spill] sm:$0xff] %v12634_v52  ;;  %v2990_v24 = vpop.f32.mrf.mxu2 }
 0x211   : > { %v3218_v49 = vpop.f32.mrf.mxu3  ;;  %v3399_v46 = vpop.f32.mrf.mxu1  ;;  %v2991_v1 = vadd.f32 %v2990_v24, %v15386_v36  ;;  %v3635_v24 = vshll.u32 %v3429_v40, 16  ;;  %v3641_v36 = vshll.u32 %v3430_v51, 16 }
 0x212   : > { %v3219_v4 = vadd.f32 %v3218_v49, %v2986_v11  ;;  %v3962_v11 = vrot.slane %v3430_v51, 5 }
 0x213   : > { %v12643_v45 = vpop.f32.mrf.mxu0 }
 0x214   : > { %v12641_v34 = vadd.f32 %v12606_v55, %v3219_v4  ;;  %v3964_v0 = vrot.slane %v3962_v11, 4  ;;  %v3620_v55 = vsel %vm11405_vm11, %v3615_v28, %v3619_v12  ;;  %v3632_v4 = vshrl.u32 %v3429_v40, 16 }
 0x215   : > { %4462 = vmatmul.bf16.gmra.mxu2 %v10889_v27  ;;  %v3645_v27 = vshrl.u32 %v3430_v51, 16  ;;  %v4115_v63 = vunpack.c.l.b16 %v3620_v55  ;;  %v3637_v40 = vrot.slane %v3635_v24, 5  ;;  %v3651_v55 = vshll.u32 %v3454_v20, 16 }
 0x216   : > { %15387 = vst [vmem:[#allocation17_spill] sm:$0xff] %v12641_v34  ;;  %4546 = vmatmul.bf16.gmra.mxu3 %v4140_v3  ;;  %4640 = vmatmul.bf16.gmra.mxu0 %v4205_v39  ;;  %v3630_v3 = vsel %vm11405_vm11, %v3625_v58, %v3629_v50  ;;  %v3966_v12 = vsel %vm11782_vm14, %v3964_v0, %v3965_v6  ;;  %v3634_v50 = vrot.slane %v3632_v4, 4  ;;  %v10890_v0 = vld [vmem:[#allocation2 + $0x6c] sm:$0xff] }
 0x217   : > { %v4116_v58 = vunpack.c.l.b16 %v3630_v3  ;;  %v4182_v51 = vunpack.c.l.b16 %v3966_v12  ;;  %v3431_v12 = vld [vmem:[#allocation2 + $0x78] sm:$0xf] }
 0x218   : > { %v2993_v49 = vpop.f32.mrf.mxu2 }
 0x219   : > { %v3221_v41 = vpop.f32.mrf.mxu3  ;;  %v2994_v22 = vadd.f32 %v2993_v49, %v15388_v8  ;;  %v12657_v56 = vpop.f32.mrf.mxu1  ;;  %v3643_v49 = vrot.slane %v3641_v36, 5  ;;  %v4141_v34 = vpack.c.b16 %v4116_v58, %v4115_v63  ;;  %v3455_v36 = vld [vmem:[#allocation2 + $0x80] sm:$0x1] }
 0x21a   : > { %v3222_v53 = vadd.f32 %v3221_v41, %v2989_v9  ;;  %v3963_v9 = vsel %vm11782_vm14, %v9958_v5, %v3962_v11  ;;  %15389 = vst [vmem:[#allocation18_spill] sm:$0xff] %v12657_v56  ;;  %v3638_v11 = vor.u32 %v3637_v40, %v3634_v50  ;;  %v15391_v5 = vld [vmem:[#allocation19_spill] sm:$0xff]  ;;  %v3972_v20 = vrot.slane %v3455_v36, 5 }
 0x21b   : > { %v12651_v35 = vpop.f32.mrf.mxu0  ;;  %v4181_v41 = vunpack.c.l.b16 %v3963_v9 }
 0x21c   : > { %v3311_v39 = vadd.f32 %v12618_v21, %v3222_v53  ;;  %v3647_v21 = vrot.slane %v3645_v27, 4  ;;  %v3855_v27 = vld [vmem:[#allocation2 + $0x78] sm:$0xe] }
 0x21d   : > { %v4206_v6 = vpack.c.b16 %v4182_v51, %v4181_v41  ;;  %v9959_v63 = vrot.slane %v3855_v27, 9  ;;  %v3656_v51 = vshrl.u32 %v3431_v12, 16 }
 0x21e   : > { %v12659_v28 = vadd.f32 %v3399_v46, %v3311_v39  ;;  %v3648_v56 = vor.u32 %v3647_v21, %v3643_v49  ;;  %v3432_v46 = vld [vmem:[#allocation2 + $0x7c] sm:$0xf]  ;;  %v3659_v21 = vshll.u32 %v3431_v12, 16 }
 0x21f   : > { %v3969_v24 = vrot.slane %v3432_v46, 5 }
 0x220   : > { %15390 = vst [vmem:[#allocation25_spill] sm:$0xff] %v12659_v28  ;;  %v2995_v52 = vpop.f32.mrf.mxu2  ;;  %v3649_v9 = vrot.slane %v3648_v56, 4  ;;  %v3669_v56 = vshrl.u32 %v3432_v46, 16 }
 0x221   : > { %v3223_v53 = vpop.f32.mrf.mxu3  ;;  %v2996_v61 = vadd.f32 %v2995_v52, %v15391_v5  ;;  %v3404_v39 = vpop.f32.mrf.mxu1  ;;  %v3653_v52 = vrot.slane %v3651_v55, 5  ;;  %v3971_v58 = vrot.slane %v3969_v24, 4 }
 0x222   : > { %v3224_v8 = vadd.f32 %v3223_v53, %v2991_v1  ;;  %v3639_v1 = vrot.slane %v3638_v11, 4  ;;  %v15393_v53 = vld [vmem:[#allocation20_spill] sm:$0xff]  ;;  %v3665_v11 = vshll.u32 %v3432_v46, 16  ;;  %v3671_v46 = vrot.slane %v3669_v56, 4 }
 0x223   : > { %v12665_v4 = vpop.f32.mrf.mxu0 }
 0x224   : > { %v12663_v3 = vadd.f32 %v12628_v31, %v3224_v8  ;;  %v3644_v31 = vsel %vm11405_vm11, %v3639_v1, %v3643_v49  ;;  %v3973_v49 = vsel %vm11782_vm14, %v3971_v58, %v3972_v20  ;;  %v3658_v1 = vrot.slane %v3656_v51, 4  ;;  %v10891_v58 = vld [vmem:[#allocation2 + $0x78] sm:$0xff] }
 0x225   : > { %4467 = vmatmul.bf16.gmra.mxu2 %v10890_v0  ;;  %v4184_v12 = vunpack.c.l.b16 %v3973_v49  ;;  %v3856_v49 = vld [vmem:[#allocation2 + $0x84] sm:$0xe] }
 0x226   : > { %15392 = vst [vmem:[#allocation19_spill] sm:$0xff] %v12663_v3  ;;  %4551 = vmatmul.bf16.gmra.mxu3 %v4141_v34  ;;  %4645 = vmatmul.bf16.gmra.mxu0 %v4206_v6  ;;  %v3654_v34 = vsel %vm11405_vm11, %v3649_v9, %v3653_v52  ;;  %v4117_v6 = vunpack.c.l.b16 %v3644_v31  ;;  %v3661_v9 = vrot.slane %v3659_v21, 5  ;;  %v3675_v31 = vshll.u32 %v3455_v36, 16 }
 0x227   : > { %v4118_v27 = vunpack.c.l.b16 %v3654_v34  ;;  %v3434_v34 = vld [vmem:[#allocation2 + $0x88] sm:$0xf] }
 0x228   : > { %v2998_v41 = vpop.f32.mrf.mxu2  ;;  %v3976_v56 = vrot.slane %v3434_v34, 5 }
 0x229   : > { %v3226_v50 = vpop.f32.mrf.mxu3  ;;  %v2999_v8 = vadd.f32 %v2998_v41, %v15393_v53  ;;  %v4142_v53 = vpack.c.b16 %v4118_v27, %v4117_v6  ;;  %v3677_v6 = vrot.slane %v3675_v31, 5  ;;  %v3433_v27 = vld [vmem:[#allocation2 + $0x84] sm:$0xf] }
 0x22a   : > { %v3227_v40 = vadd.f32 %v3226_v50, %v2994_v22  ;;  %v3970_v22 = vsel %vm11782_vm14, %v9959_v63, %v3969_v24  ;;  %v3667_v50 = vrot.slane %v3665_v11, 5  ;;  %v3662_v24 = vor.u32 %v3661_v9, %v3658_v1  ;;  %v15396_v63 = vld [vmem:[#allocation21_spill] sm:$0xff]  ;;  %v4835_v11 = vld [vmem:[#allocation3 + $0xc] sm:$0x1] }
 0x22b   : > { %v12673_v0 = vpop.f32.mrf.mxu0  ;;  %v4183_v52 = vunpack.c.l.b16 %v3970_v22  ;;  %v12691_v22 = vld [vmem:[#allocation2 + $0x8c] sm:$0x1]  ;;  %v3978_v1 = vrot.slane %v3976_v56, 4 }
 0x22c   : > { %v3316_v5 = vadd.f32 %v12643_v45, %v3227_v40  ;;  %v12681_v45 = vpop.f32.mrf.mxu1  ;;  %v3979_v9 = vrot.slane %v12691_v22, 5 }
 0x22d   : > { %15395 = vst [vmem:[#allocation26_spill] sm:$0xff] %v12681_v45  ;;  %v4207_v20 = vpack.c.b16 %v4184_v12, %v4183_v52 }
 0x22e   : > { %v12679_v55 = vadd.f32 %v3404_v39, %v3316_v5  ;;  %v3672_v39 = vor.u32 %v3671_v46, %v3667_v50 }
 0x230   : > { %15394 = vst [vmem:[#allocation20_spill] sm:$0xff] %v12679_v55  ;;  %v3000_v3 = vpop.f32.mrf.mxu2  ;;  %v3673_v36 = vrot.slane %v3672_v39, 4 }
 0x231   : > { %v3228_v41 = vpop.f32.mrf.mxu3  ;;  %v3001_v28 = vadd.f32 %v3000_v3, %v15396_v63  ;;  %v3663_v3 = vrot.slane %v3662_v24, 4  ;;  %v3683_v63 = vshll.u32 %v3433_v27, 16 }
 0x232   : > { %v3229_v40 = vadd.f32 %v3228_v41, %v2996_v61  ;;  %v4836_v61 = vsel %vm11276_vm2, 0, %v4835_v11  ;;  %v3678_v24 = vsel %vm11405_vm11, %v3673_v36, %v3677_v6  ;;  %v4883_v11 = vld [vmem:[#allocation3 + $0x14] sm:$0x1] }
 0x233   : > { %v12687_v21 = vpop.f32.mrf.mxu0  ;;  %4837 = vst [vmem:[#allocation3 + $0xc] sm:$0x1] %v4836_v61  ;;  %v3668_v46 = vsel %vm11405_vm11, %v3663_v3, %v3667_v50  ;;  %v3980_v50 = vsel %vm11782_vm14, %v3978_v1, %v3979_v9  ;;  %v4884_v3 = vsel %vm11290_vm6, 0, %v4883_v11  ;;  %v4120_v36 = vunpack.c.l.b16 %v3678_v24  ;;  %v10892_v9 = vld [vmem:[#allocation2 + $0x84] sm:$0xff]  ;;  %v3435_v24 = vld [vmem:[#allocation2 + $0x90] sm:$0xf] }
 0x234   : > { %v12685_v51 = vadd.f32 %v12651_v35, %v3229_v40  ;;  %v9960_v35 = vrot.slane %v3856_v49, 9  ;;  %v3680_v40 = vshrl.u32 %v3433_v27, 16  ;;  %v4119_v61 = vunpack.c.l.b16 %v3668_v46  ;;  %4885 = vst [vmem:[#allocation3 + $0x14] sm:$0x1] %v4884_v3  ;;  %v3457_v11 = vld [vmem:[#allocation2 + $0x98] sm:$0x1] }
 0x235   : > { %4472 = vmatmul.bf16.gmra.mxu2 %v10891_v58  ;;  %v3689_v58 = vshll.u32 %v3434_v34, 16  ;;  %v3685_v6 = vrot.slane %v3683_v63, 5  ;;  %v10979_v3 = vld [vmem:[%s15321_s4 + $0xc0] sm:$0xff] }
 0x236   : > { %15397 = vst [vmem:[#allocation21_spill] sm:$0xff] %v12685_v51  ;;  %4556 = vmatmul.bf16.gmra.mxu3 %v4142_v53  ;;  %4650 = vmatmul.bf16.gmra.mxu0 %v4207_v20  ;;  %v3409_v53 = vpop.f32.mrf.mxu1  ;;  %v3693_v20 = vshrl.u32 %v3434_v34, 16  ;;  %v3682_v34 = vrot.slane %v3680_v40, 4 }
 0x237   : > { %7275 = vmatpush.bf16.msra.mxu1 %v10979_v3  ;;  %v3723_v3 = vshll.u32 %v3457_v11, 16 }
 0x238   : > { %v4433_v41 = vpop.f32.mrf.mxu2  ;;  %v3695_v45 = vrot.slane %v3693_v20, 4  ;;  %v3686_v1 = vor.u32 %v3685_v6, %v3682_v34  ;;  %v4838_v20 = vld [vmem:[#allocation3 + $0x18] sm:$0x1]  ;;  %v3986_v6 = vrot.slane %v3457_v11, 5 }
 0x239   : > { %v3231_v52 = vpop.f32.mrf.mxu3 }
 0x23a   : > { %v3232_v12 = vadd.f32 %v3231_v52, %v2999_v8  ;;  %v3977_v8 = vsel %vm11782_vm14, %v9960_v35, %v3976_v56  ;;  %v4186_v52 = vunpack.c.l.b16 %v3980_v50  ;;  %v4143_v56 = vpack.c.b16 %v4120_v36, %v4119_v61 }
 0x23b   : > { %v12699_v31 = vpop.f32.mrf.mxu0  ;;  %v3704_v50 = vshrl.u32 %v3435_v24, 16 }
 0x23c   : > { %v3321_v39 = vadd.f32 %v12665_v4, %v3232_v12  ;;  %v4185_v4 = vunpack.c.l.b16 %v3977_v8  ;;  %v3691_v12 = vrot.slane %v3689_v58, 5  ;;  %v4839_v8 = vsel %vm11276_vm2, 0, %v4838_v20 }
 0x23d   : > { %4840 = vst [vmem:[#allocation3 + $0x18] sm:$0x1] %v4839_v8  ;;  %v4886_v8 = vld [vmem:[#allocation3 + $0x20] sm:$0x1] }
 0x23e   : > { %v12707_v27 = vadd.f32 %v3409_v53, %v3321_v39  ;;  %v4208_v46 = vpack.c.b16 %v4186_v52, %v4185_v4  ;;  %v3696_v37 = vor.u32 %v3695_v45, %v3691_v12  ;;  %v3699_v53 = vshll.u32 %v12691_v22, 16  ;;  %v3436_v39 = vld [vmem:[#allocation2 + $0x94] sm:$0xf] }
 0x23f   : > { %v3983_v58 = vrot.slane %v3436_v39, 5  ;;  %v3707_v45 = vshll.u32 %v3435_v24, 16 }
 0x240   : > { %15400 = vst [vmem:[#allocation4_spill] sm:$0xff] %v12707_v27  ;;  %v12709_v35 = vpop.f32.mrf.mxu2  ;;  %v3697_v22 = vrot.slane %v3696_v37, 4  ;;  %v3701_v61 = vrot.slane %v3699_v53, 5  ;;  %v3706_v37 = vrot.slane %v3704_v50, 4 }
 0x241   : > { %v3233_v51 = vpop.f32.mrf.mxu3  ;;  %v3985_v34 = vrot.slane %v3983_v58, 4 }
 0x242   : > { %v3234_v55 = vadd.f32 %v3233_v51, %v3001_v28  ;;  %v3857_v28 = vld [vmem:[#allocation2 + $0x90] sm:$0xe]  ;;  %v3687_v51 = vrot.slane %v3686_v1, 4 }
 0x243   : > { %v12715_v63 = vpop.f32.mrf.mxu0  ;;  %v9961_v36 = vrot.slane %v3857_v28, 9  ;;  %v3987_v28 = vsel %vm11782_vm14, %v3985_v34, %v3986_v6  ;;  %v3438_v34 = vld [vmem:[#allocation2 + $0xa0] sm:$0xf] }
 0x244   : > { %v12713_v40 = vadd.f32 %v12673_v0, %v3234_v55  ;;  %v3713_v0 = vshll.u32 %v3436_v39, 16  ;;  %v3717_v55 = vshrl.u32 %v3436_v39, 16  ;;  %v3737_v44 = vshll.u32 %v3438_v34, 16 }
 0x245   : > { %4477 = vmatmul.bf16.gmra.mxu2 %v10892_v9  ;;  %v3709_v9 = vrot.slane %v3707_v45, 5 }
 0x246   : > { %15401 = vst [vmem:[#allocation5_spill] sm:$0xff] %v12713_v40  ;;  %4561 = vmatmul.bf16.gmra.mxu3 %v4143_v56  ;;  %4655 = vmatmul.bf16.gmra.mxu0 %v4208_v46  ;;  %v3692_v56 = vsel %vm11405_vm11, %v3687_v51, %v3691_v12  ;;  %v3702_v46 = vsel %vm11405_vm11, %v3697_v22, %v3701_v61  ;;  %v12728_v53 = vrot.slane %v3713_v0, 5  ;;  %v3719_v39 = vrot.slane %v3717_v55, 4 }
 0x247   : > { %v3984_v12 = vsel %vm11782_vm14, %v9961_v36, %v3983_v58  ;;  %v4121_v51 = vunpack.c.l.b16 %v3692_v56  ;;  %v4122_v45 = vunpack.c.l.b16 %v3702_v46  ;;  %v4887_v22 = vsel %vm11290_vm6, 0, %v4886_v8 }
 0x248   : > { %v12724_v1 = vpop.f32.mrf.mxu2  ;;  %v3710_v61 = vor.u32 %v3709_v9, %v3706_v37  ;;  %4888 = vst [vmem:[#allocation3 + $0x20] sm:$0x1] %v4887_v22  ;;  %v4187_v0 = vunpack.c.l.b16 %v3984_v12  ;;  %v4188_v58 = vunpack.c.l.b16 %v3987_v28  ;;  %v3720_v55 = vor.u32 %v3719_v39, %v12728_v53  ;;  %v12756_v9 = vld [vmem:[#allocation2 + $0xa4] sm:$0x1]  ;;  %v3858_v12 = vld [vmem:[#allocation2 + $0x9c] sm:$0xe] }
 0x249   : > { %v4522_v4 = vpop.f32.mrf.mxu3  ;;  %v4144_v46 = vpack.c.b16 %v4122_v45, %v4121_v51  ;;  %v10893_v28 = vld [vmem:[#allocation2 + $0x90] sm:$0xff]  ;;  %v3725_v8 = vrot.slane %v3723_v3, 5  ;;  %v9962_v51 = vrot.slane %v3858_v12, 9 }
 0x24a   : > { %v4523_v52 = vadd.f32 %v4522_v4, %v4433_v41  ;;  %v12734_v41 = vld [vmem:[%s15319_s2] ss:$0 sm:$0xff]  ;;  %v3990_v4 = vrot.slane %v3438_v34, 5  ;;  %v3711_v37 = vrot.slane %v3710_v61, 4  ;;  %v4209_v39 = vpack.c.b16 %v4188_v58, %v4187_v0 }
 0x24b   : > { %v12736_v20 = vpop.f32.mrf.mxu0  ;;  %v3721_v11 = vrot.slane %v3720_v55, 4  ;;  %v3993_v61 = vrot.slane %v12756_v9, 5 }
 0x24c   : > { %v4612_v24 = vadd.f32 %v12687_v21, %v4523_v52  ;;  %v12746_v21 = vld [vmem:[%s15320_s3] ss:$0 sm:$0xff]  ;;  %v3992_v45 = vrot.slane %v3990_v4, 4 }
 0x24d   : > { %v3726_v58 = vsel %vm11405_vm11, %v3721_v11, %v3725_v8 }
 0x24e   : > { %v4691_v50 = vadd.f32 %v4612_v24, %v12240_v25  ;;  %v3437_v25 = vld [vmem:[#allocation2 + $0x9c] sm:$0xf]  ;;  %v4124_v8 = vunpack.c.l.b16 %v3726_v58 }
 0x250   : > { %v4727_v36 = vmul.f32 %v12734_v41, %v4691_v50  ;;  %v12754_v24 = vpop.f32.mrf.mxu2  ;;  %v3728_v50 = vshrl.u32 %v3437_v25, 16 }
 0x251   : > { %v4524_v6 = vpop.f32.mrf.mxu3 }
 0x252   : > { %v4763_v52 = vadd.f32 %v12746_v21, %v4727_v36  ;;  %v4525_v56 = vadd.f32 %v4524_v6, %v12709_v35  ;;  %v3731_v36 = vshll.u32 %v3437_v25, 16  ;;  %v4841_v35 = vld [vmem:[#allocation3 + $0x24] sm:$0x1]  ;;  %v3741_v6 = vshrl.u32 %v3438_v34, 16 }
 0x253   : > { %v12759_v27 = vpop.f32.mrf.mxu0  ;;  %v4842_v0 = vsel %vm11276_vm2, 0, %v4841_v35  ;;  %v3730_v34 = vrot.slane %v3728_v50, 4  ;;  %v4889_v35 = vld [vmem:[#allocation3 + $0x2c] sm:$0x1] }
 0x254   : > { %v4795_v22 = vmax.f32 %v4763_v52, 0.0  ;;  %v4614_v40 = vadd.f32 %v12699_v31, %v4525_v56  ;;  %v3716_v31 = vsel %vm11405_vm11, %v3711_v37, %v12728_v53  ;;  %4843 = vst [vmem:[#allocation3 + $0x24] sm:$0x1] %v4842_v0  ;;  %v3733_v25 = vrot.slane %v3731_v36, 5 }
 0x255   : > { %4482 = vmatmul.bf16.gmra.mxu2 %v10893_v28  ;;  %v3994_v52 = vsel %vm11782_vm14, %v3992_v45, %v3993_v61  ;;  %v12775_v56 = vrot.slane %v3737_v44, 5  ;;  %v4123_v11 = vunpack.c.l.b16 %v3716_v31  ;;  %v4890_v58 = vsel %vm11290_vm6, 0, %v4889_v35 }
 0x256   : > { %v4931_v26 = vpack.c.bf16 %v4795_v22, %v4795_v22  ;;  %v4692_v23 = vadd.f32 %v4614_v40, %v12261_v42  ;;  %4566 = vmatmul.bf16.gmra.mxu3 %v4144_v46  ;;  %4660 = vmatmul.bf16.gmra.mxu0 %v4209_v39  ;;  %v3991_v40 = vsel %vm11782_vm14, %v9962_v51, %v3990_v4  ;;  %v3743_v46 = vrot.slane %v3741_v6, 4  ;;  %v5283_v39 = vld [vmem:[#allocation3 + $0xc] sm:$0xf] }
 0x257   : > { %v3734_v36 = vor.u32 %v3733_v25, %v3730_v34  ;;  %v4189_v51 = vunpack.c.l.b16 %v3991_v40  ;;  %v4145_v25 = vpack.c.b16 %v4124_v8, %v4123_v11  ;;  %4891 = vst [vmem:[#allocation3 + $0x2c] sm:$0x1] %v4890_v58  ;;  %v3439_v40 = vld [vmem:[#allocation2 + $0xa8] sm:$0xf]  ;;  %v12813_v8 = vld [vmem:[#allocation2 + $0xb0] sm:$0x1] }
 0x258   : > { %v4964_v55 = vshrl.u32 %v4931_v26, 16  ;;  %v4728_v3 = vmul.f32 %v12734_v41, %v4692_v23  ;;  %v4967_v37 = vshll.u32 %v4931_v26, 16  ;;  %v12781_v23 = vpop.f32.mrf.mxu2  ;;  %v4190_v26 = vunpack.c.l.b16 %v3994_v52  ;;  %v5287_v52 = vld [vmem:[#allocation3 + $0x14] sm:$0x1] }
 0x259   : > { %v4527_v42 = vpop.f32.mrf.mxu3  ;;  %v3744_v45 = vor.u32 %v3743_v46, %v12775_v56 }
 0x25a   : > { %v12777_v53 = vrot.slane %v4964_v55, 7  ;;  %v4764_v12 = vadd.f32 %v12746_v21, %v4728_v3  ;;  %v4528_v28 = vadd.f32 %v4527_v42, %v12724_v1  ;;  %v3747_v1 = vshll.u32 %v12756_v9, 16  ;;  %v11002_v55 = vld [vmem:[%s15321_s4 + $0x178] sm:$0xff] }
 0x25b   : > { %v12785_v44 = vpop.f32.mrf.mxu0  ;;  %v10994_v9 = vld [vmem:[%s15321_s4 + $0x138] sm:$0xff]  ;;  %v12806_v42 = vrot.slane %v3734_v36, 4  ;;  %7446 = vmatpush.bf16.msrb.mxu3 %v11002_v55  ;;  %v3859_v36 = vld [vmem:[#allocation2 + $0xa8] sm:$0xe] }
 0x25c   : > { %v4969_v4 = vor.u32 %v4967_v37, %v12777_v53  ;;  %v4796_v50 = vmax.f32 %v4764_v12, 0.0  ;;  %v4617_v22 = vadd.f32 %v12715_v63, %v4528_v28  ;;  %v12794_v63 = vld [vmem:[#allocation2 + $0xac] sm:$0xf]  ;;  %v10946_v3 = vld [vmem:[%s15321_s4 + $0x38] sm:$0xff]  ;;  %7357 = vmatpush.bf16.msrb.mxu2 %v10994_v9  ;;  %v4210_v37 = vpack.c.b16 %v4190_v26, %v4189_v51 }
 0x25d   : > { %v3745_v12 = vrot.slane %v3744_v45, 4  ;;  %v3749_v28 = vrot.slane %v3747_v1, 5  ;;  %7679 = vmatpush.bf16.msrb.mxu0 %v10946_v3  ;;  %v3752_v51 = vshrl.u32 %v3439_v40, 16  ;;  %v3755_v26 = vshll.u32 %v3439_v40, 16 }
 0x25e   : > { %v5284_v6 = vsel %vm11317_vm8, %v4969_v4, %v5283_v39  ;;  %v4932_v0 = vpack.c.bf16 %v4796_v50, %v4796_v50  ;;  %v4693_v31 = vadd.f32 %v4617_v22, %v12287_v62  ;;  %v3997_v39 = vrot.slane %v12794_v63, 5 }
 0x25f   : > { %5285 = vst [vmem:[#allocation3 + $0xc] sm:$0xf] %v5284_v6  ;;  %v4970_v6 = vrot.slane %v12777_v53, 4  ;;  %v3761_v45 = vshll.u32 %v12794_v63, 16  ;;  %v9963_v3 = vrot.slane %v3859_v36, 9 }
 0x260   : > { %v4972_v34 = vshrl.u32 %v4932_v0, 16  ;;  %v4729_v62 = vmul.f32 %v12734_v41, %v4693_v31  ;;  %v4975_v50 = vshll.u32 %v4932_v0, 16  ;;  %v12811_v11 = vpop.f32.mrf.mxu2  ;;  %v10894_v31 = vld [vmem:[#allocation2 + $0x9c] sm:$0xff] }
 0x261   : > { %v4529_v46 = vpop.f32.mrf.mxu3 }
 0x262   : > { %v4974_v4 = vrot.slane %v4972_v34, 7  ;;  %v4765_v22 = vadd.f32 %v12746_v21, %v4729_v62  ;;  %v4530_v35 = vadd.f32 %v4529_v46, %v12754_v24  ;;  %v4844_v24 = vld [vmem:[#allocation3 + $0x30] sm:$0x1]  ;;  %v3999_v34 = vrot.slane %v3997_v39, 4 }
 0x263   : > { %v12818_v9 = vpop.f32.mrf.mxu0  ;;  %v4000_v62 = vrot.slane %v12813_v8, 5  ;;  %v3765_v46 = vshrl.u32 %v12794_v63, 16  ;;  %v3750_v63 = vsel %vm11405_vm11, %v3745_v12, %v3749_v28  ;;  %v12843_v12 = vrot.slane %v3761_v45, 5 }
 0x264   : > { %v4977_v1 = vor.u32 %v4975_v50, %v4974_v4  ;;  %v4979_v58 = vrot.slane %v4974_v4, 4  ;;  %v4797_v0 = vmax.f32 %v4765_v22, 0.0  ;;  %v4619_v55 = vadd.f32 %v12736_v20, %v4530_v35 }
 0x265   : > { %4487 = vmatmul.bf16.gmra.mxu2 %v10894_v31  ;;  %v3740_v20 = vsel %vm11405_vm11, %v12806_v42, %v12775_v56  ;;  %v4845_v22 = vsel %vm11276_vm2, 0, %v4844_v24  ;;  %v3998_v56 = vsel %vm11782_vm14, %v9963_v3, %v3997_v39  ;;  %v4001_v42 = vsel %vm11782_vm14, %v3999_v34, %v4000_v62  ;;  %v4892_v34 = vld [vmem:[#allocation3 + $0x38] sm:$0x1] }
 0x266   : > { %v4978_v32 = vsel %vm11304_vm7, %v4970_v6, %v4977_v1  ;;  %v5288_v40 = vsel %vm11276_vm2, %v4979_v58, %v5287_v52  ;;  %v4933_v50 = vpack.c.bf16 %v4797_v0, %v4797_v0  ;;  %v4694_v4 = vadd.f32 %v4619_v55, %v12300_v43  ;;  %4571 = vmatmul.bf16.gmra.mxu3 %v4145_v25  ;;  %v10954_v43 = vld [vmem:[%s15321_s4 + $0x78] sm:$0xff] }
 0x267   : > { %5286 = vst [vmem:[#allocation3 + $0x10] sm:$0xf] %v4978_v32  ;;  %4665 = vmatmul.bf16.gmra.mxu0 %v4210_v37  ;;  %v3754_v32 = vrot.slane %v3752_v51, 4  ;;  %v3757_v25 = vrot.slane %v3755_v26, 5  ;;  %v3767_v28 = vrot.slane %v3765_v46, 4  ;;  %7768 = vmatpush.bf16.msrb.mxu1 %v10954_v43  ;;  %v4125_v58 = vunpack.c.l.b16 %v3740_v20 }
 0x268   : > { %5289 = vst [vmem:[#allocation3 + $0x14] sm:$0x1] %v5288_v40  ;;  %v4981_v52 = vshrl.u32 %v4933_v50, 16  ;;  %v4730_v35 = vmul.f32 %v12734_v41, %v4694_v4  ;;  %v4984_v6 = vshll.u32 %v4933_v50, 16  ;;  %v12849_v51 = vpop.f32.mrf.mxu2  ;;  %v5290_v26 = vld [vmem:[#allocation3 + $0x18] sm:$0xf]  ;;  %v4126_v0 = vunpack.c.l.b16 %v3750_v63 }
 0x269   : > { %v4532_v37 = vpop.f32.mrf.mxu3  ;;  %4846 = vst [vmem:[#allocation3 + $0x30] sm:$0x1] %v4845_v22  ;;  %v3758_v3 = vor.u32 %v3757_v25, %v3754_v32  ;;  %v4191_v62 = vunpack.c.l.b16 %v3998_v56  ;;  %v4192_v46 = vunpack.c.l.b16 %v4001_v42  ;;  %v3768_v40 = vor.u32 %v3767_v28, %v12843_v12  ;;  %v3442_v22 = vld [vmem:[#allocation2 + $0xb8] sm:$0xf]  ;;  %v3860_v25 = vld [vmem:[#allocation2 + $0xb4] sm:$0xe] }
 0x26a   : > { %v12845_v36 = vrot.slane %v4981_v52, 7  ;;  %v4766_v31 = vadd.f32 %v12746_v21, %v4730_v35  ;;  %v4533_v1 = vadd.f32 %v4532_v37, %v12781_v23  ;;  %v3771_v23 = vshll.u32 %v12813_v8, 16  ;;  %v3441_v52 = vld [vmem:[#allocation2 + $0xb4] sm:$0xf] }
 0x26b   : > { %v12853_v24 = vpop.f32.mrf.mxu0  ;;  %v4146_v32 = vpack.c.b16 %v4126_v0, %v4125_v58  ;;  %v3759_v8 = vrot.slane %v3758_v3, 4  ;;  %v4211_v56 = vpack.c.b16 %v4192_v46, %v4191_v62  ;;  %v3769_v42 = vrot.slane %v3768_v40, 4  ;;  %v10895_v0 = vld [vmem:[#allocation2 + $0xa8] sm:$0xff] }
 0x26c   : > { %v4986_v39 = vor.u32 %v4984_v6, %v12845_v36  ;;  %v4798_v55 = vmax.f32 %v4766_v31, 0.0  ;;  %v4622_v45 = vadd.f32 %v12759_v27, %v4533_v1  ;;  %v4893_v27 = vsel %vm11290_vm6, 0, %v4892_v34  ;;  %v5294_v1 = vld [vmem:[#allocation3 + $0x20] sm:$0x1] }
 0x26d   : > { %4894 = vst [vmem:[#allocation3 + $0x38] sm:$0x1] %v4893_v27  ;;  %v3773_v28 = vrot.slane %v3771_v23, 5  ;;  %v4987_v58 = vrot.slane %v12845_v36, 4  ;;  %v9964_v3 = vrot.slane %v3860_v25, 9  ;;  %v3776_v34 = vshrl.u32 %v3441_v52, 16 }
 0x26e   : > { %v5291_v50 = vsel %vm11317_vm8, %v4986_v39, %v5290_v26  ;;  %v4934_v4 = vpack.c.bf16 %v4798_v55, %v4798_v55  ;;  %v4695_v20 = vadd.f32 %v4622_v45, %v12334_v38  ;;  %v10963_v63 = vld [vmem:[#allocation3 + $0xc] sm:$0xff]  ;;  %v4004_v38 = vrot.slane %v3442_v22, 5  ;;  %v12867_v45 = vld [vmem:[#allocation2 + $0xbc] sm:$0x1] }
 0x26f   : > { %5292 = vst [vmem:[#allocation3 + $0x18] sm:$0xf] %v5291_v50  ;;  %7276 = vmatmul.bf16.vlgmr.msra.gmra.mxu1 %v10963_v63  ;;  %v3779_v62 = vshll.u32 %v3441_v52, 16  ;;  %v3785_v27 = vshll.u32 %v3442_v22, 16 }
 0x270   : > { %v4989_v35 = vshrl.u32 %v4934_v4, 16  ;;  %v4731_v43 = vmul.f32 %v12734_v41, %v4695_v20  ;;  %v4992_v31 = vshll.u32 %v4934_v4, 16  ;;  %v12865_v55 = vpop.f32.mrf.mxu2  ;;  %v4847_v20 = vld [vmem:[#allocation3 + $0x3c] sm:$0x1]  ;;  %v4006_v63 = vrot.slane %v4004_v38, 4 }
 0x271   : > { %v4534_v37 = vpop.f32.mrf.mxu3 }
 0x272   : > { %v4991_v6 = vrot.slane %v4989_v35, 7  ;;  %v4767_v26 = vadd.f32 %v12746_v21, %v4731_v43  ;;  %v4535_v39 = vadd.f32 %v4534_v37, %v12811_v11  ;;  %v4007_v11 = vrot.slane %v12867_v45, 5 }
 0x273   : > { %v12871_v4 = vpop.f32.mrf.mxu0  ;;  %v3789_v35 = vshrl.u32 %v3442_v22, 16  ;;  %v3774_v22 = vsel %vm11405_vm11, %v3769_v42, %v3773_v28  ;;  %v4848_v37 = vsel %vm11276_vm2, 0, %v4847_v20  ;;  %v4895_v20 = vld [vmem:[#allocation3 + $0x44] sm:$0x1] }
 0x274   : > { %v4994_v46 = vor.u32 %v4992_v31, %v4991_v6  ;;  %v4996_v40 = vrot.slane %v4991_v6, 4  ;;  %v4799_v23 = vmax.f32 %v4767_v26, 0.0  ;;  %v4624_v50 = vadd.f32 %v12785_v44, %v4535_v39  ;;  %4849 = vst [vmem:[#allocation3 + $0x3c] sm:$0x1] %v4848_v37 }
 0x275   : > { %4492 = vmatmul.bf16.gmra.mxu2 %v10895_v0  ;;  %v3764_v44 = vsel %vm11405_vm11, %v3759_v8, %v12843_v12  ;;  %v3781_v12 = vrot.slane %v3779_v62, 5  ;;  %v12891_v8 = vrot.slane %v3785_v27, 5  ;;  %v3791_v42 = vrot.slane %v3789_v35, 4 }
 0x276   : > { %v4995_v36 = vsel %vm11304_vm7, %v4987_v58, %v4994_v46  ;;  %v5295_v43 = vsel %vm11276_vm2, %v4996_v40, %v5294_v1  ;;  %v4935_v52 = vpack.c.bf16 %v4799_v23, %v4799_v23  ;;  %v4696_v25 = vadd.f32 %v4624_v50, %v12353_v48  ;;  %4576 = vmatmul.bf16.gmra.mxu3 %v4146_v32 }
 0x277   : > { %5293 = vst [vmem:[#allocation3 + $0x1c] sm:$0xf] %v4995_v36  ;;  %4670 = vmatmul.bf16.gmra.mxu0 %v4211_v56  ;;  %v4005_v48 = vsel %vm11782_vm14, %v9964_v3, %v4004_v38  ;;  %v3778_v32 = vrot.slane %v3776_v34, 4  ;;  %v4008_v56 = vsel %vm11782_vm14, %v4006_v63, %v4007_v11  ;;  %v5297_v38 = vld [vmem:[#allocation3 + $0x24] sm:$0xf]  ;;  %v4127_v3 = vunpack.c.l.b16 %v3764_v44  ;;  %v10993_v44 = vld [vmem:[%s15321_s4 + $0x130] sm:$0xff] }
 0x278   : > { %5296 = vst [vmem:[#allocation3 + $0x20] sm:$0x1] %v5295_v43  ;;  %v4998_v6 = vshrl.u32 %v4935_v52, 16  ;;  %v4732_v31 = vmul.f32 %v12734_v41, %v4696_v25  ;;  %v5001_v26 = vshll.u32 %v4935_v52, 16  ;;  %v12897_v0 = vpop.f32.mrf.mxu2  ;;  %v4128_v34 = vunpack.c.l.b16 %v3774_v22  ;;  %v11001_v25 = vld [vmem:[%s15321_s4 + $0x170] sm:$0xff]  ;;  %7358 = vmatpush.bf16.msrb.mxu2 %v10993_v44 }
 0x279   : > { %v4537_v1 = vpop.f32.mrf.mxu3  ;;  %v4193_v50 = vunpack.c.l.b16 %v4005_v48  ;;  %v4194_v63 = vunpack.c.l.b16 %v4008_v56  ;;  %v3782_v11 = vor.u32 %v3781_v12, %v3778_v32  ;;  %v3792_v27 = vor.u32 %v3791_v42, %v12891_v8  ;;  %7447 = vmatpush.bf16.msrb.mxu3 %v11001_v25 }
 0x27a   : > { %v12893_v28 = vrot.slane %v4998_v6, 7  ;;  %v4768_v39 = vadd.f32 %v12746_v21, %v4732_v31  ;;  %v4538_v58 = vadd.f32 %v4537_v1, %v12849_v51  ;;  %v3795_v51 = vshll.u32 %v12867_v45, 16  ;;  %v10945_v45 = vld [vmem:[%s15321_s4 + $0x30] sm:$0xff]  ;;  %v3443_v6 = vld [vmem:[#allocation2 + $0xc0] sm:$0xf] }
 0x27b   : > { %v12901_v23 = vpop.f32.mrf.mxu0  ;;  %v4147_v37 = vpack.c.b16 %v4128_v34, %v4127_v3  ;;  %v4212_v48 = vpack.c.b16 %v4194_v63, %v4193_v50  ;;  %v12920_v32 = vrot.slane %v3782_v11, 4  ;;  %v12922_v1 = vrot.slane %v3792_v27, 4  ;;  %7680 = vmatpush.bf16.msrb.mxu0 %v10945_v45  ;;  %v3444_v3 = vld [vmem:[#allocation2 + $0xc4] sm:$0xf] }
 0x27c   : > { %v5003_v46 = vor.u32 %v5001_v26, %v12893_v28  ;;  %v4800_v40 = vmax.f32 %v4768_v39, 0.0  ;;  %v4627_v62 = vadd.f32 %v12818_v9, %v4538_v58  ;;  %v4896_v9 = vsel %vm11290_vm6, 0, %v4895_v20  ;;  %v5301_v26 = vld [vmem:[#allocation3 + $0x2c] sm:$0x1] }
 0x27d   : > { %4897 = vst [vmem:[#allocation3 + $0x44] sm:$0x1] %v4896_v9  ;;  %v12924_v56 = vrot.slane %v3795_v51, 5  ;;  %v5004_v34 = vrot.slane %v12893_v28, 4  ;;  %v3803_v50 = vshll.u32 %v3443_v6, 16 }
 0x27e   : > { %v5298_v35 = vsel %vm11317_vm8, %v5003_v46, %v5297_v38  ;;  %v4936_v36 = vpack.c.bf16 %v4800_v40, %v4800_v40  ;;  %v4697_v43 = vadd.f32 %v4627_v62, %v12381_v33  ;;  %v10964_v52 = vld [vmem:[#allocation3 + $0x18] sm:$0xff]  ;;  %v4011_v40 = vrot.slane %v3444_v3, 5 }
 0x27f   : > { %5299 = vst [vmem:[#allocation3 + $0x24] sm:$0xf] %v5298_v35  ;;  %7281 = vmatmul.bf16.gmra.mxu1 %v10964_v52  ;;  %v10896_v46 = vld [vmem:[#allocation2 + $0xb4] sm:$0xff]  ;;  %v3800_v62 = vshrl.u32 %v3443_v6, 16  ;;  %v3861_v35 = vld [vmem:[#allocation2 + $0xc0] sm:$0xe] }
 0x280   : > { %v5006_v22 = vshrl.u32 %v4936_v36, 16  ;;  %v4733_v33 = vmul.f32 %v12734_v41, %v4697_v43  ;;  %v5009_v42 = vshll.u32 %v4936_v36, 16  ;;  %v12928_v38 = vpop.f32.mrf.mxu2  ;;  %v4850_v36 = vld [vmem:[#allocation3 + $0x48] sm:$0x1]  ;;  %v3809_v43 = vshll.u32 %v3444_v3, 16 }
 0x281   : > { %v4539_v31 = vpop.f32.mrf.mxu3  ;;  %v3813_v52 = vshrl.u32 %v3444_v3, 16  ;;  %v9965_v45 = vrot.slane %v3861_v35, 9  ;;  %v10944_v35 = vld [vmem:[%s15321_s4 + $0x28] sm:$0xff] }
 0x282   : > { %v5008_v12 = vrot.slane %v5006_v22, 7  ;;  %v4769_v39 = vadd.f32 %v12746_v21, %v4733_v33  ;;  %v4540_v58 = vadd.f32 %v4539_v31, %v12865_v55  ;;  %v12934_v55 = vld [vmem:[#allocation2 + $0xc8] sm:$0x1]  ;;  %v3802_v22 = vrot.slane %v3800_v62, 4  ;;  %7681 = vmatpush.bf16.msrb.mxu0 %v10944_v35 }
 0x283   : > { %v12932_v51 = vpop.f32.mrf.mxu0  ;;  %v3805_v33 = vrot.slane %v3803_v50, 5 }
 0x284   : > { %v5011_v20 = vor.u32 %v5009_v42, %v5008_v12  ;;  %v5013_v63 = vrot.slane %v5008_v12, 4  ;;  %v4801_v11 = vmax.f32 %v4769_v39, 0.0  ;;  %v4629_v27 = vadd.f32 %v12853_v24, %v4540_v58  ;;  %v10953_v12 = vld [vmem:[%s15321_s4 + $0x70] sm:$0xff] }
 0x285   : > { %4497 = vmatmul.bf16.gmra.mxu2 %v10896_v46  ;;  %v4851_v24 = vsel %vm11276_vm2, 0, %v4850_v36  ;;  %v4013_v42 = vrot.slane %v4011_v40, 4  ;;  %v12956_v39 = vrot.slane %v3809_v43, 5  ;;  %v3815_v58 = vrot.slane %v3813_v52, 4  ;;  %7769 = vmatpush.bf16.msrb.mxu1 %v10953_v12  ;;  %v4898_v43 = vld [vmem:[#allocation3 + $0x50] sm:$0x1] }
 0x286   : > { %v5012_v28 = vsel %vm11304_vm7, %v5004_v34, %v5011_v20  ;;  %v5302_v9 = vsel %vm11276_vm2, %v5013_v63, %v5301_v26  ;;  %v4937_v25 = vpack.c.bf16 %v4801_v11, %v4801_v11  ;;  %v4698_v44 = vadd.f32 %v4629_v27, %v12398_v18  ;;  %4581 = vmatmul.bf16.gmra.mxu3 %v4147_v37 }
 0x287   : > { %5300 = vst [vmem:[#allocation3 + $0x28] sm:$0xf] %v5012_v28  ;;  %4675 = vmatmul.bf16.gmra.mxu0 %v4212_v48  ;;  %v4014_v18 = vrot.slane %v12934_v55, 5  ;;  %v3788_v48 = vsel %vm11405_vm11, %v12920_v32, %v12891_v8  ;;  %v3798_v26 = vsel %vm11405_vm11, %v12922_v1, %v12924_v56  ;;  %v5304_v8 = vld [vmem:[#allocation3 + $0x30] sm:$0xf]  ;;  %v4012_v32 = vsel %vm11782_vm14, %v9965_v45, %v4011_v40 }
 0x288   : > { %5303 = vst [vmem:[#allocation3 + $0x2c] sm:$0x1] %v5302_v9  ;;  %v5015_v6 = vshrl.u32 %v4937_v25, 16  ;;  %v4734_v31 = vmul.f32 %v12734_v41, %v4698_v44  ;;  %v5018_v34 = vshll.u32 %v4937_v25, 16  ;;  %v12962_v50 = vpop.f32.mrf.mxu2  ;;  %v3806_v20 = vor.u32 %v3805_v33, %v3802_v22 }
 0x289   : > { %v4542_v37 = vpop.f32.mrf.mxu3  ;;  %4852 = vst [vmem:[#allocation3 + $0x48] sm:$0x1] %v4851_v24  ;;  %v4015_v27 = vsel %vm11782_vm14, %v4013_v42, %v4014_v18  ;;  %v12978_v40 = vunpack.c.l.b16 %v3788_v48  ;;  %v12980_v36 = vunpack.c.l.b16 %v3798_v26  ;;  %v4899_v44 = vsel %vm11290_vm6, 0, %v4898_v43  ;;  %v11000_v24 = vld [vmem:[%s15321_s4 + $0x168] sm:$0xff] }
 0x28a   : > { %v12958_v3 = vrot.slane %v5015_v6, 7  ;;  %v4770_v46 = vadd.f32 %v12746_v21, %v4734_v31  ;;  %v4543_v62 = vadd.f32 %v4542_v37, %v12897_v0  ;;  %v10992_v0 = vld [vmem:[%s15321_s4 + $0x128] sm:$0xff]  ;;  %v4195_v45 = vunpack.c.l.b16 %v4012_v32  ;;  %v12994_v31 = vld [vmem:[#allocation2 + $0xd0] sm:$0xf]  ;;  %4900 = vst [vmem:[#allocation3 + $0x50] sm:$0x1] %v4899_v44  ;;  %7448 = vmatpush.bf16.msrb.mxu3 %v11000_v24 }
 0x28b   : > { %v12968_v11 = vpop.f32.mrf.mxu0  ;;  %7359 = vmatpush.bf16.msrb.mxu2 %v10992_v0  ;;  %v4196_v22 = vunpack.c.l.b16 %v4015_v27  ;;  %v12991_v33 = vrot.slane %v3806_v20, 4  ;;  %v3819_v6 = vshll.u32 %v12934_v55, 16  ;;  %v12997_v42 = vld [vmem:[#allocation2 + $0xcc] sm:$0xf]  ;;  %v3357_v18 = vadd.f32 %v12408_v17, %v12442_v60  ;;  %v10991_v55 = vld [vmem:[%s15321_s4 + $0x120] sm:$0xff] }
 0x28c   : > { %v5020_v1 = vor.u32 %v5018_v34, %v12958_v3  ;;  %v4802_v56 = vmax.f32 %v4770_v46, 0.0  ;;  %v4632_v63 = vadd.f32 %v12871_v4, %v4543_v62  ;;  %v3816_v4 = vor.u32 %v3815_v58, %v12956_v39  ;;  %v10943_v58 = vld [vmem:[%s15321_s4 + $0x20] sm:$0xff]  ;;  %v13011_v34 = vld [vmem:[#allocation2 + $0xd4] sm:$0x1] }
 0x28d   : > { %v4148_v48 = vpack.c.b16 %v12980_v36, %v12978_v40  ;;  %v4018_v46 = vrot.slane %v12994_v31, 5  ;;  %v10999_v20 = vld [vmem:[%s15321_s4 + $0x160] sm:$0xff]  ;;  %v4213_v0 = vpack.c.b16 %v4196_v22, %v4195_v45  ;;  %v3812_v35 = vsel %vm11405_vm11, %v12991_v33, %v12956_v39  ;;  %7682 = vmatpush.bf16.msrb.mxu0 %v10943_v58  ;;  %v4853_v39 = vld [vmem:[#allocation3 + $0x54] sm:$0x1] }
 0x28e   : > { %v5305_v52 = vsel %vm11317_vm8, %v5020_v1, %v5304_v8  ;;  %v4938_v28 = vpack.c.bf16 %v4802_v56, %v4802_v56  ;;  %v4699_v9 = vadd.f32 %v4632_v63, %v12428_v29  ;;  %v10965_v25 = vld [vmem:[#allocation3 + $0x24] sm:$0xff]  ;;  %v13003_v26 = vrot.slane %v3816_v4, 4  ;;  %v3862_v1 = vld [vmem:[#allocation2 + $0xcc] sm:$0xe]  ;;  %v5308_v63 = vld [vmem:[#allocation3 + $0x38] sm:$0x1]  ;;  %7449 = vmatpush.bf16.msrb.mxu3 %v10999_v20 }
 0x28f   : > { %5306 = vst [vmem:[#allocation3 + $0x30] sm:$0xf] %v5305_v52  ;;  %7286 = vmatmul.bf16.gmra.mxu1 %v10965_v25  ;;  %v5021_v56 = vrot.slane %v12958_v3, 4  ;;  %v10897_v27 = vld [vmem:[#allocation2 + $0xc0] sm:$0xff]  ;;  %v3821_v40 = vrot.slane %v3819_v6, 5  ;;  %7360 = vmatpush.bf16.msrb.mxu2 %v10991_v55  ;;  %v10990_v3 = vld [vmem:[%s15321_s4 + $0x118] sm:$0xff] }
 0x290   : > { %v5023_v29 = vshrl.u32 %v4938_v28, 16  ;;  %v4735_v12 = vmul.f32 %v12734_v41, %v4699_v9  ;;  %v5026_v17 = vshll.u32 %v4938_v28, 16  ;;  %v13016_v32 = vpop.f32.mrf.mxu2  ;;  %v10942_v28 = vld [vmem:[%s15321_s4 + $0x18] sm:$0xff]  ;;  %v9966_v9 = vrot.slane %v3862_v1, 9 }
 0x291   : > { %v4544_v37 = vpop.f32.mrf.mxu3  ;;  %v4020_v25 = vrot.slane %v4018_v46, 4  ;;  %v4021_v44 = vrot.slane %v13011_v34, 5  ;;  %v3824_v24 = vshrl.u32 %v12997_v42, 16  ;;  %v10998_v6 = vld [vmem:[%s15321_s4 + $0x158] sm:$0xff]  ;;  %v3837_v55 = vshrl.u32 %v12994_v31, 16  ;;  %7683 = vmatpush.bf16.msrb.mxu0 %v10942_v28 }
 0x292   : > { %v5025_v62 = vrot.slane %v5023_v29, 7  ;;  %v4771_v60 = vadd.f32 %v12746_v21, %v4735_v12  ;;  %v4545_v8 = vadd.f32 %v4544_v37, %v12928_v38  ;;  %v4854_v29 = vsel %vm11276_vm2, 0, %v4853_v39  ;;  %7450 = vmatpush.bf16.msrb.mxu3 %v10998_v6  ;;  %v10988_v39 = vld [vmem:[%s15321_s4 + $0x108] sm:$0xff] }
 0x293   : > { %v13027_v52 = vpop.f32.mrf.mxu0  ;;  %v3827_v12 = vshll.u32 %v12997_v42, 16  ;;  %v3833_v37 = vshll.u32 %v12994_v31, 16  ;;  %7361 = vmatpush.bf16.msrb.mxu2 %v10990_v3  ;;  %v13056_v42 = vunpack.c.l.b16 %v3812_v35  ;;  %4855 = vst [vmem:[#allocation3 + $0x54] sm:$0x1] %v4854_v29  ;;  %v4019_v31 = vsel %vm11782_vm14, %v9966_v9, %v4018_v46  ;;  %v10997_v46 = vld [vmem:[%s15321_s4 + $0x150] sm:$0xff] }
 0x294   : > { %v5028_v38 = vor.u32 %v5026_v17, %v5025_v62  ;;  %v5030_v36 = vrot.slane %v5025_v62, 4  ;;  %v4803_v43 = vmax.f32 %v4771_v60, 0.0  ;;  %v4634_v4 = vadd.f32 %v12901_v23, %v4545_v8  ;;  %v10941_v8 = vld [vmem:[%s15321_s4 + $0x10] sm:$0xff]  ;;  %v6259_v9 = vld [vmem:[#allocation3 + $0xc] sm:$0xf] }
 0x295   : > { %4502 = vmatmul.bf16.gmra.mxu2 %v10897_v27  ;;  %v3822_v17 = vsel %vm11405_vm11, %v13003_v26, %v3821_v40  ;;  %v4022_v60 = vsel %vm11782_vm14, %v4020_v25, %v4021_v44  ;;  %v13074_v27 = vld [vmem:[#allocation3 + $0x10] sm:$0xf]  ;;  %v3826_v35 = vrot.slane %v3824_v24, 4  ;;  %v3829_v40 = vrot.slane %v3827_v12, 5  ;;  %7684 = vmatpush.bf16.msrb.mxu0 %v10941_v8  ;;  %v4901_v25 = vld [vmem:[#allocation3 + $0x5c] sm:$0x1] }
 0x296   : > { %v5029_v23 = vsel %vm11304_vm7, %v5021_v56, %v5028_v38  ;;  %v5309_v45 = vsel %vm11276_vm2, %v5030_v36, %v5308_v63  ;;  %v4939_v22 = vpack.c.bf16 %v4803_v43, %v4803_v43  ;;  %v4700_v33 = vadd.f32 %v4634_v4, %v3357_v18  ;;  %4586 = vmatmul.bf16.gmra.mxu3 %v4148_v48  ;;  %v10989_v48 = vld [vmem:[%s15321_s4 + $0x110] sm:$0xff] }
 0x297   : > { %5307 = vst [vmem:[#allocation3 + $0x34] sm:$0xf] %v5029_v23  ;;  %4680 = vmatmul.bf16.gmra.mxu0 %v4213_v0  ;;  %v5311_v0 = vld [vmem:[#allocation3 + $0x3c] sm:$0xf]  ;;  %v13076_v38 = vrot.slane %v3833_v37, 5  ;;  %v3839_v36 = vrot.slane %v3837_v55, 4  ;;  %7362 = vmatpush.bf16.msrb.mxu2 %v10989_v48  ;;  %v4197_v44 = vunpack.c.l.b16 %v4019_v31  ;;  %v4198_v24 = vunpack.c.l.b16 %v4022_v60 }
 0x298   : > { %5310 = vst [vmem:[#allocation3 + $0x38] sm:$0x1] %v5309_v45  ;;  %v5032_v58 = vshrl.u32 %v4939_v22, 16  ;;  %v4736_v18 = vmul.f32 %v12734_v41, %v4700_v33  ;;  %v5035_v1 = vshll.u32 %v4939_v22, 16  ;;  %v13069_v63 = vpop.f32.mrf.mxu2  ;;  %7451 = vmatpush.bf16.msrb.mxu3 %v10997_v46  ;;  %v10940_v23 = vld [vmem:[%s15321_s4 + $0x8] sm:$0xff]  ;;  %v6321_v45 = vshrl.u32 %v13074_v27, 16 }
 0x299   : > { %v4547_v62 = vpop.f32.mrf.mxu3  ;;  %v4902_v12 = vsel %vm11290_vm6, 0, %v4901_v25  ;;  %v10996_v37 = vld [vmem:[%s15321_s4 + $0x148] sm:$0xff]  ;;  %v3362_v55 = vadd.f32 %v12451_v10, %v12470_v30  ;;  %v3843_v48 = vshll.u32 %v13011_v34, 16  ;;  %v6308_v31 = vshrl.u32 %v6259_v9, 16  ;;  %7685 = vmatpush.bf16.msrb.mxu0 %v10940_v23  ;;  %v10987_v10 = vld [vmem:[%s15321_s4 + $0x100] sm:$0xff] }
 0x29a   : > { %v13065_v20 = vrot.slane %v5032_v58, 7  ;;  %v4772_v56 = vadd.f32 %v12746_v21, %v4736_v18  ;;  %v4548_v26 = vadd.f32 %v4547_v62, %v12962_v50  ;;  %v13080_v50 = vunpack.c.l.b16 %v3822_v17  ;;  %4903 = vst [vmem:[#allocation3 + $0x5c] sm:$0x1] %v4902_v12  ;;  %v10939_v30 = vld [vmem:[%s15321_s4] sm:$0xff] }
 0x29b   : > { %v13082_v28 = vpop.f32.mrf.mxu0  ;;  %v3830_v58 = vor.u32 %v3829_v40, %v3826_v35  ;;  %v3840_v18 = vor.u32 %v3839_v36, %v13076_v38  ;;  %7363 = vmatpush.bf16.msrb.mxu2 %v10988_v39  ;;  %v4214_v8 = vpack.c.b16 %v4198_v24, %v4197_v44  ;;  %v10995_v40 = vld [vmem:[%s15321_s4 + $0x140] sm:$0xff]  ;;  %v4856_v24 = vld [vmem:[#allocation3 + $0x60] sm:$0x1]  ;;  %v6310_v23 = vrot.slane %v6308_v31, 4 }
 0x29c   : > { %v5037_v43 = vor.u32 %v5035_v1, %v13065_v20  ;;  %v4804_v4 = vmax.f32 %v4772_v56, 0.0  ;;  %v4637_v3 = vadd.f32 %v12932_v51, %v4548_v26  ;;  %v6317_v51 = vshll.u32 %v13074_v27, 16  ;;  %7452 = vmatpush.bf16.msrb.mxu3 %v10996_v37  ;;  %v5315_v26 = vld [vmem:[#allocation3 + $0x44] sm:$0x1]  ;;  %v13139_v37 = vld [vmem:[%s15319_s2] ss:$0 sm:$0xff] }
 0x29d   : > { %v4149_v17 = vpack.c.b16 %v13080_v50, %v13056_v42  ;;  %v6323_v1 = vrot.slane %v6321_v45, 4  ;;  %v5038_v36 = vrot.slane %v13065_v20, 4  ;;  %v3845_v50 = vrot.slane %v3843_v48, 5  ;;  %7686 = vmatpush.bf16.msrb.mxu0 %v10939_v30 }
 0x29e   : > { %v5312_v22 = vsel %vm11317_vm8, %v5037_v43, %v5311_v0  ;;  %v4940_v33 = vpack.c.bf16 %v4804_v4, %v4804_v4  ;;  %v4701_v6 = vadd.f32 %v4637_v3, %v12465_v13  ;;  %v10966_v29 = vld [vmem:[#allocation3 + $0x30] sm:$0xff]  ;;  %v13113_v34 = vrot.slane %v6317_v51, 5 }
 0x29f   : > { %5313 = vst [vmem:[#allocation3 + $0x3c] sm:$0xf] %v5312_v22  ;;  %7291 = vmatmul.bf16.gmra.mxu1 %v10966_v29  ;;  %v10898_v43 = vld [vmem:[#allocation2 + $0xcc] sm:$0xff]  ;;  %v3831_v4 = vrot.slane %v3830_v58, 4  ;;  %v3841_v3 = vrot.slane %v3840_v18, 4  ;;  %7364 = vmatpush.bf16.msrb.mxu2 %v10987_v10 }
 0x2a0   : > { %v5040_v62 = vshrl.u32 %v4940_v33, 16  ;;  %v4737_v13 = vmul.f32 %v12734_v41, %v4701_v6  ;;  %v6311_v41 = vshll.u32 %v6259_v9, 16  ;;  %v5043_v56 = vshll.u32 %v4940_v33, 16  ;;  %v13117_v35 = vpop.f32.mrf.mxu2  ;;  %7453 = vmatpush.bf16.msrb.mxu3 %v10995_v40 }
 0x2a1   : > { %v4549_v60 = vpop.f32.mrf.mxu3  ;;  %v6324_v20 = vor.u32 %v6323_v1, %v13113_v34  ;;  %v4857_v6 = vsel %vm11276_vm2, 0, %v4856_v24  ;;  %v3836_v18 = vsel %vm11405_vm11, %v3831_v4, %v13076_v38  ;;  %v3846_v48 = vsel %vm11405_vm11, %v3841_v3, %v3845_v50  ;;  %v5318_v1 = vld [vmem:[#allocation3 + $0x48] sm:$0xf]  ;;  %v6261_v24 = vld [vmem:[#allocation3 + $0x18] sm:$0xf] }
 0x2a2   : > { %v5042_v42 = vrot.slane %v5040_v62, 7  ;;  %v4773_v46 = vadd.f32 %v12746_v21, %v4737_v13  ;;  %v4550_v0 = vadd.f32 %v4549_v60, %v13016_v32  ;;  %v13126_v32 = vld [vmem:[#allocation3 + $0x14] sm:$0x1]  ;;  %v6313_v51 = vrot.slane %v6311_v41, 5  ;;  %4858 = vst [vmem:[#allocation3 + $0x60] sm:$0x1] %v4857_v6 }
 0x2a3   : > { %v13124_v21 = vpop.f32.mrf.mxu0  ;;  %v6327_v29 = vshll.u32 %v13126_v32, 16  ;;  %v13161_v41 = vld [vmem:[#allocation3 + $0x1c] sm:$0xf]  ;;  %v6332_v6 = vshrl.u32 %v6261_v24, 16 }
 0x2a4   : > { %v5045_v39 = vor.u32 %v5043_v56, %v5042_v42  ;;  %v5047_v9 = vrot.slane %v5042_v42, 4  ;;  %v4805_v25 = vmax.f32 %v4773_v46, 0.0  ;;  %v4639_v44 = vadd.f32 %v12968_v11, %v4550_v0 }
 0x2a5   : > { %4507 = vmatmul.bf16.gmra.mxu2 %v10898_v43  ;;  %v6314_v13 = vor.u32 %v6313_v51, %v6310_v23  ;;  %v4133_v42 = vunpack.c.l.b16 %v3836_v18  ;;  %v4134_v56 = vunpack.c.l.b16 %v3846_v48  ;;  %v4904_v43 = vld [vmem:[#allocation3 + $0x68] sm:$0x1]  ;;  %v6341_v3 = vshll.u32 %v13161_v41, 16 }
 0x2a6   : > { %v5046_v45 = vsel %vm11304_vm7, %v5038_v36, %v5045_v39  ;;  %v5316_v22 = vsel %vm11276_vm2, %v5047_v9, %v5315_v26  ;;  %v4941_v33 = vpack.c.bf16 %v4805_v25, %v4805_v25  ;;  %v4702_v11 = vadd.f32 %v4639_v44, %v3362_v55  ;;  %4591 = vmatmul.bf16.gmra.mxu3 %v4149_v17  ;;  %v10952_v55 = vld [vmem:[%s15321_s4 + $0x68] sm:$0xff] }
 0x2a7   : > { %5314 = vst [vmem:[#allocation3 + $0x40] sm:$0xf] %v5046_v45  ;;  %4685 = vmatmul.bf16.gmra.mxu0 %v4214_v8  ;;  %v6325_v17 = vrot.slane %v6324_v20, 4  ;;  %v13155_v8 = vld [vmem:[%s15320_s3] ss:$0 sm:$0xff]  ;;  %7770 = vmatpush.bf16.msrb.mxu1 %v10952_v55  ;;  %v6329_v26 = vrot.slane %v6327_v29, 5  ;;  %v3367_v23 = vadd.f32 %v12477_v57, %v12496_v14  ;;  %v4150_v51 = vpack.c.b16 %v4134_v56, %v4133_v42 }
 0x2a8   : > { %5317 = vst [vmem:[#allocation3 + $0x44] sm:$0x1] %v5316_v22  ;;  %v5049_v12 = vshrl.u32 %v4941_v33, 16  ;;  %v4738_v58 = vmul.f32 %v13139_v37, %v4702_v11  ;;  %v5052_v60 = vshll.u32 %v4941_v33, 16  ;;  %v13159_v38 = vpop.f32.mrf.mxu2  ;;  %v6315_v4 = vrot.slane %v6314_v13, 4 }
 0x2a9   : > { %v4552_v62 = vpop.f32.mrf.mxu3  ;;  %v6345_v50 = vshrl.u32 %v13161_v41, 16  ;;  %v6757_v20 = vrot.slane %v13074_v27, 5  ;;  %v6335_v29 = vshll.u32 %v6261_v24, 16  ;;  %v6691_v42 = vld [vmem:[#allocation3 + $0xc] sm:$0xe] }
 0x2aa   : > { %v13150_v31 = vrot.slane %v5049_v12, 7  ;;  %v4774_v10 = vadd.f32 %v13155_v8, %v4738_v58  ;;  %v4553_v30 = vadd.f32 %v4552_v62, %v13069_v63  ;;  %v6330_v63 = vsel %vm11405_vm11, %v6325_v17, %v6329_v26  ;;  %v5322_v62 = vld [vmem:[#allocation3 + $0x50] sm:$0x1]  ;;  %v4859_v24 = vld [vmem:[#allocation3 + $0x6c] sm:$0x1] }
 0x2ab   : > { %v13165_v36 = vpop.f32.mrf.mxu0  ;;  %v6948_v33 = vunpack.c.l.b16 %v6330_v63  ;;  %v13183_v12 = vrot.slane %v6341_v3, 5  ;;  %v6347_v57 = vrot.slane %v6345_v50, 4  ;;  %v6760_v17 = vrot.slane %v13126_v32, 5  ;;  %v10923_v50 = vld [vmem:[#allocation3] sm:$0xff] }
 0x2ac   : > { %v5054_v46 = vor.u32 %v5052_v60, %v13150_v31  ;;  %v4806_v0 = vmax.f32 %v4774_v10, 0.0  ;;  %v4642_v40 = vadd.f32 %v13027_v52, %v4553_v30  ;;  %v4905_v52 = vsel %vm11290_vm6, 0, %v4904_v43 }
 0x2ad   : > { %4906 = vst [vmem:[#allocation3 + $0x68] sm:$0x1] %v4905_v52  ;;  %v5055_v48 = vrot.slane %v13150_v31, 4  ;;  %v6348_v31 = vor.u32 %v6347_v57, %v13183_v12 }
 0x2ae   : > { %v5319_v39 = vsel %vm11317_vm8, %v5054_v46, %v5318_v1  ;;  %v4942_v9 = vpack.c.bf16 %v4806_v0, %v4806_v0  ;;  %v4703_v25 = vadd.f32 %v4642_v40, %v12489_v47  ;;  %v10967_v44 = vld [vmem:[#allocation3 + $0x3c] sm:$0xff]  ;;  %v6320_v47 = vsel %vm11405_vm11, %v6315_v4, %v13113_v34 }
 0x2af   : > { %5320 = vst [vmem:[#allocation3 + $0x48] sm:$0xf] %v5319_v39  ;;  %7296 = vmatmul.bf16.gmra.mxu1 %v10967_v44  ;;  %v6947_v13 = vunpack.c.l.b16 %v6320_v47  ;;  %v6759_v34 = vrot.slane %v6757_v20, 4  ;;  %v13194_v46 = vld [vmem:[#allocation3 + $0x20] sm:$0x1]  ;;  %v6337_v0 = vrot.slane %v6335_v29, 5 }
 0x2b0   : > { %v5057_v45 = vshrl.u32 %v4942_v9, 16  ;;  %v4739_v22 = vmul.f32 %v13139_v37, %v4703_v25  ;;  %v5060_v58 = vshll.u32 %v4942_v9, 16  ;;  %v13187_v18 = vpop.f32.mrf.mxu2  ;;  %v6351_v9 = vshll.u32 %v13194_v46, 16  ;;  %v5325_v29 = vld [vmem:[#allocation3 + $0x54] sm:$0xf] }
 0x2b1   : > { %v4554_v11 = vpop.f32.mrf.mxu3  ;;  %v6979_v26 = vpack.c.b16 %v6948_v33, %v6947_v13  ;;  %v6761_v39 = vsel %vm11782_vm14, %v6759_v34, %v6760_v17 }
 0x2b2   : > { %v5059_v14 = vrot.slane %v5057_v45, 7  ;;  %v4775_v27 = vadd.f32 %v13155_v8, %v4739_v22  ;;  %v4555_v55 = vadd.f32 %v4554_v11, %v13117_v35  ;;  %v6334_v35 = vrot.slane %v6332_v6, 4  ;;  %v13215_v6 = vld [vmem:[#allocation3 + $0x28] sm:$0xf] }
 0x2b3   : > { %v13192_v56 = vpop.f32.mrf.mxu0  ;;  %v4860_v11 = vsel %vm11276_vm2, 0, %v4859_v24  ;;  %v7012_v57 = vunpack.c.l.b16 %v6761_v39  ;;  %v6369_v13 = vshrl.u32 %v13215_v6, 16 }
 0x2b4   : > { %v5062_v60 = vor.u32 %v5060_v58, %v5059_v14  ;;  %v5064_v10 = vrot.slane %v5059_v14, 4  ;;  %v4807_v30 = vmax.f32 %v4775_v27, 0.0  ;;  %v4644_v1 = vadd.f32 %v13082_v28, %v4555_v55  ;;  %4861 = vst [vmem:[#allocation3 + $0x6c] sm:$0x1] %v4860_v11 }
 0x2b5   : > { %7365 = vmatmul.bf16.vlgmr.msrb.gmra.mxu2 %v6979_v26  ;;  %v10255_v28 = vrot.slane %v6691_v42, 9  ;;  %v6353_v27 = vrot.slane %v6351_v9, 5  ;;  %v4907_v26 = vld [vmem:[#allocation3 + $0x74] sm:$0x1]  ;;  %v5329_v9 = vld [vmem:[#allocation3 + $0x5c] sm:$0x1] }
 0x2b6   : > { %v5063_v40 = vsel %vm11304_vm7, %v5055_v48, %v5062_v60  ;;  %v5323_v32 = vsel %vm11276_vm2, %v5064_v10, %v5322_v62  ;;  %v4943_v43 = vpack.c.bf16 %v4807_v30, %v4807_v30  ;;  %v4704_v4 = vadd.f32 %v4644_v1, %v3367_v23  ;;  %4596 = vmatmul.bf16.gmra.mxu3 %v4150_v51 }
 0x2b7   : > { %5321 = vst [vmem:[#allocation3 + $0x4c] sm:$0xf] %v5063_v40  ;;  %v6758_v52 = vsel %vm11782_vm14, %v10255_v28, %v6757_v20  ;;  %v6338_v23 = vor.u32 %v6337_v0, %v6334_v35  ;;  %v6349_v51 = vrot.slane %v6348_v31, 4  ;;  %7687 = vmatmul.bf16.vlgmr.msrb.gmra.mxu0 %v10923_v50  ;;  %v6365_v62 = vshll.u32 %v13215_v6, 16 }
 0x2b8   : > { %5324 = vst [vmem:[#allocation3 + $0x50] sm:$0x1] %v5323_v32  ;;  %v5066_v63 = vshrl.u32 %v4943_v43, 16  ;;  %v4740_v3 = vmul.f32 %v13139_v37, %v4704_v4  ;;  %v5069_v25 = vshll.u32 %v4943_v43, 16  ;;  %v13211_v33 = vpop.f32.mrf.mxu2  ;;  %v7011_v55 = vunpack.c.l.b16 %v6758_v52 }
 0x2b9   : > { %v4557_v44 = vpop.f32.mrf.mxu3  ;;  %v6339_v48 = vrot.slane %v6338_v23, 4  ;;  %v6354_v30 = vsel %vm11405_vm11, %v6349_v51, %v6353_v27  ;;  %v6764_v0 = vrot.slane %v13161_v41, 5  ;;  %v4908_v40 = vsel %vm11290_vm6, 0, %v4907_v26 }
 0x2ba   : > { %v13207_v45 = vrot.slane %v5066_v63, 7  ;;  %v4776_v22 = vadd.f32 %v13155_v8, %v4740_v3  ;;  %v4558_v47 = vadd.f32 %v4557_v44, %v13159_v38  ;;  %v6263_v38 = vld [vmem:[#allocation3 + $0x24] sm:$0xf]  ;;  %v7043_v1 = vpack.c.b16 %v7012_v57, %v7011_v55  ;;  %4909 = vst [vmem:[#allocation3 + $0x74] sm:$0x1] %v4908_v40 }
 0x2bb   : > { %v13228_v42 = vpop.f32.mrf.mxu0  ;;  %v6344_v35 = vsel %vm11405_vm11, %v6339_v48, %v13183_v12  ;;  %v6356_v32 = vshrl.u32 %v6263_v38, 16  ;;  %v6359_v43 = vshll.u32 %v6263_v38, 16  ;;  %v13237_v4 = vrot.slane %v6365_v62, 5  ;;  %v10924_v38 = vld [vmem:[#allocation3 + $0xc] sm:$0xff] }
 0x2bc   : > { %v5071_v20 = vor.u32 %v5069_v25, %v13207_v45  ;;  %v4808_v14 = vmax.f32 %v4776_v22, 0.0  ;;  %v4647_v58 = vadd.f32 %v13124_v21, %v4558_v47  ;;  %v3372_v21 = vadd.f32 %v12500_v2, %v12519_v15  ;;  %v6692_v47 = vld [vmem:[#allocation3 + $0x18] sm:$0xe] }
 0x2bd   : > { %v6950_v15 = vunpack.c.l.b16 %v6354_v30  ;;  %v6371_v28 = vrot.slane %v6369_v13, 4  ;;  %v5072_v39 = vrot.slane %v13207_v45, 4  ;;  %v6949_v25 = vunpack.c.l.b16 %v6344_v35  ;;  %v4862_v30 = vld [vmem:[#allocation3 + $0x78] sm:$0x1] }
 0x2be   : > { %v5326_v34 = vsel %vm11317_vm8, %v5071_v20, %v5325_v29  ;;  %v4944_v17 = vpack.c.bf16 %v4808_v14, %v4808_v14  ;;  %v4705_v60 = vadd.f32 %v4647_v58, %v12514_v7  ;;  %v10968_v10 = vld [vmem:[#allocation3 + $0x48] sm:$0xff]  ;;  %v6766_v44 = vrot.slane %v6764_v0, 4 }
 0x2bf   : > { %5327 = vst [vmem:[#allocation3 + $0x54] sm:$0xf] %v5326_v34  ;;  %7301 = vmatmul.bf16.gmra.mxu1 %v10968_v10  ;;  %v6767_v52 = vrot.slane %v13194_v46, 5  ;;  %v6980_v11 = vpack.c.b16 %v6950_v15, %v6949_v25  ;;  %v13246_v29 = vld [vmem:[#allocation3 + $0x2c] sm:$0x1]  ;;  %v6358_v57 = vrot.slane %v6356_v32, 4  ;;  %v6372_v20 = vor.u32 %v6371_v28, %v13237_v4 }
 0x2c0   : > { %v5074_v31 = vshrl.u32 %v4944_v17, 16  ;;  %v4741_v7 = vmul.f32 %v13139_v37, %v4705_v60  ;;  %v5077_v3 = vshll.u32 %v4944_v17, 16  ;;  %v13241_v50 = vpop.f32.mrf.mxu2  ;;  %v6375_v13 = vshll.u32 %v13246_v29, 16  ;;  %v10951_v60 = vld [vmem:[%s15321_s4 + $0x60] sm:$0xff]  ;;  %v13272_v32 = vld [vmem:[#allocation3 + $0x34] sm:$0xf] }
 0x2c1   : > { %v4559_v2 = vpop.f32.mrf.mxu3  ;;  %v6768_v62 = vsel %vm11782_vm14, %v6766_v44, %v6767_v52  ;;  %v4863_v40 = vsel %vm11276_vm2, 0, %v4862_v30  ;;  %7771 = vmatpush.bf16.msrb.mxu1 %v10951_v60  ;;  %v6774_v60 = vrot.slane %v13246_v29, 5 }
 0x2c2   : > { %v5076_v63 = vrot.slane %v5074_v31, 7  ;;  %v4777_v12 = vadd.f32 %v13155_v8, %v4741_v7  ;;  %v4560_v41 = vadd.f32 %v4559_v2, %v13187_v18  ;;  %v6361_v18 = vrot.slane %v6359_v43, 5  ;;  %v5332_v2 = vld [vmem:[#allocation3 + $0x60] sm:$0xf]  ;;  %4864 = vst [vmem:[#allocation3 + $0x78] sm:$0x1] %v4863_v40 }
 0x2c3   : > { %v13254_v48 = vpop.f32.mrf.mxu0  ;;  %v13303_v40 = vld [vmem:[#allocation3 + $0x38] sm:$0x1] }
 0x2c4   : > { %v5079_v24 = vor.u32 %v5077_v3, %v5076_v63  ;;  %v5081_v23 = vrot.slane %v5076_v63, 4  ;;  %v4809_v51 = vmax.f32 %v4777_v12, 0.0  ;;  %v4649_v22 = vadd.f32 %v13165_v36, %v4560_v41  ;;  %v6265_v12 = vld [vmem:[#allocation3 + $0x30] sm:$0xf] }
 0x2c5   : > { %7370 = vmatmul.bf16.gmra.mxu2 %v6980_v11  ;;  %v10256_v36 = vrot.slane %v6692_v47, 9  ;;  %v6377_v63 = vrot.slane %v6375_v13, 5  ;;  %v6389_v41 = vshll.u32 %v13272_v32, 16  ;;  %v6771_v11 = vrot.slane %v13215_v6, 5  ;;  %v5336_v13 = vld [vmem:[#allocation3 + $0x68] sm:$0x1] }
 0x2c6   : > { %v5080_v45 = vsel %vm11304_vm7, %v5072_v39, %v5079_v24  ;;  %v5330_v14 = vsel %vm11276_vm2, %v5081_v23, %v5329_v9  ;;  %v4945_v46 = vpack.c.bf16 %v4809_v51, %v4809_v51  ;;  %v4706_v58 = vadd.f32 %v4649_v22, %v3372_v21  ;;  %7454 = vmatmul.bf16.vlgmr.msrb.gmra.mxu3 %v7043_v1  ;;  %v4910_v22 = vld [vmem:[#allocation3 + $0x80] sm:$0x1] }
 0x2c7   : > { %5328 = vst [vmem:[#allocation3 + $0x58] sm:$0xf] %v5080_v45  ;;  %v6765_v10 = vsel %vm11782_vm14, %v10256_v36, %v6764_v0  ;;  %v6362_v21 = vor.u32 %v6361_v18, %v6358_v57  ;;  %v6373_v1 = vrot.slane %v6372_v20, 4  ;;  %7692 = vmatmul.bf16.gmra.mxu0 %v10924_v38  ;;  %v7014_v0 = vunpack.c.l.b16 %v6768_v62 }
 0x2c8   : > { %5331 = vst [vmem:[#allocation3 + $0x5c] sm:$0x1] %v5330_v14  ;;  %v5083_v27 = vshrl.u32 %v4945_v46, 16  ;;  %v4742_v55 = vmul.f32 %v13139_v37, %v4706_v58  ;;  %v5086_v34 = vshll.u32 %v4945_v46, 16  ;;  %v13268_v7 = vpop.f32.mrf.mxu2  ;;  %v7013_v3 = vunpack.c.l.b16 %v6765_v10 }
 0x2c9   : > { %v4562_v17 = vpop.f32.mrf.mxu3  ;;  %v6393_v39 = vshrl.u32 %v13272_v32, 16  ;;  %v6378_v24 = vsel %vm11405_vm11, %v6373_v1, %v6377_v63  ;;  %v4911_v20 = vsel %vm11290_vm6, 0, %v4910_v22  ;;  %v6380_v45 = vshrl.u32 %v6265_v12, 16 }
 0x2ca   : > { %v13264_v26 = vrot.slane %v5083_v27, 7  ;;  %v4778_v35 = vadd.f32 %v13155_v8, %v4742_v55  ;;  %v4563_v31 = vadd.f32 %v4562_v17, %v13211_v33  ;;  %v6363_v33 = vrot.slane %v6362_v21, 4  ;;  %4912 = vst [vmem:[#allocation3 + $0x80] sm:$0x1] %v4911_v20 }
 0x2cb   : > { %v7044_v51 = vpack.c.b16 %v7014_v0, %v7013_v3  ;;  %v6952_v14 = vunpack.c.l.b16 %v6378_v24  ;;  %v6383_v46 = vshll.u32 %v6265_v12, 16  ;;  %v13294_v58 = vrot.slane %v6389_v41, 5 }
 0x2cc   : > { %v5088_v15 = vor.u32 %v5086_v34, %v13264_v26  ;;  %v4810_v43 = vmax.f32 %v4778_v35, 0.0  ;;  %v4652_v28 = vadd.f32 %v13192_v56, %v4563_v31  ;;  %v15404_v56 = vld [vmem:[#allocation22_spill] sm:$0xff]  ;;  %v6368_v47 = vsel %vm11405_vm11, %v6363_v33, %v13237_v4  ;;  %v6693_v35 = vld [vmem:[#allocation3 + $0x24] sm:$0xe]  ;;  %v10925_v33 = vld [vmem:[#allocation3 + $0x18] sm:$0xff] }
 0x2cd   : > { %v3377_v23 = vadd.f32 %v15404_v56, %v12545_v16  ;;  %v6395_v36 = vrot.slane %v6393_v39, 4  ;;  %v5089_v62 = vrot.slane %v13264_v26, 4  ;;  %v6951_v34 = vunpack.c.l.b16 %v6368_v47 }
 0x2ce   : > { %v5333_v9 = vsel %vm11317_vm8, %v5088_v15, %v5332_v2  ;;  %v4946_v25 = vpack.c.bf16 %v4810_v43, %v4810_v43  ;;  %v4707_v44 = vadd.f32 %v4652_v28, %v12537_v59  ;;  %v10969_v52 = vld [vmem:[#allocation3 + $0x54] sm:$0xff]  ;;  %v13290_v59 = vpop.f32.mrf.mxu0  ;;  %v6773_v17 = vrot.slane %v6771_v11, 4 }
 0x2cf   : > { %5334 = vst [vmem:[#allocation3 + $0x60] sm:$0xf] %v5333_v9  ;;  %7306 = vmatmul.bf16.gmra.mxu1 %v10969_v52  ;;  %v6981_v31 = vpack.c.b16 %v6952_v14, %v6951_v34  ;;  %v6382_v2 = vrot.slane %v6380_v45, 4  ;;  %v6396_v0 = vor.u32 %v6395_v36, %v13294_v58  ;;  %v6399_v41 = vshll.u32 %v13303_v40, 16 }
 0x2d0   : > { %v5091_v57 = vshrl.u32 %v4946_v25, 16  ;;  %v4743_v18 = vmul.f32 %v13139_v37, %v4707_v44  ;;  %v5094_v27 = vshll.u32 %v4946_v25, 16  ;;  %v13298_v38 = vpop.f32.mrf.mxu2  ;;  %v6775_v12 = vsel %vm11782_vm14, %v6773_v17, %v6774_v60  ;;  %v4865_v44 = vld [vmem:[#allocation3 + $0x84] sm:$0x1]  ;;  %v15406_v60 = vld [vmem:[#allocation8_spill] sm:$0xff] }
 0x2d1   : > { %v4564_v16 = vpop.f32.mrf.mxu3  ;;  %v6397_v24 = vrot.slane %v6396_v0, 4  ;;  %v4866_v47 = vsel %vm11276_vm2, 0, %v4865_v44  ;;  %v7016_v20 = vunpack.c.l.b16 %v6775_v12  ;;  %v6401_v14 = vrot.slane %v6399_v41, 5 }
 0x2d2   : > { %v5093_v4 = vrot.slane %v5091_v57, 7  ;;  %v4779_v6 = vadd.f32 %v13155_v8, %v4743_v18  ;;  %v4565_v55 = vadd.f32 %v4564_v16, %v13241_v50  ;;  %v6385_v50 = vrot.slane %v6383_v46, 5  ;;  %v13326_v57 = vld [vmem:[#allocation3 + $0x40] sm:$0xf]  ;;  %v5339_v18 = vld [vmem:[#allocation3 + $0x6c] sm:$0xf] }
 0x2d3   : > { %4867 = vst [vmem:[#allocation3 + $0x84] sm:$0x1] %v4866_v47  ;;  %v6402_v17 = vsel %vm11405_vm11, %v6397_v24, %v6401_v14  ;;  %v6781_v44 = vrot.slane %v13303_v40, 5  ;;  %v6694_v47 = vld [vmem:[#allocation3 + $0x30] sm:$0xe] }
 0x2d4   : > { %v5096_v10 = vor.u32 %v5094_v27, %v5093_v4  ;;  %v5098_v30 = vrot.slane %v5093_v4, 4  ;;  %v4811_v21 = vmax.f32 %v4779_v6, 0.0  ;;  %v4654_v1 = vadd.f32 %v13228_v42, %v4565_v55 }
 0x2d5   : > { %7375 = vmatmul.bf16.gmra.mxu2 %v6981_v31  ;;  %v10257_v42 = vrot.slane %v6693_v35, 9  ;;  %v6386_v52 = vor.u32 %v6385_v50, %v6382_v2  ;;  %v6413_v4 = vshll.u32 %v13326_v57, 16  ;;  %v6417_v27 = vshrl.u32 %v13326_v57, 16 }
 0x2d6   : > { %v5097_v26 = vsel %vm11304_vm7, %v5089_v62, %v5096_v10  ;;  %v5337_v15 = vsel %vm11276_vm2, %v5098_v30, %v5336_v13  ;;  %v4947_v29 = vpack.c.bf16 %v4811_v21, %v4811_v21  ;;  %v4708_v43 = vadd.f32 %v4654_v1, %v3377_v23  ;;  %7459 = vmatmul.bf16.gmra.mxu3 %v7044_v51  ;;  %v13311_v3 = vpop.f32.mrf.mxu0  ;;  %v15405_v62 = vld [vmem:[#allocation9_spill] sm:$0xff]  ;;  %v4913_v21 = vld [vmem:[#allocation3 + $0x8c] sm:$0x1] }
 0x2d7   : > { %5335 = vst [vmem:[#allocation3 + $0x64] sm:$0xf] %v5097_v26  ;;  %v6772_v25 = vsel %vm11782_vm14, %v10257_v42, %v6771_v11  ;;  %7697 = vmatmul.bf16.gmra.mxu0 %v10925_v33  ;;  %v6387_v36 = vrot.slane %v6386_v52, 4  ;;  %v6778_v35 = vrot.slane %v13272_v32, 5  ;;  %v4914_v0 = vsel %vm11290_vm6, 0, %v4913_v21 }
 0x2d8   : > { %5338 = vst [vmem:[#allocation3 + $0x68] sm:$0x1] %v5337_v15  ;;  %v5100_v28 = vshrl.u32 %v4947_v29, 16  ;;  %v4744_v63 = vmul.f32 %v13139_v37, %v4708_v43  ;;  %v5103_v39 = vshll.u32 %v4947_v29, 16  ;;  %v13322_v22 = vpop.f32.mrf.mxu2  ;;  %v7015_v46 = vunpack.c.l.b16 %v6772_v25 }
 0x2d9   : > { %v4567_v9 = vpop.f32.mrf.mxu3  ;;  %v6392_v1 = vsel %vm11405_vm11, %v6387_v36, %v13294_v58  ;;  %4915 = vst [vmem:[#allocation3 + $0x8c] sm:$0x1] %v4914_v0  ;;  %v6954_v29 = vunpack.c.l.b16 %v6402_v17  ;;  %v13348_v42 = vrot.slane %v6413_v4, 5  ;;  %v6780_v25 = vrot.slane %v6778_v35, 4  ;;  %v13385_v0 = vld [vmem:[#allocation3 + $0x4c] sm:$0xf] }
 0x2da   : > { %v13318_v56 = vrot.slane %v5100_v28, 7  ;;  %v4780_v23 = vadd.f32 %v13155_v8, %v4744_v63  ;;  %v4568_v51 = vadd.f32 %v4567_v9, %v13268_v7  ;;  %v6267_v7 = vld [vmem:[#allocation3 + $0x3c] sm:$0xf]  ;;  %v7045_v30 = vpack.c.b16 %v7016_v20, %v7015_v46  ;;  %v13359_v20 = vpop.f32.mrf.mxu1 }
 0x2db   : > { %v6404_v26 = vshrl.u32 %v6267_v7, 16  ;;  %v6407_v43 = vshll.u32 %v6267_v7, 16  ;;  %v6419_v28 = vrot.slane %v6417_v27, 4  ;;  %v6953_v9 = vunpack.c.l.b16 %v6392_v1 }
 0x2dc   : > { %v5105_v11 = vor.u32 %v5103_v39, %v13318_v56  ;;  %v4812_v45 = vmax.f32 %v4780_v23, 0.0  ;;  %v4657_v16 = vadd.f32 %v13254_v48, %v4568_v51  ;;  %v15407_v48 = vld [vmem:[#allocation23_spill] sm:$0xff]  ;;  %v5106_v41 = vrot.slane %v13318_v56, 4 }
 0x2dd   : > { %v3382_v10 = vadd.f32 %v15407_v48, %v15406_v60  ;;  %v5343_v39 = vld [vmem:[#allocation3 + $0x74] sm:$0x1]  ;;  %v6420_v56 = vor.u32 %v6419_v28, %v13348_v42  ;;  %v4868_v60 = vld [vmem:[#allocation3 + $0x90] sm:$0x1] }
 0x2de   : > { %v5340_v6 = vsel %vm11317_vm8, %v5105_v11, %v5339_v18  ;;  %v4948_v55 = vpack.c.bf16 %v4812_v45, %v4812_v45  ;;  %v4709_v13 = vadd.f32 %v4657_v16, %v15405_v62  ;;  %v10970_v34 = vld [vmem:[#allocation3 + $0x60] sm:$0xff]  ;;  %v13344_v50 = vpop.f32.mrf.mxu0  ;;  %v6406_v11 = vrot.slane %v6404_v26, 4  ;;  %v5346_v26 = vld [vmem:[#allocation3 + $0x78] sm:$0xf] }
 0x2df   : > { %5341 = vst [vmem:[#allocation3 + $0x6c] sm:$0xf] %v5340_v6  ;;  %7311 = vmatmul.bf16.gmra.mxu1 %v10970_v34  ;;  %v13357_v18 = vld [vmem:[#allocation3 + $0x44] sm:$0x1]  ;;  %v6409_v45 = vrot.slane %v6407_v43, 5 }
 0x2e0   : > { %v5108_v31 = vshrl.u32 %v4948_v55, 16  ;;  %v4745_v2 = vmul.f32 %v13139_v37, %v4709_v13  ;;  %v5111_v63 = vshll.u32 %v4948_v55, 16  ;;  %v13352_v12 = vpop.f32.mrf.mxu2  ;;  %v6423_v36 = vshll.u32 %v13357_v18, 16  ;;  %v10926_v6 = vld [vmem:[#allocation3 + $0x24] sm:$0xff] }
 0x2e1   : > { %v4569_v15 = vpop.f32.mrf.mxu3  ;;  %v6782_v55 = vsel %vm11782_vm14, %v6780_v25, %v6781_v44  ;;  %v10950_v34 = vld [vmem:[%s15321_s4 + $0x58] sm:$0xff]  ;;  %v6410_v48 = vor.u32 %v6409_v45, %v6406_v11  ;;  %v15408_v25 = vld [vmem:[#allocation12_spill] sm:$0xff]  ;;  %v6785_v45 = vrot.slane %v13326_v57, 5 }
 0x2e2   : > { %v5110_v58 = vrot.slane %v5108_v31, 7  ;;  %v4781_v32 = vadd.f32 %v13155_v8, %v4745_v2  ;;  %v4570_v33 = vadd.f32 %v4569_v15, %v13298_v38  ;;  %v6982_v38 = vpack.c.b16 %v6954_v29, %v6953_v9  ;;  %7772 = vmatpush.bf16.msrb.mxu1 %v10950_v34 }
 0x2e3   : > { %v4869_v2 = vsel %vm11276_vm2, 0, %v4868_v60  ;;  %v6425_v15 = vrot.slane %v6423_v36, 5 }
 0x2e4   : > { %v5113_v52 = vor.u32 %v5111_v63, %v5110_v58  ;;  %v5115_v24 = vrot.slane %v5110_v58, 4  ;;  %v4813_v23 = vmax.f32 %v4781_v32, 0.0  ;;  %v4659_v51 = vadd.f32 %v13290_v59, %v4570_v33  ;;  %4870 = vst [vmem:[#allocation3 + $0x90] sm:$0x1] %v4869_v2 }
 0x2e5   : > { %7380 = vmatmul.bf16.gmra.mxu2 %v6982_v38  ;;  %v10258_v59 = vrot.slane %v6694_v47, 9  ;;  %v6411_v63 = vrot.slane %v6410_v48, 4  ;;  %v6437_v33 = vshll.u32 %v13385_v0, 16  ;;  %v4916_v38 = vld [vmem:[#allocation3 + $0x98] sm:$0x1]  ;;  %v6787_v48 = vrot.slane %v6785_v45, 4 }
 0x2e6   : > { %v5114_v16 = vsel %vm11304_vm7, %v5106_v41, %v5113_v52  ;;  %v5344_v40 = vsel %vm11276_vm2, %v5115_v24, %v5343_v39  ;;  %v4949_v14 = vpack.c.bf16 %v4813_v23, %v4813_v23  ;;  %v4710_v46 = vadd.f32 %v4659_v51, %v3382_v10  ;;  %7464 = vmatmul.bf16.gmra.mxu3 %v7045_v30  ;;  %v13368_v27 = vpop.f32.mrf.mxu0  ;;  %v6269_v24 = vld [vmem:[#allocation3 + $0x48] sm:$0xf] }
 0x2e7   : > { %5342 = vst [vmem:[#allocation3 + $0x70] sm:$0xf] %v5114_v16  ;;  %v6779_v17 = vsel %vm11782_vm14, %v10258_v59, %v6778_v35  ;;  %v6421_v10 = vrot.slane %v6420_v56, 4  ;;  %7702 = vmatmul.bf16.gmra.mxu0 %v10926_v6  ;;  %v7018_v35 = vunpack.c.l.b16 %v6782_v55  ;;  %v6441_v41 = vshrl.u32 %v13385_v0, 16  ;;  %v15410_v23 = vld [vmem:[#allocation10_spill] sm:$0xff] }
 0x2e8   : > { %5345 = vst [vmem:[#allocation3 + $0x74] sm:$0x1] %v5344_v40  ;;  %v5117_v7 = vshrl.u32 %v4949_v14, 16  ;;  %v4746_v4 = vmul.f32 %v13139_v37, %v4710_v46  ;;  %v5120_v62 = vshll.u32 %v4949_v14, 16  ;;  %v13381_v31 = vpop.f32.mrf.mxu2  ;;  %v7017_v58 = vunpack.c.l.b16 %v6779_v17  ;;  %v5350_v17 = vld [vmem:[#allocation3 + $0x80] sm:$0x1] }
 0x2e9   : > { %v4572_v13 = vpop.f32.mrf.mxu3  ;;  %v6426_v32 = vsel %vm11405_vm11, %v6421_v10, %v6425_v15  ;;  %v6416_v11 = vsel %vm11405_vm11, %v6411_v63, %v13348_v42  ;;  %v4917_v14 = vsel %vm11290_vm6, 0, %v4916_v38  ;;  %v6428_v36 = vshrl.u32 %v6269_v24, 16 }
 0x2ea   : > { %v13377_v30 = vrot.slane %v5117_v7, 7  ;;  %v4782_v21 = vadd.f32 %v13155_v8, %v4746_v4  ;;  %v4573_v1 = vadd.f32 %v4572_v13, %v13322_v22  ;;  %v7046_v47 = vpack.c.b16 %v7018_v35, %v7017_v58  ;;  %4918 = vst [vmem:[#allocation3 + $0x98] sm:$0x1] %v4917_v14  ;;  %v6695_v35 = vld [vmem:[#allocation3 + $0x3c] sm:$0xe] }
 0x2eb   : > { %v6956_v46 = vunpack.c.l.b16 %v6426_v32  ;;  %v6431_v7 = vshll.u32 %v6269_v24, 16  ;;  %v13409_v4 = vrot.slane %v6437_v33, 5  ;;  %v6443_v6 = vrot.slane %v6441_v41, 4 }
 0x2ec   : > { %v5122_v29 = vor.u32 %v5120_v62, %v13377_v30  ;;  %v4814_v43 = vmax.f32 %v4782_v21, 0.0  ;;  %v4662_v28 = vadd.f32 %v13311_v3, %v4573_v1  ;;  %v13389_v22 = vpop.f32.mrf.mxu1  ;;  %v15409_v3 = vld [vmem:[#allocation11_spill] sm:$0xff]  ;;  %v5123_v34 = vrot.slane %v13377_v30, 4 }
 0x2ed   : > { %v3387_v51 = vadd.f32 %v15410_v23, %v15409_v3  ;;  %v6955_v60 = vunpack.c.l.b16 %v6416_v11  ;;  %v6788_v10 = vrot.slane %v13357_v18, 5  ;;  %v6444_v30 = vor.u32 %v6443_v6, %v13409_v4  ;;  %v4871_v23 = vld [vmem:[#allocation3 + $0x9c] sm:$0x1] }
 0x2ee   : > { %v5347_v39 = vsel %vm11317_vm8, %v5122_v29, %v5346_v26  ;;  %v4950_v9 = vpack.c.bf16 %v4814_v43, %v4814_v43  ;;  %v4711_v44 = vadd.f32 %v4662_v28, %v15408_v25  ;;  %v10971_v52 = vld [vmem:[#allocation3 + $0x6c] sm:$0xff]  ;;  %v13405_v40 = vpop.f32.mrf.mxu0  ;;  %v6433_v28 = vrot.slane %v6431_v7, 5 }
 0x2ef   : > { %5348 = vst [vmem:[#allocation3 + $0x78] sm:$0xf] %v5347_v39  ;;  %7316 = vmatmul.bf16.gmra.mxu1 %v10971_v52  ;;  %v6983_v29 = vpack.c.b16 %v6956_v46, %v6955_v60  ;;  %v13420_v43 = vld [vmem:[#allocation3 + $0x50] sm:$0x1]  ;;  %v6789_v25 = vsel %vm11782_vm14, %v6787_v48, %v6788_v10  ;;  %v4872_v14 = vsel %vm11276_vm2, 0, %v4871_v23  ;;  %v15411_v10 = vld [vmem:[#allocation14_spill] sm:$0xff] }
 0x2f0   : > { %v5125_v56 = vshrl.u32 %v4950_v9, 16  ;;  %v4747_v16 = vmul.f32 %v13139_v37, %v4711_v44  ;;  %v5128_v55 = vshll.u32 %v4950_v9, 16  ;;  %v13413_v13 = vpop.f32.mrf.mxu2  ;;  %v10927_v9 = vld [vmem:[#allocation3 + $0x30] sm:$0xff]  ;;  %v6447_v44 = vshll.u32 %v13420_v43, 16  ;;  %v13443_v46 = vld [vmem:[#allocation3 + $0x58] sm:$0xf] }
 0x2f1   : > { %v4574_v59 = vpop.f32.mrf.mxu3  ;;  %4873 = vst [vmem:[#allocation3 + $0x9c] sm:$0x1] %v4872_v14 }
 0x2f2   : > { %v5127_v42 = vrot.slane %v5125_v56, 7  ;;  %v4783_v57 = vadd.f32 %v13155_v8, %v4747_v16  ;;  %v4575_v62 = vadd.f32 %v4574_v59, %v13352_v12  ;;  %v6430_v12 = vrot.slane %v6428_v36, 4  ;;  %v5353_v59 = vld [vmem:[#allocation3 + $0x84] sm:$0xf] }
 0x2f3   : > { %v7020_v36 = vunpack.c.l.b16 %v6789_v25 }
 0x2f4   : > { %v5130_v21 = vor.u32 %v5128_v55, %v5127_v42  ;;  %v5132_v1 = vrot.slane %v5127_v42, 4  ;;  %v4815_v2 = vmax.f32 %v4783_v57, 0.0  ;;  %v4664_v26 = vadd.f32 %v13344_v50, %v4575_v62  ;;  %v13418_v15 = vpop.f32.mrf.mxu1  ;;  %v6271_v62 = vld [vmem:[#allocation3 + $0x54] sm:$0xf] }
 0x2f5   : > { %7385 = vmatmul.bf16.gmra.mxu2 %v6983_v29  ;;  %v10259_v50 = vrot.slane %v6695_v35, 9  ;;  %v6449_v42 = vrot.slane %v6447_v44, 5 }
 0x2f6   : > { %v5131_v58 = vsel %vm11304_vm7, %v5123_v34, %v5130_v21  ;;  %v5351_v18 = vsel %vm11276_vm2, %v5132_v1, %v5350_v17  ;;  %v4951_v63 = vpack.c.bf16 %v4815_v2, %v4815_v2  ;;  %v4712_v32 = vadd.f32 %v4664_v26, %v3387_v51  ;;  %7469 = vmatmul.bf16.gmra.mxu3 %v7046_v47  ;;  %v13428_v39 = vpop.f32.mrf.mxu0  ;;  %v15412_v2 = vld [vmem:[#allocation15_spill] sm:$0xff]  ;;  %v15413_v26 = vld [vmem:[#allocation13_spill] sm:$0xff] }
 0x2f7   : > { %5349 = vst [vmem:[#allocation3 + $0x7c] sm:$0xf] %v5131_v58  ;;  %v6786_v3 = vsel %vm11782_vm14, %v10259_v50, %v6785_v45  ;;  %v6434_v51 = vor.u32 %v6433_v28, %v6430_v12  ;;  %v6445_v47 = vrot.slane %v6444_v30, 4  ;;  %7707 = vmatmul.bf16.gmra.mxu0 %v10927_v9  ;;  %v6461_v34 = vshll.u32 %v13443_v46, 16  ;;  %v4919_v12 = vld [vmem:[#allocation3 + $0xa4] sm:$0x1] }
 0x2f8   : > { %5352 = vst [vmem:[#allocation3 + $0x80] sm:$0x1] %v5351_v18  ;;  %v5134_v33 = vshrl.u32 %v4951_v63, 16  ;;  %v4748_v41 = vmul.f32 %v13139_v37, %v4712_v32  ;;  %v5137_v52 = vshll.u32 %v4951_v63, 16  ;;  %v13439_v16 = vpop.f32.mrf.mxu2  ;;  %v6465_v17 = vshrl.u32 %v13443_v46, 16 }
 0x2f9   : > { %v4577_v24 = vpop.f32.mrf.mxu3  ;;  %v6435_v57 = vrot.slane %v6434_v51, 4  ;;  %v3392_v35 = vadd.f32 %v15413_v26, %v15412_v2  ;;  %v6792_v30 = vrot.slane %v13385_v0, 5  ;;  %v4920_v32 = vsel %vm11290_vm6, 0, %v4919_v12  ;;  %v5357_v51 = vld [vmem:[#allocation3 + $0x8c] sm:$0x1] }
 0x2fa   : > { %v13435_v38 = vrot.slane %v5134_v33, 7  ;;  %v4784_v11 = vadd.f32 %v13155_v8, %v4748_v41  ;;  %v4578_v56 = vadd.f32 %v4577_v24, %v13381_v31  ;;  %v7019_v31 = vunpack.c.l.b16 %v6786_v3  ;;  %4921 = vst [vmem:[#allocation3 + $0xa4] sm:$0x1] %v4920_v32  ;;  %v4874_v12 = vld [vmem:[#allocation3 + $0xa8] sm:$0x1] }
 0x2fb   : > { %v6440_v28 = vsel %vm11405_vm11, %v6435_v57, %v13409_v4  ;;  %v6452_v50 = vshrl.u32 %v6271_v62, 16  ;;  %v6455_v9 = vshll.u32 %v6271_v62, 16  ;;  %v13467_v25 = vrot.slane %v6461_v34, 5 }
 0x2fc   : > { %v5139_v45 = vor.u32 %v5137_v52, %v13435_v38  ;;  %v4816_v7 = vmax.f32 %v4784_v11, 0.0  ;;  %v4667_v6 = vadd.f32 %v13368_v27, %v4578_v56  ;;  %v13447_v55 = vpop.f32.mrf.mxu1  ;;  %v6450_v27 = vsel %vm11405_vm11, %v6445_v47, %v6449_v42 }
 0x2fd   : > { %v7047_v29 = vpack.c.b16 %v7020_v36, %v7019_v31  ;;  %v6958_v41 = vunpack.c.l.b16 %v6450_v27  ;;  %v6467_v44 = vrot.slane %v6465_v17, 4  ;;  %v5140_v23 = vrot.slane %v13435_v38, 4  ;;  %v13478_v31 = vld [vmem:[#allocation3 + $0x5c] sm:$0x1] }
 0x2fe   : > { %v5354_v60 = vsel %vm11317_vm8, %v5139_v45, %v5353_v59  ;;  %v4952_v48 = vpack.c.bf16 %v4816_v7, %v4816_v7  ;;  %v4713_v21 = vadd.f32 %v4667_v6, %v15411_v10  ;;  %v10972_v1 = vld [vmem:[#allocation3 + $0x78] sm:$0xff]  ;;  %v13463_v63 = vpop.f32.mrf.mxu0  ;;  %v6957_v47 = vunpack.c.l.b16 %v6440_v28  ;;  %v6696_v7 = vld [vmem:[#allocation3 + $0x48] sm:$0xe] }
 0x2ff   : > { %5355 = vst [vmem:[#allocation3 + $0x84] sm:$0xf] %v5354_v60  ;;  %7321 = vmatmul.bf16.gmra.mxu1 %v10972_v1  ;;  %v6794_v11 = vrot.slane %v6792_v30, 4  ;;  %v6795_v56 = vrot.slane %v13420_v43, 5  ;;  %v6457_v57 = vrot.slane %v6455_v9, 5  ;;  %v6468_v38 = vor.u32 %v6467_v44, %v13467_v25 }
 0x300   : > { %v5142_v58 = vshrl.u32 %v4952_v48, 16  ;;  %v4749_v18 = vmul.f32 %v13139_v37, %v4713_v21  ;;  %v5145_v52 = vshll.u32 %v4952_v48, 16  ;;  %v13471_v3 = vpop.f32.mrf.mxu2  ;;  %v6984_v42 = vpack.c.b16 %v6958_v41, %v6957_v47  ;;  %v10928_v21 = vld [vmem:[#allocation3 + $0x3c] sm:$0xff]  ;;  %v13504_v41 = vld [vmem:[#allocation3 + $0x64] sm:$0xf] }
 0x301   : > { %v4579_v33 = vpop.f32.mrf.mxu3  ;;  %v6796_v1 = vsel %vm11782_vm14, %v6794_v11, %v6795_v56  ;;  %v6471_v27 = vshll.u32 %v13478_v31, 16  ;;  %v5360_v9 = vld [vmem:[#allocation3 + $0x90] sm:$0xf]  ;;  %v6489_v47 = vshrl.u32 %v13504_v41, 16 }
 0x302   : > { %v5144_v4 = vrot.slane %v5142_v58, 7  ;;  %v4785_v0 = vadd.f32 %v13155_v8, %v4749_v18  ;;  %v4580_v24 = vadd.f32 %v4579_v33, %v13413_v13  ;;  %v6454_v13 = vrot.slane %v6452_v50, 4 }
 0x303   : > { %v4875_v33 = vsel %vm11276_vm2, 0, %v4874_v12 }
 0x304   : > { %v5147_v14 = vor.u32 %v5145_v52, %v5144_v4  ;;  %v5149_v59 = vrot.slane %v5144_v4, 4  ;;  %v4817_v36 = vmax.f32 %v4785_v0, 0.0  ;;  %v4669_v45 = vadd.f32 %v13405_v40, %v4580_v24  ;;  %v13476_v6 = vpop.f32.mrf.mxu1  ;;  %4876 = vst [vmem:[#allocation3 + $0xa8] sm:$0x1] %v4875_v33  ;;  %v6273_v0 = vld [vmem:[#allocation3 + $0x60] sm:$0xf] }
 0x305   : > { %7390 = vmatmul.bf16.gmra.mxu2 %v6984_v42  ;;  %v10260_v40 = vrot.slane %v6696_v7, 9  ;;  %v6458_v28 = vor.u32 %v6457_v57, %v6454_v13  ;;  %v15416_v7 = vld [vmem:[#allocation24_spill] sm:$0xff]  ;;  %v4922_v57 = vld [vmem:[#allocation3 + $0xb0] sm:$0x1] }
 0x306   : > { %v5148_v62 = vsel %vm11304_vm7, %v5140_v23, %v5147_v14  ;;  %v5358_v43 = vsel %vm11276_vm2, %v5149_v59, %v5357_v51  ;;  %v4953_v34 = vpack.c.bf16 %v4817_v36, %v4817_v36  ;;  %v4714_v17 = vadd.f32 %v4669_v45, %v3392_v35  ;;  %7474 = vmatmul.bf16.gmra.mxu3 %v7047_v29  ;;  %v13486_v10 = vpop.f32.mrf.mxu0  ;;  %v10949_v35 = vld [vmem:[%s15321_s4 + $0x50] sm:$0xff]  ;;  %v15415_v45 = vld [vmem:[#allocation17_spill] sm:$0xff] }
 0x307   : > { %5356 = vst [vmem:[#allocation3 + $0x88] sm:$0xf] %v5148_v62  ;;  %v6793_v29 = vsel %vm11782_vm14, %v10260_v40, %v6792_v30  ;;  %7712 = vmatmul.bf16.gmra.mxu0 %v10928_v21  ;;  %7773 = vmatpush.bf16.msrb.mxu1 %v10949_v35  ;;  %v7022_v30 = vunpack.c.l.b16 %v6796_v1  ;;  %v6459_v23 = vrot.slane %v6458_v28, 4  ;;  %v6485_v51 = vshll.u32 %v13504_v41, 16  ;;  %v15414_v14 = vld [vmem:[#allocation16_spill] sm:$0xff] }
 0x308   : > { %5359 = vst [vmem:[#allocation3 + $0x8c] sm:$0x1] %v5358_v43  ;;  %v5151_v60 = vshrl.u32 %v4953_v34, 16  ;;  %v4750_v48 = vmul.f32 %v13139_v37, %v4714_v17  ;;  %v5154_v2 = vshll.u32 %v4953_v34, 16  ;;  %v6469_v37 = vrot.slane %v6468_v38, 4  ;;  %v13500_v50 = vpop.f32.mrf.mxu2 }
 0x309   : > { %v4582_v26 = vpop.f32.mrf.mxu3  ;;  %v7021_v24 = vunpack.c.l.b16 %v6793_v29  ;;  %v3397_v42 = vadd.f32 %v15416_v7, %v15415_v45  ;;  %v6799_v38 = vrot.slane %v13443_v46, 5  ;;  %v6476_v62 = vshrl.u32 %v6273_v0, 16  ;;  %v13523_v34 = vld [vmem:[%s15319_s2] ss:$0 sm:$0xff] }
 0x30a   : > { %v13496_v58 = vrot.slane %v5151_v60, 7  ;;  %v4786_v18 = vadd.f32 %v13155_v8, %v4750_v48  ;;  %v4583_v32 = vadd.f32 %v4582_v26, %v13439_v16  ;;  %v6473_v8 = vrot.slane %v6471_v27, 5  ;;  %v13538_v29 = vld [vmem:[%s15320_s3] ss:$0 sm:$0xff] }
 0x30b   : > { %v7048_v13 = vpack.c.b16 %v7022_v30, %v7021_v24  ;;  %v4923_v60 = vsel %vm11290_vm6, 0, %v4922_v57  ;;  %v6464_v48 = vsel %vm11405_vm11, %v6459_v23, %v13467_v25  ;;  %v6479_v1 = vshll.u32 %v6273_v0, 16  ;;  %v13549_v23 = vld [vmem:[#allocation3 + $0x68] sm:$0x1] }
 0x30c   : > { %v5156_v44 = vor.u32 %v5154_v2, %v13496_v58  ;;  %v4818_v4 = vmax.f32 %v4786_v18, 0.0  ;;  %v4672_v52 = vadd.f32 %v13428_v39, %v4583_v32  ;;  %v13508_v16 = vpop.f32.mrf.mxu1  ;;  %v6474_v39 = vsel %vm11405_vm11, %v6469_v37, %v6473_v8  ;;  %4924 = vst [vmem:[#allocation3 + $0xb0] sm:$0x1] %v4923_v60  ;;  %v5364_v18 = vld [vmem:[#allocation3 + $0x98] sm:$0x1] }
 0x30d   : > { %v6960_v21 = vunpack.c.l.b16 %v6474_v39  ;;  %v13533_v27 = vrot.slane %v6485_v51, 5  ;;  %v6491_v2 = vrot.slane %v6489_v47, 4  ;;  %v5157_v25 = vrot.slane %v13496_v58, 4  ;;  %v6697_v8 = vld [vmem:[#allocation3 + $0x54] sm:$0xe]  ;;  %v10929_v39 = vld [vmem:[#allocation3 + $0x48] sm:$0xff] }
 0x30e   : > { %v5361_v11 = vsel %vm11317_vm8, %v5156_v44, %v5360_v9  ;;  %v4954_v56 = vpack.c.bf16 %v4818_v4, %v4818_v4  ;;  %v4715_v59 = vadd.f32 %v4672_v52, %v15414_v14  ;;  %v10973_v36 = vld [vmem:[#allocation3 + $0x84] sm:$0xff]  ;;  %v13526_v40 = vpop.f32.mrf.mxu0  ;;  %v6959_v32 = vunpack.c.l.b16 %v6464_v48 }
 0x30f   : > { %5362 = vst [vmem:[#allocation3 + $0x90] sm:$0xf] %v5361_v11  ;;  %7326 = vmatmul.bf16.gmra.mxu1 %v10973_v36  ;;  %v6801_v33 = vrot.slane %v6799_v38, 4  ;;  %v6802_v9 = vrot.slane %v13478_v31, 5  ;;  %v6481_v51 = vrot.slane %v6479_v1, 5  ;;  %v6492_v58 = vor.u32 %v6491_v2, %v13533_v27 }
 0x310   : > { %v5159_v43 = vshrl.u32 %v4954_v56, 16  ;;  %v4751_v17 = vmul.f32 %v13523_v34, %v4715_v59  ;;  %v5162_v35 = vshll.u32 %v4954_v56, 16  ;;  %v13542_v37 = vpop.f32.mrf.mxu2  ;;  %v6985_v24 = vpack.c.b16 %v6960_v21, %v6959_v32  ;;  %v13572_v2 = vld [vmem:[#allocation3 + $0x70] sm:$0xf] }
 0x311   : > { %v4584_v46 = vpop.f32.mrf.mxu3  ;;  %v6803_v45 = vsel %vm11782_vm14, %v6801_v33, %v6802_v9  ;;  %v6495_v7 = vshll.u32 %v13549_v23, 16  ;;  %v6275_v33 = vld [vmem:[#allocation3 + $0x6c] sm:$0xf]  ;;  %v6509_v9 = vshll.u32 %v13572_v2, 16 }
 0x312   : > { %v5161_v26 = vrot.slane %v5159_v43, 7  ;;  %v4787_v12 = vadd.f32 %v13538_v29, %v4751_v17  ;;  %v4585_v28 = vadd.f32 %v4584_v46, %v13471_v3  ;;  %v6478_v3 = vrot.slane %v6476_v62, 4 }
 0x313   : > { %v6493_v17 = vrot.slane %v6492_v58, 4  ;;  %v5378_v49 = vld [vmem:[#allocation3 + $0xb0] sm:$0x1] }
 0x314   : > { %v5164_v30 = vor.u32 %v5162_v35, %v5161_v26  ;;  %v5166_v44 = vrot.slane %v5161_v26, 4  ;;  %v4819_v4 = vmax.f32 %v4787_v12, 0.0  ;;  %v4674_v52 = vadd.f32 %v13463_v63, %v4585_v28  ;;  %v13547_v0 = vpop.f32.mrf.mxu1  ;;  %v5367_v26 = vld [vmem:[#allocation3 + $0x9c] sm:$0xf] }
 0x315   : > { %7395 = vmatmul.bf16.gmra.mxu2 %v6985_v24  ;;  %v10261_v63 = vrot.slane %v6697_v8, 9  ;;  %v6482_v43 = vor.u32 %v6481_v51, %v6478_v3  ;;  %v7024_v35 = vunpack.c.l.b16 %v6803_v45  ;;  %v15418_v3 = vld [vmem:[#allocation19_spill] sm:$0xff]  ;;  %v15419_v51 = vld [vmem:[#allocation18_spill] sm:$0xff]  ;;  %v6500_v45 = vshrl.u32 %v6275_v33, 16 }
 0x316   : > { %v5165_v47 = vsel %vm11304_vm7, %v5157_v25, %v5164_v30  ;;  %v5365_v31 = vsel %vm11276_vm2, %v5166_v44, %v5364_v18  ;;  %v4955_v11 = vpack.c.bf16 %v4819_v4, %v4819_v4  ;;  %v4716_v56 = vadd.f32 %v4674_v52, %v3397_v42  ;;  %7479 = vmatmul.bf16.gmra.mxu3 %v7048_v13  ;;  %v13557_v36 = vpop.f32.mrf.mxu0  ;;  %v4877_v13 = vld [vmem:[#allocation3 + $0xb4] sm:$0x1]  ;;  %v15417_v52 = vld [vmem:[#allocation25_spill] sm:$0xff] }
 0x317   : > { %5363 = vst [vmem:[#allocation3 + $0x94] sm:$0xf] %v5165_v47  ;;  %v6800_v42 = vsel %vm11782_vm14, %v10261_v63, %v6799_v38  ;;  %7717 = vmatmul.bf16.gmra.mxu0 %v10929_v39  ;;  %v4878_v1 = vsel %vm11276_vm2, 0, %v4877_v13  ;;  %v6497_v25 = vrot.slane %v6495_v7, 5  ;;  %v6483_v32 = vrot.slane %v6482_v43, 4 }
 0x318   : > { %5366 = vst [vmem:[#allocation3 + $0x98] sm:$0x1] %v5365_v31  ;;  %v5168_v14 = vshrl.u32 %v4955_v11, 16  ;;  %v4752_v59 = vmul.f32 %v13523_v34, %v4716_v56  ;;  %v5171_v57 = vshll.u32 %v4955_v11, 16  ;;  %v13568_v21 = vpop.f32.mrf.mxu2  ;;  %v6513_v30 = vshrl.u32 %v13572_v2, 16 }
 0x319   : > { %v4587_v62 = vpop.f32.mrf.mxu3  ;;  %4879 = vst [vmem:[#allocation3 + $0xb4] sm:$0x1] %v4878_v1  ;;  %v3402_v58 = vadd.f32 %v15419_v51, %v15418_v3  ;;  %v4925_v31 = vld [vmem:[#allocation3 + $0xbc] sm:$0x1]  ;;  %v6488_v11 = vsel %vm11405_vm11, %v6483_v32, %v13533_v27  ;;  %v6806_v56 = vrot.slane %v13504_v41, 5  ;;  %v10930_v51 = vld [vmem:[#allocation3 + $0x54] sm:$0xff] }
 0x31a   : > { %v13564_v60 = vrot.slane %v5168_v14, 7  ;;  %v4788_v48 = vadd.f32 %v13538_v29, %v4752_v59  ;;  %v4588_v46 = vadd.f32 %v4587_v62, %v13500_v50  ;;  %v7023_v50 = vunpack.c.l.b16 %v6800_v42  ;;  %v5371_v1 = vld [vmem:[#allocation3 + $0xa4] sm:$0x1]  ;;  %v6698_v32 = vld [vmem:[#allocation3 + $0x60] sm:$0xe] }
 0x31b   : > { %v4926_v39 = vsel %vm11290_vm6, 0, %v4925_v31  ;;  %v6503_v62 = vshll.u32 %v6275_v33, 16  ;;  %v13596_v42 = vrot.slane %v6509_v9, 5  ;;  %v6515_v13 = vrot.slane %v6513_v30, 4  ;;  %v13607_v30 = vld [vmem:[#allocation3 + $0x74] sm:$0x1] }
 0x31c   : > { %v5173_v38 = vor.u32 %v5171_v57, %v13564_v60  ;;  %v4820_v12 = vmax.f32 %v4788_v48, 0.0  ;;  %v4677_v28 = vadd.f32 %v13486_v10, %v4588_v46  ;;  %v13576_v18 = vpop.f32.mrf.mxu1  ;;  %v6498_v10 = vsel %vm11405_vm11, %v6493_v17, %v6497_v25  ;;  %4927 = vst [vmem:[#allocation3 + $0xbc] sm:$0x1] %v4926_v39  ;;  %v4880_v39 = vld [vmem:[#allocation3 + $0xc0] sm:$0x1] }
 0x31d   : > { %v7049_v47 = vpack.c.b16 %v7024_v35, %v7023_v50  ;;  %v6962_v57 = vunpack.c.l.b16 %v6498_v10  ;;  %v5174_v46 = vrot.slane %v13564_v60, 4  ;;  %v6808_v35 = vrot.slane %v6806_v56, 4 }
 0x31e   : > { %v5368_v44 = vsel %vm11317_vm8, %v5173_v38, %v5367_v26  ;;  %v4956_v4 = vpack.c.bf16 %v4820_v12, %v4820_v12  ;;  %v4717_v8 = vadd.f32 %v4677_v28, %v15417_v52  ;;  %v10974_v24 = vld [vmem:[#allocation3 + $0x90] sm:$0xff]  ;;  %v13592_v59 = vpop.f32.mrf.mxu0  ;;  %v6961_v26 = vunpack.c.l.b16 %v6488_v11 }
 0x31f   : > { %5369 = vst [vmem:[#allocation3 + $0x9c] sm:$0xf] %v5368_v44  ;;  %7331 = vmatmul.bf16.gmra.mxu1 %v10974_v24  ;;  %v6809_v38 = vrot.slane %v13549_v23, 5  ;;  %v6505_v44 = vrot.slane %v6503_v62, 5  ;;  %v6516_v60 = vor.u32 %v6515_v13, %v13596_v42  ;;  %v6519_v11 = vshll.u32 %v13607_v30, 16 }
 0x320   : > { %v5176_v63 = vshrl.u32 %v4956_v4, 16  ;;  %v4753_v14 = vmul.f32 %v13523_v34, %v4717_v8  ;;  %v5179_v43 = vshll.u32 %v4956_v4, 16  ;;  %v13600_v48 = vpop.f32.mrf.mxu2  ;;  %v6986_v9 = vpack.c.b16 %v6962_v57, %v6961_v26 }
 0x321   : > { %v4589_v7 = vpop.f32.mrf.mxu3  ;;  %v6810_v31 = vsel %vm11782_vm14, %v6808_v35, %v6809_v38  ;;  %v6521_v35 = vrot.slane %v6519_v11, 5 }
 0x322   : > { %v5178_v27 = vrot.slane %v5176_v63, 7  ;;  %v4789_v41 = vadd.f32 %v13538_v29, %v4753_v14  ;;  %v4590_v17 = vadd.f32 %v4589_v7, %v13542_v37  ;;  %v6502_v37 = vrot.slane %v6500_v45, 4 }
 0x323   : > { %v6517_v7 = vrot.slane %v6516_v60, 4 }
 0x324   : > { %v5181_v12 = vor.u32 %v5179_v43, %v5178_v27  ;;  %v5183_v28 = vrot.slane %v5178_v27, 4  ;;  %v4821_v25 = vmax.f32 %v4789_v41, 0.0  ;;  %v4679_v50 = vadd.f32 %v13526_v40, %v4590_v17  ;;  %v13605_v33 = vpop.f32.mrf.mxu1  ;;  %v13633_v41 = vld [vmem:[#allocation3 + $0x7c] sm:$0xf]  ;;  %v5374_v17 = vld [vmem:[#allocation3 + $0xa8] sm:$0xf] }
 0x325   : > { %7400 = vmatmul.bf16.gmra.mxu2 %v6986_v9  ;;  %v10262_v40 = vrot.slane %v6698_v32, 9  ;;  %v6506_v45 = vor.u32 %v6505_v44, %v6502_v37  ;;  %v4881_v43 = vsel %vm11276_vm2, 0, %v4880_v39  ;;  %v15420_v37 = vld [vmem:[#allocation20_spill] sm:$0xff] }
 0x326   : > { %v5182_v4 = vsel %vm11304_vm7, %v5174_v46, %v5181_v12  ;;  %v5372_v23 = vsel %vm11276_vm2, %v5183_v28, %v5371_v1  ;;  %v4957_v52 = vpack.c.bf16 %v4821_v25, %v4821_v25  ;;  %v4718_v8 = vadd.f32 %v4679_v50, %v3402_v58  ;;  %7484 = vmatmul.bf16.gmra.mxu3 %v7049_v47  ;;  %v13615_v3 = vpop.f32.mrf.mxu0  ;;  %v10948_v58 = vld [vmem:[%s15321_s4 + $0x48] sm:$0xff]  ;;  %v6277_v28 = vld [vmem:[#allocation3 + $0x78] sm:$0xf] }
 0x327   : > { %5370 = vst [vmem:[#allocation3 + $0xa0] sm:$0xf] %v5182_v4  ;;  %v6807_v47 = vsel %vm11782_vm14, %v10262_v40, %v6806_v56  ;;  %7722 = vmatmul.bf16.gmra.mxu0 %v10930_v51  ;;  %7774 = vmatpush.bf16.msrb.mxu1 %v10948_v58  ;;  %v7026_v56 = vunpack.c.l.b16 %v6810_v31  ;;  %v6507_v12 = vrot.slane %v6506_v45, 4  ;;  %v6533_v25 = vshll.u32 %v13633_v41, 16  ;;  %v15421_v4 = vld [vmem:[#allocation21_spill] sm:$0xff] }
 0x328   : > { %5373 = vst [vmem:[#allocation3 + $0xa4] sm:$0x1] %v5372_v23  ;;  %v5185_v24 = vshrl.u32 %v4957_v52, 16  ;;  %v4754_v10 = vmul.f32 %v13523_v34, %v4718_v8  ;;  %v5188_v63 = vshll.u32 %v4957_v52, 16  ;;  %v13629_v27 = vpop.f32.mrf.mxu2  ;;  %v6537_v50 = vshrl.u32 %v13633_v41, 16  ;;  %v15422_v23 = vld [vmem:[#allocation26_spill] sm:$0xff] }
 0x329   : > { %v4592_v14 = vpop.f32.mrf.mxu3  ;;  %4882 = vst [vmem:[#allocation3 + $0xc0] sm:$0x1] %v4881_v43  ;;  %v3407_v52 = vadd.f32 %v15422_v23, %v15421_v4  ;;  %v4928_v40 = vld [vmem:[#allocation3 + $0xc8] sm:$0x1]  ;;  %v6527_v39 = vshll.u32 %v6277_v28, 16  ;;  %v13657_v45 = vrot.slane %v6533_v25, 5 }
 0x32a   : > { %v13625_v57 = vrot.slane %v5185_v24, 7  ;;  %v4790_v62 = vadd.f32 %v13538_v29, %v4754_v10  ;;  %v4593_v13 = vadd.f32 %v4592_v14, %v13568_v21  ;;  %v7025_v21 = vunpack.c.l.b16 %v6807_v47 }
 0x32b   : > { %v6512_v24 = vsel %vm11405_vm11, %v6507_v12, %v13596_v42  ;;  %v6813_v10 = vrot.slane %v13572_v2, 5  ;;  %v6524_v14 = vshrl.u32 %v6277_v28, 16  ;;  %v6699_v28 = vld [vmem:[#allocation3 + $0x6c] sm:$0xe] }
 0x32c   : > { %v5190_v46 = vor.u32 %v5188_v63, %v13625_v57  ;;  %v4822_v1 = vmax.f32 %v4790_v62, 0.0  ;;  %v4682_v26 = vadd.f32 %v13557_v36, %v4593_v13  ;;  %v13637_v38 = vpop.f32.mrf.mxu1  ;;  %v6522_v36 = vsel %vm11405_vm11, %v6517_v7, %v6521_v35 }
 0x32d   : > { %v7050_v8 = vpack.c.b16 %v7026_v56, %v7025_v21  ;;  %v4929_v63 = vsel %vm11290_vm6, 0, %v4928_v40  ;;  %v6964_v47 = vunpack.c.l.b16 %v6522_v36  ;;  %v6539_v7 = vrot.slane %v6537_v50, 4  ;;  %v10931_v40 = vld [vmem:[#allocation3 + $0x60] sm:$0xff] }
 0x32e   : > { %v5375_v32 = vsel %vm11317_vm8, %v5190_v46, %v5374_v17  ;;  %v4958_v9 = vpack.c.bf16 %v4822_v1, %v4822_v1  ;;  %v4719_v44 = vadd.f32 %v4682_v26, %v15420_v37  ;;  %v10975_v60 = vld [vmem:[#allocation3 + $0x9c] sm:$0xff]  ;;  %v13653_v11 = vpop.f32.mrf.mxu0  ;;  %4930 = vst [vmem:[#allocation3 + $0xc8] sm:$0x1] %v4929_v63  ;;  %v5191_v17 = vrot.slane %v13625_v57, 4 }
 0x32f   : > { %5376 = vst [vmem:[#allocation3 + $0xa8] sm:$0xf] %v5375_v32  ;;  %7336 = vmatmul.bf16.gmra.mxu1 %v10975_v60  ;;  %v6963_v56 = vunpack.c.l.b16 %v6512_v24  ;;  %v6815_v46 = vrot.slane %v6813_v10, 4  ;;  %v6816_v1 = vrot.slane %v13607_v30, 5  ;;  %v13668_v32 = vld [vmem:[#allocation3 + $0x80] sm:$0x1]  ;;  %v6540_v57 = vor.u32 %v6539_v7, %v13657_v45 }
 0x330   : > { %v5193_v51 = vshrl.u32 %v4958_v9, 16  ;;  %v4755_v31 = vmul.f32 %v13523_v34, %v4719_v44  ;;  %v5196_v62 = vshll.u32 %v4958_v9, 16  ;;  %v13661_v43 = vpop.f32.mrf.mxu2  ;;  %v6529_v9 = vrot.slane %v6527_v39, 5 }
 0x331   : > { %v4594_v58 = vpop.f32.mrf.mxu3  ;;  %v6987_v50 = vpack.c.b16 %v6964_v47, %v6963_v56  ;;  %v6817_v24 = vsel %vm11782_vm14, %v6815_v46, %v6816_v1  ;;  %v6279_v46 = vld [vmem:[#allocation3 + $0x84] sm:$0xf] }
 0x332   : > { %v5195_v42 = vrot.slane %v5193_v51, 7  ;;  %v4791_v2 = vadd.f32 %v13538_v29, %v4755_v31  ;;  %v4595_v13 = vadd.f32 %v4594_v58, %v13600_v48  ;;  %v6526_v48 = vrot.slane %v6524_v14, 4 }
 0x333   : > { %v6543_v51 = vshll.u32 %v13668_v32, 16  ;;  %v6541_v14 = vrot.slane %v6540_v57, 4  ;;  %v15424_v57 = vld [vmem:[#allocation5_spill] sm:$0xff] }
 0x334   : > { %v5198_v26 = vor.u32 %v5196_v62, %v5195_v42  ;;  %v5200_v35 = vrot.slane %v5195_v42, 4  ;;  %v4823_v21 = vmax.f32 %v4791_v2, 0.0  ;;  %v4684_v12 = vadd.f32 %v13592_v59, %v4595_v13  ;;  %v13666_v25 = vpop.f32.mrf.mxu1  ;;  %v13688_v62 = vld [vmem:[#allocation3 + $0x88] sm:$0xf]  ;;  %v5381_v2 = vld [vmem:[#allocation3 + $0xb4] sm:$0xf] }
 0x335   : > { %7405 = vmatmul.bf16.gmra.mxu2 %v6987_v50  ;;  %v10263_v59 = vrot.slane %v6699_v28, 9  ;;  %v6530_v63 = vor.u32 %v6529_v9, %v6526_v48  ;;  %v7028_v13 = vunpack.c.l.b16 %v6817_v24  ;;  %v6545_v56 = vrot.slane %v6543_v51, 5  ;;  %v15423_v50 = vld [vmem:[#allocation4_spill] sm:$0xff] }
 0x336   : > { %v5199_v37 = vsel %vm11304_vm7, %v5191_v17, %v5198_v26  ;;  %v5379_v30 = vsel %vm11276_vm2, %v5200_v35, %v5378_v49  ;;  %v4959_v44 = vpack.c.bf16 %v4823_v21, %v4823_v21  ;;  %v4720_v60 = vadd.f32 %v4684_v12, %v3407_v52  ;;  %7489 = vmatmul.bf16.gmra.mxu3 %v7050_v8  ;;  %v13676_v23 = vpop.f32.mrf.mxu0  ;;  %v10947_v8 = vld [vmem:[%s15321_s4 + $0x40] sm:$0xff] }
 0x337   : > { %5377 = vst [vmem:[#allocation3 + $0xac] sm:$0xf] %v5199_v37  ;;  %v6814_v52 = vsel %vm11782_vm14, %v10263_v59, %v6813_v10  ;;  %7727 = vmatmul.bf16.gmra.mxu0 %v10931_v40  ;;  %7775 = vmatpush.bf16.msrb.mxu1 %v10947_v8  ;;  %v6531_v35 = vrot.slane %v6530_v63, 4  ;;  %v6557_v21 = vshll.u32 %v13688_v62, 16  ;;  %v3412_v37 = vadd.f32 %v13359_v20, %v15424_v57  ;;  %v6700_v57 = vld [vmem:[#allocation3 + $0x78] sm:$0xe] }
 0x338   : > { %5380 = vst [vmem:[#allocation3 + $0xb0] sm:$0x1] %v5379_v30  ;;  %v5202_v36 = vshrl.u32 %v4959_v44, 16  ;;  %v4756_v4 = vmul.f32 %v13523_v34, %v4720_v60  ;;  %v5205_v47 = vshll.u32 %v4959_v44, 16  ;;  %v7366_v42 = vpop.f32.mrf.mxu2  ;;  %v7027_v26 = vunpack.c.l.b16 %v6814_v52 }
 0x339   : > { %v4597_v31 = vpop.f32.mrf.mxu3  ;;  %v6548_v30 = vshrl.u32 %v6279_v46, 16  ;;  %v6551_v51 = vshll.u32 %v6279_v46, 16  ;;  %v13714_v46 = vld [vmem:[#allocation3 + $0x8c] sm:$0x1] }
 0x33a   : > { %v5204_v58 = vrot.slane %v5202_v36, 7  ;;  %v4792_v39 = vadd.f32 %v13538_v29, %v4756_v4  ;;  %v4598_v7 = vadd.f32 %v4597_v31, %v13629_v27  ;;  %v6561_v27 = vshrl.u32 %v13688_v62, 16 }
 0x33b   : > { %v7051_v59 = vpack.c.b16 %v7028_v13, %v7027_v26  ;;  %v6536_v4 = vsel %vm11405_vm11, %v6531_v35, %v13657_v45  ;;  %v13708_v31 = vrot.slane %v6557_v21, 5  ;;  %v6820_v13 = vrot.slane %v13633_v41, 5 }
 0x33c   : > { %v5207_v10 = vor.u32 %v5205_v47, %v5204_v58  ;;  %v4824_v17 = vmax.f32 %v4792_v39, 0.0  ;;  %v4687_v49 = vadd.f32 %v13615_v3, %v4598_v7  ;;  %v13691_v1 = vpop.f32.mrf.mxu1  ;;  %v6546_v3 = vsel %vm11405_vm11, %v6541_v14, %v6545_v56  ;;  %v5385_v7 = vld [vmem:[#allocation3 + $0xbc] sm:$0x1] }
 0x33d   : > { %v6966_v24 = vunpack.c.l.b16 %v6546_v3  ;;  %v6563_v52 = vrot.slane %v6561_v27, 4  ;;  %v5208_v39 = vrot.slane %v5204_v58, 4  ;;  %v7367_v35 = vadd.f32 %v7366_v42, %v13389_v22 }
 0x33e   : > { %v5382_v12 = vsel %vm11317_vm8, %v5207_v10, %v5381_v2  ;;  %v4960_v28 = vpack.c.bf16 %v4824_v17, %v4824_v17  ;;  %v4721_v48 = vadd.f32 %v4687_v49, %v15423_v50  ;;  %v10976_v9 = vld [vmem:[#allocation3 + $0xa8] sm:$0xff]  ;;  %v13703_v36 = vpop.f32.mrf.mxu0  ;;  %v6965_v2 = vunpack.c.l.b16 %v6536_v4 }
 0x33f   : > { %5383 = vst [vmem:[#allocation3 + $0xb4] sm:$0xf] %v5382_v12  ;;  %7341 = vmatmul.bf16.gmra.mxu1 %v10976_v9  ;;  %v6550_v10 = vrot.slane %v6548_v30, 4  ;;  %v6564_v58 = vor.u32 %v6563_v52, %v13708_v31  ;;  %v6822_v9 = vrot.slane %v6820_v13, 4  ;;  %v6823_v30 = vrot.slane %v13668_v32, 5  ;;  %v10962_v32 = vld [vmem:[%s15321_s4 + $0xb8] sm:$0xff] }
 0x340   : > { %v5210_v44 = vshrl.u32 %v4960_v28, 16  ;;  %v4757_v60 = vmul.f32 %v13523_v34, %v4721_v48  ;;  %v5213_v8 = vshll.u32 %v4960_v28, 16  ;;  %v7368_v47 = vpop.f32.mrf.mxu2  ;;  %v6988_v21 = vpack.c.b16 %v6966_v24, %v6965_v2  ;;  %v10932_v48 = vld [vmem:[#allocation3 + $0x6c] sm:$0xff]  ;;  %v5388_v52 = vld [vmem:[#allocation3 + $0xc0] sm:$0xf]  ;;  %7857 = vmatpush.bf16.msra.mxu2 %v10962_v32 }
 0x341   : > { %v4599_v40 = vpop.f32.mrf.mxu3 }
 0x342   : > { %v5212_v20 = vrot.slane %v5210_v44, 7  ;;  %v4793_v63 = vadd.f32 %v13538_v29, %v4757_v60  ;;  %v4600_v14 = vadd.f32 %v4599_v40, %v13661_v43  ;;  %v6553_v43 = vrot.slane %v6551_v51, 5  ;;  %v13742_v51 = vld [vmem:[#allocation3 + $0x94] sm:$0xf] }
 0x343   : > { %v6565_v60 = vrot.slane %v6564_v58, 4 }
 0x344   : > { %v5215_v45 = vor.u32 %v5213_v8, %v5212_v20  ;;  %v5217_v17 = vrot.slane %v5212_v20, 4  ;;  %v4825_v49 = vmax.f32 %v4793_v63, 0.0  ;;  %v4689_v56 = vadd.f32 %v13653_v11, %v4600_v14  ;;  %v13716_v26 = vpop.f32.mrf.mxu1 }
 0x345   : > { %7410 = vmatmul.bf16.gmra.mxu2 %v6988_v21  ;;  %v6567_v11 = vshll.u32 %v13714_v46, 16  ;;  %v6554_v44 = vor.u32 %v6553_v43, %v6550_v10  ;;  %v10264_v63 = vrot.slane %v6700_v57, 9  ;;  %v6824_v14 = vsel %vm11782_vm14, %v6822_v9, %v6823_v30 }
 0x346   : > { %v5216_v27 = vsel %vm11304_vm7, %v5208_v39, %v5215_v45  ;;  %v5386_v41 = vsel %vm11276_vm2, %v5217_v17, %v5385_v7  ;;  %v4961_v12 = vpack.c.bf16 %v4825_v49, %v4825_v49  ;;  %v4722_v28 = vadd.f32 %v4689_v56, %v3412_v37  ;;  %7494 = vmatmul.bf16.gmra.mxu3 %v7051_v59  ;;  %v13726_v42 = vpop.f32.mrf.mxu0  ;;  %v6281_v39 = vld [vmem:[#allocation3 + $0x90] sm:$0xf]  ;;  %v11034_v45 = vld [vmem:[%s15321_s4 + $0x1f8] sm:$0xff] }
 0x347   : > { %5384 = vst [vmem:[#allocation3 + $0xb8] sm:$0xf] %v5216_v27  ;;  %7732 = vmatmul.bf16.gmra.mxu0 %v10932_v48  ;;  %v6569_v20 = vrot.slane %v6567_v11, 5  ;;  %v6555_v2 = vrot.slane %v6554_v44, 4  ;;  %v6581_v17 = vshll.u32 %v13742_v51, 16  ;;  %v6585_v49 = vshrl.u32 %v13742_v51, 16 }
 0x348   : > { %5387 = vst [vmem:[#allocation3 + $0xbc] sm:$0x1] %v5386_v41  ;;  %v5219_v50 = vshrl.u32 %v4961_v12, 16  ;;  %v4758_v22 = vmul.f32 %v13523_v34, %v4722_v28  ;;  %v5222_v59 = vshll.u32 %v4961_v12, 16  ;;  %v13734_v24 = vpop.f32.mrf.mxu2  ;;  %v11026_v34 = vld [vmem:[%s15321_s4 + $0x1b8] sm:$0xff]  ;;  %v7369_v21 = vadd.f32 %v7368_v47, %v13418_v15  ;;  %9045 = vmatpush.bf16.msra.mxu0 %v11034_v45 }
 0x349   : > { %15425 = vst [vmem:[#allocation7_spill] sm:$0xff] %v13726_v42  ;;  %v7455_v3 = vpop.f32.mrf.mxu3  ;;  %8956 = vmatpush.bf16.msra.mxu3 %v11026_v34  ;;  %v6570_v10 = vsel %vm11405_vm11, %v6565_v60, %v6569_v20  ;;  %v6821_v58 = vsel %vm11782_vm14, %v10264_v63, %v6820_v13  ;;  %v7030_v27 = vunpack.c.l.b16 %v6824_v14  ;;  %v6560_v41 = vsel %vm11405_vm11, %v6555_v2, %v13708_v31  ;;  %v5395_v31 = vld [vmem:[#allocation3] sm:$0xf]  ;;  %v13770_v44 = vld [vmem:[#allocation3 + $0x4] sm:$0xf] }
 0x34a   : > { %v13729_v37 = vrot.slane %v5219_v50, 7  ;;  %v4794_v4 = vadd.f32 %v13538_v29, %v4758_v22  ;;  %v13732_v40 = vadd.f32 %v7455_v3, %v7367_v35  ;;  %v6572_v12 = vshrl.u32 %v6281_v39, 16  ;;  %v11042_v60 = vld [vmem:[%s15321_s4 + $0x238] sm:$0xff] }
 0x34b   : > { %v6575_v28 = vshll.u32 %v6281_v39, 16  ;;  %v6968_v50 = vunpack.c.l.b16 %v6570_v10  ;;  %v7029_v47 = vunpack.c.l.b16 %v6821_v58  ;;  %v13766_v48 = vrot.slane %v6581_v17, 5  ;;  %9134 = vmatpush.bf16.msra.mxu1 %v11042_v60  ;;  %v13781_v17 = vld [vmem:[#allocation3 + $0x98] sm:$0x1] }
 0x34c   : > { %v5224_v8 = vor.u32 %v5222_v59, %v13729_v37  ;;  %v4826_v29 = vmax.f32 %v4794_v4, 0.0  ;;  %v13747_v7 = vpop.f32.mrf.mxu1  ;;  %v6587_v13 = vrot.slane %v6585_v49, 4  ;;  %v6967_v30 = vunpack.c.l.b16 %v6560_v41  ;;  %v5392_v59 = vld [vmem:[#allocation3 + $0xc8] sm:$0x1] }
 0x34d   : > { %v7052_v4 = vpack.c.b16 %v7030_v27, %v7029_v47  ;;  %v6827_v34 = vrot.slane %v13688_v62, 5  ;;  %v6574_v32 = vrot.slane %v6572_v12, 4  ;;  %v5225_v20 = vrot.slane %v13729_v37, 4  ;;  %v6701_v27 = vld [vmem:[#allocation3 + $0x84] sm:$0xe] }
 0x34e   : > { %v5389_v56 = vsel %vm11317_vm8, %v5224_v8, %v5388_v52  ;;  %v4962_v35 = vpack.c.bf16 %v4826_v29, %v4826_v29  ;;  %v10977_v43 = vld [vmem:[#allocation3 + $0xb4] sm:$0xff]  ;;  %v13764_v61 = vpop.f32.mrf.mxu0  ;;  %v6577_v52 = vrot.slane %v6575_v28, 5  ;;  %v6989_v63 = vpack.c.b16 %v6968_v50, %v6967_v30 }
 0x34f   : > { %5390 = vst [vmem:[#allocation3 + $0xc0] sm:$0xf] %v5389_v56  ;;  %7346 = vmatmul.bf16.gmra.mxu1 %v10977_v43  ;;  %v5444_v39 = vshrl.u32 %v5395_v31, 16  ;;  %v5447_v2 = vshll.u32 %v5395_v31, 16  ;;  %v5453_v10 = vshll.u32 %v13770_v44, 16  ;;  %v5457_v45 = vshrl.u32 %v13770_v44, 16 }
 0x350   : > { %v5227_v11 = vshrl.u32 %v4962_v35, 16  ;;  %15426 = vst [vmem:[#allocation6_spill] sm:$0xff] %v13764_v61  ;;  %v5230_v22 = vshll.u32 %v4962_v35, 16  ;;  %v7373_v57 = vpop.f32.mrf.mxu2  ;;  %v7372_v49 = vadd.f32 %v13734_v24, %v13447_v55  ;;  %v6588_v56 = vor.u32 %v6587_v13, %v13766_v48  ;;  %v13795_v24 = vld [vmem:[#allocation3 + $0x8] sm:$0x1] }
 0x351   : > { %v7457_v15 = vpop.f32.mrf.mxu3  ;;  %v6829_v43 = vrot.slane %v6827_v34, 4  ;;  %v6591_v58 = vshll.u32 %v13781_v17, 16  ;;  %v5446_v41 = vrot.slane %v5444_v39, 4  ;;  %v5449_v5 = vrot.slane %v5447_v2, 5 }
 0x352   : > { %v5229_v9 = vrot.slane %v5227_v11, 7  ;;  %v13768_v3 = vadd.f32 %v7457_v15, %v7369_v21  ;;  %v10933_v21 = vld [vmem:[#allocation3 + $0x78] sm:$0xff]  ;;  %v5455_v12 = vrot.slane %v5453_v10, 5  ;;  %v5459_v28 = vrot.slane %v5457_v45, 4 }
 0x353   : > { %v6578_v50 = vor.u32 %v6577_v52, %v6574_v32  ;;  %v6830_v15 = vrot.slane %v13714_v46, 5  ;;  %v10265_v47 = vrot.slane %v6701_v27, 9  ;;  %v6593_v13 = vrot.slane %v6591_v58, 5  ;;  %v13808_v52 = vld [vmem:[#allocation3 + $0x10] sm:$0xf] }
 0x354   : > { %v5232_v8 = vor.u32 %v5230_v22, %v5229_v9  ;;  %v5234_v29 = vrot.slane %v5229_v9, 4  ;;  %v13777_v14 = vpop.f32.mrf.mxu1  ;;  %v6589_v22 = vrot.slane %v6588_v56, 4  ;;  %v5450_v31 = vor.u32 %v5449_v5, %v5446_v41  ;;  %v6283_v58 = vld [vmem:[#allocation3 + $0x9c] sm:$0xf] }
 0x355   : > { %7415 = vmatmul.bf16.gmra.mxu2 %v6989_v63  ;;  %v6831_v30 = vsel %vm11782_vm14, %v6829_v43, %v6830_v15  ;;  %v5460_v60 = vor.u32 %v5459_v28, %v5455_v12  ;;  %v6828_v46 = vsel %vm11782_vm14, %v10265_v47, %v6827_v34  ;;  %v5477_v43 = vshll.u32 %v13808_v52, 16 }
 0x356   : > { %v5233_v62 = vsel %vm11304_vm7, %v5225_v20, %v5232_v8  ;;  %v5393_v37 = vsel %vm11276_vm2, %v5234_v29, %v5392_v59  ;;  %7499 = vmatmul.bf16.gmra.mxu3 %v7052_v4  ;;  %v13790_v35 = vpop.f32.mrf.mxu0  ;;  %v5463_v59 = vshll.u32 %v13795_v24, 16  ;;  %v5397_v4 = vld [vmem:[#allocation3 + $0xc] sm:$0xf]  ;;  %v7374_v20 = vadd.f32 %v7373_v57, %v13476_v6 }
 0x357   : > { %5391 = vst [vmem:[#allocation3 + $0xc4] sm:$0xf] %v5233_v62  ;;  %7737 = vmatmul.bf16.gmra.mxu0 %v10933_v21  ;;  %v6579_v29 = vrot.slane %v6578_v50, 4  ;;  %v6594_v32 = vsel %vm11405_vm11, %v6589_v22, %v6593_v13  ;;  %v7032_v63 = vunpack.c.l.b16 %v6831_v30  ;;  %v5468_v10 = vshrl.u32 %v5397_v4, 16 }
 0x358   : > { %5394 = vst [vmem:[#allocation3 + $0xc8] sm:$0x1] %v5393_v37  ;;  %v7376_v55 = vpop.f32.mrf.mxu2  ;;  %v5451_v57 = vrot.slane %v5450_v31, 4  ;;  %v5461_v45 = vrot.slane %v5460_v60, 4  ;;  %v5465_v62 = vrot.slane %v5463_v59, 5  ;;  %v6970_v37 = vunpack.c.l.b16 %v6594_v32 }
 0x359   : > { %15427 = vst [vmem:[#allocation22_spill] sm:$0xff] %v13790_v35  ;;  %v7460_v53 = vpop.f32.mrf.mxu3  ;;  %v6584_v2 = vsel %vm11405_vm11, %v6579_v29, %v13766_v48  ;;  %v7031_v56 = vunpack.c.l.b16 %v6828_v46  ;;  %v5471_v21 = vshll.u32 %v5397_v4, 16  ;;  %v6596_v41 = vshrl.u32 %v6283_v58, 16  ;;  %v13830_v60 = vld [vmem:[#allocation3 + $0xa4] sm:$0x1] }
 0x35a   : > { %v13793_v11 = vadd.f32 %v7460_v53, %v7372_v49  ;;  %v13818_v53 = vld [vmem:[#allocation3 + $0xa0] sm:$0xf]  ;;  %v6969_v27 = vunpack.c.l.b16 %v6584_v2  ;;  %v6599_v5 = vshll.u32 %v6283_v58, 16  ;;  %v6834_v50 = vrot.slane %v13742_v51, 5  ;;  %v10934_v2 = vld [vmem:[#allocation3 + $0x84] sm:$0xff] }
 0x35b   : > { %v6605_v48 = vshll.u32 %v13818_v53, 16  ;;  %v7053_v28 = vpack.c.b16 %v7032_v63, %v7031_v56  ;;  %v5481_v22 = vshrl.u32 %v13808_v52, 16  ;;  %v6609_v15 = vshrl.u32 %v13818_v53, 16 }
 0x35c   : > { %v13798_v9 = vpop.f32.mrf.mxu1  ;;  %v5456_v13 = vsel %vm11405_vm11, %v5451_v57, %v5455_v12  ;;  %v5466_v30 = vsel %vm11405_vm11, %v5461_v45, %v5465_v62  ;;  %v6990_v31 = vpack.c.b16 %v6970_v37, %v6969_v27  ;;  %v7377_v51 = vadd.f32 %v7376_v55, %v13508_v16  ;;  %v13839_v37 = vld [vmem:[#allocation3 + $0x14] sm:$0x1] }
 0x35d   : > { %v13832_v59 = vrot.slane %v6605_v48, 5  ;;  %v6598_v4 = vrot.slane %v6596_v41, 4  ;;  %v5470_v29 = vrot.slane %v5468_v10, 4  ;;  %v5473_v32 = vrot.slane %v5471_v21, 5  ;;  %v6702_v10 = vld [vmem:[#allocation3 + $0x90] sm:$0xe] }
 0x35e   : > { %v10978_v8 = vld [vmem:[#allocation3 + $0xc0] sm:$0xff]  ;;  %v13810_v39 = vpop.f32.mrf.mxu0  ;;  %v6083_v46 = vunpack.c.l.b16 %v5456_v13  ;;  %v6084_v63 = vunpack.c.l.b16 %v5466_v30  ;;  %v6615_v57 = vshll.u32 %v13830_v60, 16  ;;  %v6836_v62 = vrot.slane %v6834_v50, 4  ;;  %v11025_v41 = vld [vmem:[%s15321_s4 + $0x1b0] sm:$0xff] }
 0x35f   : > { %7351 = vmatmul.bf16.gmra.mxu1 %v10978_v8  ;;  %15428 = vst [vmem:[#allocation9_spill] sm:$0xff] %v13810_v39  ;;  %v6611_v8 = vrot.slane %v6609_v15, 4  ;;  %v13841_v16 = vrot.slane %v5477_v43, 5  ;;  %v5483_v55 = vrot.slane %v5481_v22, 4  ;;  %v6837_v48 = vrot.slane %v13781_v17, 5  ;;  %8957 = vmatpush.bf16.msra.mxu3 %v11025_v41  ;;  %v11041_v41 = vld [vmem:[%s15321_s4 + $0x230] sm:$0xff] }
 0x360   : > { %v7378_v34 = vpop.f32.mrf.mxu2  ;;  %v6115_v43 = vpack.c.b16 %v6084_v63, %v6083_v46  ;;  %v6617_v22 = vrot.slane %v6615_v57, 5  ;;  %v10266_v13 = vrot.slane %v6702_v10, 9  ;;  %9135 = vmatpush.bf16.msra.mxu1 %v11041_v41 }
 0x361   : > { %v7462_v6 = vpop.f32.mrf.mxu3  ;;  %v6838_v30 = vsel %vm11782_vm14, %v6836_v62, %v6837_v48  ;;  %v7379_v17 = vadd.f32 %v7378_v34, %v13547_v0  ;;  %v13871_v62 = vld [vmem:[#allocation3 + $0x1c] sm:$0xf]  ;;  %v13878_v48 = vld [vmem:[#allocation3 + $0xac] sm:$0xf] }
 0x362   : > { %v13815_v49 = vadd.f32 %v7462_v6, %v7374_v20  ;;  %v6601_v20 = vrot.slane %v6599_v5, 5  ;;  %v6612_v6 = vor.u32 %v6611_v8, %v13832_v59  ;;  %v10961_v5 = vld [vmem:[%s15321_s4 + $0xb0] sm:$0xff]  ;;  %v7034_v46 = vunpack.c.l.b16 %v6838_v30 }
 0x363   : > { %7858 = vmatpush.bf16.msra.mxu2 %v10961_v5  ;;  %v6285_v5 = vld [vmem:[#allocation3 + $0xa8] sm:$0xf]  ;;  %v5501_v30 = vshll.u32 %v13871_v62, 16 }
 0x364   : > { %15429 = vst [vmem:[#allocation8_spill] sm:$0xff] %v13815_v49  ;;  %v13824_v47 = vpop.f32.mrf.mxu1  ;;  %v6602_v58 = vor.u32 %v6601_v20, %v6598_v4  ;;  %v6613_v27 = vrot.slane %v6612_v6, 4  ;;  %v11033_v4 = vld [vmem:[%s15321_s4 + $0x1f0] sm:$0xff] }
 0x365   : > { %7420 = vmatmul.bf16.gmra.mxu2 %v6990_v31  ;;  %v5484_v31 = vor.u32 %v5483_v55, %v13841_v16  ;;  %9046 = vmatpush.bf16.msra.mxu0 %v11033_v4 }
 0x366   : > { %7504 = vmatmul.bf16.gmra.mxu3 %v7053_v28  ;;  %v13835_v12 = vpop.f32.mrf.mxu0  ;;  %v5474_v28 = vor.u32 %v5473_v32, %v5470_v29  ;;  %v6603_v20 = vrot.slane %v6602_v58, 4  ;;  %v6618_v8 = vsel %vm11405_vm11, %v6613_v27, %v6617_v22  ;;  %v5399_v29 = vld [vmem:[#allocation3 + $0x18] sm:$0xf]  ;;  %v6835_v32 = vsel %vm11782_vm14, %v10266_v13, %v6834_v50 }
 0x367   : > { %15430 = vst [vmem:[#allocation23_spill] sm:$0xff] %v13835_v12  ;;  %7742 = vmatmul.bf16.gmra.mxu0 %v10934_v2  ;;  %v5485_v0 = vrot.slane %v5484_v31, 4  ;;  %v5492_v55 = vshrl.u32 %v5399_v29, 16  ;;  %v7033_v50 = vunpack.c.l.b16 %v6835_v32  ;;  %v5495_v27 = vshll.u32 %v5399_v29, 16  ;;  %v13889_v29 = vld [vmem:[#allocation3 + $0xb0] sm:$0x1] }
 0x368   : > { %v7381_v21 = vpop.f32.mrf.mxu2  ;;  %v5475_v2 = vrot.slane %v5474_v28, 4  ;;  %v6608_v6 = vsel %vm11405_vm11, %v6603_v20, %v13832_v59  ;;  %v6623_v28 = vshll.u32 %v6285_v5, 16  ;;  %v6629_v22 = vshll.u32 %v13878_v48, 16 }
 0x369   : > { %v7465_v45 = vpop.f32.mrf.mxu3  ;;  %v6971_v59 = vunpack.c.l.b16 %v6608_v6  ;;  %v7054_v13 = vpack.c.b16 %v7034_v46, %v7033_v50  ;;  %v5505_v31 = vshrl.u32 %v13871_v62, 16  ;;  %v7382_v46 = vadd.f32 %v7381_v21, %v13576_v18 }
 0x36a   : > { %v13843_v56 = vadd.f32 %v7465_v45, %v7377_v51  ;;  %v5487_v51 = vshll.u32 %v13839_v37, 16  ;;  %v6972_v45 = vunpack.c.l.b16 %v6618_v8  ;;  %v6841_v8 = vrot.slane %v13818_v53, 5 }
 0x36b   : > { %v6631_v32 = vrot.slane %v6629_v22, 5  ;;  %v5480_v41 = vsel %vm11405_vm11, %v5475_v2, %v13841_v16  ;;  %v13897_v53 = vrot.slane %v5501_v30, 5  ;;  %v6639_v22 = vshll.u32 %v13889_v29, 16 }
 0x36c   : > { %15431 = vst [vmem:[#allocation12_spill] sm:$0xff] %v13843_v56  ;;  %v13852_v15 = vpop.f32.mrf.mxu1  ;;  %v5489_v34 = vrot.slane %v5487_v51, 5  ;;  %v6633_v51 = vshrl.u32 %v13878_v48, 16  ;;  %v6991_v20 = vpack.c.b16 %v6972_v45, %v6971_v59  ;;  %v5507_v45 = vrot.slane %v5505_v31, 4 }
 0x36e   : > { %v13866_v63 = vpop.f32.mrf.mxu0  ;;  %v6635_v50 = vrot.slane %v6633_v51, 4  ;;  %v6844_v51 = vrot.slane %v13830_v60, 5  ;;  %v5508_v31 = vor.u32 %v5507_v45, %v13897_v53 }
 0x36f   : > { %7776 = vmatmul.bf16.vlgmr.msrb.gmra.mxu1 %v6115_v43  ;;  %15432 = vst [vmem:[#allocation11_spill] sm:$0xff] %v13866_v63  ;;  %v6620_v43 = vshrl.u32 %v6285_v5, 16  ;;  %v5494_v5 = vrot.slane %v5492_v55, 4  ;;  %v5497_v63 = vrot.slane %v5495_v27, 5  ;;  %v6085_v27 = vunpack.c.l.b16 %v5480_v41 }
 0x370   : > { %v7383_v58 = vpop.f32.mrf.mxu2  ;;  %v6636_v59 = vor.u32 %v6635_v50, %v6631_v32  ;;  %v6641_v50 = vrot.slane %v6639_v22, 5 }
 0x371   : > { %v7467_v57 = vpop.f32.mrf.mxu3  ;;  %v6622_v6 = vrot.slane %v6620_v43, 4  ;;  %v6843_v43 = vrot.slane %v6841_v8, 4  ;;  %v5498_v30 = vor.u32 %v5497_v63, %v5494_v5 }
 0x372   : > { %v13873_v10 = vadd.f32 %v7467_v57, %v7379_v17  ;;  %v5490_v17 = vsel %vm11405_vm11, %v5485_v0, %v5489_v34  ;;  %v6625_v57 = vrot.slane %v6623_v28, 5  ;;  %v10935_v34 = vld [vmem:[#allocation3 + $0x90] sm:$0xff]  ;;  %v6637_v55 = vrot.slane %v6636_v59, 4 }
 0x373   : > { %v6086_v21 = vunpack.c.l.b16 %v5490_v17  ;;  %v5499_v45 = vrot.slane %v5498_v30, 4  ;;  %v5509_v59 = vrot.slane %v5508_v31, 4  ;;  %v5829_v31 = vld [vmem:[#allocation3 + $0x18] sm:$0xe] }
 0x374   : > { %15433 = vst [vmem:[#allocation10_spill] sm:$0xff] %v13873_v10  ;;  %v13884_v4 = vpop.f32.mrf.mxu1  ;;  %v6626_v2 = vor.u32 %v6625_v57, %v6622_v6  ;;  %v6642_v60 = vsel %vm11405_vm11, %v6637_v55, %v6641_v50  ;;  %v13928_v55 = vld [vmem:[#allocation3 + $0xb8] sm:$0xf] }
 0x375   : > { %7425 = vmatmul.bf16.gmra.mxu2 %v6991_v20  ;;  %v13903_v20 = vld [vmem:[#allocation3 + $0x20] sm:$0x1]  ;;  %v6116_v17 = vpack.c.b16 %v6086_v21, %v6085_v27  ;;  %v6653_v30 = vshll.u32 %v13928_v55, 16 }
 0x376   : > { %7509 = vmatmul.bf16.gmra.mxu3 %v7054_v13  ;;  %v13895_v0 = vpop.f32.mrf.mxu0  ;;  %v6703_v13 = vld [vmem:[#allocation3 + $0x9c] sm:$0xe]  ;;  %v5511_v6 = vshll.u32 %v13903_v20, 16  ;;  %v6627_v57 = vrot.slane %v6626_v2, 4  ;;  %v6287_v2 = vld [vmem:[#allocation3 + $0xb4] sm:$0xf] }
 0x377   : > { %15434 = vst [vmem:[#allocation14_spill] sm:$0xff] %v13895_v0  ;;  %7747 = vmatmul.bf16.gmra.mxu0 %v10935_v34  ;;  %v10267_v12 = vrot.slane %v6703_v13, 9  ;;  %v7384_v34 = vadd.f32 %v7383_v58, %v13605_v33  ;;  %v6974_v33 = vunpack.c.l.b16 %v6642_v60  ;;  %v5907_v58 = vrot.slane %v13871_v62, 5 }
 0x378   : > { %v7386_v16 = vpop.f32.mrf.mxu2  ;;  %v6632_v22 = vsel %vm11405_vm11, %v6627_v57, %v6631_v32  ;;  %v6647_v32 = vshll.u32 %v6287_v2, 16 }
 0x379   : > { %v7470_v18 = vpop.f32.mrf.mxu3  ;;  %v6842_v63 = vsel %vm11782_vm14, %v10267_v12, %v6841_v8  ;;  %v5504_v12 = vsel %vm11405_vm11, %v5499_v45, %v13897_v53  ;;  %v5513_v8 = vrot.slane %v5511_v6, 5  ;;  %v6973_v27 = vunpack.c.l.b16 %v6632_v22 }
 0x37a   : > { %v13900_v28 = vadd.f32 %v7470_v18, %v7382_v46  ;;  %v6845_v46 = vsel %vm11782_vm14, %v6843_v43, %v6844_v51  ;;  %v7035_v43 = vunpack.c.l.b16 %v6842_v63  ;;  %v6644_v51 = vshrl.u32 %v6287_v2, 16  ;;  %v13940_v63 = vld [vmem:[#allocation3 + $0xbc] sm:$0x1] }
 0x37b   : > { %v7036_v41 = vunpack.c.l.b16 %v6845_v46  ;;  %v5514_v50 = vsel %vm11405_vm11, %v5509_v59, %v5513_v8  ;;  %v5401_v46 = vld [vmem:[#allocation3 + $0x24] sm:$0xf]  ;;  %v6657_v53 = vshrl.u32 %v13928_v55, 16  ;;  %v7387_v57 = vadd.f32 %v7386_v16, %v13637_v38  ;;  %v10936_v16 = vld [vmem:[#allocation3 + $0x9c] sm:$0xff] }
 0x37c   : > { %15435 = vst [vmem:[#allocation15_spill] sm:$0xff] %v13900_v28  ;;  %v13906_v0 = vpop.f32.mrf.mxu1  ;;  %v6992_v60 = vpack.c.b16 %v6974_v33, %v6973_v27  ;;  %v13942_v45 = vrot.slane %v6653_v30, 5  ;;  %v6646_v22 = vrot.slane %v6644_v51, 4  ;;  %v6649_v59 = vrot.slane %v6647_v32, 5 }
 0x37d   : > { %v7055_v62 = vpack.c.b16 %v7036_v41, %v7035_v43  ;;  %v5909_v41 = vrot.slane %v5907_v58, 4  ;;  %v5516_v43 = vshrl.u32 %v5401_v46, 16  ;;  %v6663_v30 = vshll.u32 %v13940_v63, 16 }
 0x37e   : > { %v13916_v5 = vpop.f32.mrf.mxu0  ;;  %v6650_v39 = vor.u32 %v6649_v59, %v6646_v22 }
 0x37f   : > { %7781 = vmatmul.bf16.gmra.mxu1 %v6116_v17  ;;  %15436 = vst [vmem:[#allocation13_spill] sm:$0xff] %v13916_v5  ;;  %v6848_v17 = vrot.slane %v13878_v48, 5  ;;  %v10177_v48 = vrot.slane %v5829_v31, 9  ;;  %v5910_v5 = vrot.slane %v13903_v20, 5  ;;  %v6087_v31 = vunpack.c.l.b16 %v5504_v12  ;;  %v10960_v12 = vld [vmem:[%s15321_s4 + $0xa8] sm:$0xff] }
 0x380   : > { %v13923_v13 = vpop.f32.mrf.mxu2  ;;  %7859 = vmatpush.bf16.msra.mxu2 %v10960_v12 }
 0x381   : > { %v7472_v18 = vpop.f32.mrf.mxu3  ;;  %v6850_v33 = vrot.slane %v6848_v17, 4  ;;  %v5908_v51 = vsel %vm11782_vm14, %v10177_v48, %v5907_v58  ;;  %v11024_v58 = vld [vmem:[%s15321_s4 + $0x1a8] sm:$0xff]  ;;  %v6665_v48 = vrot.slane %v6663_v30, 5 }
 0x382   : > { %v13921_v21 = vadd.f32 %v7472_v18, %v7384_v34  ;;  %v13934_v34 = vld [vmem:[#allocation3 + $0x28] sm:$0xf]  ;;  %v6659_v18 = vrot.slane %v6657_v53, 4  ;;  %8958 = vmatpush.bf16.msra.mxu3 %v11024_v58 }
 0x383   : > { %v5525_v8 = vshll.u32 %v13934_v34, 16  ;;  %v5529_v2 = vshrl.u32 %v13934_v34, 16  ;;  %v6704_v53 = vld [vmem:[#allocation3 + $0xa8] sm:$0xe] }
 0x384   : > { %15437 = vst [vmem:[#allocation16_spill] sm:$0xff] %v13921_v21  ;;  %v13937_v6 = vpop.f32.mrf.mxu1  ;;  %v6660_v27 = vor.u32 %v6659_v18, %v13942_v45  ;;  %v5911_v21 = vsel %vm11782_vm14, %v5909_v41, %v5910_v5  ;;  %v13958_v18 = vld [vmem:[#allocation3 + $0x2c] sm:$0x1]  ;;  %v10268_v41 = vrot.slane %v6704_v53, 9  ;;  %v13985_v53 = vld [vmem:[#allocation3 + $0x34] sm:$0xf] }
 0x385   : > { %7430 = vmatmul.bf16.gmra.mxu2 %v6992_v60  ;;  %v5519_v60 = vshll.u32 %v5401_v46, 16  ;;  %v5531_v5 = vrot.slane %v5529_v2, 4  ;;  %v6151_v46 = vunpack.c.l.b16 %v5908_v51  ;;  %v5518_v51 = vrot.slane %v5516_v43, 4 }
 0x386   : > { %7514 = vmatmul.bf16.gmra.mxu3 %v7055_v62  ;;  %v13947_v38 = vpop.f32.mrf.mxu0  ;;  %v6088_v62 = vunpack.c.l.b16 %v5514_v50  ;;  %v6661_v10 = vrot.slane %v6660_v27, 4  ;;  %v13966_v50 = vrot.slane %v5525_v8, 5  ;;  %v11032_v8 = vld [vmem:[%s15321_s4 + $0x1e8] sm:$0xff]  ;;  %v6849_v2 = vsel %vm11782_vm14, %v10268_v41, %v6848_v17  ;;  %v11031_v41 = vld [vmem:[%s15321_s4 + $0x1e0] sm:$0xff] }
 0x387   : > { %15438 = vst [vmem:[#allocation17_spill] sm:$0xff] %v13947_v38  ;;  %7752 = vmatmul.bf16.gmra.mxu0 %v10936_v16  ;;  %v6851_v38 = vrot.slane %v13889_v29, 5  ;;  %v5535_v16 = vshll.u32 %v13958_v18, 16 }
 0x388   : > { %v7391_v28 = vpop.f32.mrf.mxu2  ;;  %v6117_v59 = vpack.c.b16 %v6088_v62, %v6087_v31  ;;  %v5532_v31 = vor.u32 %v5531_v5, %v13966_v50  ;;  %9047 = vmatpush.bf16.msra.mxu0 %v11032_v8  ;;  %v5403_v62 = vld [vmem:[#allocation3 + $0x30] sm:$0xf]  ;;  %v11023_v8 = vld [vmem:[%s15321_s4 + $0x1a0] sm:$0xff] }
 0x389   : > { %v7475_v32 = vpop.f32.mrf.mxu3  ;;  %v6852_v29 = vsel %vm11782_vm14, %v6850_v33, %v6851_v38  ;;  %v6651_v38 = vrot.slane %v6650_v39, 4  ;;  %v6666_v33 = vsel %vm11405_vm11, %v6661_v10, %v6665_v48  ;;  %v5537_v17 = vrot.slane %v5535_v16, 5  ;;  %8959 = vmatpush.bf16.msra.mxu3 %v11023_v8  ;;  %v10937_v8 = vld [vmem:[#allocation3 + $0xa8] sm:$0xff] }
 0x38a   : > { %v13955_v20 = vadd.f32 %v7475_v32, %v7387_v57  ;;  %v6152_v57 = vunpack.c.l.b16 %v5911_v21  ;;  %v7389_v21 = vadd.f32 %v13923_v13, %v13666_v25  ;;  %v7038_v30 = vunpack.c.l.b16 %v6852_v29 }
 0x38b   : > { %v5521_v32 = vrot.slane %v5519_v60, 5  ;;  %v6656_v25 = vsel %vm11405_vm11, %v6651_v38, %v13942_v45  ;;  %v7037_v13 = vunpack.c.l.b16 %v6849_v2  ;;  %v6976_v10 = vunpack.c.l.b16 %v6666_v33  ;;  %v10959_v45 = vld [vmem:[%s15321_s4 + $0xa0] sm:$0xff]  ;;  %v14009_v2 = vld [vmem:[#allocation3 + $0xc4] sm:$0xf] }
 0x38c   : > { %15439 = vst [vmem:[#allocation24_spill] sm:$0xff] %v13955_v20  ;;  %v13970_v22 = vpop.f32.mrf.mxu1  ;;  %v13976_v27 = vpack.c.b16 %v6152_v57, %v6151_v46  ;;  %v5540_v60 = vshrl.u32 %v5403_v62, 16  ;;  %v5543_v5 = vshll.u32 %v5403_v62, 16  ;;  %v5549_v46 = vshll.u32 %v13985_v53, 16  ;;  %v11040_v57 = vld [vmem:[%s15321_s4 + $0x228] sm:$0xff]  ;;  %7860 = vmatpush.bf16.msra.mxu2 %v10959_v45  ;;  %9048 = vmatpush.bf16.msra.mxu0 %v11031_v41 }
 0x38d   : > { %v7056_v29 = vpack.c.b16 %v7038_v30, %v7037_v13  ;;  %v5522_v48 = vor.u32 %v5521_v32, %v5518_v51  ;;  %v6975_v16 = vunpack.c.l.b16 %v6656_v25  ;;  %9136 = vmatpush.bf16.msra.mxu1 %v11040_v57  ;;  %v6677_v62 = vshll.u32 %v14009_v2, 16  ;;  %v14018_v25 = vld [vmem:[#allocation3 + $0xc8] sm:$0x1]  ;;  %v14030_v41 = vld [vmem:[#allocation3 + $0x38] sm:$0x1] }
 0x38e   : > { %v13987_v58 = vpop.f32.mrf.mxu0  ;;  %v7392_v30 = vadd.f32 %v7391_v28, %v13691_v1  ;;  %v15333_v32 = vrot.slane %v13928_v55, 5  ;;  %v11030_v1 = vld [vmem:[%s15321_s4 + $0x1d8] sm:$0xff] }
 0x38f   : > { %7786 = vmatmul.bf16.gmra.mxu1 %v6117_v59  ;;  %15440 = vst [vmem:[#allocation25_spill] sm:$0xff] %v13987_v58  ;;  %v5533_v59 = vrot.slane %v5532_v31, 4  ;;  %v6993_v51 = vpack.c.b16 %v6976_v10, %v6975_v16  ;;  %v5553_v31 = vshrl.u32 %v13985_v53, 16  ;;  %v14020_v45 = vrot.slane %v6677_v62, 5 }
 0x390   : > { %v13994_v43 = vpop.f32.mrf.mxu2  ;;  %v5523_v28 = vrot.slane %v5522_v48, 4  ;;  %v6687_v48 = vshll.u32 %v14018_v25, 16  ;;  %9049 = vmatpush.bf16.msra.mxu0 %v11030_v1 }
 0x391   : > { %v7477_v39 = vpop.f32.mrf.mxu3  ;;  %v5538_v10 = vsel %vm11405_vm11, %v5533_v59, %v5537_v17  ;;  %v14043_v17 = vld [vmem:[#allocation3 + $0x3c] sm:$0xf] }
 0x392   : > { %v13992_v12 = vadd.f32 %v7477_v39, %v7389_v21  ;;  %v6289_v21 = vld [vmem:[#allocation3 + $0xc0] sm:$0xf]  ;;  %v6681_v39 = vshrl.u32 %v14009_v2, 16  ;;  %v6090_v20 = vunpack.c.l.b16 %v5538_v10 }
 0x393   : > { %v6668_v38 = vshrl.u32 %v6289_v21, 16  ;;  %v6671_v33 = vshll.u32 %v6289_v21, 16  ;;  %v14069_v10 = vld [vmem:[#allocation3 + $0x40] sm:$0xf] }
 0x394   : > { %15441 = vst [vmem:[#allocation19_spill] sm:$0xff] %v13992_v12  ;;  %v14013_v58 = vpop.f32.mrf.mxu1  ;;  %v6683_v21 = vrot.slane %v6681_v39, 4  ;;  %v10958_v12 = vld [vmem:[%s15321_s4 + $0x98] sm:$0xff]  ;;  %v5528_v39 = vsel %vm11405_vm11, %v5523_v28, %v13966_v50  ;;  %v10957_v50 = vld [vmem:[%s15321_s4 + $0x90] sm:$0xff] }
 0x395   : > { %v6670_v13 = vrot.slane %v6668_v38, 4  ;;  %v6673_v57 = vrot.slane %v6671_v33, 5  ;;  %7435 = vmatmul.bf16.gmra.mxu2 %v6993_v51  ;;  %v14037_v38 = vrot.slane %v5540_v60, 4  ;;  %v14039_v33 = vrot.slane %v5543_v5, 5  ;;  %v6705_v51 = vld [vmem:[#allocation3 + $0xb4] sm:$0xe] }
 0x396   : > { %7519 = vmatmul.bf16.gmra.mxu3 %v7056_v29  ;;  %v11022_v29 = vld [vmem:[%s15321_s4 + $0x198] sm:$0xff]  ;;  %v14035_v16 = vpop.f32.mrf.mxu0  ;;  %v6684_v62 = vor.u32 %v6683_v21, %v14020_v45  ;;  %7861 = vmatpush.bf16.msra.mxu2 %v10958_v12  ;;  %v14050_v60 = vrot.slane %v5549_v46, 5  ;;  %v5555_v5 = vrot.slane %v5553_v31, 4  ;;  %v11029_v46 = vld [vmem:[%s15321_s4 + $0x1d0] sm:$0xff]  ;;  %v6089_v1 = vunpack.c.l.b16 %v5528_v39 }
 0x397   : > { %15442 = vst [vmem:[#allocation18_spill] sm:$0xff] %v14035_v16  ;;  %v6857_v16 = vrot.slane %v15333_v32, 4  ;;  %8960 = vmatpush.bf16.msra.mxu3 %v11022_v29  ;;  %7757 = vmatmul.bf16.gmra.mxu0 %v10937_v8  ;;  %v6674_v35 = vor.u32 %v6673_v57, %v6670_v13  ;;  %v11021_v31 = vld [vmem:[%s15321_s4 + $0x190] sm:$0xff]  ;;  %v5546_v28 = vor.u32 %v14039_v33, %v14037_v38  ;;  %v5559_v13 = vshll.u32 %v14030_v41, 16  ;;  %v11028_v38 = vld [vmem:[%s15321_s4 + $0x1c8] sm:$0xff] }
 0x398   : > { %v14054_v12 = vpop.f32.mrf.mxu2  ;;  %v6685_v56 = vrot.slane %v6684_v62, 4  ;;  %v6689_v57 = vrot.slane %v6687_v48, 5  ;;  %v7948_v29 = vld [vmem:[#allocation3 + $0x1c] sm:$0xf]  ;;  %v10269_v62 = vrot.slane %v6705_v51, 9  ;;  %v5556_v32 = vor.u32 %v5555_v5, %v14050_v60  ;;  %9050 = vmatpush.bf16.msra.mxu0 %v11029_v46  ;;  %v11020_v33 = vld [vmem:[%s15321_s4 + $0x188] sm:$0xff] }
 0x399   : > { %v7480_v59 = vpop.f32.mrf.mxu3  ;;  %v5564_v48 = vshrl.u32 %v14043_v17, 16  ;;  %v6118_v39 = vpack.c.b16 %v6090_v20, %v6089_v1  ;;  %v6675_v51 = vrot.slane %v6674_v35, 4  ;;  %v15444_v46 = vrot.slane %v13928_v55, 5 }
 0x39a   : > { %v14052_v21 = vadd.f32 %v7480_v59, %v7392_v30  ;;  %v6858_v30 = vrot.slane %v13940_v63, 5  ;;  %7862 = vmatpush.bf16.msra.mxu2 %v10957_v50  ;;  %v10956_v63 = vld [vmem:[%s15321_s4 + $0x88] sm:$0xff]  ;;  %v6690_v5 = vsel %vm11405_vm11, %v6685_v56, %v6689_v57  ;;  %v7947_v50 = vld [vmem:[#allocation3 + $0x18] sm:$0xf]  ;;  %v8009_v61 = vshrl.u32 %v7948_v29, 16 }
 0x39b   : > { %8961 = vmatpush.bf16.msra.mxu3 %v11021_v31  ;;  %v6856_v31 = vsel %vm11782_vm14, %v10269_v62, %v15444_v46  ;;  %v5573_v35 = vshll.u32 %v14069_v10, 16  ;;  %v5577_v56 = vshrl.u32 %v14069_v10, 16  ;;  %v5557_v20 = vrot.slane %v5556_v32, 4  ;;  %v11019_v32 = vld [vmem:[%s15321_s4 + $0x180] sm:$0xff] }
 0x39c   : > { %15443 = vst [vmem:[#allocation20_spill] sm:$0xff] %v14052_v21  ;;  %v14071_v8 = vpop.f32.mrf.mxu1  ;;  %v6859_v59 = vsel %vm11782_vm14, %v6857_v16, %v6858_v30  ;;  %v7394_v16 = vadd.f32 %v13994_v43, %v13716_v26  ;;  %v5567_v30 = vshll.u32 %v14043_v17, 16  ;;  %v8005_v21 = vshll.u32 %v7948_v29, 16  ;;  %9051 = vmatpush.bf16.msra.mxu0 %v11028_v38 }
 0x39d   : > { %v7040_v49 = vunpack.c.l.b16 %v6859_v59  ;;  %v6680_v26 = vsel %vm11405_vm11, %v6675_v51, %v14020_v45  ;;  %v5561_v43 = vrot.slane %v5559_v13, 5  ;;  %v6978_v1 = vunpack.c.l.b16 %v6690_v5  ;;  %v10955_v45 = vld [vmem:[%s15321_s4 + $0x80] sm:$0xff] }
 0x39e   : > { %v14095_v42 = vpop.f32.mrf.mxu0  ;;  %7863 = vmatpush.bf16.msra.mxu2 %v10956_v63  ;;  %v7996_v17 = vshrl.u32 %v7947_v50, 16  ;;  %v7039_v29 = vunpack.c.l.b16 %v6856_v31  ;;  %v5566_v59 = vrot.slane %v5564_v48, 4  ;;  %v11027_v63 = vld [vmem:[%s15321_s4 + $0x1c0] sm:$0xff]  ;;  %v7999_v13 = vshll.u32 %v7947_v50, 16  ;;  %v5827_v50 = vld [vmem:[#allocation3] sm:$0xe] }
 0x39f   : > { %7791 = vmatmul.bf16.gmra.mxu1 %v6118_v39  ;;  %15445 = vst [vmem:[#allocation21_spill] sm:$0xff] %v14095_v42  ;;  %8962 = vmatpush.bf16.msra.mxu3 %v11020_v33  ;;  %v6977_v38 = vunpack.c.l.b16 %v6680_v26  ;;  %v5569_v33 = vrot.slane %v5567_v30, 5  ;;  %v8011_v39 = vrot.slane %v8009_v61, 4  ;;  %v14117_v48 = vrot.slane %v5573_v35, 5 }
 0x3a0   : > { %v14104_v62 = vpop.f32.mrf.mxu2  ;;  %v7057_v51 = vpack.c.b16 %v7040_v49, %v7039_v29  ;;  %v5579_v5 = vrot.slane %v5577_v56, 4  ;;  %v5893_v46 = vrot.slane %v13770_v44, 5  ;;  %9052 = vmatpush.bf16.msra.mxu0 %v11027_v63  ;;  %v7397_v61 = vadd.f32 %v14054_v12, %v13747_v7 }
 0x3a1   : > { %v7482_v55 = vpop.f32.mrf.mxu3  ;;  %v6994_v42 = vpack.c.b16 %v6978_v1, %v6977_v38  ;;  %v5562_v49 = vsel %vm11405_vm11, %v5557_v20, %v5561_v43  ;;  %v7998_v30 = vrot.slane %v7996_v17, 4  ;;  %v8001_v26 = vrot.slane %v7999_v13, 5  ;;  %v10938_v1 = vld [vmem:[#allocation3 + $0xb4] sm:$0xff] }
 0x3a2   : > { %v14102_v57 = vadd.f32 %v7482_v55, %v7394_v16  ;;  %v14115_v16 = vrot.slane %v8005_v21, 5  ;;  %7864 = vmatpush.bf16.msra.mxu2 %v10955_v45  ;;  %v5547_v55 = vrot.slane %v5546_v28, 4  ;;  %v7979_v21 = vld [vmem:[#allocation3 + $0x20] sm:$0x1]  ;;  %v14130_v28 = vld [vmem:[#allocation3 + $0x44] sm:$0x1]  ;;  %v5580_v7 = vor.u32 %v5579_v5, %v14117_v48 }
 0x3a3   : > { %8963 = vmatpush.bf16.msra.mxu3 %v11019_v32  ;;  %v10175_v12 = vrot.slane %v5827_v50, 9  ;;  %v5895_v20 = vrot.slane %v5893_v46, 4  ;;  %v5896_v43 = vrot.slane %v13795_v24, 5  ;;  %v6092_v29 = vunpack.c.l.b16 %v5562_v49 }
 0x3a4   : > { %15446 = vst [vmem:[#allocation26_spill] sm:$0xff] %v14102_v57  ;;  %v14120_v31 = vpop.f32.mrf.mxu1  ;;  %v6862_v57 = vrot.slane %v14009_v2, 5  ;;  %v5552_v44 = vsel %vm11405_vm11, %v5547_v55, %v14050_v60  ;;  %v5570_v2 = vor.u32 %v5569_v33, %v5566_v59  ;;  %v8012_v35 = vor.u32 %v8011_v39, %v14115_v16 }
 0x3a5   : > { %7440 = vmatmul.bf16.gmra.mxu2 %v6994_v42  ;;  %v8015_v63 = vshll.u32 %v7979_v21, 16  ;;  %v6706_v42 = vld [vmem:[#allocation3 + $0xc0] sm:$0xe]  ;;  %v5583_v32 = vshll.u32 %v14130_v28, 16  ;;  %v8002_v13 = vor.u32 %v8001_v26, %v7998_v30  ;;  %v6091_v38 = vunpack.c.l.b16 %v5552_v44  ;;  %v14149_v26 = vld [vmem:[#allocation3 + $0x4c] sm:$0xf] }
 0x3a6   : > { %7524 = vmatmul.bf16.gmra.mxu3 %v7057_v51  ;;  %v14133_v56 = vpop.f32.mrf.mxu0  ;;  %v6864_v45 = vrot.slane %v6862_v57, 4  ;;  %v6865_v33 = vrot.slane %v14018_v25, 5  ;;  %v8013_v39 = vrot.slane %v8012_v35, 4  ;;  %v5571_v51 = vrot.slane %v5570_v2, 4  ;;  %v7950_v25 = vld [vmem:[#allocation3 + $0x28] sm:$0xf] }
 0x3a7   : > { %15447 = vst [vmem:[#allocation4_spill] sm:$0xff] %v14133_v56  ;;  %7762 = vmatmul.bf16.gmra.mxu0 %v10938_v1  ;;  %v5581_v5 = vrot.slane %v5580_v7, 4  ;;  %v5894_v24 = vsel %vm11782_vm14, %v10175_v12, %v5893_v46  ;;  %v5897_v55 = vsel %vm11782_vm14, %v5895_v20, %v5896_v43  ;;  %v10270_v49 = vrot.slane %v6706_v42, 9 }
 0x3a8   : > { %v7401_v59 = vpop.f32.mrf.mxu2  ;;  %v6866_v21 = vsel %vm11782_vm14, %v6864_v45, %v6865_v33  ;;  %v8017_v30 = vrot.slane %v8015_v63, 5  ;;  %v7399_v44 = vadd.f32 %v14104_v62, %v13777_v14  ;;  %v5576_v46 = vsel %vm11405_vm11, %v5571_v51, %v14117_v48  ;;  %v11039_v51 = vld [vmem:[%s15321_s4 + $0x220] sm:$0xff] }
 0x3a9   : > { %v7485_v17 = vpop.f32.mrf.mxu3  ;;  %v5585_v2 = vrot.slane %v5583_v32, 5  ;;  %v8003_v35 = vrot.slane %v8002_v13, 4  ;;  %v6863_v1 = vsel %vm11782_vm14, %v10270_v49, %v6862_v57  ;;  %v6147_v7 = vunpack.c.l.b16 %v5894_v24  ;;  %v5828_v57 = vld [vmem:[#allocation3 + $0xc] sm:$0xe]  ;;  %v5833_v24 = vld [vmem:[#allocation3 + $0x48] sm:$0xe]  ;;  %9137 = vmatpush.bf16.msra.mxu1 %v11039_v51 }
 0x3aa   : > { %v14137_v60 = vadd.f32 %v7485_v17, %v7397_v61  ;;  %v6119_v61 = vpack.c.b16 %v6092_v29, %v6091_v38  ;;  %v6148_v12 = vunpack.c.l.b16 %v5897_v55  ;;  %v8018_v20 = vsel %vm11405_vm11, %v8013_v39, %v8017_v30  ;;  %v7949_v29 = vld [vmem:[#allocation3 + $0x24] sm:$0xf]  ;;  %v14174_v39 = vld [vmem:[#allocation3 + $0x50] sm:$0x1] }
 0x3ab   : > { %v7042_v43 = vunpack.c.l.b16 %v6866_v21  ;;  %v8029_v14 = vshll.u32 %v7950_v25, 16  ;;  %v8033_v62 = vshrl.u32 %v7950_v25, 16  ;;  %v5935_v45 = vrot.slane %v14149_v26, 5 }
 0x3ac   : > { %15448 = vst [vmem:[#allocation5_spill] sm:$0xff] %v14137_v60  ;;  %v14145_v50 = vpop.f32.mrf.mxu1  ;;  %v5586_v63 = vsel %vm11405_vm11, %v5581_v5, %v5585_v2  ;;  %v14165_v42 = vunpack.c.l.b16 %v5576_v46  ;;  %v7041_v13 = vunpack.c.l.b16 %v6863_v1  ;;  %v8008_v33 = vsel %vm11405_vm11, %v8003_v35, %v14115_v16  ;;  %v5407_v35 = vld [vmem:[#allocation3 + $0x48] sm:$0xf] }
 0x3ad   : > { %v5900_v5 = vrot.slane %v13808_v52, 5  ;;  %v6179_v55 = vpack.c.b16 %v6148_v12, %v6147_v7  ;;  %v8020_v49 = vshrl.u32 %v7949_v29, 16  ;;  %v8023_v21 = vshll.u32 %v7949_v29, 16 }
 0x3ae   : > { %v14160_v17 = vpop.f32.mrf.mxu0  ;;  %v7058_v30 = vpack.c.b16 %v7042_v43, %v7041_v13  ;;  %v14180_v25 = vrot.slane %v8029_v14, 5  ;;  %v5937_v46 = vrot.slane %v5935_v45, 4  ;;  %v8635_v2 = vunpack.c.l.b16 %v8008_v33  ;;  %v14188_v43 = vld [vmem:[#allocation3 + $0x58] sm:$0xf] }
 0x3af   : > { %7796 = vmatmul.bf16.gmra.mxu1 %v6119_v61  ;;  %15449 = vst [vmem:[#allocation27_spill] sm:$0xff] %v14160_v17  ;;  %v8636_v61 = vunpack.c.l.b16 %v8018_v20  ;;  %v10176_v1 = vrot.slane %v5828_v57, 9  ;;  %v5938_v17 = vrot.slane %v14174_v39, 5  ;;  %v7402_v52 = vadd.f32 %v7401_v59, %v13798_v9 }
 0x3b0   : > { %v14169_v38 = vpop.f32.mrf.mxu2  ;;  %v6094_v7 = vunpack.c.l.b16 %v5586_v63  ;;  %v5597_v12 = vshll.u32 %v14149_v26, 16  ;;  %v5601_v20 = vshrl.u32 %v14149_v26, 16  ;;  %v5902_v14 = vrot.slane %v5900_v5, 4  ;;  %v5834_v26 = vld [vmem:[#allocation3 + $0x54] sm:$0xe] }
 0x3b1   : > { %v7487_v48 = vpop.f32.mrf.mxu3  ;;  %v8667_v29 = vpack.c.b16 %v8636_v61, %v8635_v2  ;;  %v5939_v13 = vsel %vm11782_vm14, %v5937_v46, %v5938_v17  ;;  %v5588_v9 = vshrl.u32 %v5407_v35, 16  ;;  %v8022_v59 = vrot.slane %v8020_v49, 4 }
 0x3b2   : > { %v14167_v32 = vadd.f32 %v7487_v48, %v7399_v44  ;;  %v8035_v44 = vrot.slane %v8033_v62, 4  ;;  %v10181_v48 = vrot.slane %v5833_v24, 9  ;;  %v7980_v62 = vld [vmem:[#allocation3 + $0x2c] sm:$0x1]  ;;  %v8025_v63 = vrot.slane %v8023_v21, 5 }
 0x3b3   : > { %v6160_v61 = vunpack.c.l.b16 %v5939_v13  ;;  %v5942_v2 = vrot.slane %v14188_v43, 5  ;;  %v14201_v17 = vrot.slane %v5597_v12, 5  ;;  %v5603_v46 = vrot.slane %v5601_v20, 4 }
 0x3b4   : > { %15450 = vst [vmem:[#allocation28_spill] sm:$0xff] %v14167_v32  ;;  %v14182_v16 = vpop.f32.mrf.mxu1  ;;  %v5936_v57 = vsel %vm11782_vm14, %v10181_v48, %v5935_v45  ;;  %v8036_v51 = vor.u32 %v8035_v44, %v14180_v25  ;;  %v14203_v48 = vld [vmem:[#allocation3 + $0x5c] sm:$0x1]  ;;  %v5901_v21 = vsel %vm11782_vm14, %v10176_v1, %v5900_v5  ;;  %v5590_v13 = vrot.slane %v5588_v9, 4 }
 0x3b5   : > { %7865 = vmatmul.bf16.vlgmr.msra.gmra.mxu2 %v6179_v55  ;;  %v5903_v55 = vrot.slane %v13839_v37, 5  ;;  %v6159_v49 = vunpack.c.l.b16 %v5936_v57  ;;  %v8039_v37 = vshll.u32 %v7980_v62, 16  ;;  %v5945_v5 = vrot.slane %v14203_v48, 5 }
 0x3b6   : > { %7529 = vmatmul.bf16.gmra.mxu3 %v7058_v30  ;;  %v14194_v33 = vpop.f32.mrf.mxu0  ;;  %v5591_v30 = vshll.u32 %v5407_v35, 16  ;;  %v10182_v35 = vrot.slane %v5834_v26, 9  ;;  %v7404_v1 = vadd.f32 %v14169_v38, %v13824_v47  ;;  %v5604_v62 = vor.u32 %v5603_v46, %v14201_v17 }
 0x3b7   : > { %15451 = vst [vmem:[#allocation29_spill] sm:$0xff] %v14194_v33  ;;  %9053 = vmatmul.bf16.vlgmr.msra.gmra.mxu0 %v8667_v29  ;;  %v5904_v44 = vsel %vm11782_vm14, %v5902_v14, %v5903_v55  ;;  %v8026_v33 = vor.u32 %v8025_v63, %v8022_v59  ;;  %v14209_v29 = vpack.c.b16 %v6160_v61, %v6159_v49  ;;  %v7952_v59 = vld [vmem:[#allocation3 + $0x34] sm:$0xf]  ;;  %v8041_v63 = vrot.slane %v8039_v37, 5 }
 0x3b8   : > { %v7406_v45 = vpop.f32.mrf.mxu2  ;;  %v5593_v20 = vrot.slane %v5591_v30, 5  ;;  %v5943_v57 = vsel %vm11782_vm14, %v10182_v35, %v5942_v2  ;;  %v6120_v14 = vpack.c.b16 %v6094_v7, %v14165_v42  ;;  %v6150_v9 = vunpack.c.l.b16 %v5904_v44 }
 0x3b9   : > { %v7490_v24 = vpop.f32.mrf.mxu3  ;;  %v5607_v61 = vshll.u32 %v14174_v39, 16  ;;  %v6161_v49 = vunpack.c.l.b16 %v5943_v57  ;;  %v8053_v46 = vshll.u32 %v7952_v59, 16  ;;  %v8057_v44 = vshrl.u32 %v7952_v59, 16 }
 0x3ba   : > { %v14199_v56 = vadd.f32 %v7490_v24, %v7402_v52  ;;  %v8037_v52 = vrot.slane %v8036_v51, 4  ;;  %v7951_v24 = vld [vmem:[#allocation3 + $0x30] sm:$0xf]  ;;  %v5594_v42 = vor.u32 %v5593_v20, %v5590_v13 }
 0x3bb   : > { %v8044_v51 = vshrl.u32 %v7951_v24, 16  ;;  %v8047_v26 = vshll.u32 %v7951_v24, 16  ;;  %v5605_v24 = vrot.slane %v5604_v62, 4  ;;  %v5609_v57 = vrot.slane %v5607_v61, 5  ;;  %v7981_v61 = vld [vmem:[#allocation3 + $0x38] sm:$0x1] }
 0x3bc   : > { %15452 = vst [vmem:[#allocation30_spill] sm:$0xff] %v14199_v56  ;;  %v14211_v12 = vpop.f32.mrf.mxu1  ;;  %v5944_v56 = vrot.slane %v5942_v2, 4  ;;  %v8027_v2 = vrot.slane %v8026_v33, 4  ;;  %v8042_v7 = vsel %vm11405_vm11, %v8037_v52, %v8041_v63  ;;  %v11003_v33 = vld [vmem:[#allocation3 + $0x18] sm:$0xff]  ;;  %v14240_v63 = vrot.slane %v8053_v46, 5 }
 0x3bd   : > { %v14234_v13 = vrot.slane %v8044_v51, 4  ;;  %v14236_v20 = vrot.slane %v8047_v26, 5  ;;  %v8059_v62 = vrot.slane %v8057_v44, 4  ;;  %v5409_v26 = vld [vmem:[#allocation3 + $0x54] sm:$0xf]  ;;  %v8063_v44 = vshll.u32 %v7981_v61, 16 }
 0x3be   : > { %v5946_v30 = vsel %vm11782_vm14, %v5944_v56, %v5945_v5  ;;  %v14222_v55 = vpop.f32.mrf.mxu0  ;;  %v6149_v5 = vunpack.c.l.b16 %v5901_v21  ;;  %v8032_v39 = vsel %vm11405_vm11, %v8027_v2, %v14180_v25  ;;  %v7407_v21 = vadd.f32 %v7406_v45, %v13852_v15  ;;  %v14245_v2 = vld [vmem:[#allocation3 + $0x64] sm:$0xf] }
 0x3bf   : > { %7801 = vmatmul.bf16.gmra.mxu1 %v6120_v14  ;;  %15453 = vst [vmem:[#allocation31_spill] sm:$0xff] %v14222_v55  ;;  %v6162_v47 = vunpack.c.l.b16 %v5946_v30  ;;  %v8638_v14 = vunpack.c.l.b16 %v8042_v7  ;;  %v5610_v25 = vsel %vm11405_vm11, %v5605_v24, %v5609_v57  ;;  %v8637_v30 = vunpack.c.l.b16 %v8032_v39  ;;  %v14257_v24 = vld [vmem:[#allocation3 + $0x68] sm:$0x1] }
 0x3c0   : > { %v7408_v35 = vpop.f32.mrf.mxu2  ;;  %v6180_v59 = vpack.c.b16 %v6150_v9, %v6149_v5  ;;  %v5621_v9 = vshll.u32 %v14188_v43, 16  ;;  %v8050_v45 = vor.u32 %v14236_v20, %v14234_v13  ;;  %v6096_v7 = vunpack.c.l.b16 %v5610_v25  ;;  %v5835_v13 = vld [vmem:[#allocation3 + $0x60] sm:$0xe] }
 0x3c1   : > { %v7492_v38 = vpop.f32.mrf.mxu3  ;;  %v14229_v56 = vpack.c.b16 %v6162_v47, %v6161_v49  ;;  %v5625_v49 = vshrl.u32 %v14188_v43, 16  ;;  %v8668_v15 = vpack.c.b16 %v8638_v14, %v8637_v30  ;;  %v8060_v46 = vor.u32 %v8059_v62, %v14240_v63 }
 0x3c2   : > { %v14227_v37 = vadd.f32 %v7492_v38, %v7404_v1  ;;  %v5595_v1 = vrot.slane %v5594_v42, 4  ;;  %v7953_v38 = vld [vmem:[#allocation3 + $0x3c] sm:$0xf]  ;;  %v5949_v5 = vrot.slane %v14245_v2, 5  ;;  %v5612_v57 = vshrl.u32 %v5409_v26, 16 }
 0x3c3   : > { %15455 = vst [vmem:[#allocation33_spill] sm:$0xff] %v14229_v56  ;;  %v5615_v14 = vshll.u32 %v5409_v26, 16  ;;  %v14264_v20 = vrot.slane %v5621_v9, 5  ;;  %v8071_v62 = vshll.u32 %v7953_v38, 16  ;;  %v10183_v26 = vrot.slane %v5835_v13, 9 }
 0x3c4   : > { %15454 = vst [vmem:[#allocation32_spill] sm:$0xff] %v14227_v37  ;;  %v14238_v52 = vpop.f32.mrf.mxu1  ;;  %v5600_v51 = vsel %vm11405_vm11, %v5595_v1, %v14201_v17  ;;  %v14259_v17 = vld [vmem:[#allocation3 + $0x40] sm:$0xf]  ;;  %v5627_v1 = vrot.slane %v5625_v49, 4  ;;  %v5951_v61 = vrot.slane %v5949_v5, 4  ;;  %v7409_v9 = vadd.f32 %v7408_v35, %v13884_v4 }
 0x3c5   : > { %7870 = vmatmul.bf16.gmra.mxu2 %v6180_v59  ;;  %v6095_v43 = vunpack.c.l.b16 %v5600_v51  ;;  %v8068_v59 = vshrl.u32 %v7953_v38, 16  ;;  %v8077_v25 = vshll.u32 %v14259_v17, 16  ;;  %v8081_v30 = vshrl.u32 %v14259_v17, 16 }
 0x3c6   : > { %8964 = vmatmul.bf16.vlgmr.msra.gmra.mxu3 %v11003_v33  ;;  %v14252_v47 = vpop.f32.mrf.mxu0  ;;  %v5614_v55 = vrot.slane %v5612_v57, 4  ;;  %v5617_v49 = vrot.slane %v5615_v14, 5  ;;  %v5628_v37 = vor.u32 %v5627_v1, %v14264_v20  ;;  %v8065_v32 = vrot.slane %v8063_v44, 5 }
 0x3c7   : > { %15456 = vst [vmem:[#allocation34_spill] sm:$0xff] %v14252_v47  ;;  %9058 = vmatmul.bf16.gmra.mxu0 %v8668_v15  ;;  %v5952_v47 = vrot.slane %v14257_v24, 5  ;;  %v6121_v51 = vpack.c.b16 %v6096_v7, %v6095_v43  ;;  %v8061_v15 = vrot.slane %v8060_v46, 4  ;;  %v8070_v60 = vrot.slane %v8068_v59, 4  ;;  %v11038_v59 = vld [vmem:[%s15321_s4 + $0x218] sm:$0xff] }
 0x3c8   : > { %v7411_v33 = vpop.f32.mrf.mxu2  ;;  %v5950_v56 = vsel %vm11782_vm14, %v10183_v26, %v5949_v5  ;;  %v14280_v46 = vrot.slane %v8077_v25, 5  ;;  %v8083_v4 = vrot.slane %v8081_v30, 4  ;;  %v5631_v57 = vshll.u32 %v14203_v48, 16  ;;  %9138 = vmatpush.bf16.msra.mxu1 %v11038_v59 }
 0x3c9   : > { %v7495_v42 = vpop.f32.mrf.mxu3  ;;  %v5953_v38 = vsel %vm11782_vm14, %v5951_v61, %v5952_v47  ;;  %v8051_v14 = vrot.slane %v8050_v45, 4  ;;  %v8066_v47 = vsel %vm11405_vm11, %v8061_v15, %v8065_v32  ;;  %v5618_v5 = vor.u32 %v5617_v49, %v5614_v55  ;;  %v14299_v32 = vld [vmem:[#allocation3 + $0x44] sm:$0x1] }
 0x3ca   : > { %v14262_v39 = vadd.f32 %v7495_v42, %v7407_v21  ;;  %v5914_v42 = vrot.slane %v13934_v34, 5  ;;  %v8073_v34 = vrot.slane %v8071_v62, 5  ;;  %v6164_v35 = vunpack.c.l.b16 %v5953_v38 }
 0x3cb   : > { %v6163_v62 = vunpack.c.l.b16 %v5950_v56  ;;  %v5629_v25 = vrot.slane %v5628_v37, 4  ;;  %v8056_v48 = vsel %vm11405_vm11, %v8051_v14, %v14240_v63  ;;  %v8640_v30 = vunpack.c.l.b16 %v8066_v47  ;;  %v5831_v47 = vld [vmem:[#allocation3 + $0x30] sm:$0xe] }
 0x3cc   : > { %15457 = vst [vmem:[#allocation35_spill] sm:$0xff] %v14262_v39  ;;  %v14269_v21 = vpop.f32.mrf.mxu1  ;;  %v5830_v39 = vld [vmem:[#allocation3 + $0x24] sm:$0xe]  ;;  %v8074_v55 = vor.u32 %v8073_v34, %v8070_v60  ;;  %v8084_v61 = vor.u32 %v8083_v4, %v14280_v46  ;;  %v5633_v37 = vrot.slane %v5631_v57, 5  ;;  %v5645_v15 = vshll.u32 %v14245_v2, 16 }
 0x3cd   : > { %v10178_v44 = vrot.slane %v5830_v39, 9  ;;  %v11004_v39 = vld [vmem:[#allocation3 + $0x24] sm:$0xff]  ;;  %v5649_v63 = vshrl.u32 %v14245_v2, 16  ;;  %v5916_v26 = vrot.slane %v5914_v42, 4  ;;  %v5619_v49 = vrot.slane %v5618_v5, 4 }
 0x3ce   : > { %v14278_v7 = vpop.f32.mrf.mxu0  ;;  %v8639_v38 = vunpack.c.l.b16 %v8056_v48  ;;  %v8087_v60 = vshll.u32 %v14299_v32, 16  ;;  %v5634_v34 = vsel %vm11405_vm11, %v5629_v25, %v5633_v37  ;;  %v5917_v4 = vrot.slane %v13958_v18, 5  ;;  %v14323_v25 = vld [vmem:[#allocation3 + $0x70] sm:$0xf] }
 0x3cf   : > { %7806 = vmatmul.bf16.gmra.mxu1 %v6121_v51  ;;  %v14297_v45 = vsel %vm11782_vm14, %v10178_v44, %v5914_v42  ;;  %v14302_v51 = vpack.c.b16 %v6164_v35, %v6163_v62  ;;  %v5921_v2 = vrot.slane %v13985_v53, 5  ;;  %v8075_v57 = vrot.slane %v8074_v55, 4  ;;  %v7956_v44 = vld [vmem:[#allocation3 + $0x4c] sm:$0xf] }
 0x3d0   : > { %v14287_v1 = vpop.f32.mrf.mxu2  ;;  %v6153_v35 = vunpack.c.l.b16 %v14297_v45  ;;  %v8669_v42 = vpack.c.b16 %v8640_v30, %v8639_v38  ;;  %v8085_v14 = vrot.slane %v8084_v61, 4  ;;  %v14321_v62 = vrot.slane %v5645_v15, 5 }
 0x3d1   : > { %v7497_v43 = vpop.f32.mrf.mxu3  ;;  %v5651_v18 = vrot.slane %v5649_v63, 4  ;;  %v6098_v48 = vunpack.c.l.b16 %v5634_v34  ;;  %v5918_v45 = vsel %vm11782_vm14, %v5916_v26, %v5917_v4  ;;  %v8080_v30 = vsel %vm11405_vm11, %v8075_v57, %v14280_v46  ;;  %v5836_v46 = vld [vmem:[#allocation3 + $0x6c] sm:$0xe] }
 0x3d2   : > { %v14285_v13 = vadd.f32 %v7497_v43, %v7409_v9  ;;  %v7412_v9 = vadd.f32 %v7411_v33, %v13906_v0  ;;  %v5411_v43 = vld [vmem:[#allocation3 + $0x60] sm:$0xf]  ;;  %v5624_v0 = vsel %vm11405_vm11, %v5619_v49, %v14264_v20  ;;  %v10179_v55 = vrot.slane %v5831_v47, 9 }
 0x3d3   : > { %v5636_v59 = vshrl.u32 %v5411_v43, 16  ;;  %v5923_v61 = vrot.slane %v5921_v2, 4  ;;  %v5924_v37 = vrot.slane %v14030_v41, 5  ;;  %v6097_v15 = vunpack.c.l.b16 %v5624_v0 }
 0x3d4   : > { %v14304_v56 = vpop.f32.mrf.mxu1  ;;  %v8101_v49 = vshll.u32 %v7956_v44, 16  ;;  %v5956_v38 = vrot.slane %v14323_v25, 5  ;;  %v5652_v34 = vor.u32 %v5651_v18, %v14321_v62  ;;  %v8105_v4 = vshrl.u32 %v7956_v44, 16 }
 0x3d5   : > { %7875 = vmatmul.bf16.gmra.mxu2 %v13976_v27  ;;  %v5639_v27 = vshll.u32 %v5411_v43, 16  ;;  %v5638_v26 = vrot.slane %v5636_v59, 4  ;;  %v6122_v41 = vpack.c.b16 %v6098_v48, %v6097_v15  ;;  %v6154_v0 = vunpack.c.l.b16 %v5918_v45 }
 0x3d6   : > { %8969 = vmatmul.bf16.gmra.mxu3 %v11004_v39  ;;  %v14319_v33 = vpop.f32.mrf.mxu0  ;;  %v8089_v39 = vrot.slane %v8087_v60, 5  ;;  %v5922_v57 = vsel %vm11782_vm14, %v10179_v55, %v5921_v2  ;;  %v5925_v59 = vsel %vm11782_vm14, %v5923_v61, %v5924_v37  ;;  %v5655_v44 = vshll.u32 %v14257_v24, 16 }
 0x3d7   : > { %15458 = vst [vmem:[#allocation36_spill] sm:$0xff] %v14319_v33  ;;  %9063 = vmatmul.bf16.gmra.mxu0 %v8669_v42  ;;  %v5641_v60 = vrot.slane %v5639_v27, 5  ;;  %v7414_v42 = vadd.f32 %v14287_v1, %v13937_v6  ;;  %v10184_v6 = vrot.slane %v5836_v46, 9  ;;  %v5958_v1 = vrot.slane %v5956_v38, 4  ;;  %v7983_v33 = vld [vmem:[#allocation3 + $0x50] sm:$0x1] }
 0x3d8   : > { %v7416_v20 = vpop.f32.mrf.mxu2  ;;  %v8090_v63 = vsel %vm11405_vm11, %v8085_v14, %v8089_v39  ;;  %v8641_v14 = vunpack.c.l.b16 %v8080_v30  ;;  %v5653_v15 = vrot.slane %v5652_v34, 4  ;;  %v14350_v2 = vrot.slane %v8101_v49, 5 }
 0x3d9   : > { %v7500_v5 = vpop.f32.mrf.mxu3  ;;  %v8642_v47 = vunpack.c.l.b16 %v8090_v63  ;;  %v5642_v45 = vor.u32 %v5641_v60, %v5638_v26  ;;  %v8107_v30 = vrot.slane %v8105_v4, 4  ;;  %v5957_v61 = vsel %vm11782_vm14, %v10184_v6, %v5956_v38  ;;  %v11005_v26 = vld [vmem:[#allocation3 + $0x30] sm:$0xff]  ;;  %v14365_v6 = vld [vmem:[#allocation3 + $0x3c] sm:$0xe] }
 0x3da   : > { %v14325_v53 = vadd.f32 %v7500_v5, %v7412_v9  ;;  %v7955_v9 = vld [vmem:[#allocation3 + $0x48] sm:$0xf]  ;;  %v14343_v5 = vld [vmem:[#allocation3 + $0x74] sm:$0x1]  ;;  %v8466_v24 = vrot.slane %v14259_v17, 5  ;;  %v5657_v60 = vrot.slane %v5655_v44, 5  ;;  %v6165_v17 = vunpack.c.l.b16 %v5957_v61 }
 0x3db   : > { %v8092_v27 = vshrl.u32 %v7955_v9, 16  ;;  %v8095_v39 = vshll.u32 %v7955_v9, 16  ;;  %v5959_v37 = vrot.slane %v14343_v5, 5  ;;  %v6182_v9 = vpack.c.b16 %v6154_v0, %v6153_v35 }
 0x3dc   : > { %v14336_v43 = vpop.f32.mrf.mxu1  ;;  %v8670_v46 = vpack.c.b16 %v8642_v47, %v8641_v14  ;;  %v8108_v38 = vor.u32 %v8107_v30, %v14350_v2  ;;  %v7417_v0 = vadd.f32 %v7416_v20, %v13970_v22  ;;  %v5413_v14 = vld [vmem:[#allocation3 + $0x6c] sm:$0xf]  ;;  %v8382_v47 = vld [vmem:[#allocation3 + $0x3c] sm:$0xe]  ;;  %v5669_v44 = vshll.u32 %v14323_v25, 16 }
 0x3dd   : > { %v8094_v49 = vrot.slane %v8092_v27, 4  ;;  %v8097_v34 = vrot.slane %v8095_v39, 5  ;;  %v5960_v4 = vsel %vm11782_vm14, %v5958_v1, %v5959_v37  ;;  %v8469_v27 = vrot.slane %v14299_v32, 5 }
 0x3de   : > { %v14347_v18 = vpop.f32.mrf.mxu0  ;;  %v6166_v35 = vunpack.c.l.b16 %v5960_v4  ;;  %v5673_v39 = vshrl.u32 %v14323_v25, 16  ;;  %v8109_v4 = vrot.slane %v8108_v38, 4 }
 0x3df   : > { %7811 = vmatmul.bf16.gmra.mxu1 %v6122_v41  ;;  %15459 = vst [vmem:[#allocation37_spill] sm:$0xff] %v14347_v18  ;;  %v6155_v41 = vunpack.c.l.b16 %v5922_v57  ;;  %v6156_v18 = vunpack.c.l.b16 %v5925_v59  ;;  %v5658_v57 = vsel %vm11405_vm11, %v5653_v15, %v5657_v60  ;;  %v8468_v59 = vrot.slane %v8466_v24, 4 }
 0x3e0   : > { %v14354_v63 = vpop.f32.mrf.mxu2  ;;  %v8111_v15 = vshll.u32 %v7983_v33, 16  ;;  %v6100_v37 = vunpack.c.l.b16 %v5658_v57  ;;  %v8098_v25 = vor.u32 %v8097_v34, %v8094_v49  ;;  %v15334_v33 = vrot.slane %v14069_v10, 5 }
 0x3e1   : > { %v7502_v48 = vpop.f32.mrf.mxu3  ;;  %v14373_v1 = vpack.c.b16 %v6156_v18, %v6155_v41  ;;  %v8470_v32 = vsel %vm11782_vm14, %v8468_v59, %v8469_v27  ;;  %v14385_v18 = vld [vmem:[#allocation3 + $0x7c] sm:$0xf]  ;;  %v10578_v41 = vrot.slane %v8382_v47, 9  ;;  %v7689_v49 = vadd.f32 %v13676_v23, %v13732_v40 }
 0x3e2   : > { %v14352_v55 = vadd.f32 %v7502_v48, %v7414_v42  ;;  %v5643_v48 = vrot.slane %v5642_v45, 4  ;;  %v14375_v45 = vpack.c.b16 %v6166_v35, %v6165_v17  ;;  %v14392_v17 = vrot.slane %v5669_v44, 5 }
 0x3e3   : > { %v5675_v35 = vrot.slane %v5673_v39, 4  ;;  %v8467_v57 = vsel %vm11782_vm14, %v10578_v41, %v8466_v24  ;;  %v8113_v34 = vrot.slane %v8111_v15, 5  ;;  %v5963_v47 = vrot.slane %v14385_v18, 5  ;;  %v7957_v41 = vld [vmem:[#allocation3 + $0x54] sm:$0xf] }
 0x3e4   : > { %v14362_v42 = vpop.f32.mrf.mxu1  ;;  %v5648_v22 = vsel %vm11405_vm11, %v5643_v48, %v14321_v62  ;;  %v5663_v62 = vshll.u32 %v5413_v14, 16  ;;  %v8099_v27 = vrot.slane %v8098_v25, 4  ;;  %v8706_v44 = vunpack.c.l.b16 %v8470_v32 }
 0x3e5   : > { %7880 = vmatmul.bf16.gmra.mxu2 %v6182_v9  ;;  %v5660_v9 = vshrl.u32 %v5413_v14, 16  ;;  %v6099_v48 = vunpack.c.l.b16 %v5648_v22  ;;  %v5837_v22 = vld [vmem:[#allocation3 + $0x78] sm:$0xe]  ;;  %v7419_v24 = vadd.f32 %v14354_v63, %v14013_v58  ;;  %v8705_v23 = vunpack.c.l.b16 %v8467_v57 }
 0x3e6   : > { %8974 = vmatmul.bf16.gmra.mxu3 %v11005_v26  ;;  %v14380_v20 = vpop.f32.mrf.mxu0  ;;  %v5665_v39 = vrot.slane %v5663_v62, 5  ;;  %v5676_v40 = vor.u32 %v5675_v35, %v14392_v17  ;;  %v8104_v15 = vsel %vm11405_vm11, %v8099_v27, %v14350_v2  ;;  %v10185_v58 = vrot.slane %v5837_v22, 9 }
 0x3e7   : > { %9068 = vmatmul.bf16.gmra.mxu0 %v8670_v46  ;;  %v7958_v46 = vld [vmem:[#allocation3 + $0x58] sm:$0xf]  ;;  %v6123_v38 = vpack.c.b16 %v6100_v37, %v6099_v48  ;;  %v5662_v59 = vrot.slane %v5660_v9, 4  ;;  %v8114_v37 = vsel %vm11405_vm11, %v8109_v4, %v8113_v34  ;;  %v14410_v9 = vld [vmem:[#allocation3 + $0x80] sm:$0x1]  ;;  %v5965_v63 = vrot.slane %v5963_v47, 4 }
 0x3e8   : > { %v14389_v60 = vpop.f32.mrf.mxu2  ;;  %v8125_v32 = vshll.u32 %v7958_v46, 16  ;;  %v8129_v48 = vshrl.u32 %v7958_v46, 16  ;;  %v14414_v62 = vpack.c.b16 %v8706_v44, %v8705_v23  ;;  %v5679_v35 = vshll.u32 %v14343_v5, 16  ;;  %v14419_v4 = vld [vmem:[#allocation3 + $0x64] sm:$0xf]  ;;  %v11037_v46 = vld [vmem:[%s15321_s4 + $0x210] sm:$0xff] }
 0x3e9   : > { %v7505_v61 = vpop.f32.mrf.mxu3  ;;  %v5930_v2 = vrot.slane %v15334_v33, 4  ;;  %v5666_v27 = vor.u32 %v5665_v39, %v5662_v59  ;;  %v5964_v22 = vsel %vm11782_vm14, %v10185_v58, %v5963_v47  ;;  %v5966_v5 = vrot.slane %v14410_v9, 5  ;;  %9139 = vmatpush.bf16.msra.mxu1 %v11037_v46  ;;  %v7959_v58 = vld [vmem:[#allocation3 + $0x60] sm:$0xf] }
 0x3ea   : > { %v14387_v26 = vadd.f32 %v7505_v61, %v7417_v0  ;;  %15461 = vst [vmem:[#allocation39_spill] sm:$0xff] %v14414_v62  ;;  %v5677_v44 = vrot.slane %v5676_v40, 4  ;;  %v8643_v23 = vunpack.c.l.b16 %v8104_v15  ;;  %v8644_v0 = vunpack.c.l.b16 %v8114_v37 }
 0x3eb   : > { %v8131_v59 = vrot.slane %v8129_v48, 4  ;;  %v8149_v39 = vshll.u32 %v14419_v4, 16  ;;  %v5967_v30 = vsel %vm11782_vm14, %v5965_v63, %v5966_v5  ;;  %v5681_v47 = vrot.slane %v5679_v35, 5  ;;  %v7984_v5 = vld [vmem:[#allocation3 + $0x5c] sm:$0x1] }
 0x3ec   : > { %v7777_v14 = vpop.f32.mrf.mxu1  ;;  %v8153_v40 = vshrl.u32 %v14419_v4, 16  ;;  %v6167_v15 = vunpack.c.l.b16 %v5964_v22  ;;  %v6168_v37 = vunpack.c.l.b16 %v5967_v30  ;;  %v5693_v63 = vshll.u32 %v14385_v18, 16 }
 0x3ed   : > { %v14400_v61 = vadd.f32 %v7777_v14, %v7689_v49  ;;  %v8116_v49 = vshrl.u32 %v7957_v41, 16  ;;  %v8119_v14 = vshll.u32 %v7957_v41, 16  ;;  %v14431_v41 = vrot.slane %v8125_v32, 5 }
 0x3ee   : > { %v14412_v25 = vpop.f32.mrf.mxu0  ;;  %v5682_v46 = vsel %vm11405_vm11, %v5677_v44, %v5681_v47  ;;  %v5697_v35 = vshrl.u32 %v14385_v18, 16  ;;  %v14448_v22 = vpack.c.b16 %v6168_v37, %v6167_v15  ;;  %v14456_v44 = vrot.slane %v8149_v39, 5 }
 0x3ef   : > { %7816 = vmatmul.bf16.gmra.mxu1 %v6123_v38  ;;  %15460 = vst [vmem:[#allocation38_spill] sm:$0xff] %v14412_v25  ;;  %v8118_v48 = vrot.slane %v8116_v49, 4  ;;  %v8155_v18 = vrot.slane %v8153_v40, 4  ;;  %v6102_v15 = vunpack.c.l.b16 %v5682_v46 }
 0x3f0   : > { %v14423_v38 = vpop.f32.mrf.mxu2  ;;  %v5699_v39 = vrot.slane %v5697_v35, 4 }
 0x3f1   : > { %v7507_v57 = vpop.f32.mrf.mxu3 }
 0x3f2   : > { %v14421_v34 = vadd.f32 %v7507_v57, %v7419_v24  ;;  %v7691_v24 = vadd.f32 %v13703_v36, %v13768_v3  ;;  %v11006_v57 = vld [vmem:[#allocation3 + $0x3c] sm:$0xff]  ;;  %v7422_v36 = vadd.f32 %v14389_v60, %v14071_v8  ;;  %v5667_v3 = vrot.slane %v5666_v27, 4 }
 0x3f3   : > { %v8132_v8 = vor.u32 %v8131_v59, %v14431_v41  ;;  %v8140_v60 = vshrl.u32 %v7959_v58, 16  ;;  %v8143_v27 = vshll.u32 %v7959_v58, 16  ;;  %v8135_v59 = vshll.u32 %v7984_v5, 16  ;;  %v15465_v58 = vld [vmem:[#allocation7_spill] sm:$0xff] }
 0x3f4   : > { %v7779_v33 = vpop.f32.mrf.mxu1  ;;  %v7694_v40 = vadd.f32 %v15465_v58, %v13793_v11  ;;  %v7424_v11 = vadd.f32 %v14423_v38, %v14120_v31 }
 0x3f5   : > { %v14439_v32 = vadd.f32 %v7779_v33, %v7691_v24  ;;  %7885 = vmatmul.bf16.gmra.mxu2 %v14373_v1  ;;  %v8671_v33 = vpack.c.b16 %v8644_v0, %v8643_v23  ;;  %v5415_v24 = vld [vmem:[#allocation3 + $0x78] sm:$0xf]  ;;  %v5672_v1 = vsel %vm11405_vm11, %v5667_v3, %v14392_v17  ;;  %v15463_v0 = vrot.slane %v14069_v10, 5 }
 0x3f6   : > { %8979 = vmatmul.bf16.gmra.mxu3 %v11006_v57  ;;  %v14450_v30 = vpop.f32.mrf.mxu0  ;;  %v8121_v57 = vrot.slane %v8119_v14, 5  ;;  %v15464_v14 = vrot.slane %v14365_v6, 9  ;;  %v5687_v25 = vshll.u32 %v5415_v24, 16  ;;  %v14466_v17 = vrot.slane %v5693_v63, 5  ;;  %v14474_v6 = vld [vmem:[#allocation3 + $0x68] sm:$0x1] }
 0x3f7   : > { %15462 = vst [vmem:[#allocation40_spill] sm:$0xff] %v14450_v30  ;;  %9073 = vmatmul.bf16.gmra.mxu0 %v8671_v33  ;;  %v5684_v30 = vshrl.u32 %v5415_v24, 16  ;;  %v15466_v3 = vrot.slane %v14130_v28, 5  ;;  %v8142_v5 = vrot.slane %v8140_v60, 4  ;;  %v8156_v63 = vor.u32 %v8155_v18, %v14456_v44 }
 0x3f8   : > { %v7426_v37 = vpop.f32.mrf.mxu2  ;;  %v5929_v23 = vsel %vm11782_vm14, %v15464_v14, %v15463_v0  ;;  %v8122_v46 = vor.u32 %v8121_v57, %v8118_v48  ;;  %v8145_v0 = vrot.slane %v8143_v27, 5  ;;  %v5689_v14 = vrot.slane %v5687_v25, 5 }
 0x3f9   : > { %v7510_v49 = vpop.f32.mrf.mxu3  ;;  %v5932_v10 = vsel %vm11782_vm14, %v5930_v2, %v15466_v3  ;;  %v5686_v28 = vrot.slane %v5684_v30, 4  ;;  %v5700_v2 = vor.u32 %v5699_v39, %v14466_v17  ;;  %v8159_v48 = vshll.u32 %v14474_v6, 16  ;;  %v7961_v3 = vld [vmem:[#allocation3 + $0x6c] sm:$0xf] }
 0x3fa   : > { %v14458_v47 = vadd.f32 %v7510_v49, %v7422_v36  ;;  %v6101_v36 = vunpack.c.l.b16 %v5672_v1  ;;  %v8133_v49 = vrot.slane %v8132_v8, 4  ;;  %v8137_v1 = vrot.slane %v8135_v59, 5 }
 0x3fb   : > { %v6158_v8 = vunpack.c.l.b16 %v5932_v10  ;;  %v8123_v60 = vrot.slane %v8122_v46, 4  ;;  %v5703_v18 = vshll.u32 %v14410_v9, 16  ;;  %v8146_v31 = vor.u32 %v8145_v0, %v8142_v5  ;;  %v15469_v10 = vld [vmem:[#allocation8_spill] sm:$0xff]  ;;  %v15470_v46 = vld [vmem:[#allocation6_spill] sm:$0xff] }
 0x3fc   : > { %v7782_v33 = vpop.f32.mrf.mxu1  ;;  %v6124_v35 = vpack.c.b16 %v6102_v15, %v6101_v36  ;;  %v8138_v58 = vsel %vm11405_vm11, %v8133_v49, %v8137_v1  ;;  %v8157_v38 = vrot.slane %v8156_v63, 4  ;;  %v6157_v30 = vunpack.c.l.b16 %v5929_v23  ;;  %v14495_v5 = vld [vmem:[#allocation3 + $0x88] sm:$0xf] }
 0x3fd   : > { %v14477_v24 = vadd.f32 %v7782_v33, %v7694_v40  ;;  %v8128_v59 = vsel %vm11405_vm11, %v8123_v60, %v14431_v41  ;;  %v5690_v39 = vor.u32 %v5689_v14, %v5686_v28  ;;  %v5701_v40 = vrot.slane %v5700_v2, 4  ;;  %v11007_v33 = vld [vmem:[#allocation3 + $0x48] sm:$0xff]  ;;  %v14499_v41 = vld [vmem:[#allocation3 + $0x70] sm:$0xf]  ;;  %v5417_v2 = vld [vmem:[#allocation3 + $0x84] sm:$0xf] }
 0x3fe   : > { %v14483_v57 = vpop.f32.mrf.mxu0  ;;  %v8161_v36 = vrot.slane %v8159_v48, 5  ;;  %v7696_v9 = vadd.f32 %v15470_v46, %v15469_v10  ;;  %v8646_v49 = vunpack.c.l.b16 %v8138_v58  ;;  %v5705_v63 = vrot.slane %v5703_v18, 5 }
 0x3ff   : > { %7821 = vmatmul.bf16.gmra.mxu1 %v6124_v35  ;;  %15467 = vst [vmem:[#allocation7_spill] sm:$0xff] %v14483_v57  ;;  %v6184_v35 = vpack.c.b16 %v6158_v8, %v6157_v30  ;;  %v8147_v23 = vrot.slane %v8146_v31, 4  ;;  %v7427_v14 = vadd.f32 %v7426_v37, %v14145_v50  ;;  %v8164_v48 = vshrl.u32 %v7961_v3, 16 }
 0x400   : > { %v7428_v25 = vpop.f32.mrf.mxu2  ;;  %v8162_v1 = vsel %vm11405_vm11, %v8157_v38, %v8161_v36  ;;  %v8167_v8 = vshll.u32 %v7961_v3, 16  ;;  %v5691_v60 = vrot.slane %v5690_v39, 4  ;;  %v5717_v18 = vshll.u32 %v14495_v5, 16 }
 0x401   : > { %v7512_v27 = vpop.f32.mrf.mxu3  ;;  %v5721_v58 = vshrl.u32 %v14495_v5, 16  ;;  %v8173_v30 = vshll.u32 %v14499_v41, 16  ;;  %v5708_v39 = vshrl.u32 %v5417_v2, 16  ;;  %v8487_v36 = vrot.slane %v14419_v4, 5 }
 0x402   : > { %v14488_v15 = vadd.f32 %v7512_v27, %v7424_v11  ;;  %v8645_v11 = vunpack.c.l.b16 %v8128_v59  ;;  %v5706_v27 = vsel %vm11405_vm11, %v5701_v40, %v5705_v63  ;;  %v8177_v59 = vshrl.u32 %v14499_v41, 16 }
 0x403   : > { %v5696_v37 = vsel %vm11405_vm11, %v5691_v60, %v14466_v17  ;;  %v8152_v40 = vsel %vm11405_vm11, %v8147_v23, %v14456_v44  ;;  %v6104_v10 = vunpack.c.l.b16 %v5706_v27  ;;  %v8166_v17 = vrot.slane %v8164_v48, 4  ;;  %v15474_v60 = vld [vmem:[#allocation22_spill] sm:$0xff] }
 0x404   : > { %15468 = vst [vmem:[#allocation41_spill] sm:$0xff] %v14488_v15  ;;  %v7784_v0 = vpop.f32.mrf.mxu1  ;;  %v8672_v38 = vpack.c.b16 %v8646_v49, %v8645_v11  ;;  %v14523_v49 = vrot.slane %v5717_v18, 5  ;;  %v8169_v63 = vrot.slane %v8167_v8, 5  ;;  %v15473_v11 = vld [vmem:[#allocation12_spill] sm:$0xff]  ;;  %v6103_v44 = vunpack.c.l.b16 %v5696_v37  ;;  %v14533_v48 = vld [vmem:[#allocation3 + $0x8c] sm:$0x1] }
 0x405   : > { %v14501_v28 = vadd.f32 %v7784_v0, %v7696_v9  ;;  %7890 = vmatmul.bf16.gmra.mxu2 %v6184_v35  ;;  %v5711_v9 = vshll.u32 %v5417_v2, 16  ;;  %v8385_v35 = vld [vmem:[#allocation3 + $0x60] sm:$0xe]  ;;  %v5723_v0 = vrot.slane %v5721_v58, 4  ;;  %v14527_v23 = vrot.slane %v8173_v30, 5 }
 0x406   : > { %8984 = vmatmul.bf16.gmra.mxu3 %v11007_v33  ;;  %v14508_v31 = vpop.f32.mrf.mxu0  ;;  %v14521_v33 = vunpack.c.l.b16 %v8162_v1  ;;  %v8179_v4 = vrot.slane %v8177_v59, 4  ;;  %v5710_v27 = vrot.slane %v5708_v39, 4  ;;  %v8490_v1 = vrot.slane %v14474_v6, 5  ;;  %v7986_v6 = vld [vmem:[#allocation3 + $0x74] sm:$0x1] }
 0x407   : > { %15471 = vst [vmem:[#allocation8_spill] sm:$0xff] %v14508_v31  ;;  %9078 = vmatmul.bf16.gmra.mxu0 %v8672_v38  ;;  %v7699_v31 = vadd.f32 %v15474_v60, %v15473_v11  ;;  %v10581_v38 = vrot.slane %v8385_v35, 9  ;;  %v7429_v18 = vadd.f32 %v7428_v25, %v14182_v16  ;;  %v6125_v58 = vpack.c.b16 %v6104_v10, %v6103_v44  ;;  %v14551_v60 = vld [vmem:[#allocation3 + $0x7c] sm:$0xf] }
 0x408   : > { %v7431_v46 = vpop.f32.mrf.mxu2  ;;  %v5713_v8 = vrot.slane %v5711_v9, 5  ;;  %v5724_v11 = vor.u32 %v5723_v0, %v14523_v49  ;;  %v8170_v37 = vor.u32 %v8169_v63, %v8166_v17  ;;  %v5727_v16 = vshll.u32 %v14533_v48, 16  ;;  %v7963_v9 = vld [vmem:[#allocation3 + $0x78] sm:$0xf]  ;;  %v11036_v63 = vld [vmem:[%s15321_s4 + $0x208] sm:$0xff] }
 0x409   : > { %v7515_v50 = vpop.f32.mrf.mxu3  ;;  %v8488_v30 = vsel %vm11782_vm14, %v10581_v38, %v8487_v36  ;;  %v8647_v25 = vunpack.c.l.b16 %v8152_v40  ;;  %v8180_v10 = vor.u32 %v8179_v4, %v14527_v23  ;;  %v8183_v4 = vshll.u32 %v7986_v6, 16  ;;  %9140 = vmatpush.bf16.msra.mxu1 %v11036_v63 }
 0x40a   : > { %v14519_v3 = vadd.f32 %v7515_v50, %v7427_v14  ;;  %v8489_v50 = vrot.slane %v8487_v36, 4  ;;  %v5714_v36 = vor.u32 %v5713_v8, %v5710_v27  ;;  %v8711_v44 = vunpack.c.l.b16 %v8488_v30 }
 0x40b   : > { %v5725_v38 = vrot.slane %v5724_v11, 4  ;;  %v14554_v40 = vrot.slane %v8170_v37, 4  ;;  %v8188_v27 = vshrl.u32 %v7963_v9, 16  ;;  %v8191_v8 = vshll.u32 %v7963_v9, 16 }
 0x40c   : > { %15472 = vst [vmem:[#allocation6_spill] sm:$0xff] %v14519_v3  ;;  %v7787_v14 = vpop.f32.mrf.mxu1  ;;  %v8491_v59 = vsel %vm11782_vm14, %v8489_v50, %v8490_v1  ;;  %v8673_v50 = vpack.c.b16 %v14521_v33, %v8647_v25  ;;  %v15477_v1 = vld [vmem:[#allocation10_spill] sm:$0xff]  ;;  %v5729_v30 = vrot.slane %v5727_v16, 5  ;;  %v8197_v11 = vshll.u32 %v14551_v60, 16 }
 0x40d   : > { %v14530_v2 = vadd.f32 %v7787_v14, %v7699_v31  ;;  %v8712_v31 = vunpack.c.l.b16 %v8491_v59  ;;  %v11008_v14 = vld [vmem:[#allocation3 + $0x54] sm:$0xff]  ;;  %v8201_v33 = vshrl.u32 %v14551_v60, 16  ;;  %v7432_v25 = vadd.f32 %v7431_v46, %v14211_v12 }
 0x40e   : > { %v14540_v39 = vpop.f32.mrf.mxu0  ;;  %v14558_v59 = vld [vmem:[#allocation3 + $0x94] sm:$0xf]  ;;  %v8494_v63 = vrot.slane %v14499_v41, 5  ;;  %v8497_v12 = vrot.slane %v7986_v6, 5  ;;  %v14586_v3 = vrot.slane %v8197_v11, 5 }
 0x40f   : > { %7826 = vmatmul.bf16.gmra.mxu1 %v6125_v58  ;;  %15475 = vst [vmem:[#allocation12_spill] sm:$0xff] %v14540_v39  ;;  %v8386_v39 = vld [vmem:[#allocation3 + $0x6c] sm:$0xe]  ;;  %v5741_v16 = vshll.u32 %v14558_v59, 16 }
 0x410   : > { %v14546_v17 = vpop.f32.mrf.mxu2  ;;  %v10582_v9 = vrot.slane %v8386_v39, 9 }
 0x411   : > { %v7517_v35 = vpop.f32.mrf.mxu3  ;;  %v14584_v6 = vrot.slane %v5741_v16, 5  ;;  %v14592_v16 = vld [vmem:[#allocation3 + $0x88] sm:$0xf]  ;;  %v7434_v11 = vadd.f32 %v14546_v17, %v14238_v52 }
 0x412   : > { %v14544_v0 = vadd.f32 %v7517_v35, %v7429_v18  ;;  %v15478_v18 = vld [vmem:[#allocation9_spill] sm:$0xff]  ;;  %v14560_v35 = vpack.c.b16 %v8712_v31, %v8711_v44  ;;  %v5730_v31 = vsel %vm11405_vm11, %v5725_v38, %v5729_v30  ;;  %v8221_v52 = vshll.u32 %v14592_v16, 16 }
 0x413   : > { %v7701_v58 = vadd.f32 %v15478_v18, %v15477_v1  ;;  %v5715_v1 = vrot.slane %v5714_v36, 4  ;;  %v5419_v18 = vld [vmem:[#allocation3 + $0x90] sm:$0xf] }
 0x414   : > { %15476 = vst [vmem:[#allocation22_spill] sm:$0xff] %v14544_v0  ;;  %v7789_v57 = vpop.f32.mrf.mxu1  ;;  %v8181_v0 = vrot.slane %v8180_v10, 4  ;;  %v5745_v10 = vshrl.u32 %v14558_v59, 16  ;;  %v5732_v36 = vshrl.u32 %v5419_v18, 16  ;;  %v5735_v38 = vshll.u32 %v5419_v18, 16  ;;  %v15483_v18 = vld [vmem:[#allocation23_spill] sm:$0xff] }
 0x415   : > { %15479 = vst [vmem:[#allocation10_spill] sm:$0xff] %v14560_v35  ;;  %v14564_v37 = vadd.f32 %v7789_v57, %v7701_v58  ;;  %7895 = vmatmul.bf16.gmra.mxu2 %v14209_v29  ;;  %v8190_v57 = vrot.slane %v8188_v27, 4  ;;  %v8496_v58 = vrot.slane %v8494_v63, 4  ;;  %v5720_v41 = vsel %vm11405_vm11, %v5715_v1, %v14523_v49  ;;  %v15482_v1 = vld [vmem:[#allocation15_spill] sm:$0xff] }
 0x416   : > { %8989 = vmatmul.bf16.gmra.mxu3 %v11008_v14  ;;  %v14573_v44 = vpop.f32.mrf.mxu0  ;;  %v8193_v14 = vrot.slane %v8191_v8, 5  ;;  %v8495_v29 = vsel %vm11782_vm14, %v10582_v9, %v8494_v63  ;;  %v6106_v35 = vunpack.c.l.b16 %v5730_v31  ;;  %v5747_v8 = vrot.slane %v5745_v10, 4  ;;  %v7965_v63 = vld [vmem:[#allocation3 + $0x84] sm:$0xf] }
 0x417   : > { %15480 = vst [vmem:[#allocation9_spill] sm:$0xff] %v14573_v44  ;;  %9083 = vmatmul.bf16.gmra.mxu0 %v8673_v50  ;;  %v8185_v44 = vrot.slane %v8183_v4, 5  ;;  %v8498_v27 = vsel %vm11782_vm14, %v8496_v58, %v8497_v12  ;;  %v8203_v49 = vrot.slane %v8201_v33, 4  ;;  %v7704_v15 = vadd.f32 %v15483_v18, %v15482_v1  ;;  %v14598_v12 = vld [vmem:[#allocation3 + $0x98] sm:$0x1]  ;;  %v11009_v18 = vld [vmem:[#allocation3 + $0x60] sm:$0xff] }
 0x418   : > { %v7436_v39 = vpop.f32.mrf.mxu2  ;;  %v6105_v62 = vunpack.c.l.b16 %v5720_v41  ;;  %v8714_v9 = vunpack.c.l.b16 %v8498_v27  ;;  %v5734_v50 = vrot.slane %v5732_v36, 4  ;;  %v8194_v58 = vor.u32 %v8193_v14, %v8190_v57  ;;  %v7987_v14 = vld [vmem:[#allocation3 + $0x80] sm:$0x1] }
 0x419   : > { %v7520_v46 = vpop.f32.mrf.mxu3  ;;  %v8186_v4 = vsel %vm11405_vm11, %v8181_v0, %v8185_v44  ;;  %v8176_v0 = vsel %vm11405_vm11, %v14554_v40, %v14527_v23  ;;  %v8204_v44 = vor.u32 %v8203_v49, %v14586_v3  ;;  %v8212_v57 = vshrl.u32 %v7965_v63, 16  ;;  %v14617_v49 = vld [vmem:[#allocation3 + $0xa0] sm:$0xf] }
 0x41a   : > { %v14580_v30 = vadd.f32 %v7520_v46, %v7432_v25  ;;  %v8713_v25 = vunpack.c.l.b16 %v8495_v29  ;;  %v5737_v46 = vrot.slane %v5735_v38, 5  ;;  %v6126_v33 = vpack.c.b16 %v6106_v35, %v6105_v62 }
 0x41b   : > { %v5748_v29 = vor.u32 %v5747_v8, %v14584_v6  ;;  %v8215_v36 = vshll.u32 %v7965_v63, 16  ;;  %v5751_v35 = vshll.u32 %v14598_v12, 16  ;;  %v8225_v38 = vshrl.u32 %v14592_v16, 16 }
 0x41c   : > { %15481 = vst [vmem:[#allocation42_spill] sm:$0xff] %v14580_v30  ;;  %v7792_v31 = vpop.f32.mrf.mxu1  ;;  %v14600_v41 = vpack.c.b16 %v8714_v9, %v8713_v25  ;;  %v5738_v23 = vor.u32 %v5737_v46, %v5734_v50  ;;  %v8649_v40 = vunpack.c.l.b16 %v8176_v0  ;;  %v14619_v1 = vrot.slane %v8194_v58, 4  ;;  %v8387_v46 = vld [vmem:[#allocation3 + $0x78] sm:$0xe] }
 0x41d   : > { %v14594_v10 = vadd.f32 %v7792_v31, %v7704_v15  ;;  %v8650_v15 = vunpack.c.l.b16 %v8186_v4  ;;  %v5749_v63 = vrot.slane %v5748_v29, 4  ;;  %v14621_v25 = vrot.slane %v8204_v44, 4  ;;  %v15487_v4 = vld [vmem:[#allocation16_spill] sm:$0xff] }
 0x41e   : > { %15484 = vst [vmem:[#allocation15_spill] sm:$0xff] %v14600_v41  ;;  %v14609_v17 = vpop.f32.mrf.mxu0  ;;  %v8207_v9 = vshll.u32 %v7987_v14, 16  ;;  %v14623_v31 = vrot.slane %v8212_v57, 4  ;;  %v14629_v50 = vrot.slane %v8221_v52, 5  ;;  %v5753_v58 = vrot.slane %v5751_v35, 5  ;;  %v15489_v52 = vld [vmem:[#allocation33_spill] sm:$0xff] }
 0x41f   : > { %7831 = vmatmul.bf16.gmra.mxu1 %v6126_v33  ;;  %15485 = vst [vmem:[#allocation23_spill] sm:$0xff] %v14609_v17  ;;  %v15488_v33 = vld [vmem:[#allocation11_spill] sm:$0xff]  ;;  %v14627_v17 = vrot.slane %v8215_v36, 5  ;;  %v5769_v29 = vshrl.u32 %v14617_v49, 16  ;;  %v8227_v44 = vrot.slane %v8225_v38, 4  ;;  %v7437_v57 = vadd.f32 %v7436_v39, %v14269_v21 }
 0x420   : > { %v14615_v8 = vpop.f32.mrf.mxu2  ;;  %v7706_v41 = vadd.f32 %v15488_v33, %v15487_v4  ;;  %v5739_v4 = vrot.slane %v5738_v23, 4  ;;  %v5754_v36 = vsel %vm11405_vm11, %v5749_v63, %v5753_v58  ;;  %v10583_v33 = vrot.slane %v8387_v46, 9 }
 0x421   : > { %v7522_v62 = vpop.f32.mrf.mxu3  ;;  %v8209_v38 = vrot.slane %v8207_v9, 5  ;;  %v5771_v23 = vrot.slane %v5769_v29, 4  ;;  %v6108_v46 = vunpack.c.l.b16 %v5754_v36 }
 0x422   : > { %v14613_v27 = vadd.f32 %v7522_v62, %v7434_v11  ;;  %v8674_v11 = vpack.c.b16 %v8650_v15, %v8649_v40  ;;  %v5421_v62 = vld [vmem:[#allocation3 + $0x9c] sm:$0xf]  ;;  %v8501_v15 = vrot.slane %v14551_v60, 5  ;;  %v5744_v60 = vsel %vm11405_vm11, %v5739_v4, %v14584_v6 }
 0x423   : > { %v5756_v40 = vshrl.u32 %v5421_v62, 16  ;;  %v5759_v35 = vshll.u32 %v5421_v62, 16  ;;  %v15492_v4 = vld [vmem:[#allocation24_spill] sm:$0xff] }
 0x424   : > { %15486 = vst [vmem:[#allocation43_spill] sm:$0xff] %v14613_v27  ;;  %v7794_v0 = vpop.f32.mrf.mxu1  ;;  %v5765_v27 = vshll.u32 %v14617_v49, 16  ;;  %v8502_v63 = vsel %vm11782_vm14, %v10583_v33, %v8501_v15  ;;  %v14671_v33 = vld [vmem:[#allocation3 + $0x94] sm:$0xf] }
 0x425   : > { %v14633_v30 = vadd.f32 %v7794_v0, %v7706_v41  ;;  %7900 = vmatmul.bf16.gmra.mxu2 %v15489_v52  ;;  %v8200_v41 = vsel %vm11405_vm11, %v14619_v1, %v14586_v3  ;;  %v8504_v0 = vrot.slane %v7987_v14, 5  ;;  %v8210_v3 = vsel %vm11405_vm11, %v14621_v25, %v8209_v38  ;;  %v14658_v14 = vld [vmem:[#allocation3 + $0x8c] sm:$0x1]  ;;  %v7967_v1 = vld [vmem:[#allocation3 + $0x90] sm:$0xf] }
 0x426   : > { %8994 = vmatmul.bf16.gmra.mxu3 %v11009_v18  ;;  %v8503_v18 = vrot.slane %v8501_v15, 4  ;;  %v14647_v39 = vrot.slane %v5765_v27, 5  ;;  %v14662_v27 = vpop.f32.mrf.mxu0  ;;  %v5758_v9 = vrot.slane %v5756_v40, 4  ;;  %v5761_v29 = vrot.slane %v5759_v35, 5  ;;  %v15493_v15 = vld [vmem:[#allocation14_spill] sm:$0xff] }
 0x427   : > { %9088 = vmatmul.bf16.gmra.mxu0 %v8674_v11  ;;  %15491 = vst [vmem:[#allocation11_spill] sm:$0xff] %v14662_v27  ;;  %v8228_v11 = vor.u32 %v8227_v44, %v14629_v50  ;;  %v7709_v36 = vadd.f32 %v15493_v15, %v15492_v4  ;;  %v6107_v52 = vunpack.c.l.b16 %v5744_v60  ;;  %v14669_v25 = vld [vmem:[#allocation3 + $0xa4] sm:$0x1]  ;;  %v8715_v38 = vunpack.c.l.b16 %v8502_v63 }
 0x428   : > { %v14653_v58 = vpop.f32.mrf.mxu2  ;;  %v8505_v6 = vsel %vm11782_vm14, %v8503_v18, %v8504_v0  ;;  %v5772_v0 = vor.u32 %v5771_v23, %v14647_v39  ;;  %v8231_v40 = vshll.u32 %v14658_v14, 16  ;;  %v8236_v35 = vshrl.u32 %v7967_v1, 16 }
 0x429   : > { %v7525_v21 = vpop.f32.mrf.mxu3  ;;  %v8239_v27 = vshll.u32 %v7967_v1, 16  ;;  %v6127_v44 = vpack.c.b16 %v6108_v46, %v6107_v52  ;;  %v5762_v4 = vor.u32 %v5761_v29, %v5758_v9  ;;  %v5775_v15 = vshll.u32 %v14669_v25, 16  ;;  %v14692_v46 = vld [vmem:[#allocation3 + $0xac] sm:$0xf] }
 0x42a   : > { %v14651_v62 = vadd.f32 %v7525_v21, %v7437_v57  ;;  %v8218_v57 = vor.u32 %v14627_v17, %v14623_v31  ;;  %v8716_v21 = vunpack.c.l.b16 %v8505_v6  ;;  %v7439_v31 = vadd.f32 %v14615_v8, %v14304_v56  ;;  %v11035_v9 = vld [vmem:[%s15321_s4 + $0x200] sm:$0xff] }
 0x42b   : > { %v8245_v63 = vshll.u32 %v14671_v33, 16  ;;  %v8249_v6 = vshrl.u32 %v14671_v33, 16  ;;  %v8652_v23 = vunpack.c.l.b16 %v8210_v3  ;;  %v14697_v29 = vrot.slane %v8231_v40, 5  ;;  %v11010_v52 = vld [vmem:[#allocation3 + $0x6c] sm:$0xff]  ;;  %9141 = vmatpush.bf16.msra.mxu1 %v11035_v9 }
 0x42c   : > { %15490 = vst [vmem:[#allocation16_spill] sm:$0xff] %v14651_v62  ;;  %v7797_v18 = vpop.f32.mrf.mxu1  ;;  %v14679_v60 = vpack.c.b16 %v8716_v21, %v8715_v38  ;;  %v14684_v62 = vrot.slane %v8228_v11, 4  ;;  %v14699_v3 = vrot.slane %v8236_v35, 4  ;;  %v14701_v11 = vrot.slane %v8239_v27, 5  ;;  %v5838_v27 = vld [vmem:[#allocation3 + $0x84] sm:$0xe] }
 0x42d   : > { %v14675_v17 = vadd.f32 %v7797_v18, %v7709_v36  ;;  %v5773_v36 = vrot.slane %v5772_v0, 4  ;;  %v8651_v18 = vunpack.c.l.b16 %v8200_v41  ;;  %v5763_v41 = vrot.slane %v5762_v4, 4  ;;  %v15497_v0 = vld [vmem:[#allocation19_spill] sm:$0xff]  ;;  %v8388_v35 = vld [vmem:[#allocation3 + $0x84] sm:$0xe] }
 0x42e   : > { %15495 = vst [vmem:[#allocation24_spill] sm:$0xff] %v14679_v60  ;;  %v14703_v38 = vrot.slane %v8245_v63, 5  ;;  %v14705_v21 = vrot.slane %v8249_v6, 4  ;;  %v5423_v60 = vld [vmem:[#allocation3 + $0xa8] sm:$0xf]  ;;  %v8234_v40 = vsel %vm11405_vm11, %v14684_v62, %v14697_v29  ;;  %v14713_v4 = vpop.f32.mrf.mxu0  ;;  %v5789_v6 = vshll.u32 %v14692_v46, 16 }
 0x42f   : > { %15494 = vst [vmem:[#allocation33_spill] sm:$0xff] %v14675_v17  ;;  %7836 = vmatmul.bf16.gmra.mxu1 %v6127_v44  ;;  %v14686_v17 = vrot.slane %v8218_v57, 4  ;;  %v5777_v57 = vrot.slane %v5775_v15, 5  ;;  %v5768_v15 = vsel %vm11405_vm11, %v5763_v41, %v14647_v39  ;;  %v7442_v62 = vadd.f32 %v14653_v58, %v14336_v43 }
 0x430   : > { %v14690_v8 = vpop.f32.mrf.mxu2  ;;  %15499 = vst [vmem:[#allocation19_spill] sm:$0xff] %v14713_v4  ;;  %v5970_v9 = vrot.slane %v14495_v5, 5  ;;  %v8508_v29 = vrot.slane %v14592_v16, 5  ;;  %v5780_v39 = vshrl.u32 %v5423_v60, 16  ;;  %v5783_v41 = vshll.u32 %v5423_v60, 16  ;;  %v15501_v60 = vld [vmem:[#allocation20_spill] sm:$0xff] }
 0x431   : > { %v7527_v1 = vpop.f32.mrf.mxu3  ;;  %v5778_v63 = vsel %vm11405_vm11, %v5773_v36, %v5777_v57  ;;  %v10584_v36 = vrot.slane %v8388_v35, 9 }
 0x432   : > { %v14688_v56 = vadd.f32 %v7527_v1, %v7439_v31  ;;  %v15498_v31 = vld [vmem:[#allocation13_spill] sm:$0xff]  ;;  %v8675_v1 = vpack.c.b16 %v8652_v23, %v8651_v18  ;;  %v5793_v23 = vshrl.u32 %v14692_v46, 16  ;;  %v5972_v57 = vrot.slane %v5970_v9, 4 }
 0x433   : > { %v7711_v44 = vadd.f32 %v15498_v31, %v15497_v0  ;;  %v10186_v0 = vrot.slane %v5838_v27, 9  ;;  %v5973_v31 = vrot.slane %v14533_v48, 5  ;;  %v8510_v4 = vrot.slane %v8508_v29, 4  ;;  %v15502_v27 = vld [vmem:[#allocation17_spill] sm:$0xff] }
 0x434   : > { %15496 = vst [vmem:[#allocation14_spill] sm:$0xff] %v14688_v56  ;;  %v7799_v56 = vpop.f32.mrf.mxu1  ;;  %v5795_v43 = vrot.slane %v5793_v23, 4  ;;  %v8509_v48 = vsel %vm11782_vm14, %v10584_v36, %v8508_v29  ;;  %v7714_v35 = vadd.f32 %v15502_v27, %v15501_v60  ;;  %v5782_v23 = vrot.slane %v5780_v39, 4  ;;  %v14755_v36 = vld [vmem:[#allocation3 + $0x98] sm:$0x1] }
 0x435   : > { %v14722_v18 = vadd.f32 %v7799_v56, %v7711_v44  ;;  %7905 = vmatmul.bf16.gmra.mxu2 %v14302_v51  ;;  %v8511_v56 = vrot.slane %v14658_v14, 5  ;;  %v6110_v44 = vunpack.c.l.b16 %v5778_v63  ;;  %v5971_v5 = vsel %vm11782_vm14, %v10186_v0, %v5970_v9  ;;  %v14773_v27 = vld [vmem:[#allocation3 + $0xb8] sm:$0xf] }
 0x436   : > { %8999 = vmatmul.bf16.gmra.mxu3 %v11010_v52  ;;  %v5974_v58 = vsel %vm11782_vm14, %v5972_v57, %v5973_v31  ;;  %v6109_v63 = vunpack.c.l.b16 %v5768_v15  ;;  %v6169_v9 = vunpack.c.l.b16 %v5971_v5  ;;  %v8717_v15 = vunpack.c.l.b16 %v8509_v48 }
 0x437   : > { %15500 = vst [vmem:[#allocation13_spill] sm:$0xff] %v14722_v18  ;;  %v14731_v18 = vrot.slane %v5789_v6, 5  ;;  %9093 = vmatmul.bf16.gmra.mxu0 %v8675_v1  ;;  %v8512_v14 = vsel %vm11782_vm14, %v8510_v4, %v8511_v56  ;;  %v5785_v1 = vrot.slane %v5783_v41, 5  ;;  %v6170_v0 = vunpack.c.l.b16 %v5974_v58 }
 0x438   : > { %v7866_v51 = vpop.f32.mrf.mxu2  ;;  %v8718_v57 = vunpack.c.l.b16 %v8512_v14  ;;  %v8224_v4 = vsel %vm11405_vm11, %v14686_v17, %v14629_v50  ;;  %v7444_v39 = vadd.f32 %v14690_v8, %v14362_v42  ;;  %v6128_v41 = vpack.c.b16 %v6110_v44, %v6109_v63 }
 0x439   : > { %v7530_v52 = vpop.f32.mrf.mxu3  ;;  %v14746_v6 = vadd.f32 %v7866_v51, %v14400_v61  ;;  %v5796_v29 = vor.u32 %v5795_v43, %v14731_v18  ;;  %v14761_v56 = vpack.c.b16 %v6170_v0, %v6169_v9  ;;  %v8654_v43 = vunpack.c.l.b16 %v8234_v40  ;;  %v5839_v40 = vld [vmem:[#allocation3 + $0x90] sm:$0xe]  ;;  %v11011_v0 = vld [vmem:[#allocation3 + $0x78] sm:$0xff] }
 0x43a   : > { %v14735_v16 = vadd.f32 %v7530_v52, %v7442_v62  ;;  %v14748_v62 = vld [vmem:[#allocation3 + $0xb0] sm:$0x1]  ;;  %v9054_v52 = vpop.f32.mrf.mxu0  ;;  %v8242_v51 = vor.u32 %v14701_v11, %v14699_v3  ;;  %v14766_v58 = vpack.c.b16 %v8718_v57, %v8717_v15  ;;  %v5786_v50 = vor.u32 %v5785_v1, %v5782_v23  ;;  %v8389_v23 = vld [vmem:[#allocation3 + $0x90] sm:$0xe]  ;;  %v15504_v1 = vld [vmem:[#allocation25_spill] sm:$0xff] }
 0x43b   : > { %v5799_v5 = vshll.u32 %v14748_v62, 16  ;;  %v8252_v17 = vor.u32 %v14705_v21, %v14703_v38  ;;  %v8255_v48 = vshll.u32 %v14755_v36, 16  ;;  %v5797_v8 = vrot.slane %v5796_v29, 4  ;;  %v15503_v21 = vld [vmem:[#allocation26_spill] sm:$0xff] }
 0x43c   : > { %v7802_v31 = vpop.f32.mrf.mxu1  ;;  %v8653_v44 = vunpack.c.l.b16 %v8224_v4  ;;  %v14778_v63 = vrot.slane %v8242_v51, 4  ;;  %v7716_v9 = vadd.f32 %v15504_v1, %v15503_v21  ;;  %v5787_v57 = vrot.slane %v5786_v50, 4 }
 0x43d   : > { %v14757_v61 = vadd.f32 %v7802_v31, %v7714_v35  ;;  %v5801_v11 = vrot.slane %v5799_v5, 5  ;;  %v5425_v31 = vld [vmem:[#allocation3 + $0xb4] sm:$0xf]  ;;  %v8253_v29 = vrot.slane %v8252_v17, 4  ;;  %v8257_v4 = vrot.slane %v8255_v48, 5 }
 0x43e   : > { %v8676_v35 = vpack.c.b16 %v8654_v43, %v8653_v44  ;;  %v10187_v5 = vrot.slane %v5839_v40, 9  ;;  %v5977_v51 = vrot.slane %v14558_v59, 5  ;;  %v8515_v50 = vrot.slane %v14671_v33, 5 }
 0x43f   : > { %7841 = vmatmul.bf16.gmra.mxu1 %v6128_v41  ;;  %v5817_v41 = vshrl.u32 %v14773_v27, 16  ;;  %v5792_v17 = vsel %vm11405_vm11, %v5787_v57, %v14731_v18  ;;  %v5804_v48 = vshrl.u32 %v5425_v31, 16  ;;  %v8518_v44 = vrot.slane %v14755_v36, 5 }
 0x440   : > { %v7868_v60 = vpop.f32.mrf.mxu2  ;;  %v5979_v40 = vrot.slane %v5977_v51, 4  ;;  %v5807_v1 = vshll.u32 %v5425_v31, 16 }
 0x441   : > { %v7532_v42 = vpop.f32.mrf.mxu3  ;;  %v14776_v3 = vadd.f32 %v7868_v60, %v14439_v32  ;;  %v5813_v32 = vshll.u32 %v14773_v27, 16  ;;  %v5978_v60 = vsel %vm11782_vm14, %v10187_v5, %v5977_v51  ;;  %v14811_v5 = vld [vmem:[#allocation3 + $0xbc] sm:$0x1] }
 0x442   : > { %v14771_v14 = vadd.f32 %v7532_v42, %v7444_v39  ;;  %v5802_v39 = vsel %vm11405_vm11, %v5797_v8, %v5801_v11  ;;  %v10585_v42 = vrot.slane %v8389_v23, 9  ;;  %v5980_v8 = vrot.slane %v14598_v12, 5  ;;  %v9056_v23 = vpop.f32.mrf.mxu0 }
 0x443   : > { %v8517_v11 = vrot.slane %v8515_v50, 4  ;;  %v6112_v21 = vunpack.c.l.b16 %v5802_v39  ;;  %v14800_v18 = vrot.slane %v5813_v32, 5 }
 0x444   : > { %v7804_v15 = vpop.f32.mrf.mxu1  ;;  %v8516_v59 = vsel %vm11782_vm14, %v10585_v42, %v8515_v50  ;;  %v5981_v36 = vsel %vm11782_vm14, %v5979_v40, %v5980_v8  ;;  %v5806_v42 = vrot.slane %v5804_v48, 4  ;;  %v8258_v50 = vsel %vm11405_vm11, %v8253_v29, %v8257_v4  ;;  %v7969_v4 = vld [vmem:[#allocation3 + $0x9c] sm:$0xf] }
 0x445   : > { %v14786_v43 = vadd.f32 %v7804_v15, %v7716_v9  ;;  %7910 = vmatmul.bf16.gmra.mxu2 %v14375_v45  ;;  %v5819_v45 = vrot.slane %v5817_v41, 4  ;;  %v8519_v57 = vsel %vm11782_vm14, %v8517_v11, %v8518_v44  ;;  %v6172_v31 = vunpack.c.l.b16 %v5981_v36  ;;  %v15506_v41 = vld [vmem:[#allocation5_spill] sm:$0xff] }
 0x446   : > { %9004 = vmatmul.bf16.gmra.mxu3 %v11011_v0  ;;  %v6171_v0 = vunpack.c.l.b16 %v5978_v60  ;;  %v8719_v39 = vunpack.c.l.b16 %v8516_v59  ;;  %v8720_v32 = vunpack.c.l.b16 %v8519_v57  ;;  %v5809_v60 = vrot.slane %v5807_v1, 5 }
 0x447   : > { %15505 = vst [vmem:[#allocation20_spill] sm:$0xff] %v14786_v43  ;;  %9098 = vmatmul.bf16.gmra.mxu0 %v8676_v35  ;;  %v6111_v35 = vunpack.c.l.b16 %v5792_v17  ;;  %v5820_v44 = vor.u32 %v5819_v45, %v14800_v18  ;;  %v8248_v17 = vsel %vm11405_vm11, %v14778_v63, %v14703_v38  ;;  %v8656_v29 = vunpack.c.l.b16 %v8258_v50  ;;  %v5840_v38 = vld [vmem:[#allocation3 + $0x9c] sm:$0xe]  ;;  %v11012_v50 = vld [vmem:[#allocation3 + $0x84] sm:$0xff] }
 0x448   : > { %v7871_v12 = vpop.f32.mrf.mxu2  ;;  %v14818_v40 = vpack.c.b16 %v6172_v31, %v6171_v0  ;;  %v5810_v1 = vor.u32 %v5809_v60, %v5806_v42  ;;  %v8655_v57 = vunpack.c.l.b16 %v8248_v17  ;;  %v7970_v31 = vld [vmem:[#allocation3 + $0xa0] sm:$0xf]  ;;  %v15509_v63 = vld [vmem:[#allocation28_spill] sm:$0xff] }
 0x449   : > { %v8965_v33 = vpop.f32.mrf.mxu3  ;;  %v14809_v15 = vadd.f32 %v7871_v12, %v14477_v24  ;;  %v14820_v24 = vpack.c.b16 %v8720_v32, %v8719_v39  ;;  %v6129_v59 = vpack.c.b16 %v6112_v21, %v6111_v35  ;;  %v5821_v45 = vrot.slane %v5820_v44, 4 }
 0x44a   : > { %v14802_v9 = vadd.f32 %v9054_v52, %v8965_v33  ;;  %v15507_v52 = vld [vmem:[#allocation18_spill] sm:$0xff]  ;;  %v5823_v33 = vshll.u32 %v14811_v5, 16  ;;  %v9059_v21 = vpop.f32.mrf.mxu0  ;;  %v8260_v32 = vshrl.u32 %v7969_v4, 16  ;;  %v8677_v42 = vpack.c.b16 %v8656_v29, %v8655_v57 }
 0x44b   : > { %v7719_v51 = vadd.f32 %v15507_v52, %v15506_v41  ;;  %v8269_v41 = vshll.u32 %v7970_v31, 16  ;;  %v8273_v52 = vshrl.u32 %v7970_v31, 16  ;;  %v5811_v44 = vrot.slane %v5810_v1, 4 }
 0x44c   : > { %v7807_v8 = vpop.f32.mrf.mxu1  ;;  %v5825_v0 = vrot.slane %v5823_v33, 5 }
 0x44d   : > { %v14822_v11 = vadd.f32 %v7807_v8, %v7719_v51  ;;  %v15510_v51 = vld [vmem:[#allocation21_spill] sm:$0xff]  ;;  %v8263_v8 = vshll.u32 %v7969_v4, 16  ;;  %v14838_v33 = vrot.slane %v8269_v41, 5  ;;  %v5816_v29 = vsel %vm11405_vm11, %v5811_v44, %v14800_v18  ;;  %v15512_v44 = vld [vmem:[#allocation30_spill] sm:$0xff] }
 0x44e   : > { %v7721_v35 = vadd.f32 %v15510_v51, %v15509_v63  ;;  %v8522_v63 = vrot.slane %v7970_v31, 5  ;;  %v8262_v4 = vrot.slane %v8260_v32, 4 }
 0x44f   : > { %15508 = vst [vmem:[#allocation17_spill] sm:$0xff] %v14822_v11  ;;  %7846 = vmatmul.bf16.gmra.mxu1 %v6129_v59  ;;  %v5826_v59 = vsel %vm11405_vm11, %v5821_v45, %v5825_v0  ;;  %v5984_v11 = vrot.slane %v14617_v49, 5  ;;  %v8265_v0 = vrot.slane %v8263_v8, 5 }
 0x450   : > { %v7873_v36 = vpop.f32.mrf.mxu2  ;;  %v6114_v49 = vunpack.c.l.b16 %v5826_v59  ;;  %v8524_v51 = vrot.slane %v8522_v63, 4 }
 0x451   : > { %v8967_v48 = vpop.f32.mrf.mxu3  ;;  %v14832_v39 = vadd.f32 %v7873_v36, %v14501_v28  ;;  %v8275_v28 = vrot.slane %v8273_v52, 4  ;;  %v10188_v36 = vrot.slane %v5840_v38, 9  ;;  %v5986_v41 = vrot.slane %v5984_v11, 4 }
 0x452   : > { %v14829_v12 = vadd.f32 %v9056_v23, %v8967_v48  ;;  %v8390_v23 = vld [vmem:[#allocation3 + $0x9c] sm:$0xe]  ;;  %v7990_v48 = vld [vmem:[#allocation3 + $0xa4] sm:$0x1]  ;;  %v5987_v52 = vrot.slane %v14669_v25, 5 }
 0x453   : > { %v8276_v1 = vor.u32 %v8275_v28, %v14838_v33  ;;  %v10586_v45 = vrot.slane %v8390_v23, 9  ;;  %v5985_v57 = vsel %vm11782_vm14, %v10188_v36, %v5984_v11  ;;  %v8279_v31 = vshll.u32 %v7990_v48, 16  ;;  %v9061_v36 = vpop.f32.mrf.mxu0 }
 0x454   : > { %v7809_v60 = vpop.f32.mrf.mxu1  ;;  %v5988_v32 = vsel %vm11782_vm14, %v5986_v41, %v5987_v52  ;;  %v6173_v25 = vunpack.c.l.b16 %v5985_v57  ;;  %v8266_v28 = vor.u32 %v8265_v0, %v8262_v4  ;;  %v11184_v41 = vld [vmem:[#allocation3 + $0x1c] sm:$0xf] }
 0x455   : > { %v14840_v17 = vadd.f32 %v7809_v60, %v7721_v35  ;;  %7915 = vmatmul.bf16.gmra.mxu2 %v14448_v22  ;;  %v8525_v35 = vrot.slane %v7990_v48, 5  ;;  %v8277_v18 = vrot.slane %v8276_v1, 4  ;;  %v8523_v8 = vsel %vm11782_vm14, %v10586_v45, %v8522_v63 }
 0x456   : > { %9009 = vmatmul.bf16.gmra.mxu3 %v11012_v50  ;;  %v6174_v23 = vunpack.c.l.b16 %v5988_v32  ;;  %v8445_v52 = vrot.slane %v11184_v41, 5  ;;  %v15515_v41 = vld [vmem:[#allocation32_spill] sm:$0xff] }
 0x457   : > { %15511 = vst [vmem:[#allocation26_spill] sm:$0xff] %v14840_v17  ;;  %9103 = vmatmul.bf16.gmra.mxu0 %v8677_v42  ;;  %v8526_v60 = vsel %vm11782_vm14, %v8524_v51, %v8525_v35  ;;  %v6113_v42 = vunpack.c.l.b16 %v5816_v29  ;;  %v7971_v35 = vld [vmem:[#allocation3 + $0xa8] sm:$0xf]  ;;  %v8267_v29 = vrot.slane %v8266_v28, 4 }
 0x458   : > { %v7876_v22 = vpop.f32.mrf.mxu2  ;;  %v8722_v48 = vunpack.c.l.b16 %v8526_v60  ;;  %v14864_v63 = vpack.c.b16 %v6174_v23, %v6173_v25  ;;  %v8447_v60 = vrot.slane %v8445_v52, 4 }
 0x459   : > { %v8970_v38 = vpop.f32.mrf.mxu3  ;;  %v14858_v11 = vadd.f32 %v7876_v22, %v14530_v2  ;;  %v8721_v2 = vunpack.c.l.b16 %v8523_v8  ;;  %v6130_v57 = vpack.c.b16 %v6114_v49, %v6113_v42  ;;  %v8379_v22 = vld [vmem:[#allocation3 + $0x18] sm:$0xe]  ;;  %v8272_v49 = vsel %vm11405_vm11, %v8267_v29, %v14838_v33 }
 0x45a   : > { %v14851_v50 = vadd.f32 %v9059_v21, %v8970_v38  ;;  %v15513_v21 = vld [vmem:[#allocation4_spill] sm:$0xff]  ;;  %v8281_v38 = vrot.slane %v8279_v31, 5  ;;  %v10575_v0 = vrot.slane %v8379_v22, 9  ;;  %v8287_v42 = vshll.u32 %v7971_v35, 16  ;;  %v8391_v22 = vld [vmem:[#allocation3 + $0xa8] sm:$0xe] }
 0x45b   : > { %v7724_v59 = vadd.f32 %v15513_v21, %v15512_v44  ;;  %v14870_v32 = vpack.c.b16 %v8722_v48, %v8721_v2  ;;  %v11185_v44 = vld [vmem:[#allocation3 + $0x20] sm:$0x1]  ;;  %v7972_v21 = vld [vmem:[#allocation3 + $0xac] sm:$0xf]  ;;  %v10587_v43 = vrot.slane %v8391_v22, 9 }
 0x45c   : > { %v7812_v1 = vpop.f32.mrf.mxu1  ;;  %v8282_v51 = vsel %vm11405_vm11, %v8277_v18, %v8281_v38  ;;  %v8448_v31 = vrot.slane %v11185_v44, 5  ;;  %v8284_v18 = vshrl.u32 %v7971_v35, 16  ;;  %v8293_v28 = vshll.u32 %v7972_v21, 16  ;;  %v15516_v38 = vld [vmem:[#allocation27_spill] sm:$0xff] }
 0x45d   : > { %v14866_v45 = vadd.f32 %v7812_v1, %v7724_v59  ;;  %v8658_v23 = vunpack.c.l.b16 %v8282_v51  ;;  %v8297_v48 = vshrl.u32 %v7972_v21, 16  ;;  %v5841_v1 = vld [vmem:[#allocation3 + $0xa8] sm:$0xe]  ;;  %v7726_v2 = vadd.f32 %v15516_v38, %v15515_v41  ;;  %v7991_v44 = vld [vmem:[#allocation3 + $0xb0] sm:$0x1] }
 0x45e   : > { %v8449_v33 = vsel %vm11782_vm14, %v8447_v60, %v8448_v31  ;;  %v8657_v51 = vunpack.c.l.b16 %v8272_v49  ;;  %v14886_v29 = vrot.slane %v8293_v28, 5  ;;  %v5991_v41 = vrot.slane %v14692_v46, 5 }
 0x45f   : > { %15514 = vst [vmem:[#allocation25_spill] sm:$0xff] %v14866_v45  ;;  %7851 = vmatmul.bf16.gmra.mxu1 %v6130_v57  ;;  %v8446_v57 = vsel %vm11782_vm14, %v10575_v0, %v8445_v52  ;;  %v8529_v38 = vrot.slane %v7972_v21, 5  ;;  %v9064_v45 = vpop.f32.mrf.mxu0  ;;  %v8286_v0 = vrot.slane %v8284_v18, 4  ;;  %v8289_v17 = vrot.slane %v8287_v42, 5 }
 0x460   : > { %v7878_v8 = vpop.f32.mrf.mxu2  ;;  %v8678_v52 = vpack.c.b16 %v8658_v23, %v8657_v51  ;;  %v5993_v49 = vrot.slane %v5991_v41, 4  ;;  %v5994_v28 = vrot.slane %v14748_v62, 5  ;;  %v8532_v21 = vrot.slane %v7991_v44, 5 }
 0x461   : > { %v8972_v4 = vpop.f32.mrf.mxu3  ;;  %v14878_v59 = vadd.f32 %v7878_v8, %v14564_v37  ;;  %v8299_v37 = vrot.slane %v8297_v48, 4  ;;  %v10189_v8 = vrot.slane %v5841_v1, 9  ;;  %v8699_v1 = vunpack.c.l.b16 %v8446_v57 }
 0x462   : > { %v14872_v25 = vadd.f32 %v9061_v36, %v8972_v4  ;;  %v11013_v36 = vld [vmem:[#allocation3 + $0x90] sm:$0xff]  ;;  %v8531_v46 = vrot.slane %v8529_v38, 4  ;;  %v8303_v23 = vshll.u32 %v7991_v44, 16  ;;  %v5995_v18 = vsel %vm11782_vm14, %v5993_v49, %v5994_v28 }
 0x463   : > { %v8300_v60 = vor.u32 %v8299_v37, %v14886_v29  ;;  %v5992_v31 = vsel %vm11782_vm14, %v10189_v8, %v5991_v41  ;;  %v8530_v42 = vsel %vm11782_vm14, %v10587_v43, %v8529_v38  ;;  %v8290_v37 = vor.u32 %v8289_v17, %v8286_v0 }
 0x464   : > { %v7814_v4 = vpop.f32.mrf.mxu1  ;;  %v6175_v62 = vunpack.c.l.b16 %v5992_v31  ;;  %v8533_v57 = vsel %vm11782_vm14, %v8531_v46, %v8532_v21  ;;  %v8723_v49 = vunpack.c.l.b16 %v8530_v42  ;;  %v8305_v31 = vrot.slane %v8303_v23, 5 }
 0x465   : > { %v14888_v35 = vadd.f32 %v7814_v4, %v7726_v2  ;;  %7920 = vmatmul.bf16.gmra.mxu2 %v14761_v56  ;;  %v8700_v2 = vunpack.c.l.b16 %v8449_v33  ;;  %v6176_v4 = vunpack.c.l.b16 %v5995_v18  ;;  %v15517_v33 = vld [vmem:[#allocation35_spill] sm:$0xff]  ;;  %v8301_v8 = vrot.slane %v8300_v60, 4  ;;  %v8380_v60 = vld [vmem:[#allocation3 + $0x24] sm:$0xe] }
 0x466   : > { %9014 = vmatmul.bf16.gmra.mxu3 %v11013_v36  ;;  %v8724_v44 = vunpack.c.l.b16 %v8533_v57  ;;  %v8291_v46 = vrot.slane %v8290_v37, 4 }
 0x467   : > { %9108 = vmatmul.bf16.gmra.mxu0 %v8678_v52  ;;  %v14909_v52 = vpack.c.b16 %v6176_v4, %v6175_v62  ;;  %v8731_v43 = vpack.c.b16 %v8700_v2, %v8699_v1  ;;  %v8306_v21 = vsel %vm11405_vm11, %v8301_v8, %v8305_v31  ;;  %v9066_v17 = vpop.f32.mrf.mxu0  ;;  %v7974_v2 = vld [vmem:[#allocation3 + $0xb8] sm:$0xf]  ;;  %v11014_v8 = vld [vmem:[#allocation3 + $0x9c] sm:$0xff] }
 0x468   : > { %v7881_v56 = vpop.f32.mrf.mxu2  ;;  %v8296_v1 = vsel %vm11405_vm11, %v8291_v46, %v14886_v29  ;;  %v8660_v4 = vunpack.c.l.b16 %v8306_v21  ;;  %v8317_v57 = vshll.u32 %v7974_v2, 16  ;;  %v7992_v21 = vld [vmem:[#allocation3 + $0xbc] sm:$0x1] }
 0x469   : > { %v8975_v48 = vpop.f32.mrf.mxu3  ;;  %v14903_v22 = vadd.f32 %v7881_v56, %v14594_v10  ;;  %v11186_v10 = vld [vmem:[#allocation3 + $0x28] sm:$0xf]  ;;  %v7973_v56 = vld [vmem:[#allocation3 + $0xb4] sm:$0xf] }
 0x46a   : > { %v14896_v36 = vadd.f32 %v9064_v45, %v8975_v48  ;;  %v15518_v45 = vld [vmem:[#allocation29_spill] sm:$0xff]  ;;  %v8452_v38 = vrot.slane %v11186_v10, 5  ;;  %v14913_v48 = vpack.c.b16 %v8724_v44, %v8723_v49  ;;  %v10576_v44 = vrot.slane %v8380_v60, 9  ;;  %v8392_v10 = vld [vmem:[#allocation3 + $0xb4] sm:$0xe] }
 0x46b   : > { %v7729_v51 = vadd.f32 %v15518_v45, %v15517_v33  ;;  %v8321_v33 = vshrl.u32 %v7974_v2, 16  ;;  %v5842_v45 = vld [vmem:[#allocation3 + $0xb4] sm:$0xe]  ;;  %v8311_v29 = vshll.u32 %v7973_v56, 16  ;;  %v14927_v46 = vrot.slane %v8317_v57, 5 }
 0x46c   : > { %v7817_v41 = vpop.f32.mrf.mxu1  ;;  %v8454_v62 = vrot.slane %v8452_v38, 4  ;;  %v8453_v60 = vsel %vm11782_vm14, %v10576_v44, %v8452_v38 }
 0x46d   : > { %v14911_v28 = vadd.f32 %v7817_v41, %v7729_v51  ;;  %v15520_v51 = vld [vmem:[#allocation31_spill] sm:$0xff]  ;;  %v11187_v41 = vld [vmem:[#allocation3 + $0x2c] sm:$0x1] }
 0x46e   : > { %v7731_v37 = vadd.f32 %v15520_v51, %v14285_v13  ;;  %v8455_v49 = vrot.slane %v11187_v41, 5  ;;  %v8536_v13 = vrot.slane %v7974_v2, 5  ;;  %v8539_v41 = vrot.slane %v7992_v21, 5 }
 0x46f   : > { %15519 = vst [vmem:[#allocation5_spill] sm:$0xff] %v14911_v28  ;;  %9142 = vmatmul.bf16.vlgmr.msra.gmra.mxu1 %v8731_v43  ;;  %v8308_v43 = vshrl.u32 %v7973_v56, 16  ;;  %v5998_v28 = vrot.slane %v14773_v27, 5 }
 0x470   : > { %v7883_v42 = vpop.f32.mrf.mxu2  ;;  %v8456_v51 = vsel %vm11782_vm14, %v8454_v62, %v8455_v49  ;;  %v8538_v2 = vrot.slane %v8536_v13, 4 }
 0x471   : > { %v8977_v0 = vpop.f32.mrf.mxu3  ;;  %v14923_v23 = vadd.f32 %v7883_v42, %v14633_v30  ;;  %v8323_v30 = vrot.slane %v8321_v33, 4  ;;  %v10190_v42 = vrot.slane %v5842_v45, 9  ;;  %v8310_v57 = vrot.slane %v8308_v43, 4 }
 0x472   : > { %v14917_v18 = vadd.f32 %v9066_v17, %v8977_v0  ;;  %v8659_v17 = vunpack.c.l.b16 %v8296_v1  ;;  %v10588_v1 = vrot.slane %v8392_v10, 9  ;;  %v6001_v45 = vrot.slane %v14811_v5, 5  ;;  %v15521_v5 = vld [vmem:[#allocation34_spill] sm:$0xff] }
 0x473   : > { %v5999_v33 = vsel %vm11782_vm14, %v10190_v42, %v5998_v28  ;;  %v8324_v27 = vor.u32 %v8323_v30, %v14927_v46  ;;  %v8702_v38 = vunpack.c.l.b16 %v8456_v51  ;;  %v7734_v43 = vadd.f32 %v15521_v5, %v14325_v53 }
 0x474   : > { %v7819_v31 = vpop.f32.mrf.mxu1  ;;  %v8679_v56 = vpack.c.b16 %v8660_v4, %v8659_v17  ;;  %v8327_v4 = vshll.u32 %v7992_v21, 16  ;;  %v6177_v44 = vunpack.c.l.b16 %v5999_v33  ;;  %v8701_v10 = vunpack.c.l.b16 %v8453_v60  ;;  %v11188_v21 = vld [vmem:[#allocation3 + $0x34] sm:$0xf]  ;;  %v7975_v60 = vld [vmem:[#allocation3 + $0xc0] sm:$0xf] }
 0x475   : > { %v14929_v0 = vadd.f32 %v7819_v31, %v7731_v37  ;;  %7925 = vmatmul.bf16.gmra.mxu2 %v14818_v40  ;;  %v6000_v37 = vrot.slane %v5998_v28, 4  ;;  %v8537_v40 = vsel %vm11782_vm14, %v10588_v1, %v8536_v13  ;;  %v8540_v28 = vsel %vm11782_vm14, %v8538_v2, %v8539_v41  ;;  %v7976_v2 = vld [vmem:[#allocation3 + $0xc4] sm:$0xf] }
 0x476   : > { %9019 = vmatmul.bf16.gmra.mxu3 %v11014_v8  ;;  %v8313_v8 = vrot.slane %v8311_v29, 5  ;;  %v8726_v31 = vunpack.c.l.b16 %v8540_v28  ;;  %v8325_v30 = vrot.slane %v8324_v27, 4  ;;  %v8725_v51 = vunpack.c.l.b16 %v8537_v40  ;;  %v11015_v40 = vld [vmem:[#allocation3 + $0xa8] sm:$0xff] }
 0x477   : > { %9113 = vmatmul.bf16.gmra.mxu0 %v8679_v56  ;;  %v6002_v62 = vsel %vm11782_vm14, %v6000_v37, %v6001_v45  ;;  %v8732_v13 = vpack.c.b16 %v8702_v38, %v8701_v10  ;;  %v8459_v1 = vrot.slane %v11188_v21, 5  ;;  %v8329_v33 = vrot.slane %v8327_v4, 5  ;;  %v8393_v38 = vld [vmem:[#allocation3 + $0xc0] sm:$0xe]  ;;  %v8381_v4 = vld [vmem:[#allocation3 + $0x30] sm:$0xe] }
 0x478   : > { %v6178_v49 = vunpack.c.l.b16 %v6002_v62  ;;  %v8314_v29 = vor.u32 %v8313_v8, %v8310_v57  ;;  %v14953_v37 = vpack.c.b16 %v8726_v31, %v8725_v51  ;;  %v8341_v27 = vshll.u32 %v7976_v2, 16 }
 0x479   : > { %v8330_v53 = vsel %vm11405_vm11, %v8325_v30, %v8329_v33  ;;  %v8461_v57 = vrot.slane %v8459_v1, 4  ;;  %v8345_v41 = vshrl.u32 %v7976_v2, 16  ;;  %v7736_v62 = vadd.f32 %v14278_v7, %v14352_v55 }
 0x47a   : > { %v14949_v42 = vpack.c.b16 %v6178_v49, %v6177_v44  ;;  %v8315_v45 = vrot.slane %v8314_v29, 4  ;;  %v11189_v44 = vld [vmem:[#allocation3 + $0x38] sm:$0x1]  ;;  %v8662_v28 = vunpack.c.l.b16 %v8330_v53  ;;  %v8332_v10 = vshrl.u32 %v7975_v60, 16 }
 0x47b   : > { %v8462_v49 = vrot.slane %v11189_v44, 5  ;;  %v8335_v31 = vshll.u32 %v7975_v60, 16  ;;  %v8347_v29 = vrot.slane %v8345_v41, 4  ;;  %v10589_v51 = vrot.slane %v8393_v38, 9 }
 0x47c   : > { %v7822_v17 = vpop.f32.mrf.mxu1  ;;  %v8320_v8 = vsel %vm11405_vm11, %v8315_v45, %v14927_v46  ;;  %v10577_v21 = vrot.slane %v8381_v4, 9 }
 0x47d   : > { %v14951_v56 = vadd.f32 %v7822_v17, %v7734_v43  ;;  %v7993_v43 = vld [vmem:[#allocation3 + $0xc8] sm:$0x1]  ;;  %v8343_v17 = vrot.slane %v8341_v27, 5  ;;  %v8661_v46 = vunpack.c.l.b16 %v8320_v8  ;;  %v8463_v7 = vsel %vm11782_vm14, %v8461_v57, %v8462_v49 }
 0x47e   : > { %v8546_v53 = vrot.slane %v7993_v43, 5  ;;  %v8460_v60 = vsel %vm11782_vm14, %v10577_v21, %v8459_v1  ;;  %v8334_v27 = vrot.slane %v8332_v10, 4  ;;  %v8337_v41 = vrot.slane %v8335_v31, 5  ;;  %v11016_v21 = vld [vmem:[#allocation3 + $0xb4] sm:$0xff] }
 0x47f   : > { %9147 = vmatmul.bf16.gmra.mxu1 %v8732_v13  ;;  %v8543_v13 = vrot.slane %v7976_v2, 5  ;;  %v8680_v55 = vpack.c.b16 %v8662_v28, %v8661_v46  ;;  %v8348_v8 = vor.u32 %v8347_v29, %v8343_v17  ;;  %v8704_v38 = vunpack.c.l.b16 %v8463_v7 }
 0x480   : > { %v8351_v57 = vshll.u32 %v7993_v43, 16  ;;  %v8703_v44 = vunpack.c.l.b16 %v8460_v60  ;;  %v8338_v28 = vor.u32 %v8337_v41, %v8334_v27  ;;  %v7744_v60 = vadd.f32 %v14380_v20, %v14458_v47 }
 0x481   : > { %v8544_v33 = vsel %vm11782_vm14, %v10589_v51, %v8543_v13  ;;  %v8545_v45 = vrot.slane %v8543_v13, 4 }
 0x482   : > { %v8733_v10 = vpack.c.b16 %v8704_v38, %v8703_v44  ;;  %v8353_v31 = vrot.slane %v8351_v57, 5  ;;  %v8339_v29 = vrot.slane %v8338_v28, 4  ;;  %v15526_v57 = vld [vmem:[#allocation38_spill] sm:$0xff] }
 0x483   : > { %v8547_v2 = vsel %vm11782_vm14, %v8545_v45, %v8546_v53 }
 0x484   : > { %v7824_v5 = vpop.f32.mrf.mxu1  ;;  %v8344_v51 = vsel %vm11405_vm11, %v8339_v29, %v8343_v17  ;;  %v11190_v17 = vld [vmem:[#allocation3 + $0x4c] sm:$0xf] }
 0x485   : > { %v14962_v30 = vadd.f32 %v7824_v5, %v7736_v62  ;;  %7930 = vmatmul.bf16.gmra.mxu2 %v14864_v63  ;;  %v8727_v62 = vunpack.c.l.b16 %v8544_v33  ;;  %v8728_v63 = vunpack.c.l.b16 %v8547_v2  ;;  %v8349_v5 = vrot.slane %v8348_v8, 4  ;;  %v15525_v2 = vld [vmem:[#allocation41_spill] sm:$0xff] }
 0x486   : > { %9024 = vmatmul.bf16.gmra.mxu3 %v11015_v40  ;;  %v15522_v40 = vld [vmem:[#allocation36_spill] sm:$0xff]  ;;  %v8663_v45 = vunpack.c.l.b16 %v8344_v51  ;;  %v8473_v8 = vrot.slane %v11190_v17, 5 }
 0x487   : > { %9118 = vmatmul.bf16.gmra.mxu0 %v8680_v55  ;;  %v7739_v4 = vadd.f32 %v15522_v40, %v14387_v26  ;;  %v14975_v46 = vpack.c.b16 %v8728_v63, %v8727_v62  ;;  %v8354_v43 = vsel %vm11405_vm11, %v8349_v5, %v8353_v31  ;;  %v15523_v26 = vld [vmem:[#allocation37_spill] sm:$0xff]  ;;  %v7746_v62 = vadd.f32 %v15526_v57, %v15525_v2  ;;  %v8383_v40 = vld [vmem:[#allocation3 + $0x48] sm:$0xe]  ;;  %v15528_v31 = vld [vmem:[#allocation40_spill] sm:$0xff] }
 0x488   : > { %v7741_v13 = vadd.f32 %v15523_v26, %v14421_v34  ;;  %v8664_v7 = vunpack.c.l.b16 %v8354_v43  ;;  %v15524_v34 = vld [vmem:[#allocation39_spill] sm:$0xff]  ;;  %v8475_v38 = vrot.slane %v8473_v8, 4  ;;  %v11017_v63 = vld [vmem:[#allocation3 + $0xc0] sm:$0xff]  ;;  %v10579_v20 = vrot.slane %v8383_v40, 9  ;;  %v11193_v17 = vld [vmem:[#allocation3 + $0x5c] sm:$0x1] }
 0x489   : > { %v15532_v40 = vld [vmem:[#allocation8_spill] sm:$0xff] }
 0x48a   : > { %v8681_v53 = vpack.c.b16 %v8664_v7, %v8663_v45  ;;  %v8474_v28 = vsel %vm11782_vm14, %v10579_v20, %v8473_v8  ;;  %v15529_v45 = vld [vmem:[#allocation22_spill] sm:$0xff]  ;;  %v8483_v8 = vrot.slane %v11193_v17, 5  ;;  %v15540_v17 = vld [vmem:[#allocation11_spill] sm:$0xff] }
 0x48b   : > { %v8707_v43 = vunpack.c.l.b16 %v8474_v28  ;;  %v15533_v28 = vld [vmem:[#allocation43_spill] sm:$0xff] }
 0x48c   : > { %v7827_v49 = vpop.f32.mrf.mxu1 }
 0x48d   : > { %v14977_v1 = vadd.f32 %v7827_v49, %v7739_v4 }
 0x48f   : > { %9152 = vmatmul.bf16.gmra.mxu1 %v8733_v10  ;;  %v15527_v10 = vld [vmem:[#allocation6_spill] sm:$0xff] }
 0x490   : > { %v7749_v29 = vadd.f32 %v15528_v31, %v15527_v10 }
 0x494   : > { %v7829_v55 = vpop.f32.mrf.mxu1 }
 0x495   : > { %v14985_v33 = vadd.f32 %v7829_v55, %v7741_v13  ;;  %7935 = vmatmul.bf16.gmra.mxu2 %v14909_v52  ;;  %v11191_v52 = vld [vmem:[#allocation3 + $0x50] sm:$0x1] }
 0x496   : > { %9029 = vmatmul.bf16.gmra.mxu3 %v11016_v21  ;;  %v8476_v44 = vrot.slane %v11191_v52, 5  ;;  %v11192_v21 = vld [vmem:[#allocation3 + $0x58] sm:$0xf] }
 0x497   : > { %9123 = vmatmul.bf16.gmra.mxu0 %v8681_v53  ;;  %v8480_v7 = vrot.slane %v11192_v21, 5  ;;  %v15530_v53 = vld [vmem:[#allocation7_spill] sm:$0xff] }
 0x498   : > { %v8477_v47 = vsel %vm11782_vm14, %v8475_v38, %v8476_v44 }
 0x499   : > { %v8708_v5 = vunpack.c.l.b16 %v8477_v47  ;;  %v8482_v55 = vrot.slane %v8480_v7, 4 }
 0x49b   : > { %v8735_v13 = vpack.c.b16 %v8708_v5, %v8707_v43  ;;  %v8484_v2 = vsel %vm11782_vm14, %v8482_v55, %v8483_v8  ;;  %v15534_v5 = vld [vmem:[#allocation12_spill] sm:$0xff]  ;;  %v15537_v55 = vld [vmem:[#allocation10_spill] sm:$0xff]  ;;  %v7764_v8 = vadd.f32 %v15540_v17, %v14735_v16 }
 0x49c   : > { %v7832_v27 = vpop.f32.mrf.mxu1  ;;  %v7756_v10 = vadd.f32 %v15534_v5, %v15533_v28  ;;  %v15535_v43 = vld [vmem:[#allocation16_spill] sm:$0xff]  ;;  %v15048_v16 = vld [vmem:[%s15322_s5] ss:$0 sm:$0xff] }
 0x49d   : > { %v14990_v41 = vadd.f32 %v7832_v27, %v7744_v60  ;;  %v7751_v60 = vadd.f32 %v15530_v53, %v15529_v45  ;;  %v15538_v45 = vld [vmem:[#allocation14_spill] sm:$0xff]  ;;  %v15539_v53 = vld [vmem:[#allocation23_spill] sm:$0xff] }
 0x49e   : > { %v11044_v5 = vld [vmem:[%s11272_s16] sm:$0xff]  }
 0x49f   : > { %9157 = vmatmul.bf16.gmra.mxu1 %v15524_v34  ;;  %v11046_v17 = vunpack.c.h.bf16 %v11044_v5 }
 0x4a4   : > { %v7834_v4 = vpop.f32.mrf.mxu1 }
 0x4a5   : > { %v14995_v49 = vadd.f32 %v7834_v4, %v7746_v62  ;;  %7940 = vmatmul.bf16.gmra.mxu2 %v14949_v42  ;;  %v8384_v42 = vld [vmem:[#allocation3 + $0x54] sm:$0xe]  ;;  %v8710_v62 = vunpack.c.l.b16 %v8484_v2 }
 0x4a6   : > { %9034 = vmatmul.bf16.gmra.mxu3 %v11017_v63  ;;  %v10580_v38 = vrot.slane %v8384_v42, 9  ;;  %v15531_v63 = vld [vmem:[#allocation42_spill] sm:$0xff] }
 0x4a7   : > { %v7754_v4 = vadd.f32 %v15532_v40, %v15531_v63 }
 0x4a8   : > { %v8481_v57 = vsel %vm11782_vm14, %v10580_v38, %v8480_v7 }
 0x4a9   : > { %v8709_v52 = vunpack.c.l.b16 %v8481_v57  ;;  %v15541_v57 = vld [vmem:[#allocation15_spill] sm:$0xff] }
 0x4ab   : > { %v8736_v47 = vpack.c.b16 %v8710_v62, %v8709_v52  ;;  %v15542_v62 = vld [vmem:[#allocation19_spill] sm:$0xff]  ;;  %v15040_v52 = vpop.f32.mrf.mxu0 }
 0x4ac   : > { %v7837_v51 = vpop.f32.mrf.mxu1  ;;  %v7766_v63 = vadd.f32 %v15542_v62, %v14771_v14  ;;  %v15055_v14 = vld [vmem:[%s15323_s6] ss:$0 sm:$0xff] }
 0x4ad   : > { %v15004_v26 = vadd.f32 %v7837_v51, %v7749_v29  ;;  %v15536_v51 = vld [vmem:[#allocation9_spill] sm:$0xff] }
 0x4af   : > { %9162 = vmatmul.bf16.gmra.mxu1 %v8735_v13  ;;  %v7759_v13 = vadd.f32 %v15536_v51, %v15535_v43 }
 0x4b3   : > { %v15058_v43 = vpop.f32.mrf.mxu0 }
 0x4b4   : > { %v7839_v27 = vpop.f32.mrf.mxu1 }
 0x4b5   : > { %v15008_v34 = vadd.f32 %v7839_v27, %v7751_v60  ;;  %v7761_v60 = vadd.f32 %v15539_v53, %v15538_v45 }
 0x4bc   : > { %v7842_v44 = vpop.f32.mrf.mxu1 }
 0x4bd   : > { %v15016_v20 = vadd.f32 %v7842_v44, %v7754_v4  ;;  %v15042_v44 = vpop.f32.mrf.mxu3 }
 0x4bf   : > { %9167 = vmatmul.bf16.gmra.mxu1 %v8736_v47 }
 0x4c4   : > { %v7844_v31 = vpop.f32.mrf.mxu1 }
 0x4c5   : > { %v15020_v29 = vadd.f32 %v7844_v31, %v7756_v10  ;;  %v15543_v31 = vld [vmem:[#allocation24_spill] sm:$0xff] }
 0x4cc   : > { %v7847_v21 = vpop.f32.mrf.mxu1 }
 0x4cd   : > { %v15024_v7 = vadd.f32 %v7847_v21, %v7759_v13  ;;  %v15061_v13 = vpop.f32.mrf.mxu3 }
 0x4cf   : > { %9172 = vmatmul.bf16.gmra.mxu1 %v15537_v55 }
 0x4d4   : > { %v7849_v42 = vpop.f32.mrf.mxu1 }
 0x4d5   : > { %v15029_v27 = vadd.f32 %v7849_v42, %v7761_v60 }
 0x4dc   : > { %v7852_v38 = vpop.f32.mrf.mxu1 }
 0x4dd   : > { %v15033_v2 = vadd.f32 %v7852_v38, %v7764_v8  ;;  %v15074_v8 = vpop.f32.mrf.mxu0  ;;  %v15076_v38 = vpop.f32.mrf.mxu2 }
 0x4df   : > { %9177 = vmatmul.bf16.gmra.mxu1 %v15541_v57  ;;  %v15079_v57 = vpop.f32.mrf.mxu3 }
 0x4e4   : > { %v7854_v40 = vpop.f32.mrf.mxu1 }
 0x4e5   : > { %v15038_v4 = vadd.f32 %v7854_v40, %v7766_v63 }
 0x4ec   : > { %v9143_v47 = vpop.f32.mrf.mxu1 }
 0x4ed   : > { %v9144_v28 = vadd.f32 %v9143_v47, %v14802_v9  ;;  %v11045_v9 = vunpack.c.l.bf16 %v11044_v5  ;;  %v11107_v47 = vld [vmem:[%s11272_s16 + $0x8] sm:$0xff]  }
 0x4ef   : > { %v9223_v10 = vadd.f32 %v9144_v28, %v14746_v6  ;;  %9182 = vmatmul.bf16.gmra.mxu1 %v15543_v31 }
 0x4f1   : > { %v9259_v51 = vmul.f32 %v15048_v16, %v9223_v10  ;;  %v11049_v10 = vunpack.c.l.bf16 %v11107_v47 }
 0x4f3   : > { %v9295_v21 = vadd.f32 %v15055_v14, %v9259_v51 }
 0x4f4   : > { %v9145_v55 = vpop.f32.mrf.mxu1 }
 0x4f5   : > { %v9391_v6 = vadd.f32 %v11045_v9, %v9295_v21  ;;  %v9146_v45 = vadd.f32 %v9145_v55, %v14829_v12  ;;  %v15088_v9 = vpop.f32.mrf.mxu0  ;;  %v15090_v21 = vpop.f32.mrf.mxu2 }
 0x4f7   : > { %v9423_v53 = vmax.f32 %v9391_v6, 0.0  ;;  %v9224_v60 = vadd.f32 %v9146_v45, %v14776_v3  ;;  %v15093_v6 = vpop.f32.mrf.mxu3 }
 0x4f9   : > { %9455 = vst [vmem:[%s15069_s13] sm:$0xff] %v9423_v53  ;;  %v9260_v42 = vmul.f32 %v15048_v16, %v9224_v60  ;;  %v11050_v53 = vunpack.c.h.bf16 %v11107_v47 }
 0x4fb   : > { %v9296_v12 = vadd.f32 %v15055_v14, %v9260_v42 }
 0x4fc   : > { %v9148_v62 = vpop.f32.mrf.mxu1 }
 0x4fd   : > { %v9392_v63 = vadd.f32 %v11046_v17, %v9296_v12  ;;  %v9149_v40 = vadd.f32 %v9148_v62, %v14851_v50  ;;  %v11108_v62 = vld [vmem:[%s11272_s16 + $0x10] sm:$0xff]  }
 0x4ff   : > { %v9424_v28 = vmax.f32 %v9392_v63, 0.0  ;;  %v9225_v3 = vadd.f32 %v9149_v40, %v14809_v15  ;;  %9187 = vmatmul.bf16.gmra.mxu1 %v14766_v58  ;;  %v15101_v63 = vpop.f32.mrf.mxu0 }
 0x501   : > { %9456 = vst [vmem:[%s15069_s13 + $0x8] sm:$0xff] %v9424_v28  ;;  %v9261_v5 = vmul.f32 %v15048_v16, %v9225_v3  ;;  %v11053_v3 = vunpack.c.l.bf16 %v11108_v62 }
 0x503   : > { %v9297_v31 = vadd.f32 %v15055_v14, %v9261_v5 }
 0x504   : > { %v9150_v51 = vpop.f32.mrf.mxu1 }
 0x505   : > { %v9393_v50 = vadd.f32 %v11049_v10, %v9297_v31  ;;  %v9151_v55 = vadd.f32 %v9150_v51, %v14872_v25  ;;  %v15103_v25 = vpop.f32.mrf.mxu2 }
 0x507   : > { %v9425_v15 = vmax.f32 %v9393_v50, 0.0  ;;  %v9226_v58 = vadd.f32 %v9151_v55, %v14832_v39  ;;  %v15107_v39 = vpop.f32.mrf.mxu3 }
 0x509   : > { %9457 = vst [vmem:[%s15069_s13 + $0x10] sm:$0xff] %v9425_v15  ;;  %v9262_v45 = vmul.f32 %v15048_v16, %v9226_v58  ;;  %v11054_v15 = vunpack.c.h.bf16 %v11108_v62 }
 0x50b   : > { %v9298_v60 = vadd.f32 %v15055_v14, %v9262_v45  ;;  %v9070_v45 = vadd.f32 %v15040_v52, %v15042_v44 }
 0x50c   : > { %v9153_v42 = vpop.f32.mrf.mxu1 }
 0x50d   : > { %v9394_v17 = vadd.f32 %v11050_v53, %v9298_v60  ;;  %v9154_v12 = vadd.f32 %v9153_v42, %v14896_v36 }
 0x50f   : > { %v9426_v40 = vmax.f32 %v9394_v17, 0.0  ;;  %v9227_v28 = vadd.f32 %v9154_v12, %v14858_v11  ;;  %9192 = vmatmul.bf16.gmra.mxu1 %v14820_v24  ;;  %v15114_v11 = vpop.f32.mrf.mxu0  ;;  %v15116_v24 = vpop.f32.mrf.mxu2 }
 0x510   : > { %v15120_v58 = vpop.f32.mrf.mxu3 }
 0x511   : > { %9458 = vst [vmem:[%s15069_s13 + $0x18] sm:$0xff] %v9426_v40  ;;  %v9263_v47 = vmul.f32 %v15048_v16, %v9227_v28  ;;  %v9072_v28 = vadd.f32 %v15058_v43, %v15061_v13  ;;  %v9075_v13 = vadd.f32 %v15074_v8, %v15079_v57 }
 0x513   : > { %v9299_v5 = vadd.f32 %v15055_v14, %v9263_v47 }
 0x514   : > { %v9155_v36 = vpop.f32.mrf.mxu1 }
 0x515   : > { %v9395_v10 = vadd.f32 %v11053_v3, %v9299_v5  ;;  %v9156_v31 = vadd.f32 %v9155_v36, %v14917_v18 }
 0x517   : > { %v9427_v51 = vmax.f32 %v9395_v10, 0.0  ;;  %v9228_v50 = vadd.f32 %v9156_v31, %v14878_v59  ;;  %v11109_v59 = vld [vmem:[%s11272_s16 + $0x18] sm:$0xff]   ;;  %v15132_v52 = vpop.f32.mrf.mxu0  ;;  %v15134_v44 = vpop.f32.mrf.mxu2 }
 0x518   : > { %v11057_v40 = vunpack.c.l.bf16 %v11109_v59  ;;  %v15137_v3 = vpop.f32.mrf.mxu3  ;;  %v11058_v43 = vunpack.c.h.bf16 %v11109_v59 }
 0x519   : > { %9459 = vst [vmem:[%s15069_s13 + $0x20] sm:$0xff] %v9427_v51  ;;  %v9264_v55 = vmul.f32 %v15048_v16, %v9228_v50 }
 0x51b   : > { %v9300_v53 = vadd.f32 %v15055_v14, %v9264_v55  ;;  %v15544_v55 = vld [vmem:[#allocation33_spill] sm:$0xff] }
 0x51c   : > { %v9158_v18 = vpop.f32.mrf.mxu1 }
 0x51d   : > { %v9396_v60 = vadd.f32 %v11054_v15, %v9300_v53  ;;  %v9159_v42 = vadd.f32 %v9158_v18, %v9070_v45  ;;  %v7887_v15 = vadd.f32 %v15076_v38, %v15544_v55  ;;  %v9077_v38 = vadd.f32 %v15088_v9, %v15093_v6 }
 0x51f   : > { %v9428_v17 = vmax.f32 %v9396_v60, 0.0  ;;  %v9229_v12 = vadd.f32 %v9159_v42, %v14903_v22  ;;  %9197 = vmatmul.bf16.gmra.mxu1 %v14870_v32  ;;  %v15147_v45 = vpop.f32.mrf.mxu0  ;;  %v15149_v53 = vpop.f32.mrf.mxu2  ;;  %v11110_v42 = vld [vmem:[%s11272_s16 + $0x20] sm:$0xff]  }
 0x520   : > { %v15151_v60 = vpop.f32.mrf.mxu3  ;;  %v11061_v57 = vunpack.c.l.bf16 %v11110_v42  ;;  %v11062_v6 = vunpack.c.h.bf16 %v11110_v42 }
 0x521   : > { %9460 = vst [vmem:[%s15069_s13 + $0x28] sm:$0xff] %v9428_v17  ;;  %v9265_v62 = vmul.f32 %v15048_v16, %v9229_v12 }
 0x523   : > { %v9301_v47 = vadd.f32 %v15055_v14, %v9265_v62 }
 0x524   : > { %v9160_v5 = vpop.f32.mrf.mxu1 }
 0x525   : > { %v9397_v36 = vadd.f32 %v11057_v40, %v9301_v47  ;;  %v9161_v22 = vadd.f32 %v9160_v5, %v9072_v28  ;;  %v15545_v40 = vld [vmem:[#allocation13_spill] sm:$0xff] }
 0x526   : > { %v7889_v28 = vadd.f32 %v15090_v21, %v15545_v40  ;;  %v9080_v21 = vadd.f32 %v15101_v63, %v15107_v39 }
 0x527   : > { %v9429_v32 = vmax.f32 %v9397_v36, 0.0  ;;  %v9230_v10 = vadd.f32 %v9161_v22, %v14923_v23  ;;  %v15162_v36 = vpop.f32.mrf.mxu0  ;;  %v15164_v22 = vpop.f32.mrf.mxu2 }
 0x529   : > { %9461 = vst [vmem:[%s15069_s13 + $0x30] sm:$0xff] %v9429_v32  ;;  %v9266_v31 = vmul.f32 %v15048_v16, %v9230_v10  ;;  %v15166_v10 = vpop.f32.mrf.mxu3 }
 0x52a   : > { %v9090_v19 = vadd.f32 %v15162_v36, %v15166_v10 }
 0x52b   : > { %v9302_v51 = vadd.f32 %v15055_v14, %v9266_v31  ;;  %v11018_v31 = vld [vmem:[#allocation3 + $0xcc] sm:$0xff] }
 0x52c   : > { %v9163_v50 = vpop.f32.mrf.mxu1  ;;  %9039 = vmatmul.bf16.gmra.mxu3 %v11018_v31 }
 0x52d   : > { %v9398_v18 = vadd.f32 %v11058_v43, %v9302_v51  ;;  %v9164_v23 = vadd.f32 %v9163_v50, %v9075_v13  ;;  %v7892_v51 = vadd.f32 %v15103_v25, %v14757_v61  ;;  %v7994_v61 = vld [vmem:[#allocation3 + $0xd4] sm:$0x1] }
 0x52f   : > { %v9430_v17 = vmax.f32 %v9398_v18, 0.0  ;;  %v9231_v59 = vadd.f32 %v9164_v23, %v7887_v15  ;;  %9202 = vmatmul.bf16.gmra.mxu1 %v14913_v48  ;;  %v11111_v15 = vld [vmem:[%s11272_s16 + $0x28] sm:$0xff]   ;;  %v15179_v42 = vpop.f32.mrf.mxu2 }
 0x530   : > { %v11065_v39 = vunpack.c.l.bf16 %v11111_v15 }
 0x531   : > { %9462 = vst [vmem:[%s15069_s13 + $0x38] sm:$0xff] %v9430_v17  ;;  %v9267_v8 = vmul.f32 %v15048_v16, %v9231_v59  ;;  %v15177_v17 = vpop.f32.mrf.mxu0  ;;  %v7977_v59 = vld [vmem:[#allocation3 + $0xcc] sm:$0xf] }
 0x532   : > { %v8356_v25 = vshrl.u32 %v7977_v59, 16 }
 0x533   : > { %v9303_v12 = vadd.f32 %v15055_v14, %v9267_v8  ;;  %v7978_v8 = vld [vmem:[#allocation3 + $0xd0] sm:$0xf] }
 0x534   : > { %v9165_v62 = vpop.f32.mrf.mxu1 }
 0x535   : > { %v9399_v47 = vadd.f32 %v11061_v57, %v9303_v12  ;;  %v9166_v5 = vadd.f32 %v9165_v62, %v9077_v38  ;;  %v15183_v57 = vpop.f32.mrf.mxu3  ;;  %v8359_v38 = vshll.u32 %v7977_v59, 16  ;;  %v8365_v12 = vshll.u32 %v7978_v8, 16 }
 0x536   : > { %v8369_v62 = vshrl.u32 %v7978_v8, 16 }
 0x537   : > { %v9431_v48 = vmax.f32 %v9399_v47, 0.0  ;;  %v9232_v32 = vadd.f32 %v9166_v5, %v7889_v28  ;;  %v8375_v28 = vshll.u32 %v7994_v61, 16  ;;  %v8358_v5 = vrot.slane %v8356_v25, 4 }
 0x539   : > { %9463 = vst [vmem:[%s15069_s13 + $0x40] sm:$0xff] %v9431_v48  ;;  %v9268_v9 = vmul.f32 %v15048_v16, %v9232_v32  ;;  %v8361_v48 = vrot.slane %v8359_v38, 5  ;;  %v8367_v32 = vrot.slane %v8365_v12, 5  ;;  %v15198_v25 = vpop.f32.mrf.mxu0  ;;  %v15200_v38 = vpop.f32.mrf.mxu2 }
 0x53b   : > { %v9304_v43 = vadd.f32 %v15055_v14, %v9268_v9  ;;  %v8371_v9 = vrot.slane %v8369_v62, 4 }
 0x53c   : > { %v9168_v13 = vpop.f32.mrf.mxu1 }
 0x53d   : > { %v9400_v50 = vadd.f32 %v11062_v6, %v9304_v43  ;;  %v9169_v55 = vadd.f32 %v9168_v13, %v9080_v21  ;;  %v15546_v6 = vld [vmem:[#allocation20_spill] sm:$0xff]  ;;  %v8362_v13 = vor.u32 %v8361_v48, %v8358_v5 }
 0x53e   : > { %v7894_v31 = vadd.f32 %v15116_v24, %v15546_v6 }
 0x53f   : > { %v9432_v18 = vmax.f32 %v9400_v50, 0.0  ;;  %v9233_v23 = vadd.f32 %v9169_v55, %v7892_v51  ;;  %9207 = vmatmul.bf16.gmra.mxu1 %v14953_v37  ;;  %v9082_v37 = vadd.f32 %v15114_v11, %v15120_v58  ;;  %v8372_v51 = vor.u32 %v8371_v9, %v8367_v32 }
 0x540   : > { %v8377_v50 = vrot.slane %v8375_v28, 5  ;;  %v8363_v11 = vrot.slane %v8362_v13, 4  ;;  %v8550_v28 = vrot.slane %v7978_v8, 5 }
 0x541   : > { %9464 = vst [vmem:[%s15069_s13 + $0x48] sm:$0xff] %v9432_v18  ;;  %v9269_v63 = vmul.f32 %v15048_v16, %v9233_v23  ;;  %v8373_v58 = vrot.slane %v8372_v51, 4 }
 0x542   : > { %v8368_v59 = vsel %vm11405_vm11, %v8363_v11, %v8367_v32  ;;  %v9096_v11 = vpop.f32.mrf.mxu0 }
 0x543   : > { %v9305_v40 = vadd.f32 %v15055_v14, %v9269_v63  ;;  %v11066_v63 = vunpack.c.h.bf16 %v11111_v15  ;;  %v8378_v24 = vsel %vm11405_vm11, %v8373_v58, %v8377_v50  ;;  %v8665_v62 = vunpack.c.l.b16 %v8368_v59  ;;  %v7908_v58 = vpop.f32.mrf.mxu2 }
 0x544   : > { %v9170_v47 = vpop.f32.mrf.mxu1 }
 0x545   : > { %v9401_v21 = vadd.f32 %v11065_v39, %v9305_v40  ;;  %v9171_v43 = vadd.f32 %v9170_v47, %v9082_v37  ;;  %v9085_v39 = vadd.f32 %v15132_v52, %v15137_v3  ;;  %v8666_v37 = vunpack.c.l.b16 %v8378_v24  ;;  %v15203_v40 = vpop.f32.mrf.mxu3  ;;  %v15547_v47 = vld [vmem:[#allocation17_spill] sm:$0xff]  ;;  %v8394_v52 = vld [vmem:[#allocation3 + $0xcc] sm:$0xe]  ;;  %v11112_v3 = vld [vmem:[%s11272_s16 + $0x30] sm:$0xff]  }
 0x546   : > { %v7897_v54 = vadd.f32 %v15134_v44, %v15547_v47  ;;  %v11069_v8 = vunpack.c.l.bf16 %v11112_v3  ;;  %v9087_v44 = vadd.f32 %v15147_v45, %v15151_v60 }
 0x547   : > { %v9433_v55 = vmax.f32 %v9401_v21, 0.0  ;;  %v9234_v18 = vadd.f32 %v9171_v43, %v7894_v31  ;;  %v8682_v32 = vpack.c.b16 %v8666_v37, %v8665_v62  ;;  %v10590_v31 = vrot.slane %v8394_v52, 9 }
 0x548   : > { %v8552_v21 = vrot.slane %v8550_v28, 4  ;;  %v8553_v43 = vrot.slane %v7994_v61, 5  ;;  %v11070_v62 = vunpack.c.h.bf16 %v11112_v3 }
 0x549   : > { %9465 = vst [vmem:[%s15069_s13 + $0x50] sm:$0xff] %v9433_v55  ;;  %v9270_v23 = vmul.f32 %v15048_v16, %v9234_v18  ;;  %9128 = vmatmul.bf16.gmra.mxu0 %v8682_v32  ;;  %v8551_v55 = vsel %vm11782_vm14, %v10590_v31, %v8550_v28  ;;  %v15548_v18 = vld [vmem:[#allocation26_spill] sm:$0xff]  ;;  %v15549_v28 = vld [vmem:[#allocation25_spill] sm:$0xff]  ;;  %v9092_v31 = vadd.f32 %v15177_v17, %v15183_v57 }
 0x54a   : > { %v7899_v61 = vadd.f32 %v15149_v53, %v15548_v18  ;;  %v8729_v60 = vunpack.c.l.b16 %v8551_v55  ;;  %v7902_v47 = vadd.f32 %v15164_v22, %v15549_v28  ;;  %v9099_v32 = vpop.f32.mrf.mxu0  ;;  %v9095_v17 = vadd.f32 %v15198_v25, %v15203_v40 }
 0x54b   : > { %v9306_v12 = vadd.f32 %v15055_v14, %v9270_v23  ;;  %v7911_v52 = vpop.f32.mrf.mxu2  ;;  %v7909_v28 = vadd.f32 %v7908_v58, %v14929_v0 }
 0x54c   : > { %v9173_v15 = vpop.f32.mrf.mxu1 }
 0x54d   : > { %v9402_v5 = vadd.f32 %v11066_v63, %v9306_v12  ;;  %v9174_v48 = vadd.f32 %v9173_v15, %v9085_v39  ;;  %v9007_v59 = vpop.f32.mrf.mxu3 }
 0x54f   : > { %v9434_v9 = vmax.f32 %v9402_v5, 0.0  ;;  %v9235_v6 = vadd.f32 %v9174_v48, %v7897_v54  ;;  %9212 = vmatmul.bf16.gmra.mxu1 %v14975_v46  ;;  %v8554_v46 = vsel %vm11782_vm14, %v8552_v21, %v8553_v43  ;;  %v11113_v48 = vld [vmem:[%s11272_s16 + $0x38] sm:$0xff]   ;;  %v7904_v43 = vadd.f32 %v15179_v42, %v14888_v35 }
 0x550   : > { %v8730_v39 = vunpack.c.l.b16 %v8554_v46  ;;  %v11073_v10 = vunpack.c.l.bf16 %v11113_v48  ;;  %v11074_v18 = vunpack.c.h.bf16 %v11113_v48  ;;  %v15550_v35 = vld [vmem:[#allocation5_spill] sm:$0xff] }
 0x551   : > { %9466 = vst [vmem:[%s15069_s13 + $0x58] sm:$0xff] %v9434_v9  ;;  %v9271_v13 = vmul.f32 %v15048_v16, %v9235_v6  ;;  %v7907_v42 = vadd.f32 %v15200_v38, %v15550_v35 }
 0x552   : > { %v8746_v37 = vpack.c.b16 %v8730_v39, %v8729_v60 }
 0x553   : > { %v9307_v51 = vadd.f32 %v15055_v14, %v9271_v13  ;;  %v7913_v55 = vpop.f32.mrf.mxu2 }
 0x554   : > { %v9175_v50 = vpop.f32.mrf.mxu1 }
 0x555   : > { %v9403_v23 = vadd.f32 %v11069_v8, %v9307_v51  ;;  %v9176_v63 = vadd.f32 %v9175_v50, %v9087_v44  ;;  %v9010_v3 = vpop.f32.mrf.mxu3  ;;  %v9101_v50 = vpop.f32.mrf.mxu0 }
 0x557   : > { %v9435_v24 = vmax.f32 %v9403_v23, 0.0  ;;  %v9236_v45 = vadd.f32 %v9176_v63, %v7899_v61 }
 0x559   : > { %9467 = vst [vmem:[%s15069_s13 + $0x60] sm:$0xff] %v9435_v24  ;;  %v9272_v12 = vmul.f32 %v15048_v16, %v9236_v45  ;;  %v11114_v45 = vld [vmem:[%s11272_s16 + $0x40] sm:$0xff]  }
 0x55b   : > { %v9308_v53 = vadd.f32 %v15055_v14, %v9272_v12 }
 0x55c   : > { %v9178_v15 = vpop.f32.mrf.mxu1 }
 0x55d   : > { %v9404_v54 = vadd.f32 %v11070_v62, %v9308_v53  ;;  %v9179_v5 = vadd.f32 %v9178_v15, %v9090_v19  ;;  %v9012_v61 = vpop.f32.mrf.mxu3  ;;  %v11077_v62 = vunpack.c.l.bf16 %v11114_v45  ;;  %v9097_v19 = vadd.f32 %v9096_v11, %v9007_v59  ;;  %v9104_v53 = vpop.f32.mrf.mxu0 }
 0x55f   : > { %v9436_v9 = vmax.f32 %v9404_v54, 0.0  ;;  %v9237_v6 = vadd.f32 %v9179_v5, %v7902_v47  ;;  %9217 = vmatmul.bf16.gmra.mxu1 %v8746_v37  ;;  %v7916_v37 = vpop.f32.mrf.mxu2 }
 0x561   : > { %9468 = vst [vmem:[%s15069_s13 + $0x68] sm:$0xff] %v9436_v9  ;;  %v9273_v36 = vmul.f32 %v15048_v16, %v9237_v6  ;;  %v11078_v9 = vunpack.c.h.bf16 %v11114_v45  ;;  %v9100_v6 = vadd.f32 %v9099_v32, %v9010_v3  ;;  %v7917_v45 = vadd.f32 %v7916_v37, %v14977_v1 }
 0x563   : > { %v9309_v21 = vadd.f32 %v15055_v14, %v9273_v36  ;;  %v7912_v36 = vadd.f32 %v7911_v52, %v14951_v56 }
 0x564   : > { %v9180_v22 = vpop.f32.mrf.mxu1 }
 0x565   : > { %v9405_v13 = vadd.f32 %v11073_v10, %v9309_v21  ;;  %v9181_v8 = vadd.f32 %v9180_v22, %v9092_v31  ;;  %v9015_v40 = vpop.f32.mrf.mxu3  ;;  %v9106_v10 = vpop.f32.mrf.mxu0  ;;  %v11115_v22 = vld [vmem:[%s11272_s16 + $0x48] sm:$0xff]  }
 0x567   : > { %v9437_v44 = vmax.f32 %v9405_v13, 0.0  ;;  %v9238_v51 = vadd.f32 %v9181_v8, %v7904_v43  ;;  %v7918_v31 = vpop.f32.mrf.mxu2 }
 0x569   : > { %9469 = vst [vmem:[%s15069_s13 + $0x70] sm:$0xff] %v9437_v44  ;;  %v9274_v46 = vmul.f32 %v15048_v16, %v9238_v51  ;;  %v11081_v44 = vunpack.c.l.bf16 %v11115_v22  ;;  %v9102_v51 = vadd.f32 %v9101_v50, %v9012_v61 }
 0x56b   : > { %v9310_v57 = vadd.f32 %v15055_v14, %v9274_v46  ;;  %v7914_v46 = vadd.f32 %v7913_v55, %v14962_v30 }
 0x56c   : > { %v9183_v23 = vpop.f32.mrf.mxu1 }
 0x56d   : > { %v9406_v63 = vadd.f32 %v11074_v18, %v9310_v57  ;;  %v9184_v24 = vadd.f32 %v9183_v23, %v9095_v17  ;;  %v9017_v58 = vpop.f32.mrf.mxu3  ;;  %v9109_v18 = vpop.f32.mrf.mxu0 }
 0x56f   : > { %v9438_v60 = vmax.f32 %v9406_v63, 0.0  ;;  %v9239_v39 = vadd.f32 %v9184_v24, %v7907_v42  ;;  %v7921_v17 = vpop.f32.mrf.mxu2  ;;  %v11082_v63 = vunpack.c.h.bf16 %v11115_v22  ;;  %v9105_v24 = vadd.f32 %v9104_v53, %v9015_v40 }
 0x571   : > { %9470 = vst [vmem:[%s15069_s13 + $0x78] sm:$0xff] %v9438_v60  ;;  %v9275_v12 = vmul.f32 %v15048_v16, %v9239_v39  ;;  %v11116_v60 = vld [vmem:[%s11272_s16 + $0x50] sm:$0xff]  }
 0x573   : > { %v9311_v25 = vadd.f32 %v15055_v14, %v9275_v12 }
 0x574   : > { %v9185_v15 = vpop.f32.mrf.mxu1 }
 0x575   : > { %v9407_v38 = vadd.f32 %v11077_v62, %v9311_v25  ;;  %v9186_v47 = vadd.f32 %v9185_v15, %v9097_v19  ;;  %v9020_v35 = vpop.f32.mrf.mxu3  ;;  %v9111_v62 = vpop.f32.mrf.mxu0  ;;  %v11085_v15 = vunpack.c.l.bf16 %v11116_v60 }
 0x577   : > { %v9439_v54 = vmax.f32 %v9407_v38, 0.0  ;;  %v9240_v5 = vadd.f32 %v9186_v47, %v7909_v28  ;;  %v7923_v19 = vpop.f32.mrf.mxu2  ;;  %v9107_v38 = vadd.f32 %v9106_v10, %v9017_v58  ;;  %v7919_v47 = vadd.f32 %v7918_v31, %v14985_v33  ;;  %v11117_v58 = vld [vmem:[%s11272_s16 + $0x58] sm:$0xff]  }
 0x579   : > { %9471 = vst [vmem:[%s15069_s13 + $0x80] sm:$0xff] %v9439_v54  ;;  %v9276_v48 = vmul.f32 %v15048_v16, %v9240_v5 }
 0x57b   : > { %v9312_v11 = vadd.f32 %v15055_v14, %v9276_v48 }
 0x57c   : > { %v9188_v59 = vpop.f32.mrf.mxu1 }
 0x57d   : > { %v9408_v21 = vadd.f32 %v11078_v9, %v9312_v11  ;;  %v9189_v0 = vadd.f32 %v9188_v59, %v9100_v6  ;;  %v9022_v28 = vpop.f32.mrf.mxu3  ;;  %v11086_v9 = vunpack.c.h.bf16 %v11116_v60  ;;  %v9110_v6 = vadd.f32 %v9109_v18, %v9020_v35  ;;  %v9114_v11 = vpop.f32.mrf.mxu0 }
 0x57e   : > { %v11090_v35 = vunpack.c.h.bf16 %v11117_v58 }
 0x57f   : > { %v9440_v43 = vmax.f32 %v9408_v21, 0.0  ;;  %v9241_v13 = vadd.f32 %v9189_v0, %v7912_v36  ;;  %v7926_v59 = vpop.f32.mrf.mxu2  ;;  %v7922_v0 = vadd.f32 %v7921_v17, %v14990_v41 }
 0x581   : > { %9472 = vst [vmem:[%s15069_s13 + $0x88] sm:$0xff] %v9440_v43  ;;  %v9277_v8 = vmul.f32 %v15048_v16, %v9241_v13 }
 0x583   : > { %v9313_v32 = vadd.f32 %v15055_v14, %v9277_v8  ;;  %v11089_v8 = vunpack.c.l.bf16 %v11117_v58 }
 0x584   : > { %v9190_v3 = vpop.f32.mrf.mxu1 }
 0x585   : > { %v9409_v56 = vadd.f32 %v11081_v44, %v9313_v32  ;;  %v9191_v52 = vadd.f32 %v9190_v3, %v9102_v51  ;;  %v9025_v10 = vpop.f32.mrf.mxu3  ;;  %v9112_v44 = vadd.f32 %v9111_v62, %v9022_v28  ;;  %v7924_v3 = vadd.f32 %v7923_v19, %v14995_v49 }
 0x587   : > { %v9441_v57 = vmax.f32 %v9409_v56, 0.0  ;;  %v9242_v23 = vadd.f32 %v9191_v52, %v7914_v46  ;;  %v9116_v46 = vpop.f32.mrf.mxu0  ;;  %v7928_v56 = vpop.f32.mrf.mxu2 }
 0x589   : > { %9473 = vst [vmem:[%s15069_s13 + $0x90] sm:$0xff] %v9441_v57  ;;  %v9278_v42 = vmul.f32 %v15048_v16, %v9242_v23 }
 0x58b   : > { %v9314_v50 = vadd.f32 %v15055_v14, %v9278_v42  ;;  %v9115_v42 = vadd.f32 %v9114_v11, %v9025_v10  ;;  %v11119_v10 = vld [vmem:[%s11272_s16 + $0x68] sm:$0xff]  }
 0x58c   : > { %v9193_v61 = vpop.f32.mrf.mxu1 }
 0x58d   : > { %v9410_v30 = vadd.f32 %v11082_v63, %v9314_v50  ;;  %v9194_v55 = vadd.f32 %v9193_v61, %v9105_v24  ;;  %v9027_v18 = vpop.f32.mrf.mxu3  ;;  %v7927_v50 = vadd.f32 %v7926_v59, %v15004_v26 }
 0x58f   : > { %v9442_v39 = vmax.f32 %v9410_v30, 0.0  ;;  %v9243_v12 = vadd.f32 %v9194_v55, %v7917_v45  ;;  %v11118_v45 = vld [vmem:[%s11272_s16 + $0x60] sm:$0xff]   ;;  %v9119_v30 = vpop.f32.mrf.mxu0  ;;  %v7931_v55 = vpop.f32.mrf.mxu2 }
 0x590   : > { %v11093_v19 = vunpack.c.l.bf16 %v11118_v45  ;;  %v7932_v59 = vadd.f32 %v7931_v55, %v15016_v20 }
 0x591   : > { %9474 = vst [vmem:[%s15069_s13 + $0x98] sm:$0xff] %v9442_v39  ;;  %v9279_v25 = vmul.f32 %v15048_v16, %v9243_v12 }
 0x593   : > { %v9315_v53 = vadd.f32 %v15055_v14, %v9279_v25  ;;  %v9117_v25 = vadd.f32 %v9116_v46, %v9027_v18 }
 0x594   : > { %v9195_v40 = vpop.f32.mrf.mxu1 }
 0x595   : > { %v9411_v1 = vadd.f32 %v11085_v15, %v9315_v53  ;;  %v9196_v37 = vadd.f32 %v9195_v40, %v9107_v38  ;;  %v9030_v12 = vpop.f32.mrf.mxu3  ;;  %v7929_v38 = vadd.f32 %v7928_v56, %v15008_v34 }
 0x597   : > { %v9443_v54 = vmax.f32 %v9411_v1, 0.0  ;;  %v9244_v5 = vadd.f32 %v9196_v37, %v7919_v47  ;;  %v9121_v1 = vpop.f32.mrf.mxu0  ;;  %v7933_v37 = vpop.f32.mrf.mxu2 }
 0x599   : > { %9475 = vst [vmem:[%s15069_s13 + $0xa0] sm:$0xff] %v9443_v54  ;;  %v9280_v48 = vmul.f32 %v15048_v16, %v9244_v5  ;;  %v11094_v5 = vunpack.c.h.bf16 %v11118_v45 }
 0x59b   : > { %v9316_v36 = vadd.f32 %v15055_v14, %v9280_v48 }
 0x59c   : > { %v9198_v21 = vpop.f32.mrf.mxu1 }
 0x59d   : > { %v9412_v33 = vadd.f32 %v11086_v9, %v9316_v36  ;;  %v9199_v31 = vadd.f32 %v9198_v21, %v9110_v6  ;;  %v9032_v48 = vpop.f32.mrf.mxu3  ;;  %v9120_v9 = vadd.f32 %v9119_v30, %v9030_v12 }
 0x59e   : > { %v9122_v58 = vadd.f32 %v9121_v1, %v9032_v48 }
 0x59f   : > { %v9444_v22 = vmax.f32 %v9412_v33, 0.0  ;;  %v9245_v43 = vadd.f32 %v9199_v31, %v7922_v0  ;;  %v11097_v31 = vunpack.c.l.bf16 %v11119_v10 }
 0x5a1   : > { %9476 = vst [vmem:[%s15069_s13 + $0xa8] sm:$0xff] %v9444_v22  ;;  %v9281_v13 = vmul.f32 %v15048_v16, %v9245_v43  ;;  %v9124_v22 = vpop.f32.mrf.mxu0  ;;  %v7936_v43 = vpop.f32.mrf.mxu2 }
 0x5a3   : > { %v9317_v51 = vadd.f32 %v15055_v14, %v9281_v13 }
 0x5a4   : > { %v9200_v32 = vpop.f32.mrf.mxu1 }
 0x5a5   : > { %v9413_v41 = vadd.f32 %v11089_v8, %v9317_v51  ;;  %v9201_v52 = vadd.f32 %v9200_v32, %v9112_v44  ;;  %v9035_v8 = vpop.f32.mrf.mxu3  ;;  %v7934_v51 = vadd.f32 %v7933_v37, %v15020_v29 }
 0x5a7   : > { %v9445_v17 = vmax.f32 %v9413_v41, 0.0  ;;  %v9246_v57 = vadd.f32 %v9201_v52, %v7924_v3  ;;  %v11098_v41 = vunpack.c.h.bf16 %v11119_v10  ;;  %v9125_v52 = vadd.f32 %v9124_v22, %v9035_v8 }
 0x5a9   : > { %9477 = vst [vmem:[%s15069_s13 + $0xb0] sm:$0xff] %v9445_v17  ;;  %v9282_v23 = vmul.f32 %v15048_v16, %v9246_v57  ;;  %v7937_v57 = vadd.f32 %v7936_v43, %v15024_v7  ;;  %v7938_v29 = vpop.f32.mrf.mxu2 }
 0x5ab   : > { %v9318_v63 = vadd.f32 %v15055_v14, %v9282_v23  ;;  %v9126_v23 = vpop.f32.mrf.mxu0 }
 0x5ac   : > { %v9203_v24 = vpop.f32.mrf.mxu1 }
 0x5ad   : > { %v9414_v49 = vadd.f32 %v11090_v35, %v9318_v63  ;;  %v9204_v61 = vadd.f32 %v9203_v24, %v9115_v42  ;;  %v9037_v63 = vpop.f32.mrf.mxu3  ;;  %v11120_v24 = vld [vmem:[%s11272_s16 + $0x70] sm:$0xff]  }
 0x5ae   : > { %v11101_v45 = vunpack.c.l.bf16 %v11120_v24  ;;  %v9127_v30 = vadd.f32 %v9126_v23, %v9037_v63 }
 0x5af   : > { %v9446_v60 = vmax.f32 %v9414_v49, 0.0  ;;  %v9247_v39 = vadd.f32 %v9204_v61, %v7927_v50 }
 0x5b1   : > { %9478 = vst [vmem:[%s15069_s13 + $0xb8] sm:$0xff] %v9446_v60  ;;  %v9283_v62 = vmul.f32 %v15048_v16, %v9247_v39  ;;  %v7939_v39 = vadd.f32 %v7938_v29, %v15029_v27 }
 0x5b3   : > { %v9319_v15 = vadd.f32 %v15055_v14, %v9283_v62 }
 0x5b4   : > { %v9205_v28 = vpop.f32.mrf.mxu1 }
 0x5b5   : > { %v9415_v26 = vadd.f32 %v11093_v19, %v9319_v15  ;;  %v9206_v53 = vadd.f32 %v9205_v28, %v9117_v25  ;;  %v9040_v62 = vpop.f32.mrf.mxu3  ;;  %v7941_v28 = vpop.f32.mrf.mxu2 }
 0x5b6   : > { %v7942_v1 = vadd.f32 %v7941_v28, %v15033_v2 }
 0x5b7   : > { %v9447_v40 = vmax.f32 %v9415_v26, 0.0  ;;  %v9248_v47 = vadd.f32 %v9206_v53, %v7929_v38  ;;  %v11102_v53 = vunpack.c.h.bf16 %v11120_v24 }
 0x5b9   : > { %9479 = vst [vmem:[%s15069_s13 + $0xc0] sm:$0xff] %v9447_v40  ;;  %v9284_v54 = vmul.f32 %v15048_v16, %v9248_v47 }
 0x5bb   : > { %v9320_v6 = vadd.f32 %v15055_v14, %v9284_v54  ;;  %v11121_v54 = vld [vmem:[%s11272_s16 + $0x78] sm:$0xff]  }
 0x5bc   : > { %v9208_v11 = vpop.f32.mrf.mxu1  ;;  %v11106_v43 = vunpack.c.h.bf16 %v11121_v54 }
 0x5bd   : > { %v9416_v34 = vadd.f32 %v11094_v5, %v9320_v6  ;;  %v9209_v36 = vadd.f32 %v9208_v11, %v9120_v9  ;;  %v9042_v9 = vpop.f32.mrf.mxu3 }
 0x5bf   : > { %v9448_v21 = vmax.f32 %v9416_v34, 0.0  ;;  %v9249_v0 = vadd.f32 %v9209_v36, %v7932_v59  ;;  %v11105_v59 = vunpack.c.l.bf16 %v11121_v54  ;;  %v7943_v34 = vpop.f32.mrf.mxu2 }
 0x5c0   : > { %v7944_v2 = vadd.f32 %v7943_v34, %v15038_v4 }
 0x5c1   : > { %9480 = vst [vmem:[%s15069_s13 + $0xc8] sm:$0xff] %v9448_v21  ;;  %v9285_v33 = vmul.f32 %v15048_v16, %v9249_v0 }
 0x5c3   : > { %v9321_v13 = vadd.f32 %v15055_v14, %v9285_v33 }
 0x5c4   : > { %v9210_v44 = vpop.f32.mrf.mxu1 }
 0x5c5   : > { %v9417_v20 = vadd.f32 %v11097_v31, %v9321_v13  ;;  %v9211_v32 = vadd.f32 %v9210_v44, %v9122_v58 }
 0x5c6   : > { %v9129_v19 = vpop.f32.mrf.mxu0 }
 0x5c7   : > { %v9449_v3 = vmax.f32 %v9417_v20, 0.0  ;;  %v9250_v46 = vadd.f32 %v9211_v32, %v7934_v51  ;;  %v9130_v38 = vadd.f32 %v9129_v19, %v9040_v62 }
 0x5c9   : > { %9481 = vst [vmem:[%s15069_s13 + $0xd0] sm:$0xff] %v9449_v3  ;;  %v9286_v56 = vmul.f32 %v15048_v16, %v9250_v46 }
 0x5cb   : > { %v9322_v18 = vadd.f32 %v15055_v14, %v9286_v56 }
 0x5cc   : > { %v9213_v17 = vpop.f32.mrf.mxu1 }
 0x5cd   : > { %v9418_v35 = vadd.f32 %v11098_v41, %v9322_v18  ;;  %v9214_v42 = vadd.f32 %v9213_v17, %v9125_v52 }
 0x5ce   : > { %v9131_v6 = vpop.f32.mrf.mxu0 }
 0x5cf   : > { %v9450_v50 = vmax.f32 %v9418_v35, 0.0  ;;  %v9251_v49 = vadd.f32 %v9214_v42, %v7937_v57  ;;  %v9132_v36 = vadd.f32 %v9131_v6, %v9042_v9 }
 0x5d1   : > { %9482 = vst [vmem:[%s15069_s13 + $0xd8] sm:$0xff] %v9450_v50  ;;  %v9287_v61 = vmul.f32 %v15048_v16, %v9251_v49 }
 0x5d3   : > { %v9323_v55 = vadd.f32 %v15055_v14, %v9287_v61 }
 0x5d4   : > { %v9215_v60 = vpop.f32.mrf.mxu1 }
 0x5d5   : > { %v9419_v7 = vadd.f32 %v11101_v45, %v9323_v55  ;;  %v9216_v12 = vadd.f32 %v9215_v60, %v9127_v30 }
 0x5d7   : > { %v9451_v25 = vmax.f32 %v9419_v7, 0.0  ;;  %v9252_v15 = vadd.f32 %v9216_v12, %v7939_v39 }
 0x5d9   : > { %9483 = vst [vmem:[%s15069_s13 + $0xe0] sm:$0xff] %v9451_v25  ;;  %v9288_v26 = vmul.f32 %v15048_v16, %v9252_v15 }
 0x5db   : > { %v9324_v40 = vadd.f32 %v15055_v14, %v9288_v26 }
 0x5dc   : > { %v9218_v47 = vpop.f32.mrf.mxu1 }
 0x5dd   : > { %v9420_v27 = vadd.f32 %v11102_v53, %v9324_v40  ;;  %v9219_v37 = vadd.f32 %v9218_v47, %v9130_v38 }
 0x5df   : > { %v9452_v5 = vmax.f32 %v9420_v27, 0.0  ;;  %v9253_v48 = vadd.f32 %v9219_v37, %v7942_v1 }
 0x5e1   : > { %9484 = vst [vmem:[%s15069_s13 + $0xe8] sm:$0xff] %v9452_v5  ;;  %v9289_v11 = vmul.f32 %v15048_v16, %v9253_v48 }
 0x5e3   : > { %v9325_v10 = vadd.f32 %v15055_v14, %v9289_v11 }
 0x5e4   : > { %v9220_v21 = vpop.f32.mrf.mxu1 }
 0x5e5   : > { %v9421_v0 = vadd.f32 %v11105_v59, %v9325_v10  ;;  %v9221_v33 = vadd.f32 %v9220_v21, %v9132_v36 }
 0x5e7   : > { %v9453_v31 = vmax.f32 %v9421_v0, 0.0  ;;  %v9254_v58 = vadd.f32 %v9221_v33, %v7944_v2 }
 0x5e9   : > { %9485 = vst [vmem:[%s15069_s13 + $0xf0] sm:$0xff] %v9453_v31  ;;  %v9290_v22 = vmul.f32 %v15048_v16, %v9254_v58 }
 0x5eb   : > { %v9326_v13 = vadd.f32 %v15055_v14, %v9290_v22 }
 0x5ed   : > { %v9422_v8 = vadd.f32 %v11106_v43, %v9326_v13 }
 0x5ef   : > { %v9454_v44 = vmax.f32 %v9422_v8, 0.0 }
 0x5f1   : > { %9486 = vst [vmem:[%s15069_s13 + $0xf8] sm:$0xff] %v9454_v44 }
 0x5f2 PF: > { %s17_s24 = sadd.s32 1, %s11200_s24  }
 0x5f3   : > { %p14_p4 = scmp.ge.s32.totalorder %s17_s24, 4  }
 0x5f5   :  { %16 = sbr.rel (!%p14_p4) target bundleno = 1 (0x1), region = 88 }

</bundles_post_ra>
